<compile_context>
chip_gen: v6e
topology: v6e:2x2x1
jax: 0.10.0
libtpu: 0.0.40
codegen_flags: <defaults>
</compile_context>

<pallas_src>
import jax
import jax.numpy as jnp
from jax import lax
from jax.experimental import pallas as pl
from jax.experimental.pallas import tpu as pltpu

F32 = jnp.float32
BF16 = jnp.bfloat16


def _silu(v):
    return v * (1.0 / (1.0 + jnp.exp(-v)))


def _softplus(v):
    # numerically stable softplus, elementwise (VPU/EUP only)
    return jnp.maximum(v, 0.0) + jnp.log1p(jnp.exp(-jnp.abs(v)))


def _make_kernel(BB, L, D, N, T):
    BBL = BB * L
    n_chunks = L // T

    def kernel(
        x_ref,                 # (BB, L, D) f32
        w12_ref, b12_ref,      # (D, 2D) bf16, (1, 2D) f32      [W1^T | W2^T]
        wconv_ref, bconv_ref,  # (BBL, 3*BBL) bf16, (BBL, 1) f32  block-diag conv taps
        wdbc_ref, bdt_ref,     # (D, D+2N) bf16, (1, D) f32     [(W_dt@W_d)^T | W_B^T | W_C^T]
        negA_ref,              # (N, D) f32   == (-exp(A_log)).T, precomputed
        dpar_ref,              # (1, D) f32
        woutt_ref, bout_ref,   # (D, D) bf16, (1, D) f32
        out_ref,               # (BB, L, D)
        d_sc, du_sc, u_sc, g_sc, y_sc,   # (BBL, D) f32 scratch
        bm_sc, cm_sc,                    # (BBL, N) f32 scratch
        dA_sc,                           # (T, N, D) f32 chunk scratch
    ):
        x16 = x_ref[...].reshape(BBL, D).astype(BF16)

        # --- fused input projections: one (BBL,D)@(D,2D) MXU matmul -----------
        xw = jnp.dot(x16, w12_ref[...], preferred_element_type=F32) + b12_ref[...]
        x_one = xw[:, :D]
        g_sc[...] = _silu(xw[:, D:])      # silu(x_two) saved for the gate

        # --- Conv1d(k=3, pad=1) along D: roll-shifted copies (XLU) + ONE
        #     block-diagonal matmul over all BB batches and all 3 taps --------
        col = lax.broadcasted_iota(jnp.int32, (BBL, D), 1)
        x_m1 = jnp.where(col == 0, 0.0, pltpu.roll(x_one, shift=1, axis=1))       # x[:, d-1]
        x_p1 = jnp.where(col == D - 1, 0.0, pltpu.roll(x_one, shift=D - 1, axis=1))  # x[:, d+1]
        x_cat = jnp.concatenate([x_m1, x_one, x_p1], axis=0).astype(BF16)  # (3*BBL, D)
        u = _silu(jnp.dot(wconv_ref[...], x_cat, preferred_element_type=F32)
                  + bconv_ref[...])                                        # (BBL, D)

        # --- fused delta / B / C projection (W_dt folded into delta branch) ---
        dbc = jnp.dot(u.astype(BF16), wdbc_ref[...], preferred_element_type=F32)
        delta = _softplus(dbc[:, :D] + bdt_ref[...])            # (BBL, D)
        bm_sc[...] = dbc[:, D:D + N]
        cm_sc[...] = dbc[:, D + N:]
        d_sc[...] = delta
        du_sc[...] = delta * u
        u_sc[...] = u

        negA = negA_ref[...]   # hoisted: read once, not per loop iteration

        # --- chunked selective scan: single fori_loop over (batch, chunk) -----
        def scan_body(i, st):
            if n_chunks > 1:
                # reset the carried state at the first chunk of each batch
                st = st * (i % n_chunks != 0).astype(F32)
            else:
                st = jnp.zeros((N, D), F32)   # fresh state every batch
            r0 = pl.multiple_of(i * T, T)     # == b*L + c*T since L = n_chunks*T
            d_c = d_sc[pl.ds(r0, T), :]                         # (T, D)
            du_c = du_sc[pl.ds(r0, T), :]                       # (T, D)
            c_c16 = cm_sc[pl.ds(r0, T), :].astype(BF16)         # (T, N)
            b_cT = jnp.transpose(bm_sc[pl.ds(r0, T), :])        # (N, T) one XLU transpose

            # phase 1: all exp work off the recurrence path, one dense store
            dA_sc[...] = jnp.exp(negA[None, :, :] * d_c[:, None, :])   # (T, N, D)

            # phase 2: mul/add recurrence, fully unrolled; dBu formed inline;
            # bf16 y-dot is not on the carried chain so the MXU overlaps the
            # next step's VALU work.
            y_rows = []
            for t in range(T):
                st = dA_sc[t] * st + b_cT[:, t:t + 1] * du_c[t:t + 1, :]
                y_rows.append(jnp.dot(c_c16[t:t + 1, :], st.astype(BF16),
                                      preferred_element_type=F32))          # (1, D)
            y_sc[pl.ds(r0, T), :] = jnp.concatenate(y_rows, axis=0)          # dense (T, D)
            return st

        lax.fori_loop(0, BB * n_chunks, scan_body, jnp.zeros((N, D), F32))

        # --- gate, residual, output projection --------------------------------
        x_res = x_ref[...].reshape(BBL, D).astype(F32)   # re-read: no live range across scan
        gated = (y_sc[...] + u_sc[...] * dpar_ref[...]) * g_sc[...] + x_res
        out = (jnp.dot(gated.astype(BF16), woutt_ref[...],
                       preferred_element_type=F32) + bout_ref[...])
        out_ref[...] = out.reshape(BB, L, D).astype(out_ref.dtype)

    return kernel


def mamba_block_pallas(x, p, *, block_batch=None, chunk=16):
    B, L, D = x.shape
    N = p["A_log"].shape[1]          # d_state
    R = p["W_dt"].shape[1]           # dt_rank
    Din = p["W_dt"].shape[0]         # dim_inner
    assert Din == D, "gating in MambaBlock requires dim_inner == dim"
    assert D % 128 == 0 and N % 128 == 0, "need lane-aligned dim / d_state"
    assert L % 8 == 0, "in_channels must be a multiple of 8 (sublane tiling)"
    T = min(chunk, L)
    assert L % T == 0 and T % 8 == 0

    if block_batch is None:
        # Fill the MXU: target >= 128 activation rows per grid step, but keep
        # >= 2 grid steps so the batch axis can shard across v7x's 2 TensorCores.
        bb = max(1, min(max(B // 2, 1), -(-128 // L)))
        while B % bb:
            bb -= 1
        block_batch = bb
    BB = block_batch
    assert B % BB == 0
    BBL = BB * L

    # ---- host-side weight packing -------------------------------------------
    W12 = jnp.concatenate([p["W1"].T, p["W2"].T], axis=1).astype(BF16)      # (D, 2D)
    b12 = jnp.concatenate([p["b1"], p["b2"]]).reshape(1, 2 * D).astype(F32)

    Wc = p["W_conv"]                                                        # (L, L, 3)
    eyeBB = jnp.eye(BB, dtype=F32)
    Wconv_big = jnp.concatenate(
        [jnp.kron(eyeBB, Wc[:, :, k]) for k in range(3)], axis=1).astype(BF16)  # (BBL, 3*BBL)
    bconv = jnp.tile(p["b_conv"], BB).reshape(BBL, 1).astype(F32)

    Wd = p["W_dbc"][:R]                     # (R, D)
    Wb = p["W_dbc"][R:R + N]                # (N, D)
    Wcs = p["W_dbc"][R + N:]                # (N, D)
    W_delta_eff = p["W_dt"] @ Wd            # (D, D): fold dt_rank bottleneck (exact)
    Wdbcf = jnp.concatenate([W_delta_eff.T, Wb.T, Wcs.T], axis=1).astype(BF16)   # (D, D+2N)
    bdt = p["b_dt"].reshape(1, D).astype(F32)

    negA = (-jnp.exp(p["A_log"])).T.astype(F32)                             # (N, D)
    dpar = p["D"].reshape(1, D).astype(F32)
    Woutt = p["W_out"].T.astype(BF16)
    bout = p["b_out"].reshape(1, D).astype(F32)

    args = (x, W12, b12, Wconv_big, bconv, Wdbcf, bdt, negA, dpar, Woutt, bout)

    def full_spec(a):
        nd = a.ndim
        return pl.BlockSpec(a.shape, lambda g, _nd=nd: (0,) * _nd)

    in_specs = [pl.BlockSpec((BB, L, D), lambda g: (g, 0, 0))]
    in_specs += [full_spec(a) for a in args[1:]]

    kernel = _make_kernel(BB, L, D, N, T)

    return pl.pallas_call(
        kernel,
        out_shape=jax.ShapeDtypeStruct((B, L, D), x.dtype),
        grid_spec=pltpu.PrefetchScalarGridSpec(
            num_scalar_prefetch=0,
            grid=(B // BB,),
            in_specs=in_specs,
            out_specs=pl.BlockSpec((BB, L, D), lambda g: (g, 0, 0)),
            scratch_shapes=[
                pltpu.VMEM((BBL, D), F32),   # delta
                pltpu.VMEM((BBL, D), F32),   # delta * u
                pltpu.VMEM((BBL, D), F32),   # u
                pltpu.VMEM((BBL, D), F32),   # silu(x_two) gate
                pltpu.VMEM((BBL, D), F32),   # y
                pltpu.VMEM((BBL, N), F32),   # B(x)
                pltpu.VMEM((BBL, N), F32),   # C(x)
                pltpu.VMEM((T, N, D), F32),  # dA chunk
            ],
        ),
        compiler_params=pltpu.CompilerParams(
            dimension_semantics=("parallel",),   # batch axis has no carry -> megacore
            vmem_limit_bytes=32 * 1024 * 1024,
        ),
    )(*args)


def mamba_block_ref(x, p):
    """Pure-JAX reference with identical semantics (for verification)."""
    silu = lambda v: v * jax.nn.sigmoid(v)
    R = p["W_dt"].shape[1]
    N = p["A_log"].shape[1]

    x_one = x @ p["W1"].T + p["b1"]
    x_two = x @ p["W2"].T + p["b2"]
    x_one = lax.conv_general_dilated(
        x_one, p["W_conv"], window_strides=(1,), padding=((1, 1),),
        dimension_numbers=("NCH", "OIH", "NCH"),
    ) + p["b_conv"][None, :, None]
    u = silu(x_one)

    dbc = u @ p["W_dbc"].T
    delta_lo, Bm, Cm = dbc[..., :R], dbc[..., R:R + N], dbc[..., R + N:]
    delta = jax.nn.softplus(delta_lo @ p["W_dt"].T + p["b_dt"])
    A = -jnp.exp(p["A_log"])

    dA = jnp.exp(jnp.einsum("bld,dn->bldn", delta, A))
    dBu = jnp.einsum("bld,bln,bld->bldn", delta, Bm, u)

    Bsz, L, D = x.shape

    def step(state, inp):
        dA_i, dBu_i, C_i = inp
        state = dA_i * state + dBu_i
        y = jnp.einsum("bdn,bn->bd", state, C_i)
        return state, y

    init = jnp.zeros((Bsz, D, N), jnp.float32)
    _, ys = lax.scan(step, init,
                     (jnp.moveaxis(dA, 1, 0), jnp.moveaxis(dBu, 1, 0),
                      jnp.moveaxis(Cm, 1, 0)))
    y = jnp.moveaxis(ys, 0, 1) + u * p["D"]

    out = y * silu(x_two) + x
    return out @ p["W_out"].T + p["b_out"]


if __name__ == "__main__":
    # Small, lane-friendly shapes consistent with
    # MambaBlock(dim, in_channels, dt_rank, dim_inner, d_state)
    # (original: 256, 64, 8, 256, 256; scaled down; dim_inner == dim as the
    #  gating requires; D and d_state multiples of 128 for lane-dense layout;
    #  batch=16 so each grid step gets a 128-row MXU-filling block with 2
    #  grid steps left for megacore.)
    dim, in_channels, dt_rank, dim_inner, d_state = 128, 16, 8, 128, 128
    batch = 16

    key = jax.random.PRNGKey(0)
    keys = jax.random.split(key, 12)
    s = 0.1
    params = {
        "W1": jax.random.normal(keys[0], (dim, dim), F32) * s,
        "b1": jax.random.normal(keys[1], (dim,), F32) * s,
        "W2": jax.random.normal(keys[2], (dim, dim), F32) * s,
        "b2": jax.random.normal(keys[3], (dim,), F32) * s,
        "W_conv": jax.random.normal(keys[4], (in_channels, in_channels, 3), F32) * s,
        "b_conv": jax.random.normal(keys[5], (in_channels,), F32) * s,
        "W_dbc": jax.random.normal(keys[6], (dt_rank + 2 * d_state, dim), F32) * s,
        "W_dt": jax.random.normal(keys[7], (dim_inner, dt_rank), F32) * s,
        "b_dt": jax.random.normal(keys[8], (dim_inner,), F32) * s,
        "A_log": jnp.log(jnp.tile(jnp.arange(1, d_state + 1, dtype=F32), (dim_inner, 1))),
        "D": jnp.ones((dim_inner,), F32),
        "W_out": jax.random.normal(keys[9], (dim, dim), F32) * s,
        "b_out": jax.random.normal(keys[10], (dim,), F32) * s,
    }
    x = jax.random.uniform(keys[11], (batch, in_channels, dim), F32)

    out = jax.block_until_ready(mamba_block_pallas(x, params))
    with jax.default_matmul_precision("highest"):
        ref = jax.block_until_ready(mamba_block_ref(x, params))

    assert out.shape == x.shape
    err = jnp.max(jnp.abs(out - ref))
    # bf16 MXU inputs (f32 accumulation) => relaxed tolerance vs. the f32 reference
    if not jnp.allclose(out, ref, atol=5e-2, rtol=5e-2):
        raise AssertionError(f"kernel/reference mismatch, max abs err = {err}")
    print("KERNEL_OK")
</pallas_src>

<mosaic_0001>
module attributes {stable_mosaic.version = 11 : i64} {
  func.func @kernel(%arg0: i32, %arg1: memref<8x16x128xf32, #tpu.memory_space<vmem>>, %arg2: memref<128x256xbf16, #tpu.memory_space<vmem>>, %arg3: memref<1x256xf32, #tpu.memory_space<vmem>>, %arg4: memref<128x384xbf16, #tpu.memory_space<vmem>>, %arg5: memref<128x1xf32, #tpu.memory_space<vmem>>, %arg6: memref<128x384xbf16, #tpu.memory_space<vmem>>, %arg7: memref<1x128xf32, #tpu.memory_space<vmem>>, %arg8: memref<128x128xf32, #tpu.memory_space<vmem>>, %arg9: memref<1x128xf32, #tpu.memory_space<vmem>>, %arg10: memref<128x128xbf16, #tpu.memory_space<vmem>>, %arg11: memref<1x128xf32, #tpu.memory_space<vmem>>, %arg12: memref<8x16x128xf32, #tpu.memory_space<vmem>>, %arg13: memref<128x128xf32, #tpu.memory_space<vmem>>, %arg14: memref<128x128xf32, #tpu.memory_space<vmem>>, %arg15: memref<128x128xf32, #tpu.memory_space<vmem>>, %arg16: memref<128x128xf32, #tpu.memory_space<vmem>>, %arg17: memref<128x128xf32, #tpu.memory_space<vmem>>, %arg18: memref<128x128xf32, #tpu.memory_space<vmem>>, %arg19: memref<128x128xf32, #tpu.memory_space<vmem>>, %arg20: memref<16x128x128xf32, #tpu.memory_space<vmem>>) attributes {dimension_semantics = [#tpu.dimension_semantics<parallel>], iteration_bounds = array<i64: 2>, scalar_prefetch = 0 : i64, scratch_operands = 8 : i64, tpu.core_type = #tpu.core_type<tc>, window_params = [{transform_indices = @transform_0, window_bounds = array<i64: 8, 16, 128>}, {pipeline_mode = #tpu.pipeline_mode<synchronous>, transform_indices = @transform_1, window_bounds = array<i64: 128, 256>}, {pipeline_mode = #tpu.pipeline_mode<synchronous>, transform_indices = @transform_2, window_bounds = array<i64: 1, 256>}, {pipeline_mode = #tpu.pipeline_mode<synchronous>, transform_indices = @transform_3, window_bounds = array<i64: 128, 384>}, {pipeline_mode = #tpu.pipeline_mode<synchronous>, transform_indices = @transform_4, window_bounds = array<i64: 128, 1>}, {pipeline_mode = #tpu.pipeline_mode<synchronous>, transform_indices = @transform_5, window_bounds = array<i64: 128, 384>}, {pipeline_mode = #tpu.pipeline_mode<synchronous>, transform_indices = @transform_6, window_bounds = array<i64: 1, 128>}, {pipeline_mode = #tpu.pipeline_mode<synchronous>, transform_indices = @transform_7, window_bounds = array<i64: 128, 128>}, {pipeline_mode = #tpu.pipeline_mode<synchronous>, transform_indices = @transform_8, window_bounds = array<i64: 1, 128>}, {pipeline_mode = #tpu.pipeline_mode<synchronous>, transform_indices = @transform_9, window_bounds = array<i64: 128, 128>}, {pipeline_mode = #tpu.pipeline_mode<synchronous>, transform_indices = @transform_10, window_bounds = array<i64: 1, 128>}, {transform_indices = @transform_11, window_bounds = array<i64: 8, 16, 128>}]} {
    %c0 = arith.constant 0 : index
    %c0_0 = arith.constant 0 : index
    %c0_1 = arith.constant 0 : index
    %0 = vector.load %arg1[%c0, %c0_0, %c0_1] : memref<8x16x128xf32, #tpu.memory_space<vmem>>, vector<8x16x128xf32>
    %1 = vector.shape_cast %0 : vector<8x16x128xf32> to vector<128x128xf32>
    %2 = arith.truncf %1 : vector<128x128xf32> to vector<128x128xbf16>
    %c0_2 = arith.constant 0 : index
    %c0_3 = arith.constant 0 : index
    %3 = vector.load %arg2[%c0_2, %c0_3] : memref<128x256xbf16, #tpu.memory_space<vmem>>, vector<128x256xbf16>
    %cst = arith.constant dense<0.000000e+00> : vector<128x256xf32>
    %4 = tpu.matmul %2, %3, %cst {dimension_numbers = #tpu.dot_dimension_numbers<[1], [0], [0], [1], [0, 0, 1, 1], [], []>} : vector<128x128xbf16>, vector<128x256xbf16>, vector<128x256xf32> -> vector<128x256xf32>
    %c0_4 = arith.constant 0 : index
    %c0_5 = arith.constant 0 : index
    %5 = vector.load %arg3[%c0_4, %c0_5] : memref<1x256xf32, #tpu.memory_space<vmem>>, vector<1x256xf32>
    %6 = vector.broadcast %5 : vector<1x256xf32> to vector<128x256xf32>
    %7 = arith.addf %4, %6 : vector<128x256xf32>
    %8 = vector.extract_strided_slice %7 {offsets = [0, 0], sizes = [128, 128], strides = [1, 1]} : vector<128x256xf32> to vector<128x128xf32>
    %9 = vector.extract_strided_slice %7 {offsets = [0, 128], sizes = [128, 128], strides = [1, 1]} : vector<128x256xf32> to vector<128x128xf32>
    %cst_6 = arith.constant 0.000000e+00 : f32
    %10 = vector.broadcast %cst_6 : f32 to vector<128x128xf32>
    %11 = arith.subf %10, %9 : vector<128x128xf32>
    %12 = math.exp %11 : vector<128x128xf32>
    %cst_7 = arith.constant 1.000000e+00 : f32
    %13 = vector.broadcast %cst_7 : f32 to vector<128x128xf32>
    %14 = arith.addf %13, %12 : vector<128x128xf32>
    %cst_8 = arith.constant 1.000000e+00 : f32
    %15 = vector.broadcast %cst_8 : f32 to vector<128x128xf32>
    %16 = arith.divf %15, %14 : vector<128x128xf32>
    %17 = arith.mulf %9, %16 : vector<128x128xf32>
    %c0_9 = arith.constant 0 : index
    %c0_10 = arith.constant 0 : index
    %18 = vector.load %arg16[%c0_9, %c0_10] : memref<128x128xf32, #tpu.memory_space<vmem>>, vector<128x128xf32>
    tpu.vector_store %arg16[%c0_9, %c0_10], %17 {strides = array<i32>} : memref<128x128xf32, #tpu.memory_space<vmem>>, vector<128x128xf32>,
    %19 = tpu.iota {dimensions = array<i32: 1>} : vector<128x128xi32>
    %c0_i32 = arith.constant 0 : i32
    %20 = vector.broadcast %c0_i32 : i32 to vector<128x128xi32>
    %21 = arith.cmpi eq, %19, %20 : vector<128x128xi32>
    %c1_i32 = arith.constant 1 : i32
    %22 = tpu.dynamic_rotate %8 by %c1_i32 dim 1 : vector<128x128xf32>, i32 -> vector<128x128xf32>
    %cst_11 = arith.constant 0.000000e+00 : f32
    %23 = vector.broadcast %cst_11 : f32 to vector<128x128xf32>
    %24 = arith.select %21, %23, %22 : vector<128x128xi1>, vector<128x128xf32>
    %c127_i32 = arith.constant 127 : i32
    %25 = vector.broadcast %c127_i32 : i32 to vector<128x128xi32>
    %26 = arith.cmpi eq, %19, %25 : vector<128x128xi32>
    %c127_i32_12 = arith.constant 127 : i32
    %27 = tpu.dynamic_rotate %8 by %c127_i32_12 dim 1 : vector<128x128xf32>, i32 -> vector<128x128xf32>
    %cst_13 = arith.constant 0.000000e+00 : f32
    %28 = vector.broadcast %cst_13 : f32 to vector<128x128xf32>
    %29 = arith.select %26, %28, %27 : vector<128x128xi1>, vector<128x128xf32>
    %30 = tpu.concatenate %24, %8, %29 in 0 : vector<128x128xf32>, vector<128x128xf32>, vector<128x128xf32> -> vector<384x128xf32>
    %31 = arith.truncf %30 : vector<384x128xf32> to vector<384x128xbf16>
    %c0_14 = arith.constant 0 : index
    %c0_15 = arith.constant 0 : index
    %32 = vector.load %arg4[%c0_14, %c0_15] : memref<128x384xbf16, #tpu.memory_space<vmem>>, vector<128x384xbf16>
    %cst_16 = arith.constant dense<0.000000e+00> : vector<128x128xf32>
    %33 = tpu.matmul %32, %31, %cst_16 {dimension_numbers = #tpu.dot_dimension_numbers<[1], [0], [0], [1], [0, 0, 1, 1], [], []>} : vector<128x384xbf16>, vector<384x128xbf16>, vector<128x128xf32> -> vector<128x128xf32>
    %c0_17 = arith.constant 0 : index
    %c0_18 = arith.constant 0 : index
    %34 = vector.load %arg5[%c0_17, %c0_18] : memref<128x1xf32, #tpu.memory_space<vmem>>, vector<128x1xf32>
    %35 = vector.broadcast %34 : vector<128x1xf32> to vector<128x128xf32>
    %36 = arith.addf %33, %35 : vector<128x128xf32>
    %cst_19 = arith.constant 0.000000e+00 : f32
    %37 = vector.broadcast %cst_19 : f32 to vector<128x128xf32>
    %38 = arith.subf %37, %36 : vector<128x128xf32>
    %39 = math.exp %38 : vector<128x128xf32>
    %cst_20 = arith.constant 1.000000e+00 : f32
    %40 = vector.broadcast %cst_20 : f32 to vector<128x128xf32>
    %41 = arith.addf %40, %39 : vector<128x128xf32>
    %cst_21 = arith.constant 1.000000e+00 : f32
    %42 = vector.broadcast %cst_21 : f32 to vector<128x128xf32>
    %43 = arith.divf %42, %41 : vector<128x128xf32>
    %44 = arith.mulf %36, %43 : vector<128x128xf32>
    %45 = arith.truncf %44 : vector<128x128xf32> to vector<128x128xbf16>
    %c0_22 = arith.constant 0 : index
    %c0_23 = arith.constant 0 : index
    %46 = vector.load %arg6[%c0_22, %c0_23] : memref<128x384xbf16, #tpu.memory_space<vmem>>, vector<128x384xbf16>
    %cst_24 = arith.constant dense<0.000000e+00> : vector<128x384xf32>
    %47 = tpu.matmul %45, %46, %cst_24 {dimension_numbers = #tpu.dot_dimension_numbers<[1], [0], [0], [1], [0, 0, 1, 1], [], []>} : vector<128x128xbf16>, vector<128x384xbf16>, vector<128x384xf32> -> vector<128x384xf32>
    %48 = vector.extract_strided_slice %47 {offsets = [0, 0], sizes = [128, 128], strides = [1, 1]} : vector<128x384xf32> to vector<128x128xf32>
    %c0_25 = arith.constant 0 : index
    %c0_26 = arith.constant 0 : index
    %49 = vector.load %arg7[%c0_25, %c0_26] : memref<1x128xf32, #tpu.memory_space<vmem>>, vector<1x128xf32>
    %50 = vector.broadcast %49 : vector<1x128xf32> to vector<128x128xf32>
    %51 = arith.addf %48, %50 : vector<128x128xf32>
    %cst_27 = arith.constant 0.000000e+00 : f32
    %52 = vector.broadcast %cst_27 : f32 to vector<128x128xf32>
    %53 = arith.maximumf %51, %52 : vector<128x128xf32>
    %54 = math.absf %51 : vector<128x128xf32>
    %cst_28 = arith.constant 0.000000e+00 : f32
    %55 = vector.broadcast %cst_28 : f32 to vector<128x128xf32>
    %56 = arith.subf %55, %54 : vector<128x128xf32>
    %57 = math.exp %56 : vector<128x128xf32>
    %58 = math.log1p %57 : vector<128x128xf32>
    %59 = arith.addf %53, %58 : vector<128x128xf32>
    %60 = vector.extract_strided_slice %47 {offsets = [0, 128], sizes = [128, 128], strides = [1, 1]} : vector<128x384xf32> to vector<128x128xf32>
    %c0_29 = arith.constant 0 : index
    %c0_30 = arith.constant 0 : index
    %61 = vector.load %arg18[%c0_29, %c0_30] : memref<128x128xf32, #tpu.memory_space<vmem>>, vector<128x128xf32>
    tpu.vector_store %arg18[%c0_29, %c0_30], %60 {strides = array<i32>} : memref<128x128xf32, #tpu.memory_space<vmem>>, vector<128x128xf32>,
    %62 = vector.extract_strided_slice %47 {offsets = [0, 256], sizes = [128, 128], strides = [1, 1]} : vector<128x384xf32> to vector<128x128xf32>
    %c0_31 = arith.constant 0 : index
    %c0_32 = arith.constant 0 : index
    %63 = vector.load %arg19[%c0_31, %c0_32] : memref<128x128xf32, #tpu.memory_space<vmem>>, vector<128x128xf32>
    tpu.vector_store %arg19[%c0_31, %c0_32], %62 {strides = array<i32>} : memref<128x128xf32, #tpu.memory_space<vmem>>, vector<128x128xf32>,
    %c0_33 = arith.constant 0 : index
    %c0_34 = arith.constant 0 : index
    %64 = vector.load %arg13[%c0_33, %c0_34] : memref<128x128xf32, #tpu.memory_space<vmem>>, vector<128x128xf32>
    tpu.vector_store %arg13[%c0_33, %c0_34], %59 {strides = array<i32>} : memref<128x128xf32, #tpu.memory_space<vmem>>, vector<128x128xf32>,
    %65 = arith.mulf %59, %44 : vector<128x128xf32>
    %c0_35 = arith.constant 0 : index
    %c0_36 = arith.constant 0 : index
    %66 = vector.load %arg14[%c0_35, %c0_36] : memref<128x128xf32, #tpu.memory_space<vmem>>, vector<128x128xf32>
    tpu.vector_store %arg14[%c0_35, %c0_36], %65 {strides = array<i32>} : memref<128x128xf32, #tpu.memory_space<vmem>>, vector<128x128xf32>,
    %c0_37 = arith.constant 0 : index
    %c0_38 = arith.constant 0 : index
    %67 = vector.load %arg15[%c0_37, %c0_38] : memref<128x128xf32, #tpu.memory_space<vmem>>, vector<128x128xf32>
    tpu.vector_store %arg15[%c0_37, %c0_38], %44 {strides = array<i32>} : memref<128x128xf32, #tpu.memory_space<vmem>>, vector<128x128xf32>,
    %c0_39 = arith.constant 0 : index
    %c0_40 = arith.constant 0 : index
    %68 = vector.load %arg8[%c0_39, %c0_40] : memref<128x128xf32, #tpu.memory_space<vmem>>, vector<128x128xf32>
    %c0_i32_41 = arith.constant 0 : i32
    %c8_i32 = arith.constant 8 : i32
    %69 = arith.addi %c0_i32_41, %c8_i32 : i32
    %c1_i32_42 = arith.constant 1 : i32
    scf.for %arg21 = %c0_i32_41 to %69 step %c1_i32_42  : i32 {
      %cst_63 = arith.constant 0.000000e+00 : f32
      %89 = vector.broadcast %cst_63 : f32 to vector<128x128xf32>
      %c16_i32 = arith.constant 16 : i32
      %90 = arith.muli %arg21, %c16_i32 : i32
      %91 = tpu.assume_multiple %90, 16 : i32
      %92 = arith.index_cast %91 : i32 to index
      %c0_64 = arith.constant 0 : index
      %93 = vector.load %arg13[%92, %c0_64] : memref<128x128xf32, #tpu.memory_space<vmem>>, vector<16x128xf32>
      %94 = arith.index_cast %91 : i32 to index
      %c0_65 = arith.constant 0 : index
      %95 = vector.load %arg14[%94, %c0_65] : memref<128x128xf32, #tpu.memory_space<vmem>>, vector<16x128xf32>
      %96 = arith.index_cast %91 : i32 to index
      %c0_66 = arith.constant 0 : index
      %97 = vector.load %arg19[%96, %c0_66] : memref<128x128xf32, #tpu.memory_space<vmem>>, vector<16x128xf32>
      %98 = arith.truncf %97 : vector<16x128xf32> to vector<16x128xbf16>
      %99 = arith.index_cast %91 : i32 to index
      %c0_67 = arith.constant 0 : index
      %100 = vector.load %arg18[%99, %c0_67] : memref<128x128xf32, #tpu.memory_space<vmem>>, vector<16x128xf32>
      %101 = tpu.transpose %100, [1, 0] : vector<16x128xf32> -> vector<128x16xf32>
      %102 = vector.shape_cast %68 : vector<128x128xf32> to vector<1x128x128xf32>
      %103 = vector.shape_cast %93 : vector<16x128xf32> to vector<16x1x128xf32>
      %104 = vector.broadcast %102 : vector<1x128x128xf32> to vector<16x128x128xf32>
      %105 = vector.broadcast %103 : vector<16x1x128xf32> to vector<16x128x128xf32>
      %106 = arith.mulf %104, %105 : vector<16x128x128xf32>
      %107 = math.exp %106 : vector<16x128x128xf32>
      %c0_68 = arith.constant 0 : index
      %c0_69 = arith.constant 0 : index
      %c0_70 = arith.constant 0 : index
      %108 = vector.load %arg20[%c0_68, %c0_69, %c0_70] : memref<16x128x128xf32, #tpu.memory_space<vmem>>, vector<16x128x128xf32>
      tpu.vector_store %arg20[%c0_68, %c0_69, %c0_70], %107 {strides = array<i32>} : memref<16x128x128xf32, #tpu.memory_space<vmem>>, vector<16x128x128xf32>,
      %c0_71 = arith.constant 0 : index
      %c0_72 = arith.constant 0 : index
      %c0_73 = arith.constant 0 : index
      %109 = vector.load %arg20[%c0_71, %c0_72, %c0_73] : memref<16x128x128xf32, #tpu.memory_space<vmem>>, vector<1x128x128xf32>
      %110 = vector.shape_cast %109 : vector<1x128x128xf32> to vector<128x128xf32>
      %111 = arith.mulf %110, %89 : vector<128x128xf32>
      %112 = vector.extract_strided_slice %101 {offsets = [0, 0], sizes = [128, 1], strides = [1, 1]} : vector<128x16xf32> to vector<128x1xf32>
      %113 = vector.extract_strided_slice %95 {offsets = [0, 0], sizes = [1, 128], strides = [1, 1]} : vector<16x128xf32> to vector<1x128xf32>
      %114 = vector.broadcast %112 : vector<128x1xf32> to vector<128x128xf32>
      %115 = vector.broadcast %113 : vector<1x128xf32> to vector<128x128xf32>
      %116 = arith.mulf %114, %115 : vector<128x128xf32>
      %117 = arith.addf %111, %116 : vector<128x128xf32>
      %118 = vector.extract_strided_slice %98 {offsets = [0, 0], sizes = [1, 128], strides = [1, 1]} : vector<16x128xbf16> to vector<1x128xbf16>
      %119 = arith.truncf %117 : vector<128x128xf32> to vector<128x128xbf16>
      %cst_74 = arith.constant dense<0.000000e+00> : vector<1x128xf32>
      %120 = tpu.matmul %118, %119, %cst_74 {dimension_numbers = #tpu.dot_dimension_numbers<[1], [0], [0], [1], [0, 0, 1, 1], [], []>} : vector<1x128xbf16>, vector<128x128xbf16>, vector<1x128xf32> -> vector<1x128xf32>
      %c1 = arith.constant 1 : index
      %c0_75 = arith.constant 0 : index
      %c0_76 = arith.constant 0 : index
      %121 = vector.load %arg20[%c1, %c0_75, %c0_76] : memref<16x128x128xf32, #tpu.memory_space<vmem>>, vector<1x128x128xf32>
      %122 = vector.shape_cast %121 : vector<1x128x128xf32> to vector<128x128xf32>
      %123 = arith.mulf %122, %117 : vector<128x128xf32>
      %124 = vector.extract_strided_slice %101 {offsets = [0, 1], sizes = [128, 1], strides = [1, 1]} : vector<128x16xf32> to vector<128x1xf32>
      %125 = vector.extract_strided_slice %95 {offsets = [1, 0], sizes = [1, 128], strides = [1, 1]} : vector<16x128xf32> to vector<1x128xf32>
      %126 = vector.broadcast %124 : vector<128x1xf32> to vector<128x128xf32>
      %127 = vector.broadcast %125 : vector<1x128xf32> to vector<128x128xf32>
      %128 = arith.mulf %126, %127 : vector<128x128xf32>
      %129 = arith.addf %123, %128 : vector<128x128xf32>
      %130 = vector.extract_strided_slice %98 {offsets = [1, 0], sizes = [1, 128], strides = [1, 1]} : vector<16x128xbf16> to vector<1x128xbf16>
      %131 = arith.truncf %129 : vector<128x128xf32> to vector<128x128xbf16>
      %cst_77 = arith.constant dense<0.000000e+00> : vector<1x128xf32>
      %132 = tpu.matmul %130, %131, %cst_77 {dimension_numbers = #tpu.dot_dimension_numbers<[1], [0], [0], [1], [0, 0, 1, 1], [], []>} : vector<1x128xbf16>, vector<128x128xbf16>, vector<1x128xf32> -> vector<1x128xf32>
      %c2 = arith.constant 2 : index
      %c0_78 = arith.constant 0 : index
      %c0_79 = arith.constant 0 : index
      %133 = vector.load %arg20[%c2, %c0_78, %c0_79] : memref<16x128x128xf32, #tpu.memory_space<vmem>>, vector<1x128x128xf32>
      %134 = vector.shape_cast %133 : vector<1x128x128xf32> to vector<128x128xf32>
      %135 = arith.mulf %134, %129 : vector<128x128xf32>
      %136 = vector.extract_strided_slice %101 {offsets = [0, 2], sizes = [128, 1], strides = [1, 1]} : vector<128x16xf32> to vector<128x1xf32>
      %137 = vector.extract_strided_slice %95 {offsets = [2, 0], sizes = [1, 128], strides = [1, 1]} : vector<16x128xf32> to vector<1x128xf32>
      %138 = vector.broadcast %136 : vector<128x1xf32> to vector<128x128xf32>
      %139 = vector.broadcast %137 : vector<1x128xf32> to vector<128x128xf32>
      %140 = arith.mulf %138, %139 : vector<128x128xf32>
      %141 = arith.addf %135, %140 : vector<128x128xf32>
      %142 = vector.extract_strided_slice %98 {offsets = [2, 0], sizes = [1, 128], strides = [1, 1]} : vector<16x128xbf16> to vector<1x128xbf16>
      %143 = arith.truncf %141 : vector<128x128xf32> to vector<128x128xbf16>
      %cst_80 = arith.constant dense<0.000000e+00> : vector<1x128xf32>
      %144 = tpu.matmul %142, %143, %cst_80 {dimension_numbers = #tpu.dot_dimension_numbers<[1], [0], [0], [1], [0, 0, 1, 1], [], []>} : vector<1x128xbf16>, vector<128x128xbf16>, vector<1x128xf32> -> vector<1x128xf32>
      %c3 = arith.constant 3 : index
      %c0_81 = arith.constant 0 : index
      %c0_82 = arith.constant 0 : index
      %145 = vector.load %arg20[%c3, %c0_81, %c0_82] : memref<16x128x128xf32, #tpu.memory_space<vmem>>, vector<1x128x128xf32>
      %146 = vector.shape_cast %145 : vector<1x128x128xf32> to vector<128x128xf32>
      %147 = arith.mulf %146, %141 : vector<128x128xf32>
      %148 = vector.extract_strided_slice %101 {offsets = [0, 3], sizes = [128, 1], strides = [1, 1]} : vector<128x16xf32> to vector<128x1xf32>
      %149 = vector.extract_strided_slice %95 {offsets = [3, 0], sizes = [1, 128], strides = [1, 1]} : vector<16x128xf32> to vector<1x128xf32>
      %150 = vector.broadcast %148 : vector<128x1xf32> to vector<128x128xf32>
      %151 = vector.broadcast %149 : vector<1x128xf32> to vector<128x128xf32>
      %152 = arith.mulf %150, %151 : vector<128x128xf32>
      %153 = arith.addf %147, %152 : vector<128x128xf32>
      %154 = vector.extract_strided_slice %98 {offsets = [3, 0], sizes = [1, 128], strides = [1, 1]} : vector<16x128xbf16> to vector<1x128xbf16>
      %155 = arith.truncf %153 : vector<128x128xf32> to vector<128x128xbf16>
      %cst_83 = arith.constant dense<0.000000e+00> : vector<1x128xf32>
      %156 = tpu.matmul %154, %155, %cst_83 {dimension_numbers = #tpu.dot_dimension_numbers<[1], [0], [0], [1], [0, 0, 1, 1], [], []>} : vector<1x128xbf16>, vector<128x128xbf16>, vector<1x128xf32> -> vector<1x128xf32>
      %c4 = arith.constant 4 : index
      %c0_84 = arith.constant 0 : index
      %c0_85 = arith.constant 0 : index
      %157 = vector.load %arg20[%c4, %c0_84, %c0_85] : memref<16x128x128xf32, #tpu.memory_space<vmem>>, vector<1x128x128xf32>
      %158 = vector.shape_cast %157 : vector<1x128x128xf32> to vector<128x128xf32>
      %159 = arith.mulf %158, %153 : vector<128x128xf32>
      %160 = vector.extract_strided_slice %101 {offsets = [0, 4], sizes = [128, 1], strides = [1, 1]} : vector<128x16xf32> to vector<128x1xf32>
      %161 = vector.extract_strided_slice %95 {offsets = [4, 0], sizes = [1, 128], strides = [1, 1]} : vector<16x128xf32> to vector<1x128xf32>
      %162 = vector.broadcast %160 : vector<128x1xf32> to vector<128x128xf32>
      %163 = vector.broadcast %161 : vector<1x128xf32> to vector<128x128xf32>
      %164 = arith.mulf %162, %163 : vector<128x128xf32>
      %165 = arith.addf %159, %164 : vector<128x128xf32>
      %166 = vector.extract_strided_slice %98 {offsets = [4, 0], sizes = [1, 128], strides = [1, 1]} : vector<16x128xbf16> to vector<1x128xbf16>
      %167 = arith.truncf %165 : vector<128x128xf32> to vector<128x128xbf16>
      %cst_86 = arith.constant dense<0.000000e+00> : vector<1x128xf32>
      %168 = tpu.matmul %166, %167, %cst_86 {dimension_numbers = #tpu.dot_dimension_numbers<[1], [0], [0], [1], [0, 0, 1, 1], [], []>} : vector<1x128xbf16>, vector<128x128xbf16>, vector<1x128xf32> -> vector<1x128xf32>
      %c5 = arith.constant 5 : index
      %c0_87 = arith.constant 0 : index
      %c0_88 = arith.constant 0 : index
      %169 = vector.load %arg20[%c5, %c0_87, %c0_88] : memref<16x128x128xf32, #tpu.memory_space<vmem>>, vector<1x128x128xf32>
      %170 = vector.shape_cast %169 : vector<1x128x128xf32> to vector<128x128xf32>
      %171 = arith.mulf %170, %165 : vector<128x128xf32>
      %172 = vector.extract_strided_slice %101 {offsets = [0, 5], sizes = [128, 1], strides = [1, 1]} : vector<128x16xf32> to vector<128x1xf32>
      %173 = vector.extract_strided_slice %95 {offsets = [5, 0], sizes = [1, 128], strides = [1, 1]} : vector<16x128xf32> to vector<1x128xf32>
      %174 = vector.broadcast %172 : vector<128x1xf32> to vector<128x128xf32>
      %175 = vector.broadcast %173 : vector<1x128xf32> to vector<128x128xf32>
      %176 = arith.mulf %174, %175 : vector<128x128xf32>
      %177 = arith.addf %171, %176 : vector<128x128xf32>
      %178 = vector.extract_strided_slice %98 {offsets = [5, 0], sizes = [1, 128], strides = [1, 1]} : vector<16x128xbf16> to vector<1x128xbf16>
      %179 = arith.truncf %177 : vector<128x128xf32> to vector<128x128xbf16>
      %cst_89 = arith.constant dense<0.000000e+00> : vector<1x128xf32>
      %180 = tpu.matmul %178, %179, %cst_89 {dimension_numbers = #tpu.dot_dimension_numbers<[1], [0], [0], [1], [0, 0, 1, 1], [], []>} : vector<1x128xbf16>, vector<128x128xbf16>, vector<1x128xf32> -> vector<1x128xf32>
      %c6 = arith.constant 6 : index
      %c0_90 = arith.constant 0 : index
      %c0_91 = arith.constant 0 : index
      %181 = vector.load %arg20[%c6, %c0_90, %c0_91] : memref<16x128x128xf32, #tpu.memory_space<vmem>>, vector<1x128x128xf32>
      %182 = vector.shape_cast %181 : vector<1x128x128xf32> to vector<128x128xf32>
      %183 = arith.mulf %182, %177 : vector<128x128xf32>
      %184 = vector.extract_strided_slice %101 {offsets = [0, 6], sizes = [128, 1], strides = [1, 1]} : vector<128x16xf32> to vector<128x1xf32>
      %185 = vector.extract_strided_slice %95 {offsets = [6, 0], sizes = [1, 128], strides = [1, 1]} : vector<16x128xf32> to vector<1x128xf32>
      %186 = vector.broadcast %184 : vector<128x1xf32> to vector<128x128xf32>
      %187 = vector.broadcast %185 : vector<1x128xf32> to vector<128x128xf32>
      %188 = arith.mulf %186, %187 : vector<128x128xf32>
      %189 = arith.addf %183, %188 : vector<128x128xf32>
      %190 = vector.extract_strided_slice %98 {offsets = [6, 0], sizes = [1, 128], strides = [1, 1]} : vector<16x128xbf16> to vector<1x128xbf16>
      %191 = arith.truncf %189 : vector<128x128xf32> to vector<128x128xbf16>
      %cst_92 = arith.constant dense<0.000000e+00> : vector<1x128xf32>
      %192 = tpu.matmul %190, %191, %cst_92 {dimension_numbers = #tpu.dot_dimension_numbers<[1], [0], [0], [1], [0, 0, 1, 1], [], []>} : vector<1x128xbf16>, vector<128x128xbf16>, vector<1x128xf32> -> vector<1x128xf32>
      %c7 = arith.constant 7 : index
      %c0_93 = arith.constant 0 : index
      %c0_94 = arith.constant 0 : index
      %193 = vector.load %arg20[%c7, %c0_93, %c0_94] : memref<16x128x128xf32, #tpu.memory_space<vmem>>, vector<1x128x128xf32>
      %194 = vector.shape_cast %193 : vector<1x128x128xf32> to vector<128x128xf32>
      %195 = arith.mulf %194, %189 : vector<128x128xf32>
      %196 = vector.extract_strided_slice %101 {offsets = [0, 7], sizes = [128, 1], strides = [1, 1]} : vector<128x16xf32> to vector<128x1xf32>
      %197 = vector.extract_strided_slice %95 {offsets = [7, 0], sizes = [1, 128], strides = [1, 1]} : vector<16x128xf32> to vector<1x128xf32>
      %198 = vector.broadcast %196 : vector<128x1xf32> to vector<128x128xf32>
      %199 = vector.broadcast %197 : vector<1x128xf32> to vector<128x128xf32>
      %200 = arith.mulf %198, %199 : vector<128x128xf32>
      %201 = arith.addf %195, %200 : vector<128x128xf32>
      %202 = vector.extract_strided_slice %98 {offsets = [7, 0], sizes = [1, 128], strides = [1, 1]} : vector<16x128xbf16> to vector<1x128xbf16>
      %203 = arith.truncf %201 : vector<128x128xf32> to vector<128x128xbf16>
      %cst_95 = arith.constant dense<0.000000e+00> : vector<1x128xf32>
      %204 = tpu.matmul %202, %203, %cst_95 {dimension_numbers = #tpu.dot_dimension_numbers<[1], [0], [0], [1], [0, 0, 1, 1], [], []>} : vector<1x128xbf16>, vector<128x128xbf16>, vector<1x128xf32> -> vector<1x128xf32>
      %c8 = arith.constant 8 : index
      %c0_96 = arith.constant 0 : index
      %c0_97 = arith.constant 0 : index
      %205 = vector.load %arg20[%c8, %c0_96, %c0_97] : memref<16x128x128xf32, #tpu.memory_space<vmem>>, vector<1x128x128xf32>
      %206 = vector.shape_cast %205 : vector<1x128x128xf32> to vector<128x128xf32>
      %207 = arith.mulf %206, %201 : vector<128x128xf32>
      %208 = vector.extract_strided_slice %101 {offsets = [0, 8], sizes = [128, 1], strides = [1, 1]} : vector<128x16xf32> to vector<128x1xf32>
      %209 = vector.extract_strided_slice %95 {offsets = [8, 0], sizes = [1, 128], strides = [1, 1]} : vector<16x128xf32> to vector<1x128xf32>
      %210 = vector.broadcast %208 : vector<128x1xf32> to vector<128x128xf32>
      %211 = vector.broadcast %209 : vector<1x128xf32> to vector<128x128xf32>
      %212 = arith.mulf %210, %211 : vector<128x128xf32>
      %213 = arith.addf %207, %212 : vector<128x128xf32>
      %214 = vector.extract_strided_slice %98 {offsets = [8, 0], sizes = [1, 128], strides = [1, 1]} : vector<16x128xbf16> to vector<1x128xbf16>
      %215 = arith.truncf %213 : vector<128x128xf32> to vector<128x128xbf16>
      %cst_98 = arith.constant dense<0.000000e+00> : vector<1x128xf32>
      %216 = tpu.matmul %214, %215, %cst_98 {dimension_numbers = #tpu.dot_dimension_numbers<[1], [0], [0], [1], [0, 0, 1, 1], [], []>} : vector<1x128xbf16>, vector<128x128xbf16>, vector<1x128xf32> -> vector<1x128xf32>
      %c9 = arith.constant 9 : index
      %c0_99 = arith.constant 0 : index
      %c0_100 = arith.constant 0 : index
      %217 = vector.load %arg20[%c9, %c0_99, %c0_100] : memref<16x128x128xf32, #tpu.memory_space<vmem>>, vector<1x128x128xf32>
      %218 = vector.shape_cast %217 : vector<1x128x128xf32> to vector<128x128xf32>
      %219 = arith.mulf %218, %213 : vector<128x128xf32>
      %220 = vector.extract_strided_slice %101 {offsets = [0, 9], sizes = [128, 1], strides = [1, 1]} : vector<128x16xf32> to vector<128x1xf32>
      %221 = vector.extract_strided_slice %95 {offsets = [9, 0], sizes = [1, 128], strides = [1, 1]} : vector<16x128xf32> to vector<1x128xf32>
      %222 = vector.broadcast %220 : vector<128x1xf32> to vector<128x128xf32>
      %223 = vector.broadcast %221 : vector<1x128xf32> to vector<128x128xf32>
      %224 = arith.mulf %222, %223 : vector<128x128xf32>
      %225 = arith.addf %219, %224 : vector<128x128xf32>
      %226 = vector.extract_strided_slice %98 {offsets = [9, 0], sizes = [1, 128], strides = [1, 1]} : vector<16x128xbf16> to vector<1x128xbf16>
      %227 = arith.truncf %225 : vector<128x128xf32> to vector<128x128xbf16>
      %cst_101 = arith.constant dense<0.000000e+00> : vector<1x128xf32>
      %228 = tpu.matmul %226, %227, %cst_101 {dimension_numbers = #tpu.dot_dimension_numbers<[1], [0], [0], [1], [0, 0, 1, 1], [], []>} : vector<1x128xbf16>, vector<128x128xbf16>, vector<1x128xf32> -> vector<1x128xf32>
      %c10 = arith.constant 10 : index
      %c0_102 = arith.constant 0 : index
      %c0_103 = arith.constant 0 : index
      %229 = vector.load %arg20[%c10, %c0_102, %c0_103] : memref<16x128x128xf32, #tpu.memory_space<vmem>>, vector<1x128x128xf32>
      %230 = vector.shape_cast %229 : vector<1x128x128xf32> to vector<128x128xf32>
      %231 = arith.mulf %230, %225 : vector<128x128xf32>
      %232 = vector.extract_strided_slice %101 {offsets = [0, 10], sizes = [128, 1], strides = [1, 1]} : vector<128x16xf32> to vector<128x1xf32>
      %233 = vector.extract_strided_slice %95 {offsets = [10, 0], sizes = [1, 128], strides = [1, 1]} : vector<16x128xf32> to vector<1x128xf32>
      %234 = vector.broadcast %232 : vector<128x1xf32> to vector<128x128xf32>
      %235 = vector.broadcast %233 : vector<1x128xf32> to vector<128x128xf32>
      %236 = arith.mulf %234, %235 : vector<128x128xf32>
      %237 = arith.addf %231, %236 : vector<128x128xf32>
      %238 = vector.extract_strided_slice %98 {offsets = [10, 0], sizes = [1, 128], strides = [1, 1]} : vector<16x128xbf16> to vector<1x128xbf16>
      %239 = arith.truncf %237 : vector<128x128xf32> to vector<128x128xbf16>
      %cst_104 = arith.constant dense<0.000000e+00> : vector<1x128xf32>
      %240 = tpu.matmul %238, %239, %cst_104 {dimension_numbers = #tpu.dot_dimension_numbers<[1], [0], [0], [1], [0, 0, 1, 1], [], []>} : vector<1x128xbf16>, vector<128x128xbf16>, vector<1x128xf32> -> vector<1x128xf32>
      %c11 = arith.constant 11 : index
      %c0_105 = arith.constant 0 : index
      %c0_106 = arith.constant 0 : index
      %241 = vector.load %arg20[%c11, %c0_105, %c0_106] : memref<16x128x128xf32, #tpu.memory_space<vmem>>, vector<1x128x128xf32>
      %242 = vector.shape_cast %241 : vector<1x128x128xf32> to vector<128x128xf32>
      %243 = arith.mulf %242, %237 : vector<128x128xf32>
      %244 = vector.extract_strided_slice %101 {offsets = [0, 11], sizes = [128, 1], strides = [1, 1]} : vector<128x16xf32> to vector<128x1xf32>
      %245 = vector.extract_strided_slice %95 {offsets = [11, 0], sizes = [1, 128], strides = [1, 1]} : vector<16x128xf32> to vector<1x128xf32>
      %246 = vector.broadcast %244 : vector<128x1xf32> to vector<128x128xf32>
      %247 = vector.broadcast %245 : vector<1x128xf32> to vector<128x128xf32>
      %248 = arith.mulf %246, %247 : vector<128x128xf32>
      %249 = arith.addf %243, %248 : vector<128x128xf32>
      %250 = vector.extract_strided_slice %98 {offsets = [11, 0], sizes = [1, 128], strides = [1, 1]} : vector<16x128xbf16> to vector<1x128xbf16>
      %251 = arith.truncf %249 : vector<128x128xf32> to vector<128x128xbf16>
      %cst_107 = arith.constant dense<0.000000e+00> : vector<1x128xf32>
      %252 = tpu.matmul %250, %251, %cst_107 {dimension_numbers = #tpu.dot_dimension_numbers<[1], [0], [0], [1], [0, 0, 1, 1], [], []>} : vector<1x128xbf16>, vector<128x128xbf16>, vector<1x128xf32> -> vector<1x128xf32>
      %c12 = arith.constant 12 : index
      %c0_108 = arith.constant 0 : index
      %c0_109 = arith.constant 0 : index
      %253 = vector.load %arg20[%c12, %c0_108, %c0_109] : memref<16x128x128xf32, #tpu.memory_space<vmem>>, vector<1x128x128xf32>
      %254 = vector.shape_cast %253 : vector<1x128x128xf32> to vector<128x128xf32>
      %255 = arith.mulf %254, %249 : vector<128x128xf32>
      %256 = vector.extract_strided_slice %101 {offsets = [0, 12], sizes = [128, 1], strides = [1, 1]} : vector<128x16xf32> to vector<128x1xf32>
      %257 = vector.extract_strided_slice %95 {offsets = [12, 0], sizes = [1, 128], strides = [1, 1]} : vector<16x128xf32> to vector<1x128xf32>
      %258 = vector.broadcast %256 : vector<128x1xf32> to vector<128x128xf32>
      %259 = vector.broadcast %257 : vector<1x128xf32> to vector<128x128xf32>
      %260 = arith.mulf %258, %259 : vector<128x128xf32>
      %261 = arith.addf %255, %260 : vector<128x128xf32>
      %262 = vector.extract_strided_slice %98 {offsets = [12, 0], sizes = [1, 128], strides = [1, 1]} : vector<16x128xbf16> to vector<1x128xbf16>
      %263 = arith.truncf %261 : vector<128x128xf32> to vector<128x128xbf16>
      %cst_110 = arith.constant dense<0.000000e+00> : vector<1x128xf32>
      %264 = tpu.matmul %262, %263, %cst_110 {dimension_numbers = #tpu.dot_dimension_numbers<[1], [0], [0], [1], [0, 0, 1, 1], [], []>} : vector<1x128xbf16>, vector<128x128xbf16>, vector<1x128xf32> -> vector<1x128xf32>
      %c13 = arith.constant 13 : index
      %c0_111 = arith.constant 0 : index
      %c0_112 = arith.constant 0 : index
      %265 = vector.load %arg20[%c13, %c0_111, %c0_112] : memref<16x128x128xf32, #tpu.memory_space<vmem>>, vector<1x128x128xf32>
      %266 = vector.shape_cast %265 : vector<1x128x128xf32> to vector<128x128xf32>
      %267 = arith.mulf %266, %261 : vector<128x128xf32>
      %268 = vector.extract_strided_slice %101 {offsets = [0, 13], sizes = [128, 1], strides = [1, 1]} : vector<128x16xf32> to vector<128x1xf32>
      %269 = vector.extract_strided_slice %95 {offsets = [13, 0], sizes = [1, 128], strides = [1, 1]} : vector<16x128xf32> to vector<1x128xf32>
      %270 = vector.broadcast %268 : vector<128x1xf32> to vector<128x128xf32>
      %271 = vector.broadcast %269 : vector<1x128xf32> to vector<128x128xf32>
      %272 = arith.mulf %270, %271 : vector<128x128xf32>
      %273 = arith.addf %267, %272 : vector<128x128xf32>
      %274 = vector.extract_strided_slice %98 {offsets = [13, 0], sizes = [1, 128], strides = [1, 1]} : vector<16x128xbf16> to vector<1x128xbf16>
      %275 = arith.truncf %273 : vector<128x128xf32> to vector<128x128xbf16>
      %cst_113 = arith.constant dense<0.000000e+00> : vector<1x128xf32>
      %276 = tpu.matmul %274, %275, %cst_113 {dimension_numbers = #tpu.dot_dimension_numbers<[1], [0], [0], [1], [0, 0, 1, 1], [], []>} : vector<1x128xbf16>, vector<128x128xbf16>, vector<1x128xf32> -> vector<1x128xf32>
      %c14 = arith.constant 14 : index
      %c0_114 = arith.constant 0 : index
      %c0_115 = arith.constant 0 : index
      %277 = vector.load %arg20[%c14, %c0_114, %c0_115] : memref<16x128x128xf32, #tpu.memory_space<vmem>>, vector<1x128x128xf32>
      %278 = vector.shape_cast %277 : vector<1x128x128xf32> to vector<128x128xf32>
      %279 = arith.mulf %278, %273 : vector<128x128xf32>
      %280 = vector.extract_strided_slice %101 {offsets = [0, 14], sizes = [128, 1], strides = [1, 1]} : vector<128x16xf32> to vector<128x1xf32>
      %281 = vector.extract_strided_slice %95 {offsets = [14, 0], sizes = [1, 128], strides = [1, 1]} : vector<16x128xf32> to vector<1x128xf32>
      %282 = vector.broadcast %280 : vector<128x1xf32> to vector<128x128xf32>
      %283 = vector.broadcast %281 : vector<1x128xf32> to vector<128x128xf32>
      %284 = arith.mulf %282, %283 : vector<128x128xf32>
      %285 = arith.addf %279, %284 : vector<128x128xf32>
      %286 = vector.extract_strided_slice %98 {offsets = [14, 0], sizes = [1, 128], strides = [1, 1]} : vector<16x128xbf16> to vector<1x128xbf16>
      %287 = arith.truncf %285 : vector<128x128xf32> to vector<128x128xbf16>
      %cst_116 = arith.constant dense<0.000000e+00> : vector<1x128xf32>
      %288 = tpu.matmul %286, %287, %cst_116 {dimension_numbers = #tpu.dot_dimension_numbers<[1], [0], [0], [1], [0, 0, 1, 1], [], []>} : vector<1x128xbf16>, vector<128x128xbf16>, vector<1x128xf32> -> vector<1x128xf32>
      %c15 = arith.constant 15 : index
      %c0_117 = arith.constant 0 : index
      %c0_118 = arith.constant 0 : index
      %289 = vector.load %arg20[%c15, %c0_117, %c0_118] : memref<16x128x128xf32, #tpu.memory_space<vmem>>, vector<1x128x128xf32>
      %290 = vector.shape_cast %289 : vector<1x128x128xf32> to vector<128x128xf32>
      %291 = arith.mulf %290, %285 : vector<128x128xf32>
      %292 = vector.extract_strided_slice %101 {offsets = [0, 15], sizes = [128, 1], strides = [1, 1]} : vector<128x16xf32> to vector<128x1xf32>
      %293 = vector.extract_strided_slice %95 {offsets = [15, 0], sizes = [1, 128], strides = [1, 1]} : vector<16x128xf32> to vector<1x128xf32>
      %294 = vector.broadcast %292 : vector<128x1xf32> to vector<128x128xf32>
      %295 = vector.broadcast %293 : vector<1x128xf32> to vector<128x128xf32>
      %296 = arith.mulf %294, %295 : vector<128x128xf32>
      %297 = arith.addf %291, %296 : vector<128x128xf32>
      %298 = vector.extract_strided_slice %98 {offsets = [15, 0], sizes = [1, 128], strides = [1, 1]} : vector<16x128xbf16> to vector<1x128xbf16>
      %299 = arith.truncf %297 : vector<128x128xf32> to vector<128x128xbf16>
      %cst_119 = arith.constant dense<0.000000e+00> : vector<1x128xf32>
      %300 = tpu.matmul %298, %299, %cst_119 {dimension_numbers = #tpu.dot_dimension_numbers<[1], [0], [0], [1], [0, 0, 1, 1], [], []>} : vector<1x128xbf16>, vector<128x128xbf16>, vector<1x128xf32> -> vector<1x128xf32>
      %301 = tpu.concatenate %120, %132, %144, %156, %168, %180, %192, %204, %216, %228, %240, %252, %264, %276, %288, %300 in 0 : vector<1x128xf32>, vector<1x128xf32>, vector<1x128xf32>, vector<1x128xf32>, vector<1x128xf32>, vector<1x128xf32>, vector<1x128xf32>, vector<1x128xf32>, vector<1x128xf32>, vector<1x128xf32>, vector<1x128xf32>, vector<1x128xf32>, vector<1x128xf32>, vector<1x128xf32>, vector<1x128xf32>, vector<1x128xf32> -> vector<16x128xf32>
      %302 = arith.index_cast %91 : i32 to index
      %c0_120 = arith.constant 0 : index
      %303 = vector.load %arg17[%302, %c0_120] : memref<128x128xf32, #tpu.memory_space<vmem>>, vector<16x128xf32>
      tpu.vector_store %arg17[%302, %c0_120], %301 {strides = array<i32>} : memref<128x128xf32, #tpu.memory_space<vmem>>, vector<16x128xf32>,
    }
    %c8_i32_43 = arith.constant 8 : i32
    %c0_44 = arith.constant 0 : index
    %c0_45 = arith.constant 0 : index
    %c0_46 = arith.constant 0 : index
    %70 = vector.load %arg1[%c0_44, %c0_45, %c0_46] : memref<8x16x128xf32, #tpu.memory_space<vmem>>, vector<8x16x128xf32>
    %71 = vector.shape_cast %70 : vector<8x16x128xf32> to vector<128x128xf32>
    %c0_47 = arith.constant 0 : index
    %c0_48 = arith.constant 0 : index
    %72 = vector.load %arg17[%c0_47, %c0_48] : memref<128x128xf32, #tpu.memory_space<vmem>>, vector<128x128xf32>
    %c0_49 = arith.constant 0 : index
    %c0_50 = arith.constant 0 : index
    %73 = vector.load %arg15[%c0_49, %c0_50] : memref<128x128xf32, #tpu.memory_space<vmem>>, vector<128x128xf32>
    %c0_51 = arith.constant 0 : index
    %c0_52 = arith.constant 0 : index
    %74 = vector.load %arg9[%c0_51, %c0_52] : memref<1x128xf32, #tpu.memory_space<vmem>>, vector<1x128xf32>
    %75 = vector.broadcast %74 : vector<1x128xf32> to vector<128x128xf32>
    %76 = arith.mulf %73, %75 : vector<128x128xf32>
    %77 = arith.addf %72, %76 : vector<128x128xf32>
    %c0_53 = arith.constant 0 : index
    %c0_54 = arith.constant 0 : index
    %78 = vector.load %arg16[%c0_53, %c0_54] : memref<128x128xf32, #tpu.memory_space<vmem>>, vector<128x128xf32>
    %79 = arith.mulf %77, %78 : vector<128x128xf32>
    %80 = arith.addf %79, %71 : vector<128x128xf32>
    %81 = arith.truncf %80 : vector<128x128xf32> to vector<128x128xbf16>
    %c0_55 = arith.constant 0 : index
    %c0_56 = arith.constant 0 : index
    %82 = vector.load %arg10[%c0_55, %c0_56] : memref<128x128xbf16, #tpu.memory_space<vmem>>, vector<128x128xbf16>
    %cst_57 = arith.constant dense<0.000000e+00> : vector<128x128xf32>
    %83 = tpu.matmul %81, %82, %cst_57 {dimension_numbers = #tpu.dot_dimension_numbers<[1], [0], [0], [1], [0, 0, 1, 1], [], []>} : vector<128x128xbf16>, vector<128x128xbf16>, vector<128x128xf32> -> vector<128x128xf32>
    %c0_58 = arith.constant 0 : index
    %c0_59 = arith.constant 0 : index
    %84 = vector.load %arg11[%c0_58, %c0_59] : memref<1x128xf32, #tpu.memory_space<vmem>>, vector<1x128xf32>
    %85 = vector.broadcast %84 : vector<1x128xf32> to vector<128x128xf32>
    %86 = arith.addf %83, %85 : vector<128x128xf32>
    %87 = vector.shape_cast %86 : vector<128x128xf32> to vector<8x16x128xf32>
    %c0_60 = arith.constant 0 : index
    %c0_61 = arith.constant 0 : index
    %c0_62 = arith.constant 0 : index
    %88 = vector.load %arg12[%c0_60, %c0_61, %c0_62] : memref<8x16x128xf32, #tpu.memory_space<vmem>>, vector<8x16x128xf32>
    tpu.vector_store %arg12[%c0_60, %c0_61, %c0_62], %87 {strides = array<i32>} : memref<8x16x128xf32, #tpu.memory_space<vmem>>, vector<8x16x128xf32>,
    return
  }
  func.func @transform_0(%arg0: i32) -> (i32, i32, i32) {
    %c0_i32 = arith.constant 0 : i32
    %c0_i32_0 = arith.constant 0 : i32
    %c0_i32_1 = arith.constant 0 : i32
    return %arg0, %c0_i32, %c0_i32_0 : i32, i32, i32
  }
  func.func @transform_1(%arg0: i32) -> (i32, i32) {
    %c0_i32 = arith.constant 0 : i32
    %c0_i32_0 = arith.constant 0 : i32
    %c0_i32_1 = arith.constant 0 : i32
    return %c0_i32, %c0_i32_0 : i32, i32
  }
  func.func @transform_2(%arg0: i32) -> (i32, i32) {
    %c0_i32 = arith.constant 0 : i32
    %c0_i32_0 = arith.constant 0 : i32
    %c0_i32_1 = arith.constant 0 : i32
    return %c0_i32, %c0_i32_0 : i32, i32
  }
  func.func @transform_3(%arg0: i32) -> (i32, i32) {
    %c0_i32 = arith.constant 0 : i32
    %c0_i32_0 = arith.constant 0 : i32
    %c0_i32_1 = arith.constant 0 : i32
    return %c0_i32, %c0_i32_0 : i32, i32
  }
  func.func @transform_4(%arg0: i32) -> (i32, i32) {
    %c0_i32 = arith.constant 0 : i32
    %c0_i32_0 = arith.constant 0 : i32
    %c0_i32_1 = arith.constant 0 : i32
    return %c0_i32, %c0_i32_0 : i32, i32
  }
  func.func @transform_5(%arg0: i32) -> (i32, i32) {
    %c0_i32 = arith.constant 0 : i32
    %c0_i32_0 = arith.constant 0 : i32
    %c0_i32_1 = arith.constant 0 : i32
    return %c0_i32, %c0_i32_0 : i32, i32
  }
  func.func @transform_6(%arg0: i32) -> (i32, i32) {
    %c0_i32 = arith.constant 0 : i32
    %c0_i32_0 = arith.constant 0 : i32
    %c0_i32_1 = arith.constant 0 : i32
    return %c0_i32, %c0_i32_0 : i32, i32
  }
  func.func @transform_7(%arg0: i32) -> (i32, i32) {
    %c0_i32 = arith.constant 0 : i32
    %c0_i32_0 = arith.constant 0 : i32
    %c0_i32_1 = arith.constant 0 : i32
    return %c0_i32, %c0_i32_0 : i32, i32
  }
  func.func @transform_8(%arg0: i32) -> (i32, i32) {
    %c0_i32 = arith.constant 0 : i32
    %c0_i32_0 = arith.constant 0 : i32
    %c0_i32_1 = arith.constant 0 : i32
    return %c0_i32, %c0_i32_0 : i32, i32
  }
  func.func @transform_9(%arg0: i32) -> (i32, i32) {
    %c0_i32 = arith.constant 0 : i32
    %c0_i32_0 = arith.constant 0 : i32
    %c0_i32_1 = arith.constant 0 : i32
    return %c0_i32, %c0_i32_0 : i32, i32
  }
  func.func @transform_10(%arg0: i32) -> (i32, i32) {
    %c0_i32 = arith.constant 0 : i32
    %c0_i32_0 = arith.constant 0 : i32
    %c0_i32_1 = arith.constant 0 : i32
    return %c0_i32, %c0_i32_0 : i32, i32
  }
  func.func @transform_11(%arg0: i32) -> (i32, i32, i32) {
    %c0_i32 = arith.constant 0 : i32
    %c0_i32_0 = arith.constant 0 : i32
    %c0_i32_1 = arith.constant 0 : i32
    return %arg0, %c0_i32, %c0_i32_0 : i32, i32, i32
  }
}

</mosaic_0001>

<bundles_post_ra>
// kernel: tpu_custom_call.1
= control target key start
LH: loop header
LB: loop body
LE: loop exit
PB: predicated region body
PF: predicated region fallthrough
CT: control target
= control target key end

     0   :  { %s13670_s0 = inlined_call_operand.hbm [shape: f32[16,16,128], index: 0, kind: input, shape index: {}]   ;;  %s13671_s1 = inlined_call_operand.vmem [shape: bf16[128,256], index: 1, kind: input, shape index: {}]   ;;  %s13672_s2 = inlined_call_operand.vmem [shape: f32[1,256], index: 2, kind: input, shape index: {}]   ;;  %s13673_s3 = inlined_call_operand.hbm [shape: bf16[128,384], index: 3, kind: input, shape index: {}]   ;;  %s13674_s4 = inlined_call_operand.vmem [shape: f32[128,1], index: 4, kind: input, shape index: {}]   ;;  %s13675_s5 = inlined_call_operand.hbm [shape: bf16[128,384], index: 5, kind: input, shape index: {}]   ;;  %s13676_s6 = inlined_call_operand.vmem [shape: f32[1,128], index: 6, kind: input, shape index: {}]   ;;  %s13677_s7 = inlined_call_operand.hbm [shape: f32[128,128], index: 7, kind: input, shape index: {}]   ;;  %s13678_s8 = inlined_call_operand.vmem [shape: f32[1,128], index: 8, kind: input, shape index: {}]   ;;  %s13679_s9 = inlined_call_operand.hbm [shape: bf16[128,128], index: 9, kind: input, shape index: {}]   ;;  %s13680_s10 = inlined_call_operand.vmem [shape: f32[1,128], index: 10, kind: input, shape index: {}]   ;;  %s13681_s11 = inlined_call_operand.hbm [shape: f32[16,16,128], index: 11, kind: output, shape index: {}]  }
   0x1   :  { %13896 = sst [smem:[#allocation153_spill]] %s13673_s3 }
   0x2   :  { %13897 = sst [smem:[#allocation154_spill]] %s13675_s5 }
   0x3   :  { %13898 = sst [smem:[#allocation155_spill]] %s13677_s7 }
   0x4   :  { %13899 = sst [smem:[#allocation156_spill]] %s13679_s9 }
   0x5   :  { %16 = vsyncpa [#allocation11], 0 }
   0x6   :  { %18 = vsyncpa [#allocation11 + $0x1], 0 }
   0x7   :  { %19 = vsyncpa [#allocation14], 0 }
   0x8   :  { %20 = vsyncpa [#allocation17], 0 }
   0x9   :  { %21 = vsyncpa [#allocation12], 0 }
   0xa   :  { %23 = vsyncpa [#allocation12 + $0x1], 0  ;;  %s9302_s17 = smov 0   ;;  %s9304_s18 = smov 0  }
   0xb   :  { %s9306_s19 = smov 0   ;;  %s9308_s20 = smov 0  }
   0xc LB: > { %s9323_s21 = sadd.s32 4294967295, %s9200_s20   ;;  %s7013_s22 = sadd.s32 4294967294, %s9200_s20   ;;  %s9200_s20 = sphi %s9308_s20, %s14596_s20   ;;  %s9196_s19 = sphi %s9306_s19, %s14595_s19   ;;  %s9192_s18 = sphi %s9304_s18, %s14594_s18   ;;  %s9188_s17 = sphi %s9302_s17, %s14593_s17  }
   0xd   : > { %p49_p0 = scmp.ne.s32.totalorder %s9192_s18, %s9188_s17  ;;  %p13684_p1 = scmp.eq.s32.totalorder %s9323_s21, 0 }
   0xe   : > { %p289_p3 = scmp.eq.s32.totalorder %s7013_s22, 1  ;;  %p7014_p5 = scmp.ge.s32.totalorder %s9200_s20, 1 }
   0xf   : > { %p9332_p4 = por %p13684_p1, %p49_p0  ;;  %p296_p7 = scmp.lt.s32.totalorder %s9200_s20, 3 }
  0x10   : > { %p9337_p6 = por %p289_p3, %p49_p0  ;;  %s9206_s26 = smov [#allocation13]  }
  0x11   : > { %s13900_s23 = scalar_select %p9332_p4, 1, 0 }
  0x12   : > { %s13901_s24 = scalar_select %p9337_p6, 1, 0 }
  0x13   : > { %p9342_p8 = pnand %p7014_p5, %p296_p7  ;;  %s314_s27 = sshll.u32 %s9206_s26, 4  ;;  %s315_s27 = int_to_ptr.vmem [resolvable:$true] %s314_s27 }
  0x14   : > { %s9207_s29 = smov [#allocation16]   ;;  %s9003_s12 = scalar_lea.vmem %s315_s27, 3072 }
  0x15   : > { %s13902_s25 = scalar_select %p9342_p8, 1, 0 }
  0x16   : > { %p7907_p9 = pneg %p9342_p8  ;;  %s346_s30 = sshll.u32 %s9207_s29, 4  ;;  %s347_s30 = int_to_ptr.vmem [resolvable:$true] %s346_s30 }
  0x17   : > { %p9004_p13 = scmp.ne.s32.totalorder %s315_s27, %s9003_s12  ;;  %p9011_p5 = scmp.lt.s32.totalorder %s315_s27, %s315_s27 }
  0x18   : > { %p9351_p11 = pnand %p7907_p9, %p13684_p1  ;;  %p9012_p7 = scmp.lt.s32.totalorder %s9003_s12, %s9003_s12 }
  0x1a   : > { %p8994_p12 = pneg %p9351_p11  ;;  %p9013_p10 = por %p9012_p7, %p9011_p5 }
  0x1c   : > { %p9006_p0 = pnand %p9004_p13, %p8994_p12 }
  0x1e   : > { %p9007_p3 = pneg %p9006_p0 }
  0x20   : > { %p9014_p9 = pnand %p9013_p10, %p9007_p3 }
  0x22   : > { %9017 = shalt.err (!%p9014_p9)
}
  0x23   : > { %s13682_s13 = smov 192   ;;  %s13683_s14 = smov 12  }
  0x24   : > { %s13904_s3 = sld [smem:[#allocation153_spill]]  ;;  %s9029_s22 = scalar_lea.vmem %s347_s30, 2048 }
  0x25   : > { %p9030_p13 = scmp.ne.s32.totalorder %s347_s30, %s9029_s22  ;;  %p9037_p10 = scmp.lt.s32.totalorder %s347_s30, %s347_s30 }
  0x26   : > { %p9038_p3 = scmp.lt.s32.totalorder %s9029_s22, %s9029_s22 }
  0x27   : > { %p9032_p0 = pnand %p9030_p13, %p8994_p12 }
  0x28   : > { %p9039_p7 = por %p9038_p3, %p9037_p10 }
  0x29   : > { %p9033_p5 = pneg %p9032_p0 }
  0x2a   : > { %7910 = dma.hbm_to_vmem [thread:$0]  (!%p9351_p11), %s13904_s3, 3072, %s315_s27, [#allocation14], %s13682_s13, %s13682_s13, %s13683_s14  }
  0x2b   : > { %p9040_p9 = pnand %p9039_p7, %p9033_p5 }
  0x2d   : > { %9043 = shalt.err (!%p9040_p9)
}
  0x2e   : > { %s13685_s26 = smov 128   ;;  %s13686_s29 = smov 8  }
  0x2f   : > { %s13905_s7 = sld [smem:[#allocation155_spill]]  ;;  %s9212_s15 = smov [#allocation15]  }
  0x30   : > { %s330_s16 = sshll.u32 %s9212_s15, 4  ;;  %s9213_s13 = smov [#allocation18]   ;;  %s331_s16 = int_to_ptr.vmem [resolvable:$true] %s330_s16 }
  0x31   : > { %s362_s14 = sshll.u32 %s9213_s13, 4  ;;  %s9055_s22 = scalar_lea.vmem %s331_s16, 3072  ;;  %s363_s14 = int_to_ptr.vmem [resolvable:$true] %s362_s14 }
  0x32   : > { %p9056_p13 = scmp.ne.s32.totalorder %s331_s16, %s9055_s22  ;;  %p9063_p10 = scmp.lt.s32.totalorder %s331_s16, %s331_s16 }
  0x33   : > { %p9064_p3 = scmp.lt.s32.totalorder %s9055_s22, %s9055_s22 }
  0x34   : > { %p9058_p0 = pnand %p9056_p13, %p8994_p12 }
  0x35   : > { %7916 = dma.hbm_to_vmem [thread:$0]  (!%p9351_p11), %s13905_s7, 2048, %s347_s30, [#allocation17], %s13685_s26, %s13685_s26, %s13686_s29  }
  0x36   : > { %p9059_p5 = pneg %p9058_p0  ;;  %p9065_p7 = por %p9064_p3, %p9063_p10 }
  0x38   : > { %p9066_p9 = pnand %p9065_p7, %p9059_p5 }
  0x3a   : > { %9069 = shalt.err (!%p9066_p9)
}
  0x3b   : > { %s13906_s30 = smov 12   ;;  %s13907_s27 = smov 192  }
  0x3c   : > { %s13908_s5 = sld [smem:[#allocation154_spill]]  ;;  %s9081_s15 = scalar_lea.vmem %s363_s14, 1024 }
  0x3d   : > { %p9082_p1 = scmp.ne.s32.totalorder %s363_s14, %s9081_s15  ;;  %p9089_p2 = scmp.lt.s32.totalorder %s363_s14, %s363_s14 }
  0x3e   : > { %p9090_p10 = scmp.lt.s32.totalorder %s9081_s15, %s9081_s15 }
  0x3f   : > { %p9084_p13 = pnand %p9082_p1, %p8994_p12 }
  0x40   : > { %p9091_p5 = por %p9090_p10, %p9089_p2 }
  0x41   : > { %p9085_p0 = pneg %p9084_p13 }
  0x42   : > { %7913 = dma.hbm_to_vmem [thread:$0]  (!%p9351_p11), %s13908_s5, 3072, %s331_s16, [#allocation14], %s13907_s27, %s13907_s27, %s13906_s30  }
  0x43   : > { %p9092_p3 = pnand %p9091_p5, %p9085_p0 }
  0x45   : > { %9095 = shalt.err (!%p9092_p3)
}
  0x46   : > { %s9214_s22 = smov 64   ;;  %s9215_s16 = smov 4  }
  0x47   : > { %s13909_s9 = sld [smem:[#allocation156_spill]]  ;;  %s9399_s12 = sadd.s32 1, %s9200_s20  }
  0x48   : > { %s33_s13 = ssub.s32 %s9200_s20, %s9399_s12  ;;  %s36_s15 = sadd.s32 1, %s9196_s19 }
  0x49   : > { %p34_p1 = scmp.eq.s32.totalorder %s33_s13, 0  ;;  %p43_p2 = scmp.ne.s32.totalorder %s9196_s19, %s9192_s18 }
  0x4a   : > { %p44_p12 = scmp.eq.s32.totalorder %s9200_s20, 0  ;;  %p13911_p9 = scmp.eq.s32.totalorder %s9323_s21, 1 }
  0x4b   : > { %s9408_s26 = scalar_select %p34_p1, %s9196_s19, %s36_s15  }
  0x4c   : > { %p45_p7 = por %p44_p12, %p43_p2  ;;  %p9412_p13 = por %p13911_p9, %p43_p2 }
  0x4d   : > { %7919 = dma.hbm_to_vmem [thread:$0]  (!%p9351_p11), %s13909_s9, 1024, %s363_s14, [#allocation17], %s9214_s22, %s9214_s22, %s9215_s16  }
  0x4e   : > { %13910 = sst [smem:[#allocation24_spill]] %s9408_s26  ;;  %p7932_p0 = scmp.lt.s32.totalorder %s9200_s20, 2 }
  0x4f   : > { %s13912_s29 = scalar_select %p9412_p13, 1, 0 }
  0x50   : > { %s379_s28 = sand.u32 1, %s9196_s19   ;;  %s7194_s14 = sshll.u32 %s9200_s20, 11 }
  0x51   : > { %s7020_s30 = sshll.u32 %s379_s28, 7  ;;  %s9422_s27 = scalar_lea.hbm %s13670_s0, %s7194_s14 }
  0x52   : > { %s383_s13 = scalar_lea.vmem [#allocation10], %s7020_s30  ;;  %p9426_p11 = pnand %p7932_p0, %p45_p7 }
  0x53   : > { %s391_s15 = sshll.u32 %s383_s13, 4  ;;  %s9430_s5 = scalar_lea.sflag [#allocation11], %s379_s28  ;;  %s9424_s15 = int_to_ptr.vmem [resolvable:$true] %s391_s15 }
  0x54   : > { %s9096_s7 = scalar_lea.hbm %s9422_s27, 2048  ;;  %p9098_p5 = pneg %p9426_p11 }
  0x55   : > { %p9097_p10 = scmp.ne.s32.totalorder %s9422_s27, %s9096_s7  ;;  %s9101_s30 = scalar_lea.hbm %s13670_s0, 4096 }
  0x56   : > { %p9102_p2 = scmp.lt.s32.totalorder %s9422_s27, %s13670_s0  ;;  %p9103_p12 = scmp.lt.s32.totalorder %s9101_s30, %s9096_s7 }
  0x57   : > { %p9099_p3 = pnand %p9098_p5, %p9097_p10 }
  0x58   : > { %p9104_p7 = por %p9103_p12, %p9102_p2 }
  0x59   : > { %p9100_p1 = pneg %p9099_p3 }
  0x5b   : > { %p9105_p9 = pnand %p9104_p7, %p9100_p1 }
  0x5d   : > { %9108 = shalt.err (!%p9105_p9)
}
  0x5e   : > { %s9109_s28 = scalar_lea.vmem %s9424_s15, 2048  ;;  %s9216_s9 = smov [#allocation10]  }
  0x5f   : > { %p9110_p0 = scmp.ne.s32.totalorder %s9424_s15, %s9109_s28  ;;  %s9114_s26 = sshll.u32 %s9216_s9, 4  ;;  %s9115_s26 = int_to_ptr.vmem [resolvable:$false] %s9114_s26 }
  0x60   : > { %s9116_s14 = scalar_lea.vmem %s9115_s26, 4096  ;;  %p9117_p3 = scmp.lt.s32.totalorder %s9424_s15, %s9115_s26 }
  0x61   : > { %p9112_p6 = pnand %p9110_p0, %p9098_p5  ;;  %p9118_p13 = scmp.lt.s32.totalorder %s9116_s14, %s9109_s28 }
  0x63   : > { %p9113_p10 = pneg %p9112_p6  ;;  %p9119_p4 = por %p9118_p13, %p9117_p3 }
  0x65   : > { %p9120_p8 = pnand %p9119_p4, %p9113_p10 }
  0x67   : > { %9123 = shalt.err (!%p9120_p8)
}
  0x68   : > { %s13914_s7 = smov 8   ;;  %s13915_s22 = smov 128  }
  0x69   : > { %7923 = dma.hbm_to_vmem [thread:$0]  (!%p9426_p11), %s9422_s27, 2048, %s9424_s15, %s9430_s5, %s13915_s22, %s13915_s22, %s13914_s7  }
  0x6a   : > { %p13916_p6 = scmp.ne.s32.totalorder %s13902_s25, 0 }
  0x6c   : > { %403 = sbr.rel (%p13916_p6) target bundleno = 2519 (0x9d7), region = 64 }
  0x71   : > { %s9457_s9 = sand.u32 1, %s9192_s18   ;;  %p13917_p4 = scmp.ne.s32.totalorder %s13900_s23, 0 }
  0x72   : > { %s7025_s26 = sshll.u32 %s9457_s9, 7  ;;  %s406_s30 = scalar_lea.sflag [#allocation11], %s9457_s9 }
  0x73   : > { %s9463_s3 = scalar_lea.vmem [#allocation10], %s7025_s26 }
  0x74   : > { %9171 = dma.done.wait (%p13917_p4), %s406_s30, 2048  }
  0x75   : > { %9173 = vsyncadd (%p13917_p4), %s406_s30, 4294965248  ;;  %p13918_p8 = scmp.eq.s32.totalorder %s9323_s21, 0 }
  0x77   : > { %9175 = dma.done.wait (%p13918_p8), [#allocation14], 6144   ;;  %p13919_p13 = pmov %p13918_p8 }
  0x78   : > { %p13920_p11 = pmov %p13918_p8 }
  0x79   : > { %9177 = vsyncadd (%p13919_p13), [#allocation14], 4294961152 }
  0x7a   : > { %9179 = dma.done.wait (%p13920_p11), [#allocation17], 3072   ;;  %p13921_p5 = pmov %p13918_p8 }
  0x7b   : > { %v13690_v0 = vmov 0   ;;  %v9480_v1 = vld [vmem:[#allocation16] sm:$0xff]  ;;  %v9482_v2 = vld [vmem:[#allocation16 + $0x8] sm:$0xff]  ;;  %v9484_v3 = vld [vmem:[#allocation16 + $0x10] sm:$0xff]  ;;  %v509_v57 = vlaneseq  ;;  %s9218_s22 = smov 1   ;;  %s9219_s30 = smov 127  }
  0x7c   : > { %9181 = vsyncadd (%p13921_p5), [#allocation17], 4294964224  ;;  %631 = vmatprep.mubr.bf16.mxu0 %v13690_v0  ;;  %8092 = vset.pattern.permute.xlu0 %v13690_v0  ;;  %13922 = vst [vmem:[#allocation25_spill] sm:$0xff] %v9480_v1  ;;  %v9486_v4 = vld [vmem:[#allocation16 + $0x18] sm:$0xff]  ;;  %v9488_v5 = vld [vmem:[#allocation16 + $0x20] sm:$0xff] }
  0x7d   : > { %8093 = vset.pattern.permute.xlu1 %v13690_v0  ;;  %13923 = vst [vmem:[#allocation26_spill] sm:$0xff] %v9482_v2  ;;  %13924 = vst [vmem:[#allocation27_spill] sm:$0xff] %v9484_v3  ;;  %v9490_v6 = vld [vmem:[#allocation16 + $0x28] sm:$0xff]  ;;  %v9492_v7 = vld [vmem:[#allocation16 + $0x30] sm:$0xff]  ;;  %v9584_v58 = vshrl.u32 %v509_v57, 7 }
  0x7e   : > { %13925 = vst [vmem:[#allocation28_spill] sm:$0xff] %v9486_v4  ;;  %13926 = vst [vmem:[#allocation29_spill] sm:$0xff] %v9488_v5  ;;  %v9494_v8 = vld [vmem:[#allocation16 + $0x38] sm:$0xff]  ;;  %v9496_v9 = vld [vmem:[#allocation16 + $0x40] sm:$0xff] }
  0x7f   : > { %13927 = vst [vmem:[#allocation30_spill] sm:$0xff] %v9490_v6  ;;  %13928 = vst [vmem:[#allocation31_spill] sm:$0xff] %v9492_v7  ;;  %v9498_v10 = vld [vmem:[#allocation16 + $0x48] sm:$0xff]  ;;  %v9500_v11 = vld [vmem:[#allocation16 + $0x50] sm:$0xff]  ;;  %v9587_v59 = vsub.s32 1, %v9584_v58  ;;  %v9590_v60 = vsub.s32 0, %v9584_v58 }
  0x80   : > { %13929 = vst [vmem:[#allocation32_spill] sm:$0xff] %v9494_v8  ;;  %13930 = vst [vmem:[#allocation33_spill] sm:$0xff] %v9496_v9  ;;  %v9502_v12 = vld [vmem:[#allocation16 + $0x58] sm:$0xff]  ;;  %v9504_v13 = vld [vmem:[#allocation16 + $0x60] sm:$0xff] }
  0x81   : > { %13931 = vst [vmem:[#allocation34_spill] sm:$0xff] %v9498_v10  ;;  %13932 = vst [vmem:[#allocation35_spill] sm:$0xff] %v9500_v11  ;;  %v9506_v14 = vld [vmem:[#allocation16 + $0x68] sm:$0xff]  ;;  %v9508_v15 = vld [vmem:[#allocation16 + $0x70] sm:$0xff] }
  0x82   : > { %13933 = vst [vmem:[#allocation36_spill] sm:$0xff] %v9502_v12  ;;  %13934 = vst [vmem:[#allocation37_spill] sm:$0xff] %v9504_v13  ;;  %v9510_v16 = vld [vmem:[#allocation16 + $0x78] sm:$0xff]  ;;  %v8097_v19 = vld [vmem:[%s13671_s1 + $0x64] ss:$8 sps:$4 sm:$0xff]  }
  0x83   : > { %13935 = vst [vmem:[#allocation38_spill] sm:$0xff] %v9506_v14  ;;  %13936 = vst [vmem:[#allocation39_spill] sm:$0xff] %v9508_v15  ;;  %v8094_v17 = vld [vmem:[%s13671_s1 + $0x74] ss:$8 sps:$4 sm:$0xff]   ;;  %v8096_v18 = vld [vmem:[%s13671_s1 + $0x70] ss:$8 sps:$4 sm:$0xff]  }
  0x84   : > { %13937 = vst [vmem:[#allocation40_spill] sm:$0xff] %v9510_v16  ;;  %599 = vmatprep.subr.bf16.mxu0 %v8094_v17  ;;  %v8099_v20 = vld [vmem:[%s13671_s1 + $0x60] ss:$8 sps:$4 sm:$0xff]   ;;  %v8100_v21 = vld [vmem:[%s13671_s1 + $0x54] ss:$8 sps:$4 sm:$0xff]   ;;  %13938 = vst [vmem:[#allocation41_spill] sm:$0xff] %v9584_v58 }
  0x85   : > { %600 = vmatpush1.bf16.msra.mxu0 %v8096_v18  ;;  %v8102_v22 = vld [vmem:[%s13671_s1 + $0x50] ss:$8 sps:$4 sm:$0xff]   ;;  %v8103_v23 = vld [vmem:[%s13671_s1 + $0x44] ss:$8 sps:$4 sm:$0xff]   ;;  %v8105_v24 = vld [vmem:[%s13671_s1 + $0x40] ss:$8 sps:$4 sm:$0xff]  }
  0x86   : > { %601 = vmatprep.subr.bf16.mxu0 %v8097_v19  ;;  %v8106_v25 = vld [vmem:[%s13671_s1 + $0x34] ss:$8 sps:$4 sm:$0xff]   ;;  %v8108_v26 = vld [vmem:[%s13671_s1 + $0x30] ss:$8 sps:$4 sm:$0xff]   ;;  %v8109_v27 = vld [vmem:[%s13671_s1 + $0x24] ss:$8 sps:$4 sm:$0xff]  }
  0x87   : > { %v8111_v28 = vld [vmem:[%s13671_s1 + $0x20] ss:$8 sps:$4 sm:$0xff]   ;;  %v8112_v29 = vld [vmem:[%s13671_s1 + $0x14] ss:$8 sps:$4 sm:$0xff]   ;;  %v8114_v30 = vld [vmem:[%s13671_s1 + $0x10] ss:$8 sps:$4 sm:$0xff]  }
  0x88   : > { %v8115_v31 = vld [vmem:[%s13671_s1 + $0x4] ss:$8 sps:$4 sm:$0xff]   ;;  %v8117_v32 = vld [vmem:[%s13671_s1] ss:$8 sps:$4 sm:$0xff]   ;;  %v469_v36 = vld [vmem:[%s9463_s3 + $0x10] sm:$0xff]  ;;  %13939 = vst [vmem:[#allocation42_spill] sm:$0xff] %v9587_v59 }
  0x89   : > { %602 = vmatpush1.bf16.msra.mxu0 %v8099_v20  ;;  %v467_v33 = vld [vmem:[%s9463_s3] sm:$0xff]  ;;  %v468_v34 = vld [vmem:[%s9463_s3 + $0x8] sm:$0xff]  ;;  %v470_v37 = vld [vmem:[%s9463_s3 + $0x18] sm:$0xff]  ;;  %13940 = vst [vmem:[#allocation43_spill] sm:$0xff] %v9590_v60 }
  0x8a   : > { %603 = vmatprep.subr.bf16.mxu0 %v8100_v21  ;;  %v483_v35 = vpack.c.bf16 %v468_v34, %v467_v33  ;;  %v484_v38 = vpack.c.bf16 %v470_v37, %v469_v36  ;;  %v471_v39 = vld [vmem:[%s9463_s3 + $0x20] sm:$0xff]  ;;  %v472_v40 = vld [vmem:[%s9463_s3 + $0x28] sm:$0xff]  ;;  %v473_v42 = vld [vmem:[%s9463_s3 + $0x30] sm:$0xff] }
  0x8b   : > { %v485_v41 = vpack.c.bf16 %v472_v40, %v471_v39  ;;  %v474_v43 = vld [vmem:[%s9463_s3 + $0x38] sm:$0xff]  ;;  %v475_v45 = vld [vmem:[%s9463_s3 + $0x40] sm:$0xff]  ;;  %v476_v46 = vld [vmem:[%s9463_s3 + $0x48] sm:$0xff] }
  0x8c   : > { %v486_v44 = vpack.c.bf16 %v474_v43, %v473_v42  ;;  %v487_v47 = vpack.c.bf16 %v476_v46, %v475_v45  ;;  %v477_v48 = vld [vmem:[%s9463_s3 + $0x50] sm:$0xff]  ;;  %v478_v49 = vld [vmem:[%s9463_s3 + $0x58] sm:$0xff]  ;;  %v479_v51 = vld [vmem:[%s9463_s3 + $0x60] sm:$0xff] }
  0x8d   : > { %604 = vmatpush1.bf16.msra.mxu0 %v8102_v22  ;;  %v488_v50 = vpack.c.bf16 %v478_v49, %v477_v48  ;;  %v480_v52 = vld [vmem:[%s9463_s3 + $0x68] sm:$0xff]  ;;  %v481_v54 = vld [vmem:[%s9463_s3 + $0x70] sm:$0xff]  ;;  %v482_v55 = vld [vmem:[%s9463_s3 + $0x78] sm:$0xff] }
  0x8e   : > { %605 = vmatprep.subr.bf16.mxu0 %v8103_v23  ;;  %v489_v53 = vpack.c.bf16 %v480_v52, %v479_v51  ;;  %v490_v56 = vpack.c.bf16 %v482_v55, %v481_v54  ;;  %v507_v61 = vld [vmem:[%s13672_s2] sm:$0x3] }
  0x8f   : > { %v9596_v62 = vrot.slane %v507_v61, %v9587_v59  ;;  %v9599_v17 = vrot.slane %v507_v61, %v9590_v60 }
  0x91   : > { %606 = vmatpush1.bf16.msra.mxu0 %v8105_v24 }
  0x92   : > { %607 = vmatprep.subr.bf16.mxu0 %v8106_v25 }
  0x95   : > { %608 = vmatpush1.bf16.msra.mxu0 %v8108_v26 }
  0x96   : > { %609 = vmatprep.subr.bf16.mxu0 %v8109_v27 }
  0x99   : > { %610 = vmatpush1.bf16.msra.mxu0 %v8111_v28 }
  0x9a   : > { %611 = vmatprep.subr.bf16.mxu0 %v8112_v29 }
  0x9d   : > { %612 = vmatpush1.bf16.msra.mxu0 %v8114_v30 }
  0x9e   : > { %613 = vmatprep.subr.bf16.mxu0 %v8115_v31 }
  0xa1   : > { %614 = vmatpush1.bf16.msra.mxu0 %v8117_v32 }
  0xa4   : > { %632 = vmatmul.mubr.bf16.vlgmr.msra.gmra.mxu0 %v483_v35 }
  0xa5   : > { %641 = vmatprep.mubr.bf16.mxu0 %v13690_v0 }
  0xac   : > { %642 = vmatmul.mubr.bf16.gmra.mxu0 %v484_v38 }
  0xad   : > { %651 = vmatprep.mubr.bf16.mxu0 %v13690_v0 }
  0xb4   : > { %652 = vmatmul.mubr.bf16.gmra.mxu0 %v485_v41 }
  0xb5   : > { %661 = vmatprep.mubr.bf16.mxu0 %v13690_v0 }
  0xbc   : > { %662 = vmatmul.mubr.bf16.gmra.mxu0 %v486_v44 }
  0xbd   : > { %671 = vmatprep.mubr.bf16.mxu0 %v13690_v0 }
  0xc4   : > { %672 = vmatmul.mubr.bf16.gmra.mxu0 %v487_v47 }
  0xc5   : > { %681 = vmatprep.mubr.bf16.mxu0 %v13690_v0 }
  0xcc   : > { %682 = vmatmul.mubr.bf16.gmra.mxu0 %v488_v50 }
  0xcd   : > { %691 = vmatprep.mubr.bf16.mxu0 %v13690_v0 }
  0xd4   : > { %692 = vmatmul.mubr.bf16.gmra.mxu0 %v489_v53 }
  0xd5   : > { %701 = vmatprep.mubr.bf16.mxu0 %v13690_v0 }
  0xdc   : > { %702 = vmatmul.mubr.bf16.gmra.mxu0 %v490_v56 }
 0x164   : > { %v633_v63 = vpop.f32.mrf.mxu0 }
 0x165   : > { %v9605_v21 = vadd.f32 %v633_v63, %v9599_v17 }
 0x166   : > { %v635_v18 = vpop.f32.mrf.mxu0 }
 0x167   : > { %v9602_v19 = vadd.f32 %v635_v18, %v9596_v62 }
 0x168   : > { %v637_v20 = vpop.f32.mrf.mxu0 }
 0x169   : > { %v712_v22 = vsub.f32 0.0, %v9602_v19  ;;  %v9609_v23 = vadd.f32 %v637_v20, %v9599_v17 }
 0x16a   : > { %v639_v24 = vpop.f32.mrf.mxu0 }
 0x16b   : > { %v728_v25 = vmul.f32 1.442695, %v712_v22  ;;  %v9612_v26 = vadd.f32 %v639_v24, %v9596_v62  ;;  %v9616_v27 = vpack.i.bf16 %v9609_v23, %v9605_v21 }
 0x16c   : > { %v643_v28 = vpop.f32.mrf.mxu0 }
 0x16d   : > { %8182 = vpow2.f32 %v728_v25  ;;  %v713_v30 = vsub.f32 0.0, %v9612_v26  ;;  %v9625_v35 = vadd.f32 %v643_v28, %v9599_v17 }
 0x16e   : > { %v645_v31 = vpop.f32.mrf.mxu0 }
 0x16f   : > { %v730_v32 = vmul.f32 1.442695, %v713_v30  ;;  %v9622_v33 = vadd.f32 %v645_v31, %v9596_v62 }
 0x170   : > { %v647_v34 = vpop.f32.mrf.mxu0 }
 0x171   : > { %8184 = vpow2.f32 %v730_v32  ;;  %v714_v36 = vsub.f32 0.0, %v9622_v33  ;;  %v9629_v37 = vadd.f32 %v647_v34, %v9599_v17 }
 0x172   : > { %v649_v38 = vpop.f32.mrf.mxu0 }
 0x173   : > { %v732_v39 = vmul.f32 1.442695, %v714_v36  ;;  %v9632_v40 = vadd.f32 %v649_v38, %v9596_v62  ;;  %v9636_v41 = vpack.i.bf16 %v9629_v37, %v9625_v35 }
 0x174   : > { %v653_v42 = vpop.f32.mrf.mxu0 }
 0x175   : > { %8186 = vpow2.f32 %v732_v39  ;;  %v715_v44 = vsub.f32 0.0, %v9632_v40  ;;  %v9649_v52 = vadd.f32 %v653_v42, %v9599_v17 }
 0x176   : > { %v655_v45 = vpop.f32.mrf.mxu0 }
 0x177   : > { %v734_v46 = vmul.f32 1.442695, %v715_v44  ;;  %v9642_v47 = vadd.f32 %v655_v45, %v9596_v62 }
 0x178   : > { %v657_v48 = vpop.f32.mrf.mxu0 }
 0x179   : > { %8188 = vpow2.f32 %v734_v46  ;;  %v716_v49 = vsub.f32 0.0, %v9642_v47  ;;  %v9646_v50 = vadd.f32 %v657_v48, %v9599_v17 }
 0x17a   : > { %v8183_v51 = vpop.eup %8182  ;;  %v659_v53 = vpop.f32.mrf.mxu0 }
 0x17b   : > { %v760_v54 = vadd.f32 1.0, %v8183_v51  ;;  %v736_v55 = vmul.f32 1.442695, %v716_v49  ;;  %v9652_v56 = vadd.f32 %v659_v53, %v9596_v62 }
 0x17c   : > { %v663_v61 = vpop.f32.mrf.mxu0 }
 0x17d   : > { %8190 = vrcp.f32 %v760_v54  ;;  %v717_v18 = vsub.f32 0.0, %v9652_v56  ;;  %v9665_v36 = vadd.f32 %v663_v61, %v9599_v17 }
 0x17e   : > { %v8185_v20 = vpop.eup %8184  ;;  %8192 = vpow2.f32 %v736_v55  ;;  %v665_v22 = vpop.f32.mrf.mxu0 }
 0x17f   : > { %v761_v24 = vadd.f32 1.0, %v8185_v20  ;;  %v738_v25 = vmul.f32 1.442695, %v717_v18  ;;  %v9658_v28 = vadd.f32 %v665_v22, %v9596_v62 }
 0x180   : > { %v667_v30 = vpop.f32.mrf.mxu0 }
 0x181   : > { %8194 = vrcp.f32 %v761_v24  ;;  %v718_v31 = vsub.f32 0.0, %v9658_v28  ;;  %v9662_v32 = vadd.f32 %v667_v30, %v9599_v17 }
 0x182   : > { %v8187_v34 = vpop.eup %8186  ;;  %8196 = vpow2.f32 %v738_v25  ;;  %v669_v38 = vpop.f32.mrf.mxu0 }
 0x183   : > { %v762_v39 = vadd.f32 1.0, %v8187_v34  ;;  %v740_v42 = vmul.f32 1.442695, %v718_v31  ;;  %v9668_v44 = vadd.f32 %v669_v38, %v9596_v62 }
 0x184   : > { %v673_v45 = vpop.f32.mrf.mxu0 }
 0x185   : > { %8198 = vrcp.f32 %v762_v39  ;;  %v719_v48 = vsub.f32 0.0, %v9668_v44  ;;  %v9681_v24 = vadd.f32 %v673_v45, %v9599_v17 }
 0x186   : > { %v8189_v49 = vpop.eup %8188  ;;  %8200 = vpow2.f32 %v740_v42  ;;  %v675_v51 = vpop.f32.mrf.mxu0 }
 0x187   : > { %v763_v53 = vadd.f32 1.0, %v8189_v49  ;;  %v742_v54 = vmul.f32 1.442695, %v719_v48  ;;  %v9674_v55 = vadd.f32 %v675_v51, %v9596_v62 }
 0x188   : > { %v677_v61 = vpop.f32.mrf.mxu0 }
 0x189   : > { %8202 = vrcp.f32 %v763_v53  ;;  %v720_v18 = vsub.f32 0.0, %v9674_v55  ;;  %v9678_v20 = vadd.f32 %v677_v61, %v9599_v17 }
 0x18a   : > { %v8191_v22 = vpop.eup %8190  ;;  %8204 = vpow2.f32 %v742_v54  ;;  %v679_v25 = vpop.f32.mrf.mxu0 }
 0x18b   : > { %v8193_v30 = vpop.eup %8192  ;;  %v808_v31 = vmul.f32 %v8191_v22, %v9602_v19  ;;  %v744_v34 = vmul.f32 1.442695, %v720_v18  ;;  %v9685_v38 = vadd.f32 %v679_v25, %v9596_v62 }
 0x18c   : > { %v764_v39 = vadd.f32 1.0, %v8193_v30  ;;  %v683_v42 = vpop.f32.mrf.mxu0 }
 0x18d   : > { %824 = vst [vmem:[#allocation5 + $0x28] sm:$0xff] %v808_v31  ;;  %8206 = vpow2.f32 %v744_v34  ;;  %v721_v49 = vsub.f32 0.0, %v9685_v38  ;;  %v9699_v34 = vadd.f32 %v683_v42, %v9599_v17 }
 0x18e   : > { %v8195_v51 = vpop.eup %8194  ;;  %8208 = vrcp.f32 %v764_v39  ;;  %v685_v45 = vpop.f32.mrf.mxu0 }
 0x18f   : > { %v8197_v53 = vpop.eup %8196  ;;  %v809_v54 = vmul.f32 %v8195_v51, %v9612_v26  ;;  %v746_v19 = vmul.f32 1.442695, %v721_v49  ;;  %v9692_v61 = vadd.f32 %v685_v45, %v9596_v62 }
 0x190   : > { %v765_v18 = vadd.f32 1.0, %v8197_v53  ;;  %v687_v22 = vpop.f32.mrf.mxu0 }
 0x191   : > { %825 = vst [vmem:[#allocation5 + $0x68] sm:$0xff] %v809_v54  ;;  %8210 = vpow2.f32 %v746_v19  ;;  %v722_v25 = vsub.f32 0.0, %v9692_v61  ;;  %v9696_v30 = vadd.f32 %v687_v22, %v9599_v17 }
 0x192   : > { %v8199_v31 = vpop.eup %8198  ;;  %8212 = vrcp.f32 %v765_v18  ;;  %v689_v39 = vpop.f32.mrf.mxu0 }
 0x193   : > { %v8201_v26 = vpop.eup %8200  ;;  %v810_v49 = vmul.f32 %v8199_v31, %v9622_v33  ;;  %v748_v51 = vmul.f32 1.442695, %v722_v25  ;;  %v9703_v45 = vadd.f32 %v689_v39, %v9596_v62 }
 0x194   : > { %v766_v53 = vadd.f32 1.0, %v8201_v26  ;;  %v693_v54 = vpop.f32.mrf.mxu0 }
 0x195   : > { %826 = vst [vmem:[#allocation5 + $0x10] sm:$0xff] %v810_v49  ;;  %8214 = vpow2.f32 %v748_v51  ;;  %v723_v18 = vsub.f32 0.0, %v9703_v45  ;;  %v9713_v26 = vadd.f32 %v693_v54, %v9599_v17 }
 0x196   : > { %v8203_v22 = vpop.eup %8202  ;;  %8216 = vrcp.f32 %v766_v53  ;;  %v695_v42 = vpop.f32.mrf.mxu0 }
 0x197   : > { %v8205_v0 = vpop.eup %8204  ;;  %v811_v29 = vmul.f32 %v8203_v22, %v9632_v40  ;;  %v750_v33 = vmul.f32 1.442695, %v723_v18  ;;  %v9710_v25 = vadd.f32 %v695_v42, %v9596_v62 }
 0x198   : > { %v767_v31 = vadd.f32 1.0, %v8205_v0  ;;  %v697_v39 = vpop.f32.mrf.mxu0 }
 0x199   : > { %827 = vst [vmem:[#allocation5 + $0x40] sm:$0xff] %v811_v29  ;;  %8218 = vpow2.f32 %v750_v33  ;;  %v724_v49 = vsub.f32 0.0, %v9710_v25  ;;  %v9717_v51 = vadd.f32 %v697_v39, %v9599_v17 }
 0x19a   : > { %v8207_v53 = vpop.eup %8206  ;;  %8220 = vrcp.f32 %v767_v31  ;;  %v699_v43 = vpop.f32.mrf.mxu0 }
 0x19b   : > { %v8209_v40 = vpop.eup %8208  ;;  %v768_v18 = vadd.f32 1.0, %v8207_v53  ;;  %v752_v22 = vmul.f32 1.442695, %v724_v49  ;;  %v9720_v42 = vadd.f32 %v699_v43, %v9596_v62  ;;  %v8022_v0 = vpack.i.bf16 %v9717_v51, %v9713_v26 }
 0x19c   : > { %v812_v29 = vmul.f32 %v8209_v40, %v9642_v47  ;;  %v703_v54 = vpop.f32.mrf.mxu0  ;;  %v954_v33 = vpack.c.bf16 %v9717_v51, %v9713_v26 }
 0x19d   : > { %8222 = vrcp.f32 %v768_v18  ;;  %v725_v39 = vsub.f32 0.0, %v9720_v42  ;;  %8023 = vrot.lane.b32.xlu1 %v8022_v0, %s9218_s22  ;;  %v704_v18 = vadd.f32 %v703_v54, %v9599_v17 }
 0x19e   : > { %v8211_v31 = vpop.eup %8210  ;;  %828 = vst [vmem:[#allocation5 + $0x48] sm:$0xff] %v812_v29  ;;  %8224 = vpow2.f32 %v752_v22  ;;  %v705_v43 = vpop.f32.mrf.mxu0 }
 0x19f   : > { %v8213_v49 = vpop.eup %8212  ;;  %v769_v53 = vadd.f32 1.0, %v8211_v31  ;;  %v754_v63 = vmul.f32 1.442695, %v725_v39  ;;  %v9730_v46 = vadd.f32 %v705_v43, %v9596_v62  ;;  %v8037_v39 = vpack.i.bf16 %v9696_v30, %v9699_v34 }
 0x1a0   : > { %v813_v47 = vmul.f32 %v8213_v49, %v9652_v56  ;;  %v707_v40 = vpop.f32.mrf.mxu0 }
 0x1a1   : > { %8226 = vrcp.f32 %v769_v53  ;;  %v726_v48 = vsub.f32 0.0, %v9730_v46  ;;  %v708_v19 = vadd.f32 %v707_v40, %v9599_v17  ;;  %8028 = vrot.lane.b32.xlu1 %v8022_v0, %s9219_s30 }
 0x1a2   : > { %v8215_v22 = vpop.eup %8214  ;;  %829 = vst [vmem:[#allocation5 + $0x30] sm:$0xff] %v813_v47  ;;  %8228 = vpow2.f32 %v754_v63  ;;  %v709_v29 = vpop.f32.mrf.mxu0 }
 0x1a3   : > { %v8217_v31 = vpop.eup %8216  ;;  %v770_v56 = vadd.f32 1.0, %v8215_v22  ;;  %v756_v43 = vmul.f32 1.442695, %v726_v48  ;;  %v9740_v49 = vadd.f32 %v709_v29, %v9596_v62  ;;  %v8012_v54 = vpack.i.bf16 %v708_v19, %v704_v18 }
 0x1a4   : > { %v814_v53 = vmul.f32 %v8217_v31, %v9658_v28  ;;  %v955_v17 = vpack.c.bf16 %v708_v19, %v704_v18  ;;  %v8047_v62 = vpack.i.bf16 %v9678_v20, %v9681_v24  ;;  %v8057_v29 = vpack.i.bf16 %v9662_v32, %v9665_v36 }
 0x1a5   : > { %8230 = vrcp.f32 %v770_v56  ;;  %v727_v0 = vsub.f32 0.0, %v9740_v49  ;;  %8013 = vrot.lane.b32.xlu0 %v8012_v54, %s9218_s22  ;;  %8038 = vrot.lane.b32.xlu1 %v8037_v39, %s9219_s30 }
 0x1a6   : > { %v8219_v63 = vpop.eup %8218  ;;  %830 = vst [vmem:[#allocation5 + $0x70] sm:$0xff] %v814_v53  ;;  %8232 = vpow2.f32 %v756_v43  ;;  %7199 = vmatprep.subr.bf16.mxu1 %v955_v17 }
 0x1a7   : > { %v8221_v47 = vpop.eup %8220  ;;  %v771_v48 = vadd.f32 1.0, %v8219_v63  ;;  %v758_v40 = vmul.f32 1.442695, %v727_v0 }
 0x1a8   : > { %v815_v28 = vmul.f32 %v8221_v47, %v9668_v44 }
 0x1a9   : > { %8234 = vrcp.f32 %v771_v48  ;;  %8018 = vrot.lane.b32.xlu0 %v8012_v54, %s9219_s30  ;;  %8048 = vrot.lane.b32.xlu1 %v8047_v62, %s9219_s30  ;;  %v8067_v54 = vpack.i.bf16 %v9646_v50, %v9649_v52 }
 0x1aa   : > { %v8223_v19 = vpop.eup %8222  ;;  %831 = vst [vmem:[#allocation5 + $0x38] sm:$0xff] %v815_v28  ;;  %8236 = vpow2.f32 %v758_v40  ;;  %v8121_v28 = vld [vmem:[#allocation13 + $0x8] ss:$12 sps:$4 sm:$0xff]  }
 0x1ab   : > { %v8225_v18 = vpop.eup %8224  ;;  %v816_v22 = vmul.f32 %v8223_v19, %v9674_v55  ;;  %7471 = vmatprep.mubr.bf16.mxu0 %v8121_v28 }
 0x1ac   : > { %v772_v31 = vadd.f32 1.0, %v8225_v18 }
 0x1ad   : > { %832 = vst [vmem:[#allocation5 + $0x20] sm:$0xff] %v816_v22  ;;  %8033 = vrot.lane.b32.xlu0 %v8037_v39, %s9218_s22  ;;  %8058 = vrot.lane.b32.xlu1 %v8057_v29, %s9219_s30 }
 0x1ae   : > { %v8227_v44 = vpop.eup %8226  ;;  %8238 = vrcp.f32 %v772_v31  ;;  %v1001_v31 = vld [vmem:[%s13674_s4 + $0x28] sm:$0xff] }
 0x1af   : > { %v8229_v56 = vpop.eup %8228  ;;  %v817_v43 = vmul.f32 %v8227_v44, %v9685_v38  ;;  %v1002_v44 = vld [vmem:[%s13674_s4 + $0x30] sm:$0xff] }
 0x1b0   : > { %v773_v53 = vadd.f32 1.0, %v8229_v56  ;;  %v1003_v56 = vld [vmem:[%s13674_s4 + $0x38] sm:$0xff] }
 0x1b1   : > { %833 = vst [vmem:[#allocation5 + $0x78] sm:$0xff] %v817_v43  ;;  %8043 = vrot.lane.b32.xlu0 %v8047_v62, %s9218_s22  ;;  %8068 = vrot.lane.b32.xlu1 %v8067_v54, %s9219_s30  ;;  %v1004_v43 = vld [vmem:[%s13674_s4 + $0x40] sm:$0xff] }
 0x1b2   : > { %v8231_v55 = vpop.eup %8230  ;;  %8240 = vrcp.f32 %v773_v53  ;;  %v1006_v53 = vld [vmem:[%s13674_s4 + $0x50] sm:$0xff] }
 0x1b3   : > { %v8233_v17 = vpop.eup %8232  ;;  %v818_v39 = vmul.f32 %v8231_v55, %v9692_v61  ;;  %v8120_v61 = vld [vmem:[#allocation13 + $0x4] ss:$12 sps:$4 sm:$0xff]   ;;  %v1007_v55 = vld [vmem:[%s13674_s4 + $0x58] sm:$0xff] }
 0x1b4   : > { %v774_v0 = vadd.f32 1.0, %v8233_v17  ;;  %1252 = vmatprep.mubr.bf16.mxu1 %v8120_v61  ;;  %v1008_v17 = vld [vmem:[%s13674_s4 + $0x60] sm:$0xff] }
 0x1b5   : > { %834 = vst [vmem:[#allocation5 + $0x18] sm:$0xff] %v818_v39  ;;  %8053 = vrot.lane.b32.xlu0 %v8057_v29, %s9218_s22  ;;  %8078 = vrot.lane.b32.xlu1 %v9636_v41, %s9219_s30  ;;  %v1009_v39 = vld [vmem:[%s13674_s4 + $0x68] sm:$0xff] }
 0x1b6   : > { %v8235_v38 = vpop.eup %8234  ;;  %8242 = vrcp.f32 %v774_v0  ;;  %v1010_v0 = vld [vmem:[%s13674_s4 + $0x70] sm:$0xff] }
 0x1b7   : > { %v8237_v63 = vpop.eup %8236  ;;  %v819_v47 = vmul.f32 %v8235_v38, %v9703_v45  ;;  %v1011_v38 = vld [vmem:[%s13674_s4 + $0x78] sm:$0xff] }
 0x1b8   : > { %v775_v48 = vadd.f32 1.0, %v8237_v63 }
 0x1b9   : > { %835 = vst [vmem:[#allocation5 + $0x58] sm:$0xff] %v819_v47  ;;  %8063 = vrot.lane.b32.xlu0 %v8067_v54, %s9218_s22  ;;  %8088 = vrot.lane.b32.xlu1 %v9616_v27, %s9219_s30  ;;  %v1005_v54 = vld [vmem:[%s13674_s4 + $0x48] sm:$0xff]  ;;  %v841_v47 = vand.u32 127, %v509_v57  ;;  %s10231_s30 = smov 0  }
 0x1ba   : > { %8244 = vrcp.f32 %v775_v48 }
 0x1bb   : > { %v8239_v40 = vpop.eup %8238  ;;  %vm7197_vm0 = vcmp.ne.s32.totalorder %v841_v47, 0  ;;  %vm7198_vm2 = vcmp.ne.s32.totalorder %v841_v47, 127 }
 0x1bc   : > { %v820_v62 = vmul.f32 %v8239_v40, %v9710_v25  ;;  %vm9826_vm1 = vmpackc.low %vm7197_vm0, %vm7197_vm0 }
 0x1bd   : > { %8073 = vrot.lane.b32.xlu0 %v9636_v41, %s9218_s22  ;;  %v996_v41 = vld [vmem:[%s13674_s4] sm:$0xff]  ;;  %vm9832_vm3 = vmpackc.low %vm7198_vm2, %vm7198_vm2 }
 0x1be   : > { %836 = vst [vmem:[#allocation5] sm:$0xff] %v820_v62 }
 0x1bf   : > { %v8241_v19 = vpop.eup %8240 }
 0x1c0   : > { %v821_v45 = vmul.f32 %v8241_v19, %v9720_v42  ;;  %v997_v42 = vld [vmem:[%s13674_s4 + $0x8] sm:$0xff]  ;;  %v8130_v19 = vld [vmem:[#allocation13 + $0x50] ss:$12 sps:$4 sm:$0xff]  }
 0x1c1   : > { %8083 = vrot.lane.b32.xlu0 %v9616_v27, %s9218_s22  ;;  %1019 = vperm.xlu1 %8093, %v997_v42   ;;  %v998_v27 = vld [vmem:[%s13674_s4 + $0x10] sm:$0xff]  ;;  %s10229_s22 = scalar_lea.vmem [#allocation19], %s7025_s26 }
 0x1c2   : > { %837 = vst [vmem:[#allocation5 + $0x8] sm:$0xff] %v821_v45 }
 0x1c3   : > { %v8243_v18 = vpop.eup %8242 }
 0x1c4   : > { %v822_v22 = vmul.f32 %v8243_v18, %v9730_v46  ;;  %v999_v46 = vld [vmem:[%s13674_s4 + $0x18] sm:$0xff] }
 0x1c5   : > { %1014 = vperm.xlu0 %8092, %v996_v41   ;;  %1024 = vperm.xlu1 %8093, %v998_v27  }
 0x1c6   : > { %838 = vst [vmem:[#allocation5 + $0x60] sm:$0xff] %v822_v22 }
 0x1c7   : > { %v8245_v29 = vpop.eup %8244 }
 0x1c8   : > { %v823_v25 = vmul.f32 %v8245_v29, %v9740_v49  ;;  %v1000_v49 = vld [vmem:[%s13674_s4 + $0x20] sm:$0xff] }
 0x1c9   : > { %1029 = vperm.xlu0 %8092, %v999_v46   ;;  %1034 = vperm.xlu1 %8093, %v1000_v49   ;;  %v8134_v46 = vld [vmem:[#allocation13 + $0x64] ss:$12 sps:$4 sm:$0xff]  }
 0x1ca   : > { %839 = vst [vmem:[#allocation5 + $0x50] sm:$0xff] %v823_v25 }
 0x1cd   : > { %1039 = vperm.xlu0 %8092, %v1001_v31   ;;  %1044 = vperm.xlu1 %8093, %v1002_v44  }
 0x1d1   : > { %1049 = vperm.xlu0 %8092, %v1003_v56   ;;  %1054 = vperm.xlu1 %8093, %v1004_v43  }
 0x1d5   : > { %1059 = vperm.xlu0 %8092, %v1005_v54   ;;  %1064 = vperm.xlu1 %8093, %v1006_v53  }
 0x1d9   : > { %1069 = vperm.xlu0 %8092, %v1007_v55   ;;  %1074 = vperm.xlu1 %8093, %v1008_v17  }
 0x1dd   : > { %1079 = vperm.xlu0 %8092, %v1009_v39   ;;  %1084 = vperm.xlu1 %8093, %v1010_v0   ;;  %v13945_v39 = vpack.c.bf16 %v9696_v30, %v9699_v34  ;;  %v13946_v30 = vpack.c.bf16 %v9678_v20, %v9681_v24  ;;  %v13947_v20 = vpack.c.bf16 %v9662_v32, %v9665_v36 }
 0x1de   : > { %v13948_v32 = vpack.c.bf16 %v9646_v50, %v9649_v52  ;;  %v13949_v50 = vpack.c.bf16 %v9629_v37, %v9625_v35  ;;  %v13950_v35 = vpack.c.bf16 %v9609_v23, %v9605_v21  ;;  %v8122_v21 = vld [vmem:[#allocation13 + $0x20] ss:$12 sps:$4 sm:$0xff]   ;;  %v8129_v23 = vld [vmem:[#allocation13 + $0x38] ss:$12 sps:$4 sm:$0xff]  }
 0x1e1   : > { %1089 = vperm.xlu0 %8092, %v1011_v38  }
 0x20f   : > { %v8024_v63 = vpop.permute.xlu1 %8023 }
 0x210   : > { %v8026_v45 = vunpack.i.h.bf16 %v8024_v63  ;;  %v8025_v18 = vunpack.i.l.bf16 %v8024_v63 }
 0x212   : > { %v7079_v49 = vpack.c.bf16 %v8026_v45, %v8025_v18 }
 0x213   : > { %v8029_v48 = vpop.permute.xlu1 %8028 }
 0x214   : > { %v8031_v41 = vunpack.i.h.bf16 %v8029_v48  ;;  %v8030_v42 = vunpack.i.l.bf16 %v8029_v48 }
 0x216   : > { %v7119_v53 = vpack.c.bf16 %v8031_v41, %v8030_v42 }
 0x217   : > { %v8014_v61 = vpop.permute.xlu0 %8013  ;;  %v8039_v40 = vpop.permute.xlu1 %8038 }
 0x218   : > { %v8016_v62 = vunpack.i.h.bf16 %v8014_v61  ;;  %v8015_v28 = vunpack.i.l.bf16 %v8014_v61  ;;  %v8041_v44 = vunpack.i.h.bf16 %v8039_v40  ;;  %v8040_v56 = vunpack.i.l.bf16 %v8039_v40 }
 0x21a   : > { %v7074_v22 = vpack.c.bf16 %v8016_v62, %v8015_v28  ;;  %v7124_v51 = vpack.c.bf16 %v8041_v44, %v8040_v56 }
 0x21b   : > { %v8019_v29 = vpop.permute.xlu0 %8018  ;;  %v8049_v25 = vpop.permute.xlu1 %8048 }
 0x21c   : > { %v8021_v27 = vunpack.i.h.bf16 %v8019_v29  ;;  %v8020_v57 = vunpack.i.l.bf16 %v8019_v29  ;;  %7200 = vmatpush3.bf16.msk.msra.mxu1 %vm9826_vm1, %v7074_v22  ;;  %v8051_v0 = vunpack.i.h.bf16 %v8049_v25  ;;  %v8050_v38 = vunpack.i.l.bf16 %v8049_v25 }
 0x21d   : > { %7201 = vmatprep.subr.bf16.mxu1 %v954_v33 }
 0x21e   : > { %v7114_v31 = vpack.c.bf16 %v8021_v27, %v8020_v57  ;;  %v7129_v28 = vpack.c.bf16 %v8051_v0, %v8050_v38  ;;  %v8118_v0 = vld [vmem:[#allocation13] ss:$12 sps:$4 sm:$0xff]  }
 0x21f   : > { %v8034_v43 = vpop.permute.xlu0 %8033  ;;  %v8059_v54 = vpop.permute.xlu1 %8058 }
 0x220   : > { %v8036_v55 = vunpack.i.h.bf16 %v8034_v43  ;;  %v8035_v17 = vunpack.i.l.bf16 %v8034_v43  ;;  %7202 = vmatpush3.bf16.msk.msra.mxu1 %vm9826_vm1, %v7079_v49  ;;  %7455 = vmatprep.subr.msk.bf16.mxu0 %vm9832_vm3, %v7114_v31  ;;  %v8061_v61 = vunpack.i.h.bf16 %v8059_v54  ;;  %v8060_v40 = vunpack.i.l.bf16 %v8059_v54 }
 0x221   : > { %7203 = vmatprep.subr.bf16.mxu1 %v13945_v39  ;;  %7456 = vmatpush3.bf16.msk.msra.mxu0 %vm9832_vm3, %v7114_v31 }
 0x222   : > { %v7084_v26 = vpack.c.bf16 %v8036_v55, %v8035_v17  ;;  %7457 = vmatprep.subr.msk.bf16.mxu0 %vm9832_vm3, %v7119_v53  ;;  %v7134_v22 = vpack.c.bf16 %v8061_v61, %v8060_v40  ;;  %v8131_v61 = vld [vmem:[#allocation13 + $0x4c] ss:$12 sps:$4 sm:$0xff]  }
 0x223   : > { %v8044_v33 = vpop.permute.xlu0 %8043  ;;  %v8069_v48 = vpop.permute.xlu1 %8068  ;;  %v8138_v40 = vld [vmem:[#allocation13 + $0x80] ss:$12 sps:$4 sm:$0xff]  }
 0x224   : > { %v8046_v63 = vunpack.i.h.bf16 %v8044_v33  ;;  %v8045_v47 = vunpack.i.l.bf16 %v8044_v33  ;;  %7204 = vmatpush3.bf16.msk.msra.mxu1 %vm9826_vm1, %v7084_v26  ;;  %v8071_v41 = vunpack.i.h.bf16 %v8069_v48  ;;  %v8070_v42 = vunpack.i.l.bf16 %v8069_v48  ;;  %v8126_v48 = vld [vmem:[#allocation13 + $0x34] ss:$12 sps:$4 sm:$0xff]  }
 0x225   : > { %7205 = vmatprep.subr.bf16.mxu1 %v13946_v30  ;;  %7458 = vmatpush3.bf16.msk.msra.mxu0 %vm9832_vm3, %v7119_v53  ;;  %v8137_v30 = vld [vmem:[#allocation13 + $0x68] ss:$12 sps:$4 sm:$0xff]  }
 0x226   : > { %v7089_v34 = vpack.c.bf16 %v8046_v63, %v8045_v47  ;;  %7459 = vmatprep.subr.msk.bf16.mxu0 %vm9832_vm3, %v7124_v51  ;;  %v7139_v56 = vpack.c.bf16 %v8071_v41, %v8070_v42  ;;  %v8123_v63 = vld [vmem:[#allocation13 + $0x1c] ss:$12 sps:$4 sm:$0xff]   ;;  %v8125_v47 = vld [vmem:[#allocation13 + $0x18] ss:$12 sps:$4 sm:$0xff]   ;;  %v13951_v42 = vmov 0  }
 0x227   : > { %v8054_v62 = vpop.permute.xlu0 %8053  ;;  %v8079_v29 = vpop.permute.xlu1 %8078  ;;  %v8149_v41 = vld [vmem:[#allocation13 + $0xa8] ss:$12 sps:$4 sm:$0xff]  }
 0x228   : > { %v8056_v45 = vunpack.i.h.bf16 %v8054_v62  ;;  %v8055_v18 = vunpack.i.l.bf16 %v8054_v62  ;;  %7206 = vmatpush3.bf16.msk.msra.mxu1 %vm9826_vm1, %v7089_v34  ;;  %v8081_v49 = vunpack.i.h.bf16 %v8079_v29  ;;  %v8080_v31 = vunpack.i.l.bf16 %v8079_v29  ;;  %v8128_v34 = vld [vmem:[#allocation13 + $0x30] ss:$12 sps:$4 sm:$0xff]   ;;  %v8145_v62 = vld [vmem:[#allocation13 + $0x98] ss:$12 sps:$4 sm:$0xff]  }
 0x229   : > { %7207 = vmatprep.subr.bf16.mxu1 %v13947_v20  ;;  %7460 = vmatpush3.bf16.msk.msra.mxu0 %vm9832_vm3, %v7124_v51  ;;  %v8139_v20 = vld [vmem:[#allocation13 + $0x7c] ss:$12 sps:$4 sm:$0xff]  }
 0x22a   : > { %v7094_v24 = vpack.c.bf16 %v8056_v45, %v8055_v18  ;;  %7461 = vmatprep.subr.msk.bf16.mxu0 %vm9832_vm3, %v7129_v28  ;;  %v7144_v55 = vpack.c.bf16 %v8081_v49, %v8080_v31  ;;  %v8146_v45 = vld [vmem:[#allocation13 + $0xb0] ss:$12 sps:$4 sm:$0xff]   ;;  %v8136_v18 = vld [vmem:[#allocation13 + $0x60] ss:$12 sps:$4 sm:$0xff]  }
 0x22b   : > { %v8064_v25 = vpop.permute.xlu0 %8063  ;;  %v8089_v53 = vpop.permute.xlu1 %8088  ;;  %v8144_v29 = vld [vmem:[#allocation13 + $0x90] ss:$12 sps:$4 sm:$0xff]  }
 0x22c   : > { %v8066_v27 = vunpack.i.h.bf16 %v8064_v25  ;;  %v8065_v57 = vunpack.i.l.bf16 %v8064_v25  ;;  %7208 = vmatpush3.bf16.msk.msra.mxu1 %vm9826_vm1, %v7094_v24  ;;  %v8091_v39 = vunpack.i.h.bf16 %v8089_v53  ;;  %v8090_v26 = vunpack.i.l.bf16 %v8089_v53  ;;  %v8141_v24 = vld [vmem:[#allocation13 + $0x78] ss:$12 sps:$4 sm:$0xff]   ;;  %v8156_v49 = vld [vmem:[#allocation15 + $0xb0] ss:$12 sps:$4 sm:$0xff]   ;;  %v8164_v53 = vld [vmem:[#allocation15 + $0x80] ss:$12 sps:$4 sm:$0xff]  }
 0x22d   : > { %7209 = vmatprep.subr.bf16.mxu1 %v13948_v32  ;;  %7462 = vmatpush3.bf16.msk.msra.mxu0 %vm9832_vm3, %v7129_v28  ;;  %v8133_v28 = vld [vmem:[#allocation13 + $0x48] ss:$12 sps:$4 sm:$0xff]   ;;  %v8147_v25 = vld [vmem:[#allocation13 + $0xac] ss:$12 sps:$4 sm:$0xff]  }
 0x22e   : > { %v7099_v36 = vpack.c.bf16 %v8066_v27, %v8065_v57  ;;  %7463 = vmatprep.subr.msk.bf16.mxu0 %vm9832_vm3, %v7134_v22  ;;  %v7149_v38 = vpack.c.bf16 %v8091_v39, %v8090_v26  ;;  %v8152_v27 = vld [vmem:[#allocation15 + $0xac] ss:$12 sps:$4 sm:$0xff]   ;;  %v8150_v57 = vld [vmem:[#allocation15 + $0xa8] ss:$12 sps:$4 sm:$0xff]   ;;  %v8169_v39 = vld [vmem:[#allocation15 + $0x30] ss:$12 sps:$4 sm:$0xff]  }
 0x22f   : > { %v8074_v44 = vpop.permute.xlu0 %8073  ;;  %v8155_v32 = vld [vmem:[#allocation15 + $0x94] ss:$12 sps:$4 sm:$0xff]   ;;  %v8159_v31 = vld [vmem:[#allocation15 + $0x7c] ss:$12 sps:$4 sm:$0xff]  }
 0x230   : > { %v8076_v43 = vunpack.i.h.bf16 %v8074_v44  ;;  %v8075_v54 = vunpack.i.l.bf16 %v8074_v44  ;;  %7210 = vmatpush3.bf16.msk.msra.mxu1 %vm9826_vm1, %v7099_v36  ;;  %v8153_v36 = vld [vmem:[#allocation15 + $0x90] ss:$12 sps:$4 sm:$0xff]   ;;  %v8157_v44 = vld [vmem:[#allocation15 + $0x78] ss:$12 sps:$4 sm:$0xff]  }
 0x231   : > { %7211 = vmatprep.subr.bf16.mxu1 %v13949_v50  ;;  %7464 = vmatpush3.bf16.msk.msra.mxu0 %vm9832_vm3, %v7134_v22  ;;  %v8142_v22 = vld [vmem:[#allocation13 + $0x94] ss:$12 sps:$4 sm:$0xff]   ;;  %v8167_v50 = vld [vmem:[#allocation15 + $0x4c] ss:$12 sps:$4 sm:$0xff]   ;;  %v8172_v26 = vld [vmem:[#allocation15 + $0x50] ss:$12 sps:$4 sm:$0xff]  }
 0x232   : > { %v7104_v52 = vpack.c.bf16 %v8076_v43, %v8075_v54  ;;  %7465 = vmatprep.subr.msk.bf16.mxu0 %vm9832_vm3, %v7139_v56  ;;  %v8163_v43 = vld [vmem:[#allocation15 + $0x64] ss:$12 sps:$4 sm:$0xff]   ;;  %v8161_v54 = vld [vmem:[#allocation15 + $0x60] ss:$12 sps:$4 sm:$0xff]  }
 0x233   : > { %v8084_v17 = vpop.permute.xlu0 %8083 }
 0x234   : > { %v8086_v51 = vunpack.i.h.bf16 %v8084_v17  ;;  %v8085_v33 = vunpack.i.l.bf16 %v8084_v17  ;;  %7212 = vmatpush3.bf16.msk.msra.mxu1 %vm9826_vm1, %v7104_v52  ;;  %v8165_v52 = vld [vmem:[#allocation15 + $0x48] ss:$12 sps:$4 sm:$0xff]  }
 0x235   : > { %7213 = vmatprep.subr.bf16.mxu1 %v13950_v35  ;;  %7466 = vmatpush3.bf16.msk.msra.mxu0 %vm9832_vm3, %v7139_v56  ;;  %v8160_v56 = vld [vmem:[#allocation15 + $0x98] ss:$12 sps:$4 sm:$0xff]   ;;  %v8171_v17 = vld [vmem:[#allocation15 + $0x34] ss:$12 sps:$4 sm:$0xff]  }
 0x236   : > { %v7109_v37 = vpack.c.bf16 %v8086_v51, %v8085_v33  ;;  %7467 = vmatprep.subr.msk.bf16.mxu0 %vm9832_vm3, %v7144_v55  ;;  %v8175_v51 = vld [vmem:[#allocation15 + $0x1c] ss:$12 sps:$4 sm:$0xff]   ;;  %v8173_v33 = vld [vmem:[#allocation15 + $0x18] ss:$12 sps:$4 sm:$0xff]  }
 0x237   : > { %v8176_v35 = vld [vmem:[#allocation15 + $0x38] ss:$12 sps:$4 sm:$0xff]  }
 0x238   : > { %7214 = vmatpush3.bf16.msk.msra.mxu1 %vm9826_vm1, %v7109_v37  ;;  %v8179_v37 = vld [vmem:[#allocation15 + $0x4] ss:$12 sps:$4 sm:$0xff]  }
 0x239   : > { %7468 = vmatpush3.bf16.msk.msra.mxu0 %vm9832_vm3, %v7144_v55  ;;  %1694 = vmatprep.subr.bf16.mxu1 %v8152_v27  ;;  %v8168_v55 = vld [vmem:[#allocation15 + $0x68] ss:$12 sps:$4 sm:$0xff]  }
 0x23a   : > { %7469 = vmatprep.subr.msk.bf16.mxu0 %vm9832_vm3, %v7149_v38 }
 0x23b   : > { %1253 = vmatmul.mubr.bf16.vlgmr.msra.gmra.mxu1 %v8118_v0  ;;  %v8177_v0 = vld [vmem:[#allocation15] ss:$12 sps:$4 sm:$0xff]  }
 0x23c   : > { %1260 = vmatprep.mubr.bf16.mxu1 %v8123_v63  ;;  %1695 = vmatpush1.bf16.msra.mxu1 %v8150_v57  ;;  %v8181_v63 = vld [vmem:[#allocation15 + $0x8] ss:$12 sps:$4 sm:$0xff]  }
 0x23d   : > { %7470 = vmatpush3.bf16.msk.msra.mxu0 %vm9832_vm3, %v7149_v38  ;;  %1696 = vmatprep.subr.bf16.mxu1 %v8155_v32  ;;  %v8180_v38 = vld [vmem:[#allocation15 + $0x20] ss:$12 sps:$4 sm:$0xff]  }
 0x23e   : > { %7487 = vmatprep.subr.bf16.mxu0 %v8156_v49 }
 0x240   : > { %7472 = vmatmul.mubr.bf16.vlgmr.msra.gmra.mxu0 %v8122_v21  ;;  %1697 = vmatpush1.bf16.msra.mxu1 %v8153_v36 }
 0x241   : > { %7475 = vmatprep.mubr.bf16.mxu0 %v8129_v23  ;;  %1698 = vmatprep.subr.bf16.mxu1 %v8159_v31 }
 0x242   : > { %7488 = vmatpush3.bf16.msra.mxu0 %v8156_v49 }
 0x243   : > { %1261 = vmatmul.mubr.bf16.gmra.mxu1 %v8125_v47  ;;  %7489 = vmatprep.subr.bf16.mxu0 %v8160_v56 }
 0x244   : > { %1268 = vmatprep.mubr.bf16.mxu1 %v8126_v48  ;;  %1699 = vmatpush1.bf16.msra.mxu1 %v8157_v44 }
 0x245   : > { %1700 = vmatprep.subr.bf16.mxu1 %v8163_v43 }
 0x246   : > { %7490 = vmatpush3.bf16.msra.mxu0 %v8160_v56 }
 0x247   : > { %7491 = vmatprep.subr.bf16.mxu0 %v8164_v53 }
 0x248   : > { %7476 = vmatmul.mubr.bf16.gmra.mxu0 %v8130_v19  ;;  %1701 = vmatpush1.bf16.msra.mxu1 %v8161_v54  ;;  %v1015_v19 = vpop.permute.xlu0 %1014 }
 0x249   : > { %7479 = vmatprep.mubr.bf16.mxu0 %v8137_v30  ;;  %1702 = vmatprep.subr.bf16.mxu1 %v8167_v50 }
 0x24a   : > { %7492 = vmatpush3.bf16.msra.mxu0 %v8164_v53 }
 0x24b   : > { %1269 = vmatmul.mubr.bf16.gmra.mxu1 %v8128_v34  ;;  %7493 = vmatprep.subr.bf16.mxu0 %v8168_v55 }
 0x24c   : > { %1276 = vmatprep.mubr.bf16.mxu1 %v8131_v61  ;;  %1703 = vmatpush1.bf16.msra.mxu1 %v8165_v52  ;;  %v1030_v53 = vpop.permute.xlu0 %1029 }
 0x24d   : > { %1704 = vmatprep.subr.bf16.mxu1 %v8171_v17 }
 0x24e   : > { %7494 = vmatpush3.bf16.msra.mxu0 %v8168_v55 }
 0x24f   : > { %7495 = vmatprep.subr.bf16.mxu0 %v8172_v26 }
 0x250   : > { %7480 = vmatmul.mubr.bf16.gmra.mxu0 %v8138_v40  ;;  %1705 = vmatpush1.bf16.msra.mxu1 %v8169_v39  ;;  %v1020_v40 = vpop.permute.xlu1 %1019 }
 0x251   : > { %7483 = vmatprep.mubr.bf16.mxu0 %v8145_v62  ;;  %1706 = vmatprep.subr.bf16.mxu1 %v8175_v51 }
 0x252   : > { %7496 = vmatpush3.bf16.msra.mxu0 %v8172_v26 }
 0x253   : > { %1277 = vmatmul.mubr.bf16.gmra.mxu1 %v8133_v28  ;;  %7497 = vmatprep.subr.bf16.mxu0 %v8176_v35 }
 0x254   : > { %1284 = vmatprep.mubr.bf16.mxu1 %v8134_v46  ;;  %1707 = vmatpush1.bf16.msra.mxu1 %v8173_v33  ;;  %v1025_v57 = vpop.permute.xlu1 %1024 }
 0x255   : > { %1708 = vmatprep.subr.bf16.mxu1 %v8179_v37 }
 0x256   : > { %7498 = vmatpush3.bf16.msra.mxu0 %v8176_v35 }
 0x257   : > { %7499 = vmatprep.subr.bf16.mxu0 %v8180_v38 }
 0x258   : > { %7484 = vmatmul.mubr.bf16.gmra.mxu0 %v8146_v45  ;;  %1709 = vmatpush1.bf16.msra.mxu1 %v8177_v0  ;;  %v1035_v35 = vpop.permute.xlu1 %1034 }
 0x25a   : > { %7500 = vmatpush3.bf16.msra.mxu0 %v8180_v38 }
 0x25b   : > { %1285 = vmatmul.mubr.bf16.gmra.mxu1 %v8136_v18  ;;  %7501 = vmatprep.subr.bf16.mxu0 %v8181_v63 }
 0x25c   : > { %1292 = vmatprep.mubr.bf16.mxu1 %v8139_v20 }
 0x25e   : > { %7502 = vmatpush3.bf16.msra.mxu0 %v8181_v63 }
 0x263   : > { %1293 = vmatmul.mubr.bf16.gmra.mxu1 %v8141_v24 }
 0x264   : > { %1300 = vmatprep.mubr.bf16.mxu1 %v8142_v22 }
 0x26b   : > { %1301 = vmatmul.mubr.bf16.gmra.mxu1 %v8144_v29 }
 0x26c   : > { %1308 = vmatprep.mubr.bf16.mxu1 %v8147_v25 }
 0x273   : > { %1309 = vmatmul.mubr.bf16.gmra.mxu1 %v8149_v41 }
 0x274   : > { %1726 = vmatprep.mubr.bf16.mxu1 %v13951_v42 }
 0x2fb   : > { %v7215_v21 = vpop.f32.mrf.mxu1 }
 0x2fd   : > { %v7216_v23 = vpop.f32.mrf.mxu1 }
 0x2fe   : > { %v7217_v47 = vadd.f32 %v7216_v23, %v7215_v21 }
 0x2ff   : > { %v7218_v48 = vpop.f32.mrf.mxu1 }
 0x300   : > { %v7473_v30 = vpop.f32.mrf.mxu0  ;;  %v1255_v34 = vadd.f32 %v7217_v47, %v1015_v19  ;;  %v1040_v19 = vpop.permute.xlu0 %1039 }
 0x301   : > { %v7219_v61 = vpop.f32.mrf.mxu1 }
 0x302   : > { %v7220_v62 = vadd.f32 %v7219_v61, %v7218_v48  ;;  %v1351_v28 = vpop.f32.mrf.mxu0 }
 0x303   : > { %v9904_v46 = vadd.f32 %v1351_v28, %v1255_v34  ;;  %v7221_v45 = vpop.f32.mrf.mxu1 }
 0x304   : > { %v1258_v18 = vadd.f32 %v7220_v62, %v1020_v40  ;;  %v7474_v20 = vpop.f32.mrf.mxu0 }
 0x305   : > { %v1414_v24 = vsub.f32 0.0, %v9904_v46  ;;  %v7222_v22 = vpop.f32.mrf.mxu1 }
 0x306   : > { %v7223_v29 = vadd.f32 %v7222_v22, %v7221_v45  ;;  %v1354_v25 = vpop.f32.mrf.mxu0  ;;  %v1045_v22 = vpop.permute.xlu1 %1044 }
 0x307   : > { %v1430_v41 = vmul.f32 1.442695, %v1414_v24  ;;  %v9907_v27 = vadd.f32 %v1354_v25, %v1258_v18  ;;  %v7224_v32 = vpop.f32.mrf.mxu1 }
 0x308   : > { %v1263_v36 = vadd.f32 %v7223_v29, %v1025_v57  ;;  %v7477_v44 = vpop.f32.mrf.mxu0 }
 0x309   : > { %8246 = vpow2.f32 %v1430_v41  ;;  %v1415_v49 = vsub.f32 0.0, %v9907_v27  ;;  %v7225_v31 = vpop.f32.mrf.mxu1 }
 0x30a   : > { %v9910_v56 = vadd.f32 %v7473_v30, %v1263_v36  ;;  %v7226_v43 = vadd.f32 %v7225_v31, %v7224_v32  ;;  %v1367_v39 = vpop.f32.mrf.mxu0 }
 0x30b   : > { %v1432_v54 = vmul.f32 1.442695, %v1415_v49  ;;  %v7227_v50 = vpop.f32.mrf.mxu1 }
 0x30c   : > { %v1416_v52 = vsub.f32 0.0, %v9910_v56  ;;  %v1266_v55 = vadd.f32 %v7226_v43, %v1030_v53  ;;  %v7478_v21 = vpop.f32.mrf.mxu0  ;;  %v1050_v53 = vpop.permute.xlu0 %1049 }
 0x30d   : > { %8248 = vpow2.f32 %v1432_v54  ;;  %v7228_v17 = vpop.f32.mrf.mxu1 }
 0x30e   : > { %v1434_v26 = vmul.f32 1.442695, %v1416_v52  ;;  %v9913_v51 = vadd.f32 %v7474_v20, %v1266_v55  ;;  %v7229_v33 = vadd.f32 %v7228_v17, %v7227_v50  ;;  %v1370_v40 = vpop.f32.mrf.mxu0 }
 0x30f   : > { %v7230_v37 = vpop.f32.mrf.mxu1 }
 0x310   : > { %8250 = vpow2.f32 %v1434_v26  ;;  %v1417_v0 = vsub.f32 0.0, %v9913_v51  ;;  %v1271_v38 = vadd.f32 %v7229_v33, %v1035_v35  ;;  %v7481_v32 = vpop.f32.mrf.mxu0 }
 0x311   : > { %v7231_v63 = vpop.f32.mrf.mxu1 }
 0x312   : > { %v1436_v23 = vmul.f32 1.442695, %v1417_v0  ;;  %v9916_v47 = vadd.f32 %v1367_v39, %v1271_v38  ;;  %v7232_v48 = vadd.f32 %v7231_v63, %v7230_v37  ;;  %v1383_v26 = vpop.f32.mrf.mxu0  ;;  %v1055_v38 = vpop.permute.xlu1 %1054 }
 0x313   : > { %v7233_v30 = vpop.f32.mrf.mxu1 }
 0x314   : > { %8252 = vpow2.f32 %v1436_v23  ;;  %v1418_v34 = vsub.f32 0.0, %v9916_v47  ;;  %v1274_v61 = vadd.f32 %v7232_v48, %v1040_v19 }
 0x315   : > { %v7234_v62 = vpop.f32.mrf.mxu1 }
 0x316   : > { %v8247_v28 = vpop.eup %8246  ;;  %v1438_v45 = vmul.f32 1.442695, %v1418_v34  ;;  %v9919_v18 = vadd.f32 %v1370_v40, %v1274_v61  ;;  %v7235_v20 = vadd.f32 %v7234_v62, %v7233_v30  ;;  %v7482_v30 = vpop.f32.mrf.mxu0 }
 0x317   : > { %v1462_v24 = vadd.f32 1.0, %v8247_v28  ;;  %v7236_v29 = vpop.f32.mrf.mxu1  ;;  %v1060_v28 = vpop.permute.xlu0 %1059 }
 0x318   : > { %8254 = vpow2.f32 %v1438_v45  ;;  %v1419_v25 = vsub.f32 0.0, %v9919_v18  ;;  %v1279_v41 = vadd.f32 %v7235_v20, %v1045_v22  ;;  %v1386_v22 = vpop.f32.mrf.mxu0 }
 0x319   : > { %8256 = vrcp.f32 %v1462_v24  ;;  %v7237_v57 = vpop.f32.mrf.mxu1 }
 0x31a   : > { %v8249_v36 = vpop.eup %8248  ;;  %v1440_v49 = vmul.f32 1.442695, %v1419_v25  ;;  %v9922_v31 = vadd.f32 %v7477_v44, %v1279_v41  ;;  %v7238_v43 = vadd.f32 %v7237_v57, %v7236_v29 }
 0x31b   : > { %v1463_v54 = vadd.f32 1.0, %v8249_v36  ;;  %v7239_v50 = vpop.f32.mrf.mxu1 }
 0x31c   : > { %8258 = vpow2.f32 %v1440_v49  ;;  %v1420_v52 = vsub.f32 0.0, %v9922_v31  ;;  %v1282_v55 = vadd.f32 %v7238_v43, %v1050_v53 }
 0x31d   : > { %v8251_v17 = vpop.eup %8250  ;;  %8260 = vrcp.f32 %v1463_v54  ;;  %v7240_v39 = vpop.f32.mrf.mxu1 }
 0x31e   : > { %v1464_v33 = vadd.f32 1.0, %v8251_v17  ;;  %v1442_v35 = vmul.f32 1.442695, %v1420_v52  ;;  %v9925_v37 = vadd.f32 %v7478_v21, %v1282_v55  ;;  %v7241_v0 = vadd.f32 %v7240_v39, %v7239_v50  ;;  %v1065_v54 = vpop.permute.xlu1 %1064  ;;  %v9938_v39 = vpop.f32.mrf.mxu0 }
 0x31f   : > { %v7242_v44 = vpop.f32.mrf.mxu1 }
 0x320   : > { %8262 = vrcp.f32 %v1464_v33  ;;  %v1421_v63 = vsub.f32 0.0, %v9925_v37  ;;  %v1287_v23 = vadd.f32 %v7241_v0, %v1055_v38 }
 0x321   : > { %v8253_v48 = vpop.eup %8252  ;;  %8264 = vpow2.f32 %v1442_v35  ;;  %v7243_v19 = vpop.f32.mrf.mxu1 }
 0x322   : > { %v1465_v34 = vadd.f32 1.0, %v8253_v48  ;;  %v1444_v61 = vmul.f32 1.442695, %v1421_v63  ;;  %v9928_v40 = vadd.f32 %v1383_v26, %v1287_v23  ;;  %v7244_v62 = vadd.f32 %v7243_v19, %v7242_v44  ;;  %v1070_v44 = vpop.permute.xlu0 %1069 }
 0x323   : > { %v7245_v45 = vpop.f32.mrf.mxu1 }
 0x324   : > { %8266 = vrcp.f32 %v1465_v34  ;;  %v1422_v21 = vsub.f32 0.0, %v9928_v40  ;;  %v1290_v20 = vadd.f32 %v7244_v62, %v1060_v28 }
 0x325   : > { %v8255_v24 = vpop.eup %8254  ;;  %8268 = vpow2.f32 %v1444_v61  ;;  %v7246_v29 = vpop.f32.mrf.mxu1 }
 0x326   : > { %v8257_v25 = vpop.eup %8256  ;;  %v1466_v41 = vadd.f32 1.0, %v8255_v24  ;;  %v1446_v57 = vmul.f32 1.442695, %v1422_v21  ;;  %v9931_v36 = vadd.f32 %v1386_v22, %v1290_v20  ;;  %v7247_v49 = vadd.f32 %v7246_v29, %v7245_v45  ;;  %v1075_v24 = vpop.permute.xlu1 %1074 }
 0x327   : > { %v9934_v43 = vmul.f32 %v8257_v25, %v9904_v46  ;;  %v7248_v53 = vpop.f32.mrf.mxu1 }
 0x328   : > { %8270 = vrcp.f32 %v1466_v41  ;;  %v1423_v50 = vsub.f32 0.0, %v9931_v36  ;;  %v1295_v52 = vadd.f32 %v7247_v49, %v1065_v54 }
 0x329   : > { %v8259_v55 = vpop.eup %8258  ;;  %2247 = vst [vmem:[#allocation4 + $0x30] sm:$0xff] %v9934_v43  ;;  %8272 = vpow2.f32 %v1446_v57  ;;  %v7249_v17 = vpop.f32.mrf.mxu1 }
 0x32a   : > { %v8261_v26 = vpop.eup %8260  ;;  %v1467_v33 = vadd.f32 1.0, %v8259_v55  ;;  %v1448_v35 = vmul.f32 1.442695, %v1423_v50  ;;  %v9940_v0 = vadd.f32 %v7481_v32, %v1295_v52  ;;  %v7250_v46 = vadd.f32 %v7249_v17, %v7248_v53  ;;  %v1399_v32 = vpop.f32.mrf.mxu0 }
 0x32b   : > { %v9943_v38 = vmul.f32 %v8261_v26, %v9907_v27  ;;  %v7251_v63 = vpop.f32.mrf.mxu1  ;;  %v1080_v55 = vpop.permute.xlu0 %1079 }
 0x32c   : > { %8274 = vrcp.f32 %v1467_v33  ;;  %v1424_v23 = vsub.f32 0.0, %v9940_v0  ;;  %v1298_v48 = vadd.f32 %v7250_v46, %v1070_v44  ;;  %v7486_v57 = vpop.f32.mrf.mxu0 }
 0x32d   : > { %v8263_v19 = vpop.eup %8262  ;;  %v1526_v34 = vpack.c.bf16 %v9943_v38, %v9934_v43  ;;  %2248 = vst [vmem:[#allocation4] sm:$0xff] %v9943_v38  ;;  %8276 = vpow2.f32 %v1448_v35  ;;  %v7252_v61 = vpop.f32.mrf.mxu1 }
 0x32e   : > { %v8265_v62 = vpop.eup %8264  ;;  %v9950_v28 = vmul.f32 %v8263_v19, %v9910_v56  ;;  %v1450_v27 = vmul.f32 1.442695, %v1424_v23  ;;  %v9952_v45 = vadd.f32 %v7482_v30, %v1298_v48  ;;  %v7253_v21 = vadd.f32 %v7252_v61, %v7251_v63  ;;  %v1402_v44 = vpop.f32.mrf.mxu0 }
 0x32f   : > { %v1468_v20 = vadd.f32 1.0, %v8265_v62  ;;  %v7254_v22 = vpop.f32.mrf.mxu1  ;;  %1727 = vmatmul.mubr.bf16.vlgmr.msra.gmra.mxu1 %v1526_v34  ;;  %7503 = vmatprep.mubr.bf16.mxu0 %v1526_v34 }
 0x330   : > { %2249 = vst [vmem:[#allocation4 + $0x58] sm:$0xff] %v9950_v28  ;;  %8278 = vpow2.f32 %v1450_v27  ;;  %v1425_v29 = vsub.f32 0.0, %v9952_v45  ;;  %v1303_v25 = vadd.f32 %v7253_v21, %v1075_v24  ;;  %1736 = vmatprep.mubr.bf16.mxu1 %v13951_v42 }
 0x331   : > { %v8267_v41 = vpop.eup %8266  ;;  %8280 = vrcp.f32 %v1468_v20  ;;  %v7255_v56 = vpop.f32.mrf.mxu1 }
 0x332   : > { %v8269_v30 = vpop.eup %8268  ;;  %v9958_v49 = vmul.f32 %v8267_v41, %v9913_v51  ;;  %v1452_v54 = vmul.f32 1.442695, %v1425_v29  ;;  %v7256_v53 = vadd.f32 %v7255_v56, %v7254_v22  ;;  %v9960_v50 = vadd.f32 %v1399_v32, %v1303_v25  ;;  %v1085_v32 = vpop.permute.xlu1 %1084 }
 0x333   : > { %v1469_v52 = vadd.f32 1.0, %v8269_v30  ;;  %v7257_v17 = vpop.f32.mrf.mxu1  ;;  %v1090_v30 = vpop.permute.xlu0 %1089 }
 0x334   : > { %v1527_v26 = vpack.c.bf16 %v9958_v49, %v9950_v28  ;;  %2250 = vst [vmem:[#allocation4 + $0x18] sm:$0xff] %v9958_v49  ;;  %8282 = vpow2.f32 %v1452_v54  ;;  %v1426_v33 = vsub.f32 0.0, %v9960_v50  ;;  %v1306_v35 = vadd.f32 %v7256_v53, %v1080_v55 }
 0x335   : > { %v8271_v46 = vpop.eup %8270  ;;  %8284 = vrcp.f32 %v1469_v52  ;;  %v7258_v51 = vpop.f32.mrf.mxu1 }
 0x336   : > { %v8273_v63 = vpop.eup %8272  ;;  %v9967_v23 = vmul.f32 %v8271_v46, %v9916_v47  ;;  %v1454_v48 = vmul.f32 1.442695, %v1426_v33  ;;  %v7259_v19 = vadd.f32 %v7258_v51, %v7257_v17  ;;  %v9969_v34 = vadd.f32 %v1402_v44, %v1306_v35  ;;  %7504 = vmatmul.mubr.bf16.vlgmr.msra.gmra.mxu0 %v1527_v26 }
 0x337   : > { %v1470_v61 = vadd.f32 1.0, %v8273_v63  ;;  %v7260_v62 = vpop.f32.mrf.mxu1  ;;  %1737 = vmatmul.mubr.bf16.gmra.mxu1 %v1527_v26 }
 0x338   : > { %2251 = vst [vmem:[#allocation4 + $0x50] sm:$0xff] %v9967_v23  ;;  %8286 = vpow2.f32 %v1454_v48  ;;  %v1311_v27 = vadd.f32 %v7259_v19, %v1085_v32  ;;  %v1427_v21 = vsub.f32 0.0, %v9969_v34  ;;  %1746 = vmatprep.mubr.bf16.mxu1 %v13951_v42 }
 0x339   : > { %v8275_v20 = vpop.eup %8274  ;;  %8288 = vrcp.f32 %v1470_v61  ;;  %v7261_v47 = vpop.f32.mrf.mxu1 }
 0x33a   : > { %v8277_v24 = vpop.eup %8276  ;;  %v9975_v22 = vmul.f32 %v8275_v20, %v9919_v18  ;;  %v9978_v29 = vadd.f32 %v9938_v39, %v1311_v27  ;;  %v1456_v25 = vmul.f32 1.442695, %v1427_v21  ;;  %v7262_v41 = vadd.f32 %v7261_v47, %v7260_v62 }
 0x33b   : > { %v1471_v56 = vadd.f32 1.0, %v8277_v24 }
 0x33c   : > { %2252 = vst [vmem:[#allocation4 + $0x68] sm:$0xff] %v9975_v22  ;;  %v1428_v54 = vsub.f32 0.0, %v9978_v29  ;;  %8290 = vpow2.f32 %v1456_v25  ;;  %v1314_v53 = vadd.f32 %v7262_v41, %v1090_v30  ;;  %v1528_v52 = vpack.c.bf16 %v9975_v22, %v9967_v23 }
 0x33d   : > { %v8279_v55 = vpop.eup %8278  ;;  %8292 = vrcp.f32 %v1471_v56 }
 0x33e   : > { %v8281_v18 = vpop.eup %8280  ;;  %v1472_v17 = vadd.f32 1.0, %v8279_v55  ;;  %v1458_v26 = vmul.f32 1.442695, %v1428_v54  ;;  %v9984_v39 = vadd.f32 %v7486_v57, %v1314_v53  ;;  %7507 = vmatprep.mubr.bf16.mxu0 %v1528_v52 }
 0x33f   : > { %v9987_v33 = vmul.f32 %v8281_v18, %v9922_v31  ;;  %1747 = vmatmul.mubr.bf16.gmra.mxu1 %v1528_v52 }
 0x340   : > { %8294 = vrcp.f32 %v1472_v17  ;;  %v1429_v35 = vsub.f32 0.0, %v9984_v39  ;;  %1756 = vmatprep.mubr.bf16.mxu1 %v13951_v42 }
 0x341   : > { %v8283_v46 = vpop.eup %8282  ;;  %2253 = vst [vmem:[#allocation4 + $0x8] sm:$0xff] %v9987_v33  ;;  %8296 = vpow2.f32 %v1458_v26 }
 0x342   : > { %v8285_v51 = vpop.eup %8284  ;;  %v1473_v44 = vadd.f32 1.0, %v8283_v46  ;;  %v1460_v63 = vmul.f32 1.442695, %v1429_v35 }
 0x343   : > { %v9993_v57 = vmul.f32 %v8285_v51, %v9925_v37 }
 0x344   : > { %8298 = vrcp.f32 %v1473_v44 }
 0x345   : > { %v8287_v48 = vpop.eup %8286  ;;  %2254 = vst [vmem:[#allocation4 + $0x48] sm:$0xff] %v9993_v57  ;;  %8300 = vpow2.f32 %v1460_v63  ;;  %v1529_v31 = vpack.c.bf16 %v9993_v57, %v9987_v33 }
 0x346   : > { %v8289_v19 = vpop.eup %8288  ;;  %v1474_v61 = vadd.f32 1.0, %v8287_v48 }
 0x347   : > { %v9999_v32 = vmul.f32 %v8289_v19, %v9928_v40  ;;  %7508 = vmatmul.mubr.bf16.gmra.mxu0 %v1529_v31  ;;  %1757 = vmatmul.mubr.bf16.gmra.mxu1 %v1529_v31 }
 0x348   : > { %8302 = vrcp.f32 %v1474_v61  ;;  %1766 = vmatprep.mubr.bf16.mxu1 %v13951_v42 }
 0x349   : > { %v8291_v37 = vpop.eup %8290  ;;  %2255 = vst [vmem:[#allocation4 + $0x40] sm:$0xff] %v9999_v32 }
 0x34a   : > { %v8293_v62 = vpop.eup %8292  ;;  %v1475_v27 = vadd.f32 1.0, %v8291_v37 }
 0x34b   : > { %v10004_v21 = vmul.f32 %v8293_v62, %v9931_v36 }
 0x34c   : > { %8304 = vrcp.f32 %v1475_v27 }
 0x34d   : > { %v8295_v20 = vpop.eup %8294  ;;  %2256 = vst [vmem:[#allocation4 + $0x20] sm:$0xff] %v10004_v21  ;;  %v1530_v40 = vpack.c.bf16 %v10004_v21, %v9999_v32 }
 0x34e   : > { %v8297_v47 = vpop.eup %8296  ;;  %v10010_v24 = vmul.f32 %v8295_v20, %v9940_v0 }
 0x34f   : > { %v1476_v25 = vadd.f32 1.0, %v8297_v47  ;;  %7511 = vmatprep.mubr.bf16.mxu0 %v1530_v40  ;;  %1767 = vmatmul.mubr.bf16.gmra.mxu1 %v1530_v40 }
 0x350   : > { %2257 = vst [vmem:[#allocation4 + $0x10] sm:$0xff] %v10010_v24  ;;  %1776 = vmatprep.mubr.bf16.mxu1 %v13951_v42 }
 0x351   : > { %v8299_v36 = vpop.eup %8298  ;;  %8306 = vrcp.f32 %v1476_v25 }
 0x352   : > { %v8301_v41 = vpop.eup %8300  ;;  %v10015_v56 = vmul.f32 %v8299_v36, %v9952_v45 }
 0x353   : > { %v1477_v30 = vadd.f32 1.0, %v8301_v41 }
 0x354   : > { %2258 = vst [vmem:[#allocation4 + $0x38] sm:$0xff] %v10015_v56  ;;  %v1531_v0 = vpack.c.bf16 %v10015_v56, %v10010_v24 }
 0x355   : > { %v8303_v54 = vpop.eup %8302  ;;  %8308 = vrcp.f32 %v1477_v30 }
 0x356   : > { %v10021_v53 = vmul.f32 %v8303_v54, %v9960_v50  ;;  %7512 = vmatmul.mubr.bf16.gmra.mxu0 %v1531_v0 }
 0x357   : > { %1777 = vmatmul.mubr.bf16.gmra.mxu1 %v1531_v0 }
 0x358   : > { %2259 = vst [vmem:[#allocation4 + $0x60] sm:$0xff] %v10021_v53  ;;  %1786 = vmatprep.mubr.bf16.mxu1 %v13951_v42 }
 0x359   : > { %v8305_v52 = vpop.eup %8304 }
 0x35a   : > { %v10026_v45 = vmul.f32 %v8305_v52, %v9969_v34 }
 0x35c   : > { %2260 = vst [vmem:[#allocation4 + $0x70] sm:$0xff] %v10026_v45  ;;  %v1532_v55 = vpack.c.bf16 %v10026_v45, %v10021_v53 }
 0x35e   : > { %v8307_v18 = vpop.eup %8306  ;;  %7515 = vmatprep.mubr.bf16.mxu0 %v1532_v55 }
 0x35f   : > { %v10032_v50 = vmul.f32 %v8307_v18, %v9978_v29  ;;  %1787 = vmatmul.mubr.bf16.gmra.mxu1 %v1532_v55  ;;  %v10045_v29 = vld [vmem:[%s13676_s6] ss:$0 sm:$0xff] }
 0x360   : > { %1796 = vmatprep.mubr.bf16.mxu1 %v13951_v42 }
 0x361   : > { %2261 = vst [vmem:[#allocation4 + $0x78] sm:$0xff] %v10032_v50 }
 0x362   : > { %v8309_v17 = vpop.eup %8308 }
 0x363   : > { %v10037_v26 = vmul.f32 %v8309_v17, %v9984_v39 }
 0x365   : > { %2262 = vst [vmem:[#allocation4 + $0x28] sm:$0xff] %v10037_v26  ;;  %v1533_v34 = vpack.c.bf16 %v10037_v26, %v10032_v50 }
 0x367   : > { %7516 = vmatmul.mubr.bf16.gmra.mxu0 %v1533_v34  ;;  %1797 = vmatmul.mubr.bf16.gmra.mxu1 %v1533_v34 }
 0x3ef   : > { %v1728_v35 = vpop.f32.mrf.mxu1 }
 0x3f0   : > { %v10048_v42 = vadd.f32 %v10045_v29, %v1728_v35 }
 0x3f1   : > { %v1730_v46 = vpop.f32.mrf.mxu1 }
 0x3f2   : > { %v1943_v39 = vand.u32 2147483647, %v10048_v42  ;;  %2167 = vst [vmem:[#allocation7] sm:$0xff] %v1730_v46  ;;  %v1927_v59 = vmax.f32 %v10048_v42, 0.0 }
 0x3f3   : > { %v1732_v51 = vpop.f32.mrf.mxu1 }
 0x3f4   : > { %v1959_v44 = vsub.f32 0.0, %v1943_v39  ;;  %v10052_v63 = vadd.f32 %v10045_v29, %v1732_v51 }
 0x3f5   : > { %v1734_v48 = vpop.f32.mrf.mxu1 }
 0x3f6   : > { %v1975_v31 = vmul.f32 1.442695, %v1959_v44  ;;  %v1944_v19 = vand.u32 2147483647, %v10052_v63  ;;  %2168 = vst [vmem:[#allocation7 + $0x8] sm:$0xff] %v1734_v48  ;;  %v7505_v61 = vpop.f32.mrf.mxu0  ;;  %v1928_v42 = vmax.f32 %v10052_v63, 0.0 }
 0x3f7   : > { %2185 = vst [vmem:[#allocation8 + $0x10] sm:$0xff] %v7505_v61  ;;  %v1738_v37 = vpop.f32.mrf.mxu1 }
 0x3f8   : > { %8310 = vpow2.f32 %v1975_v31  ;;  %v1960_v62 = vsub.f32 0.0, %v1944_v19  ;;  %v10056_v27 = vadd.f32 %v10045_v29, %v1738_v37  ;;  %v1841_v20 = vpop.f32.mrf.mxu0 }
 0x3f9   : > { %2183 = vst [vmem:[#allocation8] sm:$0xff] %v1841_v20  ;;  %v1740_v40 = vpop.f32.mrf.mxu1 }
 0x3fa   : > { %v1977_v47 = vmul.f32 1.442695, %v1960_v62  ;;  %v1945_v25 = vand.u32 2147483647, %v10056_v27  ;;  %2169 = vst [vmem:[#allocation7 + $0x10] sm:$0xff] %v1740_v40  ;;  %v7506_v36 = vpop.f32.mrf.mxu0 }
 0x3fb   : > { %2186 = vst [vmem:[#allocation8 + $0x18] sm:$0xff] %v7506_v36  ;;  %v1742_v41 = vpop.f32.mrf.mxu1 }
 0x3fc   : > { %8312 = vpow2.f32 %v1977_v47  ;;  %v1961_v30 = vsub.f32 0.0, %v1945_v25  ;;  %v10060_v0 = vadd.f32 %v10045_v29, %v1742_v41  ;;  %v1844_v54 = vpop.f32.mrf.mxu0 }
 0x3fd   : > { %2184 = vst [vmem:[#allocation8 + $0x8] sm:$0xff] %v1844_v54  ;;  %v1744_v52 = vpop.f32.mrf.mxu1 }
 0x3fe   : > { %v1979_v55 = vmul.f32 1.442695, %v1961_v30  ;;  %v1946_v18 = vand.u32 2147483647, %v10060_v0  ;;  %2170 = vst [vmem:[#allocation7 + $0x18] sm:$0xff] %v1744_v52 }
 0x3ff   : > { %v1748_v17 = vpop.f32.mrf.mxu1 }
 0x400   : > { %8314 = vpow2.f32 %v1979_v55  ;;  %v1962_v34 = vsub.f32 0.0, %v1946_v18  ;;  %v10064_v35 = vadd.f32 %v10045_v29, %v1748_v17 }
 0x401   : > { %v1750_v46 = vpop.f32.mrf.mxu1 }
 0x402   : > { %v1981_v39 = vmul.f32 1.442695, %v1962_v34  ;;  %v1947_v51 = vand.u32 2147483647, %v10064_v35  ;;  %2171 = vst [vmem:[#allocation7 + $0x20] sm:$0xff] %v1750_v46 }
 0x403   : > { %v1752_v44 = vpop.f32.mrf.mxu1 }
 0x404   : > { %8316 = vpow2.f32 %v1981_v39  ;;  %v1963_v48 = vsub.f32 0.0, %v1947_v51  ;;  %v10068_v31 = vadd.f32 %v10045_v29, %v1752_v44 }
 0x405   : > { %v8311_v19 = vpop.eup %8310  ;;  %v1754_v61 = vpop.f32.mrf.mxu1 }
 0x406   : > { %v2007_v37 = vadd.f32 1.0, %v8311_v19  ;;  %v1983_v62 = vmul.f32 1.442695, %v1963_v48  ;;  %2172 = vst [vmem:[#allocation7 + $0x28] sm:$0xff] %v1754_v61  ;;  %v1948_v20 = vand.u32 2147483647, %v10068_v31 }
 0x407   : > { %v7509_v40 = vpop.f32.mrf.mxu0  ;;  %v1758_v47 = vpop.f32.mrf.mxu1  ;;  %v2010_v61 = vmul.f32 -0.5, %v8311_v19 }
 0x408   : > { %8318 = vlog2.f32 %v2007_v37  ;;  %2189 = vst [vmem:[#allocation8 + $0x30] sm:$0xff] %v7509_v40  ;;  %v10072_v25 = vadd.f32 %v10045_v29, %v1758_v47  ;;  %v1964_v41 = vsub.f32 0.0, %v1948_v20 }
 0x409   : > { %v10074_v36 = vpop.eup %8312  ;;  %8320 = vpow2.f32 %v1983_v62  ;;  %v1857_v30 = vpop.f32.mrf.mxu0 }
 0x40a   : > { %v1760_v54 = vpop.f32.mrf.mxu1  ;;  %v2016_v52 = vadd.f32 1.0, %v10074_v36  ;;  %2187 = vst [vmem:[#allocation8 + $0x20] sm:$0xff] %v1857_v30  ;;  %v1985_v55 = vmul.f32 1.442695, %v1964_v41  ;;  %v1949_v18 = vand.u32 2147483647, %v10072_v25 }
 0x40b   : > { %2173 = vst [vmem:[#allocation7 + $0x30] sm:$0xff] %v1760_v54  ;;  %v7510_v17 = vpop.f32.mrf.mxu0  ;;  %v2013_v30 = vand.u32 2147483647, %v8311_v19  ;;  %v2019_v54 = vmul.f32 -0.5, %v10074_v36 }
 0x40c   : > { %v1762_v34 = vpop.f32.mrf.mxu1  ;;  %8322 = vlog2.f32 %v2016_v52  ;;  %2190 = vst [vmem:[#allocation8 + $0x38] sm:$0xff] %v7510_v17  ;;  %v1965_v51 = vsub.f32 0.0, %v1949_v18  ;;  %v2011_v18 = vadd.f32 1.0, %v2010_v61 }
 0x40d   : > { %v10079_v46 = vadd.f32 %v10045_v29, %v1762_v34  ;;  %v10081_v39 = vpop.eup %8314  ;;  %8324 = vpow2.f32 %v1985_v55  ;;  %v1860_v44 = vpop.f32.mrf.mxu0  ;;  %vm10096_vm4 = vcmp.lt.f32.partialorder %v2013_v30, 0.0004427343  ;;  %v2022_v30 = vand.u32 2147483647, %v10074_v36 }
 0x40e   : > { %v1764_v48 = vpop.f32.mrf.mxu1  ;;  %v2025_v37 = vadd.f32 1.0, %v10081_v39  ;;  %2188 = vst [vmem:[#allocation8 + $0x28] sm:$0xff] %v1860_v44  ;;  %v1987_v62 = vmul.f32 1.442695, %v1965_v51  ;;  %v2028_v15 = vmul.f32 -0.5, %v10081_v39 }
 0x40f   : > { %2174 = vst [vmem:[#allocation7 + $0x38] sm:$0xff] %v1764_v48  ;;  %v1950_v20 = vand.u32 2147483647, %v10079_v46  ;;  %vm2023_vm5 = vcmp.lt.f32.partialorder %v2022_v30, 0.0004427343 }
 0x410   : > { %v1768_v40 = vpop.f32.mrf.mxu1  ;;  %8326 = vlog2.f32 %v2025_v37 }
 0x411   : > { %v10086_v47 = vadd.f32 %v10045_v29, %v1768_v40  ;;  %v10088_v41 = vpop.eup %8316  ;;  %8328 = vpow2.f32 %v1987_v62  ;;  %v1966_v52 = vsub.f32 0.0, %v1950_v20  ;;  %v2020_v62 = vadd.f32 1.0, %v2019_v54 }
 0x412   : > { %v1770_v55 = vpop.f32.mrf.mxu1  ;;  %v2034_v17 = vadd.f32 1.0, %v10088_v41 }
 0x413   : > { %2175 = vst [vmem:[#allocation7 + $0x40] sm:$0xff] %v1770_v55  ;;  %v1989_v34 = vmul.f32 1.442695, %v1966_v52  ;;  %v1951_v51 = vand.u32 2147483647, %v10086_v47  ;;  %v2012_v52 = vmul.f32 %v8311_v19, %v2011_v18  ;;  %v2037_v19 = vmul.f32 -0.5, %v10088_v41 }
 0x414   : > { %v1772_v44 = vpop.f32.mrf.mxu1  ;;  %8330 = vlog2.f32 %v2034_v17  ;;  %v2021_v11 = vmul.f32 %v10074_v36, %v2020_v62 }
 0x415   : > { %v10094_v48 = vadd.f32 %v10045_v29, %v1772_v44  ;;  %v8319_v37 = vpop.eup %8318  ;;  %8332 = vpow2.f32 %v1989_v34  ;;  %v1967_v20 = vsub.f32 0.0, %v1951_v51  ;;  %v2038_v62 = vadd.f32 1.0, %v2037_v19 }
 0x416   : > { %v1774_v61 = vpop.f32.mrf.mxu1  ;;  %v10100_v16 = vpop.eup %8320  ;;  %v2009_v55 = vmul.f32 0.6931472, %v8319_v37 }
 0x417   : > { %v1952_v17 = vand.u32 2147483647, %v10094_v48  ;;  %2176 = vst [vmem:[#allocation7 + $0x48] sm:$0xff] %v1774_v61  ;;  %v7513_v44 = vpop.f32.mrf.mxu0  ;;  %v2043_v14 = vadd.f32 1.0, %v10100_v16  ;;  %v1991_v54 = vmul.f32 1.442695, %v1967_v20 }
 0x418   : > { %2193 = vst [vmem:[#allocation8 + $0x50] sm:$0xff] %v7513_v44  ;;  %v1778_v34 = vpop.f32.mrf.mxu1  ;;  %v2015_v51 = vsel %vm10096_vm4, %v2012_v52, %v2009_v55  ;;  %v2029_v55 = vadd.f32 1.0, %v2028_v15 }
 0x419   : > { %v1968_v18 = vsub.f32 0.0, %v1952_v17  ;;  %v10111_v37 = vadd.f32 %v10045_v29, %v1778_v34  ;;  %v1873_v61 = vpop.f32.mrf.mxu0  ;;  %v8323_v13 = vpop.eup %8322  ;;  %v2151_v12 = vadd.f32 %v2015_v51, %v1927_v59  ;;  %8334 = vlog2.f32 %v2043_v14 }
 0x41a   : > { %2191 = vst [vmem:[#allocation8 + $0x40] sm:$0xff] %v1873_v61  ;;  %v1780_v20 = vpop.f32.mrf.mxu1  ;;  %v10115_v44 = vpop.eup %8324  ;;  %v2018_v40 = vmul.f32 0.6931472, %v8323_v13  ;;  %8336 = vpow2.f32 %v1991_v54  ;;  %v2031_v59 = vand.u32 2147483647, %v10081_v39  ;;  %v2030_v61 = vmul.f32 %v10081_v39, %v2029_v55 }
 0x41b   : > { %v1993_v52 = vmul.f32 1.442695, %v1968_v18  ;;  %2177 = vst [vmem:[#allocation7 + $0x50] sm:$0xff] %v1780_v20  ;;  %v7514_v17 = vpop.f32.mrf.mxu0  ;;  %2199 = vst [vmem:[#allocation2] sm:$0xff] %v2151_v12  ;;  %v2215_v34 = vmul.f32 %v2151_v12, %v9934_v43  ;;  %v2052_v63 = vadd.f32 1.0, %v10115_v44  ;;  %v2046_v18 = vmul.f32 -0.5, %v10100_v16 }
 0x41c   : > { %2194 = vst [vmem:[#allocation8 + $0x58] sm:$0xff] %v7514_v17  ;;  %v1782_v14 = vpop.f32.mrf.mxu1  ;;  %v2024_v36 = vsel %vm2023_vm5, %v2021_v11, %v2018_v40  ;;  %v1953_v13 = vand.u32 2147483647, %v10111_v37  ;;  %v1929_v11 = vmax.f32 %v10056_v27, 0.0  ;;  %vm2032_vm6 = vcmp.lt.f32.partialorder %v2031_v59, 0.0004427343 }
 0x41d   : > { %8338 = vpow2.f32 %v1993_v52  ;;  %v1876_v15 = vpop.f32.mrf.mxu0  ;;  %v8327_v54 = vpop.eup %8326  ;;  %2231 = vst [vmem:[#allocation3] sm:$0xff] %v2215_v34  ;;  %v2152_v51 = vadd.f32 %v2024_v36, %v1928_v42  ;;  %v10123_v12 = vadd.f32 %v10045_v29, %v1782_v14  ;;  %v2040_v40 = vand.u32 2147483647, %v10088_v41 }
 0x41e   : > { %8340 = vlog2.f32 %v2052_v63  ;;  %2192 = vst [vmem:[#allocation8 + $0x48] sm:$0xff] %v1876_v15  ;;  %v1784_v43 = vpop.f32.mrf.mxu1  ;;  %v10125_v30 = vpop.eup %8328  ;;  %v2027_v19 = vmul.f32 0.6931472, %v8327_v54  ;;  %v1969_v20 = vsub.f32 0.0, %v1953_v13  ;;  %v2039_v63 = vmul.f32 %v10088_v41, %v2038_v62 }
 0x41f   : > { %2178 = vst [vmem:[#allocation7 + $0x58] sm:$0xff] %v1784_v43  ;;  %2200 = vst [vmem:[#allocation2 + $0x8] sm:$0xff] %v2152_v51  ;;  %v2216_v42 = vmul.f32 %v2152_v51, %v9943_v38  ;;  %v2061_v52 = vadd.f32 1.0, %v10125_v30  ;;  %v2047_v15 = vadd.f32 1.0, %v2046_v18  ;;  %v1954_v39 = vand.u32 2147483647, %v10123_v12 }
 0x420   : > { %v1788_v17 = vpop.f32.mrf.mxu1  ;;  %v2033_v34 = vsel %vm2032_vm6, %v2030_v61, %v2027_v19  ;;  %v1995_v14 = vmul.f32 1.442695, %v1969_v20  ;;  %v2055_v59 = vmul.f32 -0.5, %v10115_v44  ;;  %v1930_v62 = vmax.f32 %v10060_v0, 0.0 }
 0x421   : > { %v8331_v36 = vpop.eup %8330  ;;  %2232 = vst [vmem:[#allocation3 + $0x8] sm:$0xff] %v2216_v42  ;;  %v2153_v27 = vadd.f32 %v2033_v34, %v1929_v11  ;;  %8342 = vlog2.f32 %v2061_v52  ;;  %v10138_v54 = vadd.f32 %v10045_v29, %v1788_v17  ;;  %vm2041_vm7 = vcmp.lt.f32.partialorder %v2040_v40, 0.0004427343 }
 0x422   : > { %v1790_v55 = vpop.f32.mrf.mxu1  ;;  %v10134_v13 = vpop.eup %8332  ;;  %v2036_v38 = vmul.f32 0.6931472, %v8331_v36  ;;  %8344 = vpow2.f32 %v1995_v14  ;;  %v2049_v11 = vand.u32 2147483647, %v10100_v16  ;;  %v1970_v19 = vsub.f32 0.0, %v1954_v39 }
 0x423   : > { %2179 = vst [vmem:[#allocation7 + $0x60] sm:$0xff] %v1790_v55  ;;  %2201 = vst [vmem:[#allocation2 + $0x10] sm:$0xff] %v2153_v27  ;;  %v2217_v41 = vmul.f32 %v2153_v27, %v9950_v28  ;;  %v2070_v51 = vadd.f32 1.0, %v10134_v13  ;;  %v2048_v20 = vmul.f32 %v10100_v16, %v2047_v15  ;;  %v1955_v42 = vand.u32 2147483647, %v10138_v54 }
 0x424   : > { %v1792_v18 = vpop.f32.mrf.mxu1  ;;  %v2042_v43 = vsel %vm2041_vm7, %v2039_v63, %v2036_v38  ;;  %v2056_v28 = vadd.f32 1.0, %v2055_v59  ;;  %v2058_v0 = vand.u32 2147483647, %v10115_v44  ;;  %v1997_v40 = vmul.f32 1.442695, %v1970_v19 }
 0x425   : > { %2233 = vst [vmem:[#allocation3 + $0x10] sm:$0xff] %v2217_v41  ;;  %v2154_v61 = vadd.f32 %v2042_v43, %v1930_v62  ;;  %8346 = vlog2.f32 %v2070_v51  ;;  %v10148_v34 = vadd.f32 %v10045_v29, %v1792_v18  ;;  %v2064_v16 = vmul.f32 -0.5, %v10125_v30 }
 0x426   : > { %v1794_v52 = vpop.f32.mrf.mxu1  ;;  %v8335_v17 = vpop.eup %8334  ;;  %v1971_v27 = vsub.f32 0.0, %v1955_v42  ;;  %v1931_v55 = vmax.f32 %v10064_v35, 0.0  ;;  %vm2050_vm8 = vcmp.lt.f32.partialorder %v2049_v11, 0.0004427343  ;;  %8348 = vpow2.f32 %v1997_v40 }
 0x427   : > { %2180 = vst [vmem:[#allocation7 + $0x68] sm:$0xff] %v1794_v52  ;;  %v10150_v63 = vpop.eup %8336  ;;  %2202 = vst [vmem:[#allocation2 + $0x18] sm:$0xff] %v2154_v61  ;;  %v2218_v14 = vmul.f32 %v2154_v61, %v9958_v49  ;;  %v2045_v36 = vmul.f32 0.6931472, %v8335_v17  ;;  %v7517_v15 = vpop.f32.mrf.mxu0  ;;  %v2073_v62 = vmul.f32 -0.5, %v10134_v13  ;;  %v1932_v35 = vmax.f32 %v10068_v31, 0.0 }
 0x428   : > { %v1798_v39 = vpop.f32.mrf.mxu1  ;;  %v2079_v38 = vadd.f32 1.0, %v10150_v63  ;;  %2197 = vst [vmem:[#allocation8 + $0x70] sm:$0xff] %v7517_v15  ;;  %v1999_v49 = vmul.f32 1.442695, %v1971_v27  ;;  %v1956_v51 = vand.u32 2147483647, %v10148_v34 }
 0x429   : > { %2234 = vst [vmem:[#allocation3 + $0x18] sm:$0xff] %v2218_v14  ;;  %v2051_v41 = vsel %vm2050_vm8, %v2048_v20, %v2045_v36  ;;  %v1889_v18 = vpop.f32.mrf.mxu0  ;;  %vm10161_vm9 = vcmp.lt.f32.partialorder %v2058_v0, 0.0004427343  ;;  %v2057_v20 = vmul.f32 %v10115_v44, %v2056_v28  ;;  %v2065_v52 = vadd.f32 1.0, %v2064_v16 }
 0x42a   : > { %v10156_v59 = vpop.eup %8338  ;;  %v1800_v43 = vpop.f32.mrf.mxu1  ;;  %v2155_v61 = vadd.f32 %v2051_v41, %v1931_v55  ;;  %8350 = vlog2.f32 %v2079_v38  ;;  %2195 = vst [vmem:[#allocation8 + $0x60] sm:$0xff] %v1889_v18  ;;  %v2067_v31 = vand.u32 2147483647, %v10125_v30  ;;  %v1972_v0 = vsub.f32 0.0, %v1956_v51 }
 0x42b   : > { %v8341_v19 = vpop.eup %8340  ;;  %2181 = vst [vmem:[#allocation7 + $0x70] sm:$0xff] %v1800_v43  ;;  %v2088_v17 = vadd.f32 1.0, %v10156_v59  ;;  %v7518_v40 = vpop.f32.mrf.mxu0  ;;  %8352 = vpow2.f32 %v1999_v49  ;;  %v2074_v15 = vadd.f32 1.0, %v2073_v62  ;;  %v2082_v38 = vmul.f32 -0.5, %v10150_v63 }
 0x42c   : > { %v2054_v42 = vmul.f32 0.6931472, %v8341_v19  ;;  %v1802_v14 = vpop.f32.mrf.mxu1  ;;  %2203 = vst [vmem:[#allocation2 + $0x20] sm:$0xff] %v2155_v61  ;;  %v2219_v36 = vmul.f32 %v2155_v61, %v9967_v23  ;;  %2198 = vst [vmem:[#allocation8 + $0x78] sm:$0xff] %v7518_v40  ;;  %v2001_v41 = vmul.f32 1.442695, %v1972_v0  ;;  %v10173_v23 = vadd.f32 %v10045_v29, %v1798_v39 }
 0x42d   : > { %8354 = vlog2.f32 %v2088_v17  ;;  %v1892_v55 = vpop.f32.mrf.mxu0  ;;  %v1933_v51 = vmax.f32 %v10072_v25, 0.0  ;;  %v2066_v62 = vmul.f32 %v10125_v30, %v2065_v52  ;;  %v10180_v43 = vadd.f32 %v10045_v29, %v1802_v14 }
 0x42e   : > { %v2060_v27 = vsel %vm10161_vm9, %v2057_v20, %v2054_v42  ;;  %v1804_v44 = vpop.f32.mrf.mxu1  ;;  %v8343_v28 = vpop.eup %8342  ;;  %2235 = vst [vmem:[#allocation3 + $0x20] sm:$0xff] %v2219_v36  ;;  %2196 = vst [vmem:[#allocation8 + $0x68] sm:$0xff] %v1892_v55  ;;  %vm2068_vm10 = vcmp.lt.f32.partialorder %v2067_v31, 0.0004427343  ;;  %v2076_v61 = vand.u32 2147483647, %v10134_v13  ;;  %8356 = vpow2.f32 %v2001_v41 }
 0x42f   : > { %v2156_v16 = vadd.f32 %v2060_v27, %v1932_v35  ;;  %2182 = vst [vmem:[#allocation7 + $0x78] sm:$0xff] %v1804_v44  ;;  %v10175_v49 = vpop.eup %8344  ;;  %v2063_v18 = vmul.f32 0.6931472, %v8343_v28  ;;  %v1957_v11 = vand.u32 2147483647, %v10173_v23  ;;  %v2075_v30 = vmul.f32 %v10134_v13, %v2074_v15 }
 0x430   : > { %v2097_v39 = vadd.f32 1.0, %v10175_v49  ;;  %v2083_v20 = vadd.f32 1.0, %v2082_v38  ;;  %v2091_v52 = vmul.f32 -0.5, %v10156_v59  ;;  %v1958_v17 = vand.u32 2147483647, %v10180_v43 }
 0x431   : > { %2204 = vst [vmem:[#allocation2 + $0x28] sm:$0xff] %v2156_v16  ;;  %v2220_v19 = vmul.f32 %v2156_v16, %v9975_v22  ;;  %v2069_v35 = vsel %vm2068_vm10, %v2066_v62, %v2063_v18  ;;  %v1973_v22 = vsub.f32 0.0, %v1957_v11  ;;  %v1934_v14 = vmax.f32 %v10079_v46, 0.0 }
 0x432   : > { %v8347_v42 = vpop.eup %8346  ;;  %v2157_v25 = vadd.f32 %v2069_v35, %v1933_v51  ;;  %8358 = vlog2.f32 %v2097_v39  ;;  %vm2077_vm11 = vcmp.lt.f32.partialorder %v2076_v61, 0.0004427343  ;;  %v2085_v0 = vand.u32 2147483647, %v10150_v63 }
 0x433   : > { %2236 = vst [vmem:[#allocation3 + $0x28] sm:$0xff] %v2220_v19  ;;  %v2072_v29 = vmul.f32 0.6931472, %v8347_v42  ;;  %v10191_v36 = vpop.eup %8348  ;;  %v2003_v13 = vmul.f32 1.442695, %v1973_v22  ;;  %v1974_v27 = vsub.f32 0.0, %v1958_v17  ;;  %v2084_v16 = vmul.f32 %v10150_v63, %v2083_v20 }
 0x434   : > { %2205 = vst [vmem:[#allocation2 + $0x30] sm:$0xff] %v2157_v25  ;;  %v2221_v40 = vmul.f32 %v2157_v25, %v9987_v33  ;;  %v2094_v55 = vand.u32 2147483647, %v10156_v59  ;;  %v2106_v44 = vadd.f32 1.0, %v10191_v36  ;;  %v2092_v33 = vadd.f32 1.0, %v2091_v52 }
 0x435   : > { %v2078_v31 = vsel %vm2077_vm11, %v2075_v30, %v2072_v29  ;;  %8360 = vpow2.f32 %v2003_v13  ;;  %v2005_v46 = vmul.f32 1.442695, %v1974_v27  ;;  %v2100_v51 = vmul.f32 -0.5, %v10175_v49 }
 0x436   : > { %2237 = vst [vmem:[#allocation3 + $0x30] sm:$0xff] %v2221_v40  ;;  %v2158_v15 = vadd.f32 %v2078_v31, %v1934_v14  ;;  %8362 = vlog2.f32 %v2106_v44  ;;  %v1935_v62 = vmax.f32 %v10086_v47, 0.0  ;;  %vm2086_vm12 = vcmp.lt.f32.partialorder %v2085_v0, 0.0004427343 }
 0x437   : > { %v8351_v28 = vpop.eup %8350  ;;  %8364 = vpow2.f32 %v2005_v46  ;;  %v2093_v11 = vmul.f32 %v10156_v59, %v2092_v33  ;;  %vm2095_vm13 = vcmp.lt.f32.partialorder %v2094_v55, 0.0004427343  ;;  %v2101_v42 = vadd.f32 1.0, %v2100_v51 }
 0x438   : > { %2206 = vst [vmem:[#allocation2 + $0x38] sm:$0xff] %v2158_v15  ;;  %v2222_v38 = vmul.f32 %v2158_v15, %v9993_v57  ;;  %v2081_v41 = vmul.f32 0.6931472, %v8351_v28  ;;  %v10199_v18 = vpop.eup %8352  ;;  %v1936_v57 = vmax.f32 %v10094_v48, 0.0  ;;  %v2103_v30 = vand.u32 2147483647, %v10175_v49 }
 0x439   : > { %v2115_v63 = vadd.f32 1.0, %v10199_v18  ;;  %v2109_v52 = vmul.f32 -0.5, %v10191_v36  ;;  %v2102_v40 = vmul.f32 %v10175_v49, %v2101_v42  ;;  %v1937_v14 = vmax.f32 %v10111_v37, 0.0 }
 0x43a   : > { %v8355_v19 = vpop.eup %8354  ;;  %2238 = vst [vmem:[#allocation3 + $0x38] sm:$0xff] %v2222_v38  ;;  %v2087_v61 = vsel %vm2086_vm12, %v2084_v16, %v2081_v41  ;;  %vm2104_vm14 = vcmp.lt.f32.partialorder %v2103_v30, 0.0004427343  ;;  %v2112_v0 = vand.u32 2147483647, %v10191_v36  ;;  %v2118_v13 = vmul.f32 -0.5, %v10199_v18 }
 0x43b   : > { %v2159_v39 = vadd.f32 %v2087_v61, %v1935_v62  ;;  %v2090_v35 = vmul.f32 0.6931472, %v8355_v19  ;;  %8366 = vlog2.f32 %v2115_v63  ;;  %v8357_v20 = vpop.eup %8356  ;;  %v2110_v31 = vadd.f32 1.0, %v2109_v52 }
 0x43c   : > { %v2124_v17 = vadd.f32 1.0, %v8357_v20  ;;  %v1938_v44 = vmax.f32 %v10123_v12, 0.0  ;;  %vm2113_vm15 = vcmp.lt.f32.partialorder %v2112_v0, 0.0004427343  ;;  %v2119_v33 = vadd.f32 1.0, %v2118_v13 }
 0x43d   : > { %2207 = vst [vmem:[#allocation2 + $0x40] sm:$0xff] %v2159_v39  ;;  %v2223_v25 = vmul.f32 %v2159_v39, %v9999_v32  ;;  %v2096_v47 = vsel %vm2095_vm13, %v2093_v11, %v2090_v35  ;;  %v2111_v16 = vmul.f32 %v10191_v36, %v2110_v31  ;;  %v2121_v46 = vand.u32 2147483647, %v10199_v18 }
 0x43e   : > { %v2160_v29 = vadd.f32 %v2096_v47, %v1936_v57  ;;  %8368 = vlog2.f32 %v2124_v17  ;;  %v2127_v38 = vmul.f32 -0.5, %v8357_v20  ;;  %v2120_v12 = vmul.f32 %v10199_v18, %v2119_v33 }
 0x43f   : > { %v8359_v22 = vpop.eup %8358  ;;  %2239 = vst [vmem:[#allocation3 + $0x40] sm:$0xff] %v2223_v25  ;;  %v1939_v36 = vmax.f32 %v10138_v54, 0.0  ;;  %vm2122_vm0 = vcmp.lt.f32.partialorder %v2121_v46, 0.0004427343  ;;  %v2130_v35 = vand.u32 2147483647, %v8357_v20 }
 0x440   : > { %2208 = vst [vmem:[#allocation2 + $0x48] sm:$0xff] %v2160_v29  ;;  %v2224_v59 = vmul.f32 %v2160_v29, %v10004_v21  ;;  %v2099_v48 = vmul.f32 0.6931472, %v8359_v22  ;;  %v2128_v63 = vadd.f32 1.0, %v2127_v38  ;;  %v1940_v18 = vmax.f32 %v10148_v34, 0.0 }
 0x441   : > { %vm2131_vm1 = vcmp.lt.f32.partialorder %v2130_v35, 0.0004427343 }
 0x442   : > { %2240 = vst [vmem:[#allocation3 + $0x48] sm:$0xff] %v2224_v59  ;;  %v2105_v32 = vsel %vm2104_vm14, %v2102_v40, %v2099_v48  ;;  %v8361_v15 = vpop.eup %8360  ;;  %v2129_v30 = vmul.f32 %v8357_v20, %v2128_v63  ;;  %v1941_v20 = vmax.f32 %v10173_v23, 0.0 }
 0x443   : > { %v2161_v27 = vadd.f32 %v2105_v32, %v1937_v14  ;;  %v8363_v55 = vpop.eup %8362  ;;  %v2133_v49 = vadd.f32 1.0, %v8361_v15  ;;  %v2136_v57 = vmul.f32 -0.5, %v8361_v15  ;;  %v2139_v22 = vand.u32 2147483647, %v8361_v15 }
 0x444   : > { %v8365_v28 = vpop.eup %8364  ;;  %v2108_v37 = vmul.f32 0.6931472, %v8363_v55 }
 0x445   : > { %2209 = vst [vmem:[#allocation2 + $0x50] sm:$0xff] %v2161_v27  ;;  %v2225_v21 = vmul.f32 %v2161_v27, %v10010_v24  ;;  %8370 = vlog2.f32 %v2133_v49  ;;  %v2142_v41 = vadd.f32 1.0, %v8365_v28  ;;  %v2145_v29 = vmul.f32 -0.5, %v8365_v28 }
 0x446   : > { %v2114_v51 = vsel %vm2113_vm15, %v2111_v16, %v2108_v37  ;;  %v2137_v54 = vadd.f32 1.0, %v2136_v57  ;;  %v2148_v40 = vand.u32 2147483647, %v8365_v28  ;;  %vm2140_vm2 = vcmp.lt.f32.partialorder %v2139_v22, 0.0004427343 }
 0x447   : > { %2241 = vst [vmem:[#allocation3 + $0x50] sm:$0xff] %v2225_v21  ;;  %v2162_v19 = vadd.f32 %v2114_v51, %v1938_v44  ;;  %8372 = vlog2.f32 %v2142_v41  ;;  %v2146_v17 = vadd.f32 1.0, %v2145_v29  ;;  %v1942_v27 = vmax.f32 %v10180_v43, 0.0 }
 0x448   : > { %v8367_v62 = vpop.eup %8366  ;;  %v2138_v32 = vmul.f32 %v8361_v15, %v2137_v54  ;;  %vm2149_vm3 = vcmp.lt.f32.partialorder %v2148_v40, 0.0004427343 }
 0x449   : > { %v2117_v24 = vmul.f32 0.6931472, %v8367_v62  ;;  %2210 = vst [vmem:[#allocation2 + $0x58] sm:$0xff] %v2162_v19  ;;  %v2226_v61 = vmul.f32 %v2162_v19, %v10015_v56  ;;  %v2147_v0 = vmul.f32 %v8365_v28, %v2146_v17 }
 0x44b   : > { %v2123_v39 = vsel %vm2122_vm0, %v2120_v12, %v2117_v24  ;;  %2242 = vst [vmem:[#allocation3 + $0x58] sm:$0xff] %v2226_v61  ;;  %v8369_v42 = vpop.eup %8368 }
 0x44c   : > { %v2163_v11 = vadd.f32 %v2123_v39, %v1939_v36  ;;  %v2126_v47 = vmul.f32 0.6931472, %v8369_v42 }
 0x44e   : > { %2211 = vst [vmem:[#allocation2 + $0x60] sm:$0xff] %v2163_v11  ;;  %v2227_v25 = vmul.f32 %v2163_v11, %v10021_v53  ;;  %v2132_v56 = vsel %vm2131_vm1, %v2129_v30, %v2126_v47 }
 0x44f   : > { %v2164_v52 = vadd.f32 %v2132_v56, %v1940_v18 }
 0x450   : > { %2243 = vst [vmem:[#allocation3 + $0x60] sm:$0xff] %v2227_v25 }
 0x451   : > { %2212 = vst [vmem:[#allocation2 + $0x68] sm:$0xff] %v2164_v52  ;;  %v2228_v48 = vmul.f32 %v2164_v52, %v10026_v45 }
 0x452   : > { %v8371_v59 = vpop.eup %8370 }
 0x453   : > { %v2135_v14 = vmul.f32 0.6931472, %v8371_v59  ;;  %2244 = vst [vmem:[#allocation3 + $0x68] sm:$0xff] %v2228_v48 }
 0x454   : > { %v8373_v53 = vpop.eup %8372 }
 0x455   : > { %v2141_v34 = vsel %vm2140_vm2, %v2138_v32, %v2135_v14  ;;  %v2144_v31 = vmul.f32 0.6931472, %v8373_v53 }
 0x456   : > { %v2165_v13 = vadd.f32 %v2141_v34, %v1941_v20 }
 0x457   : > { %v2150_v55 = vsel %vm2149_vm3, %v2147_v0, %v2144_v31 }
 0x458   : > { %2213 = vst [vmem:[#allocation2 + $0x70] sm:$0xff] %v2165_v13  ;;  %v2229_v45 = vmul.f32 %v2165_v13, %v10032_v50  ;;  %v2166_v21 = vadd.f32 %v2150_v55, %v1942_v27 }
 0x45a   : > { %2245 = vst [vmem:[#allocation3 + $0x70] sm:$0xff] %v2229_v45  ;;  %2214 = vst [vmem:[#allocation2 + $0x78] sm:$0xff] %v2166_v21  ;;  %v2230_v15 = vmul.f32 %v2166_v21, %v10037_v26 }
 0x45c   : > { %2246 = vst [vmem:[#allocation3 + $0x78] sm:$0xff] %v2230_v15 }
 0x45d LB: >> { %v13956_v10 = vld [vmem:[#allocation34_spill] sm:$0xff]  ;;  %v13957_v58 = vld [vmem:[#allocation41_spill] sm:$0xff]  ;;  %v13958_v60 = vld [vmem:[#allocation43_spill] sm:$0xff]  ;;  %v9220_v23 = vmov 1966171168   ;;  %v9221_v50 = vmov 0   ;;  %s9204_s30 = sphi %s10231_s30, %s2284_s30  }
 0x45e   : >> { %v13959_v9 = vld [vmem:[#allocation33_spill] sm:$0xff]  ;;  %v13960_v8 = vld [vmem:[#allocation32_spill] sm:$0xff]  ;;  %v13961_v6 = vld [vmem:[#allocation30_spill] sm:$0xff]  ;;  %v2335_v43 = vunpack.c.l.s4 %v9220_v23  ;;  %8374 = vset.pattern.permute.xlu1 %v9221_v50  ;;  %s10238_s5 = sshll.u32 %s9204_s30, 4  ;;  %v9222_v25 = vmov 1   ;;  %v9223_v30 = vmov 2  }
 0x45f   : >> { %v13962_v4 = vld [vmem:[#allocation28_spill] sm:$0xff]  ;;  %v13963_v7 = vld [vmem:[#allocation31_spill] sm:$0xff]  ;;  %v13964_v1 = vld [vmem:[#allocation25_spill] sm:$0xff]  ;;  %s2296_s26 = scalar_lea.vmem [#allocation7], %s10238_s5  ;;  %s2286_s23 = scalar_lea.vmem [#allocation2], %s10238_s5  ;;  %v9224_v53 = vmov 3  }
 0x460   : >> { %v13965_v5 = vld [vmem:[#allocation29_spill] sm:$0xff]  ;;  %v13966_v3 = vld [vmem:[#allocation27_spill] sm:$0xff]  ;;  %v13967_v2 = vld [vmem:[#allocation26_spill] sm:$0xff]  ;;  %v2336_v26 = vunpack.c.0.s8 %v2335_v43  ;;  %v13702_v20 = vmov 4   ;;  %v13701_v27 = vmov 5   ;;  %vm9229_vm4 = vmmov 0  }
 0x461   : >> { %v2297_v44 = vld [vmem:[%s2296_s26] sm:$0xff]  ;;  %v2288_v28 = vld [vmem:[%s2286_s23 + $0x8] sm:$0xff]  ;;  %s2292_s25 = scalar_lea.vmem [#allocation8], %s10238_s5  ;;  %s10687_s27 = scalar_lea.vmem [#allocation3], %s10238_s5  ;;  %vm6521_vm5 = vcmask 1040384   ;;  %vm6523_vm6 = vcmask 1041408  }
 0x462   : >> { %v10242_v49 = vld [vmem:[%s2286_s23] sm:$0xff]  ;;  %v10245_v37 = vsub.s32 %v2336_v26, %v13957_v58  ;;  %2299 = vxpose.xlu0.b32.start [1/2] (short) %v2297_v44, 128  ;;  %v2382_v33 = vcombine.high %v2288_v28, %v2288_v28  ;;  %v2298_v46 = vld [vmem:[%s2296_s26 + $0x8] sm:$0xff]  ;;  %vm6525_vm7 = vcmask 1042432   ;;  %vm6527_vm8 = vcmask 1043456   ;;  %s6542_s15 = scalar_lea.vmem [#allocation6], %s10238_s5  ;;  %s2284_s30 = sadd.s32 1, %s9204_s30  }
 0x463   : >> { %v2333_v16 = vcombine.high %v10242_v49, %v10242_v49  ;;  %vm6529_vm9 = vcmask 1044480   ;;  %vm6531_vm10 = vcmask 1045504   ;;  %vm6533_vm11 = vcmask 1046528   ;;  %p2281_p1 = scmp.ge.s32.totalorder %s2284_s30, 8  }
 0x464   : >> { %v2389_v41 = vrot.slane %v2288_v28, %v10245_v37  ;;  %v2396_v51 = vrot.slane %v2382_v33, %v10245_v37  ;;  %v13703_v28 = vmov 0.0   ;;  %s7196_s14 = sshll.u32 (%p2281_p1), %s9323_s21, 11  ;;  %s6887_s7 = sshll.u32 (%p2281_p1), %s10229_s22, 4  ;;  %s13623_s7 = int_to_ptr.vmem [resolvable:$true] %s6887_s7 }
 0x465   : >> { %v2347_v38 = vrot.slane %v2333_v16, %v10245_v37  ;;  %7519 = vmatprep.subr.bf16.mxu0 %v13703_v28  ;;  %7539 = vmatprep.subr.bf16.mxu1 %v13703_v28  ;;  %s13621_s26 = scalar_lea.hbm (%p2281_p1), %s13681_s11, %s7196_s14  ;;  %s6873_s21 = scalar_lea.sflag (%p2281_p1), [#allocation12], %s9457_s9 }
 0x466   : >> { %2300 = vxpose.xlu0.b32.end [2/2] (short) %v2298_v46, 128  ;;  %v2397_v24 = vcombine.high %v2389_v41, %v2389_v41  ;;  %v2398_v12 = vcombine.high %v2396_v51, %v2396_v51  ;;  %v10256_v61 = vrot.slane %v2389_v41, %v10245_v37  ;;  %v10259_v36 = vrot.slane %v2396_v51, %v10245_v37  ;;  %s9124_s23 = scalar_lea.vmem (%p2281_p1), %s13623_s7, 2048  ;;  %p14589_p12 = scmp.ne.s32.totalorder (%p2281_p1), %s13912_s29, 0 }
 0x467   : >> { %v2349_v62 = vcombine.high %v2347_v38, %v2347_v38  ;;  %v10253_v19 = vrot.slane %v2347_v38, %v10245_v37  ;;  %v13700_v38 = vmov 6   ;;  %p9125_p2 = scmp.ne.s32.totalorder (%p2281_p1), %s13623_s7, %s9124_s23 }
 0x468   : >> { %13968 = vst [vmem:[#allocation44_spill] sm:$0xff] %v10256_v61  ;;  %13969 = vst [vmem:[#allocation45_spill] sm:$0xff] %v10259_v36  ;;  %v10265_v39 = vrot.slane %v2397_v24, %v10245_v37  ;;  %v10268_v35 = vrot.slane %v2398_v12, %v10245_v37  ;;  %v2340_v24 = vrot.slane %v10242_v49, %v10245_v37 }
 0x469   : >> { %v10262_v63 = vrot.slane %v2349_v62, %v10245_v37  ;;  %p9126_p7 = pnand (%p2281_p1), %p9125_p2, %p14589_p12 }
 0x46a   : >> { %13971 = vst [vmem:[#allocation47_spill] sm:$0xff] %v10265_v39  ;;  %13972 = vst [vmem:[#allocation48_spill] sm:$0xff] %v10268_v35 }
 0x46b   : >> { %13970 = vst [vmem:[#allocation46_spill] sm:$0xff] %v10262_v63  ;;  %p9127_p9 = pneg (%p2281_p1), %p9126_p7 }
 0x48f   : >> { %8375 = vset.pattern.permute.xlu0 %v9221_v50 }
 0x4de   : >> { %v10271_v11 = vpop.trf.xlu0 }
 0x4df   : >> { %13973 = vst [vmem:[#allocation49_spill] sm:$0xff] %v10271_v11  ;;  %3569 = vperm.xlu1 %8374, %v10271_v11  }
 0x4e2   : >> { %v10274_v57 = vpop.trf.xlu0 }
 0x4e3   : >> { %13974 = vst [vmem:[#allocation50_spill] sm:$0xff] %v10274_v57  ;;  %3574 = vperm.xlu1 %8374, %v10274_v57  }
 0x4e6   : >> { %v10277_v42 = vpop.trf.xlu0 }
 0x4e7   : >> { %13975 = vst [vmem:[#allocation51_spill] sm:$0xff] %v10277_v42  ;;  %8376 = vset.pattern.permute.xlu1 %v9222_v25  ;;  %3579 = vperm.xlu0 %8375, %v10277_v42  }
 0x4e8   : >> { %3765 = vperm.xlu1 %8376, %v10271_v11  }
 0x4ea   : >> { %v10282_v47 = vpop.trf.xlu0 }
 0x4eb   : >> { %13976 = vst [vmem:[#allocation52_spill] sm:$0xff] %v10282_v47  ;;  %8378 = vset.pattern.permute.xlu0 %v9223_v30 }
 0x4ec   : >> { %3769 = vperm.xlu1 %8376, %v10274_v57   ;;  %3954 = vperm.xlu0 %8378, %v10274_v57  }
 0x4ee   : >> { %v10287_v29 = vpop.trf.xlu0 }
 0x4ef   : >> { %13977 = vst [vmem:[#allocation53_spill] sm:$0xff] %v10287_v29 }
 0x4f0   : >> { %8377 = vset.pattern.permute.xlu1 %v9223_v30  ;;  %3966 = vperm.xlu0 %8378, %v10287_v29  }
 0x4f1   : >> { %3950 = vperm.xlu1 %8377, %v10271_v11  }
 0x4f2   : >> { %v10292_v18 = vpop.trf.xlu0 }
 0x4f3   : >> { %13978 = vst [vmem:[#allocation54_spill] sm:$0xff] %v10292_v18 }
 0x4f5   : >> { %8379 = vset.pattern.permute.xlu1 %v9222_v25 }
 0x4f6   : >> { %3773 = vperm.xlu1 %8379, %v10277_v42   ;;  %v10296_v56 = vpop.trf.xlu0 }
 0x4f7   : >> { %13979 = vst [vmem:[#allocation55_spill] sm:$0xff] %v10296_v56  ;;  %3974 = vperm.xlu0 %8378, %v10296_v56  }
 0x4fa   : >> { %8380 = vset.pattern.permute.xlu1 %v9223_v30  ;;  %v10300_v54 = vpop.trf.xlu0 }
 0x4fb   : >> { %13980 = vst [vmem:[#allocation56_spill] sm:$0xff] %v10300_v54  ;;  %3958 = vperm.xlu1 %8380, %v10277_v42  }
 0x4fe   : >> { %v10303_v52 = vpop.trf.xlu0 }
 0x4ff   : >> { %13981 = vst [vmem:[#allocation57_spill] sm:$0xff] %v10303_v52  ;;  %8381 = vset.pattern.permute.xlu1 %v9221_v50  ;;  %3982 = vperm.xlu0 %8378, %v10303_v52  }
 0x500   : >> { %3584 = vperm.xlu1 %8381, %v10282_v47  }
 0x502   : >> { %v10308_v22 = vpop.trf.xlu0 }
 0x503   : >> { %13982 = vst [vmem:[#allocation58_spill] sm:$0xff] %v10308_v22  ;;  %8403 = vset.pattern.permute.xlu0 %v9222_v25 }
 0x504   : >> { %8382 = vset.pattern.permute.xlu1 %v9222_v25 }
 0x505   : >> { %3777 = vperm.xlu1 %8382, %v10282_v47  }
 0x506   : >> { %v10313_v17 = vpop.trf.xlu0 }
 0x507   : >> { %13983 = vst [vmem:[#allocation59_spill] sm:$0xff] %v10313_v17 }
 0x509   : >> { %8383 = vset.pattern.permute.xlu1 %v9223_v30 }
 0x50a   : >> { %3962 = vperm.xlu1 %8383, %v10282_v47   ;;  %v10317_v59 = vpop.trf.xlu0 }
 0x50b   : >> { %13984 = vst [vmem:[#allocation60_spill] sm:$0xff] %v10317_v59 }
 0x50e   : >> { %8384 = vset.pattern.permute.xlu1 %v9221_v50  ;;  %v10320_v48 = vpop.trf.xlu0 }
 0x50f   : >> { %13985 = vst [vmem:[#allocation61_spill] sm:$0xff] %v10320_v48  ;;  %3589 = vperm.xlu1 %8384, %v10287_v29   ;;  %3813 = vperm.xlu0 %8403, %v10320_v48  }
 0x512   : >> { %v10324_v40 = vpop.trf.xlu0 }
 0x513   : >> { %13986 = vst [vmem:[#allocation62_spill] sm:$0xff] %v10324_v40  ;;  %8385 = vset.pattern.permute.xlu1 %v9222_v25 }
 0x514   : >> { %3781 = vperm.xlu1 %8385, %v10287_v29  }
 0x516   : >> { %v10328_v14 = vpop.trf.xlu0 }
 0x517   : >> { %13987 = vst [vmem:[#allocation63_spill] sm:$0xff] %v10328_v14 }
 0x518   : >> { %8386 = vset.pattern.permute.xlu1 %v9221_v50 }
 0x519   : >> { %3594 = vperm.xlu1 %8386, %v10292_v18  }
 0x51a   : >> { %v10332_v32 = vpop.trf.xlu0 }
 0x51b   : >> { %13988 = vst [vmem:[#allocation64_spill] sm:$0xff] %v10332_v32  ;;  %3825 = vperm.xlu0 %8403, %v10332_v32  }
 0x51d   : >> { %8387 = vset.pattern.permute.xlu1 %v9222_v25 }
 0x51e   : >> { %3785 = vperm.xlu1 %8387, %v10292_v18  }
 0x51f   : >> { %8409 = vset.pattern.permute.xlu0 %v9223_v30 }
 0x520   : >> { %3990 = vperm.xlu0 %8409, %v10313_v17  }
 0x522   : >> { %8388 = vset.pattern.permute.xlu1 %v9223_v30 }
 0x523   : >> { %3970 = vperm.xlu1 %8388, %v10292_v18  }
 0x524   : >> { %3998 = vperm.xlu0 %8409, %v10320_v48  }
 0x527   : >> { %8389 = vset.pattern.permute.xlu1 %v9221_v50 }
 0x528   : >> { %3599 = vperm.xlu1 %8389, %v10296_v56   ;;  %4006 = vperm.xlu0 %8409, %v10328_v14  }
 0x52c   : >> { %8390 = vset.pattern.permute.xlu1 %v9222_v25  ;;  %8410 = vset.pattern.permute.xlu0 %v9224_v53 }
 0x52d   : >> { %3789 = vperm.xlu1 %8390, %v10296_v56   ;;  %4134 = vperm.xlu0 %8410, %v10271_v11  }
 0x531   : >> { %8391 = vset.pattern.permute.xlu1 %v9221_v50  ;;  %4146 = vperm.xlu0 %8410, %v10282_v47  }
 0x532   : >> { %3604 = vperm.xlu1 %8391, %v10300_v54  }
 0x535   : >> { %4154 = vperm.xlu0 %8410, %v10292_v18  }
 0x536   : >> { %8392 = vset.pattern.permute.xlu1 %v9222_v25 }
 0x537   : >> { %3793 = vperm.xlu1 %8392, %v10300_v54  }
 0x539   : >> { %4162 = vperm.xlu0 %8410, %v10300_v54  }
 0x53b   : >> { %8393 = vset.pattern.permute.xlu1 %v9223_v30 }
 0x53c   : >> { %3978 = vperm.xlu1 %8393, %v10300_v54  }
 0x53d   : >> { %4170 = vperm.xlu0 %8410, %v10308_v22  }
 0x540   : >> { %8394 = vset.pattern.permute.xlu1 %v9221_v50 }
 0x541   : >> { %3609 = vperm.xlu1 %8394, %v10303_v52   ;;  %4178 = vperm.xlu0 %8410, %v10317_v59  }
 0x545   : >> { %8395 = vset.pattern.permute.xlu1 %v9222_v25  ;;  %4186 = vperm.xlu0 %8410, %v10324_v40  }
 0x546   : >> { %3797 = vperm.xlu1 %8395, %v10303_v52  }
 0x549   : >> { %4194 = vperm.xlu0 %8410, %v10332_v32  }
 0x54a   : >> { %8396 = vset.pattern.permute.xlu1 %v9221_v50 }
 0x54b   : >> { %3614 = vperm.xlu1 %8396, %v10308_v22  }
 0x54d   : >> { %8413 = vset.pattern.permute.xlu0 %v13702_v20 }
 0x54e   : >> { %4321 = vperm.xlu0 %8413, %v10274_v57  }
 0x54f   : >> { %8397 = vset.pattern.permute.xlu1 %v9222_v25 }
 0x550   : >> { %3801 = vperm.xlu1 %8397, %v10308_v22  }
 0x552   : >> { %4333 = vperm.xlu0 %8413, %v10287_v29  }
 0x554   : >> { %8398 = vset.pattern.permute.xlu1 %v9221_v50 }
 0x555   : >> { %3619 = vperm.xlu1 %8398, %v10313_v17  }
 0x556   : >> { %4341 = vperm.xlu0 %8413, %v10296_v56  }
 0x559   : >> { %8399 = vset.pattern.permute.xlu1 %v9222_v25 }
 0x55a   : >> { %v10377_v34 = vpop.permute.xlu1 %3569  ;;  %3805 = vperm.xlu1 %8399, %v10313_v17   ;;  %4349 = vperm.xlu0 %8413, %v10303_v52  }
 0x55e   : >> { %v10381_v31 = vpop.permute.xlu1 %3574  ;;  %8400 = vset.pattern.permute.xlu1 %v9221_v50  ;;  %4357 = vperm.xlu0 %8413, %v10313_v17  }
 0x55f   : >> { %3624 = vperm.xlu1 %8400, %v10317_v59  }
 0x562   : >> { %4365 = vperm.xlu0 %8413, %v10320_v48   ;;  %v10407_v21 = vpop.permute.xlu0 %3579 }
 0x563   : >> { %v10387_v0 = vpop.permute.xlu1 %3765  ;;  %8401 = vset.pattern.permute.xlu1 %v9222_v25 }
 0x564   : >> { %3809 = vperm.xlu1 %8401, %v10317_v59  }
 0x566   : >> { %4373 = vperm.xlu0 %8413, %v10328_v14  }
 0x567   : >> { %v10392_v13 = vpop.permute.xlu1 %3769  ;;  %v10414_v23 = vpop.permute.xlu0 %3954 }
 0x568   : >> { %8402 = vset.pattern.permute.xlu1 %v9221_v50 }
 0x569   : >> { %3629 = vperm.xlu1 %8402, %v10320_v48  }
 0x56a   : >> { %8414 = vset.pattern.permute.xlu0 %v13701_v27 }
 0x56b   : >> { %4500 = vperm.xlu0 %8414, %v10271_v11   ;;  %v10421_v26 = vpop.permute.xlu0 %3966 }
 0x56c   : >> { %v10398_v55 = vpop.permute.xlu1 %3950  ;;  %13990 = vst [vmem:[#allocation66_spill] sm:$0xff] %v10421_v26 }
 0x56d   : >> { %3634 = vperm.xlu1 %8402, %v10324_v40  }
 0x56f   : >> { %4512 = vperm.xlu0 %8414, %v10282_v47  }
 0x571   : >> { %v10402_v45 = vpop.permute.xlu1 %3773  ;;  %8404 = vset.pattern.permute.xlu1 %v9222_v25 }
 0x572   : >> { %3817 = vperm.xlu1 %8404, %v10324_v40   ;;  %v10431_v16 = vpop.permute.xlu0 %3974 }
 0x573   : >> { %4520 = vperm.xlu0 %8414, %v10292_v18   ;;  %13992 = vst [vmem:[#allocation68_spill] sm:$0xff] %v10431_v16 }
 0x576   : >> { %v10409_v15 = vpop.permute.xlu1 %3958  ;;  %8405 = vset.pattern.permute.xlu1 %v9221_v50 }
 0x577   : >> { %13989 = vst [vmem:[#allocation65_spill] sm:$0xff] %v10409_v15  ;;  %3639 = vperm.xlu1 %8405, %v10328_v14   ;;  %4528 = vperm.xlu0 %8414, %v10300_v54  }
 0x57a   : >> { %v10441_v46 = vpop.permute.xlu0 %3982 }
 0x57b   : >> { %v10416_v43 = vpop.permute.xlu1 %3584  ;;  %8406 = vset.pattern.permute.xlu1 %v9222_v25  ;;  %4536 = vperm.xlu0 %8414, %v10308_v22   ;;  %13995 = vst [vmem:[#allocation71_spill] sm:$0xff] %v10441_v46  ;;  %v2348_v25 = vcombine.high %v2340_v24, %v2340_v24  ;;  %v13710_v46 = vmov 7  }
 0x57c   : >> { %3821 = vperm.xlu1 %8406, %v10328_v14  }
 0x57d   : >> { %v2370_v27 = vrot.slane %v2348_v25, %v10245_v37 }
 0x57f   : >> { %4544 = vperm.xlu0 %8414, %v10317_v59   ;;  %v10476_v35 = vrot.slane %v2370_v27, %v13958_v60 }
 0x580   : >> { %v10424_v44 = vpop.permute.xlu1 %3777  ;;  %8407 = vset.pattern.permute.xlu1 %v9221_v50 }
 0x581   : >> { %13991 = vst [vmem:[#allocation67_spill] sm:$0xff] %v10424_v44  ;;  %3644 = vperm.xlu1 %8407, %v10332_v32   ;;  %v2527_v39 = vmul.f32 %v10476_v35, %v13964_v1 }
 0x583   : >> { %4552 = vperm.xlu0 %8414, %v10324_v40  }
 0x585   : >> { %v10433_v33 = vpop.permute.xlu1 %3962  ;;  %8408 = vset.pattern.permute.xlu1 %v9223_v30  ;;  %v2356_v30 = vrot.slane %v2340_v24, %v10245_v37  ;;  %v2380_v37 = vcombine.high %v2370_v27, %v2370_v27  ;;  %v14006_v27 = vmov 0.0  }
 0x586   : >> { %13993 = vst [vmem:[#allocation69_spill] sm:$0xff] %v10433_v33  ;;  %3986 = vperm.xlu1 %8408, %v10308_v22   ;;  %7535 = vmatprep.mubr.msk.bf16.mxu0 %vm9229_vm4, %v14006_v27 }
 0x587   : >> { %4560 = vperm.xlu0 %8414, %v10332_v32   ;;  %v2378_v49 = vcombine.high %v2356_v30, %v2356_v30  ;;  %7555 = vmatprep.mubr.msk.bf16.mxu1 %vm9229_vm4, %v14006_v27 }
 0x589   : >> { %v10483_v25 = vrot.slane %v2378_v49, %v13958_v60  ;;  %v10499_v49 = vrot.slane %v2380_v37, %v13958_v60 }
 0x58a   : >> { %v10438_v50 = vpop.permute.xlu1 %3589  ;;  %3994 = vperm.xlu1 %8408, %v10317_v59   ;;  %v10449_v51 = vpop.permute.xlu0 %3813 }
 0x58b   : >> { %13994 = vst [vmem:[#allocation70_spill] sm:$0xff] %v10438_v50  ;;  %8417 = vset.pattern.permute.xlu0 %v13700_v38  ;;  %13997 = vst [vmem:[#allocation73_spill] sm:$0xff] %v10449_v51 }
 0x58c   : >> { %4687 = vperm.xlu0 %8417, %v10274_v57  }
 0x58e   : >> { %4002 = vperm.xlu1 %8408, %v10324_v40  }
 0x58f   : >> { %v10446_v41 = vpop.permute.xlu1 %3781 }
 0x590   : >> { %13996 = vst [vmem:[#allocation72_spill] sm:$0xff] %v10446_v41  ;;  %4699 = vperm.xlu0 %8417, %v10287_v29  }
 0x592   : >> { %4010 = vperm.xlu1 %8408, %v10332_v32  }
 0x594   : >> { %v10452_v62 = vpop.permute.xlu1 %3594  ;;  %4707 = vperm.xlu0 %8417, %v10296_v56  }
 0x595   : >> { %13998 = vst [vmem:[#allocation74_spill] sm:$0xff] %v10452_v62 }
 0x596   : >> { %8411 = vset.pattern.permute.xlu1 %v9224_v53  ;;  %v10458_v12 = vpop.permute.xlu0 %3825  ;;  %v10471_v53 = vrot.slane %v2356_v30, %v13958_v60 }
 0x597   : >> { %13999 = vst [vmem:[#allocation75_spill] sm:$0xff] %v10458_v12  ;;  %4138 = vperm.xlu1 %8411, %v10274_v57   ;;  %v2799_v12 = vmul.f32 1.442695, %v2527_v39  ;;  %v2529_v39 = vmul.f32 %v10476_v35, %v13966_v3 }
 0x598   : >> { %4715 = vperm.xlu0 %8417, %v10303_v52   ;;  %v2511_v36 = vmul.f32 %v10471_v53, %v13964_v1  ;;  %v2512_v30 = vmul.f32 %v10471_v53, %v13967_v2  ;;  %v2513_v37 = vmul.f32 %v10471_v53, %v13966_v3  ;;  %v2518_v15 = vmul.f32 %v10471_v53, %v13960_v8 }
 0x599   : >> { %v10463_v38 = vpop.permute.xlu1 %3785 }
 0x59a   : >> { %14000 = vst [vmem:[#allocation76_spill] sm:$0xff] %v10463_v38  ;;  %v2544_v38 = vmul.f32 %v10483_v25, %v13967_v2 }
 0x59b   : >> { %4142 = vperm.xlu1 %8411, %v10277_v42   ;;  %v10467_v20 = vpop.permute.xlu0 %3990 }
 0x59c   : >> { %14001 = vst [vmem:[#allocation77_spill] sm:$0xff] %v10467_v20  ;;  %4723 = vperm.xlu0 %8417, %v10313_v17   ;;  %v2528_v20 = vmul.f32 %v10476_v35, %v13967_v2  ;;  %v2833_v33 = vmul.f32 1.442695, %v2544_v38 }
 0x59e   : >> { %v10473_v28 = vpop.permute.xlu1 %3970  ;;  %v2801_v51 = vmul.f32 1.442695, %v2528_v20  ;;  %v2560_v20 = vmul.f32 %v10499_v49, %v13967_v2 }
 0x59f   : >> { %14002 = vst [vmem:[#allocation78_spill] sm:$0xff] %v10473_v28  ;;  %4150 = vperm.xlu1 %8411, %v10287_v29   ;;  %v10479_v24 = vpop.permute.xlu0 %3998  ;;  %v2767_v28 = vmul.f32 1.442695, %v2511_v36 }
 0x5a0   : >> { %14003 = vst [vmem:[#allocation79_spill] sm:$0xff] %v10479_v24  ;;  %4731 = vperm.xlu0 %8417, %v10320_v48  }
 0x5a1   : >> { %8469 = vpow2.f32 %v2767_v28 }
 0x5a3   : >> { %v10491_v61 = vpop.permute.xlu1 %3599  ;;  %4158 = vperm.xlu1 %8411, %v10296_v56   ;;  %v10494_v24 = vpop.permute.xlu0 %4006 }
 0x5a4   : >> { %14004 = vst [vmem:[#allocation80_spill] sm:$0xff] %v10491_v61  ;;  %14005 = vst [vmem:[#allocation81_spill] sm:$0xff] %v10494_v24  ;;  %4739 = vperm.xlu0 %8417, %v10328_v14   ;;  %v2543_v61 = vmul.f32 %v10483_v25, %v13964_v1  ;;  %v2769_v24 = vmul.f32 1.442695, %v2512_v30  ;;  %v2559_v30 = vmul.f32 %v10499_v49, %v13964_v1 }
 0x5a6   : >> { %v2831_v27 = vmul.f32 1.442695, %v2543_v61  ;;  %8471 = vpow2.f32 %v2769_v24  ;;  %v2514_v61 = vmul.f32 %v10471_v53, %v13962_v4  ;;  %v2863_v28 = vmul.f32 1.442695, %v2559_v30 }
 0x5a7   : >> { %4166 = vperm.xlu1 %8411, %v10303_v52   ;;  %8473 = vpow2.f32 %v2799_v12  ;;  %v2803_v24 = vmul.f32 1.442695, %v2529_v39  ;;  %v2561_v12 = vmul.f32 %v10499_v49, %v13966_v3  ;;  %v2546_v30 = vmul.f32 %v10483_v25, %v13962_v4 }
 0x5a8   : >> { %v10513_v62 = vpop.permute.xlu1 %3789  ;;  %8418 = vset.pattern.permute.xlu0 %v13710_v46  ;;  %v10516_v36 = vpop.permute.xlu0 %4134  ;;  %v2545_v46 = vmul.f32 %v10483_v25, %v13966_v3  ;;  %8475 = vpow2.f32 %v2801_v51  ;;  %v2865_v51 = vmul.f32 1.442695, %v2560_v20  ;;  %v2562_v39 = vmul.f32 %v10499_v49, %v13962_v4 }
 0x5a9   : >> { %14007 = vst [vmem:[#allocation82_spill] sm:$0xff] %v10513_v62  ;;  %14008 = vst [vmem:[#allocation83_spill] sm:$0xff] %v10516_v36  ;;  %4866 = vperm.xlu0 %8418, %v10271_v11   ;;  %v2771_v62 = vmul.f32 1.442695, %v2513_v37  ;;  %8477 = vpow2.f32 %v2831_v27  ;;  %v2530_v37 = vmul.f32 %v10476_v35, %v13962_v4  ;;  %v2773_v27 = vmul.f32 1.442695, %v2514_v61 }
 0x5aa   : >> { %8479 = vpow2.f32 %v2833_v33  ;;  %v2835_v2 = vmul.f32 1.442695, %v2545_v46  ;;  %v2515_v33 = vmul.f32 %v10471_v53, %v13965_v5  ;;  %v2531_v20 = vmul.f32 %v10476_v35, %v13965_v5 }
 0x5ab   : >> { %4174 = vperm.xlu1 %8411, %v10313_v17   ;;  %8481 = vpow2.f32 %v2771_v62  ;;  %v2867_v62 = vmul.f32 1.442695, %v2561_v12  ;;  %v2805_v46 = vmul.f32 1.442695, %v2530_v37  ;;  %v2837_v61 = vmul.f32 1.442695, %v2546_v30 }
 0x5ac   : >> { %v10530_v36 = vpop.permute.xlu0 %4146  ;;  %8483 = vpow2.f32 %v2863_v28  ;;  %v2547_v28 = vmul.f32 %v10483_v25, %v13965_v5  ;;  %v2775_v37 = vmul.f32 1.442695, %v2515_v33  ;;  %v2532_v3 = vmul.f32 %v10476_v35, %v13961_v6 }
 0x5ad   : >> { %14009 = vst [vmem:[#allocation84_spill] sm:$0xff] %v10530_v36  ;;  %v10532_v38 = vpop.permute.xlu1 %3604  ;;  %4878 = vperm.xlu0 %8418, %v10282_v47   ;;  %8485 = vpow2.f32 %v2803_v24  ;;  %v2516_v24 = vmul.f32 %v10471_v53, %v13961_v6  ;;  %v2563_v30 = vmul.f32 %v10499_v49, %v13965_v5  ;;  %v2548_v33 = vmul.f32 %v10483_v25, %v13961_v6 }
 0x5ae   : >> { %14010 = vst [vmem:[#allocation85_spill] sm:$0xff] %v10532_v38  ;;  %8487 = vpow2.f32 %v2865_v51  ;;  %v2807_v51 = vmul.f32 1.442695, %v2531_v20 }
 0x5af   : >> { %4182 = vperm.xlu1 %8411, %v10320_v48   ;;  %8489 = vpow2.f32 %v2835_v2  ;;  %v10563_v2 = vpop.eup %8469  ;;  %v2841_v16 = vmul.f32 1.442695, %v2548_v33 }
 0x5b0   : >> { %v10544_v36 = vpop.permute.xlu0 %4154  ;;  %8491 = vpow2.f32 %v2773_v27 }
 0x5b1   : >> { %14011 = vst [vmem:[#allocation86_spill] sm:$0xff] %v10544_v36  ;;  %4886 = vperm.xlu0 %8418, %v10292_v18   ;;  %v2869_v36 = vmul.f32 1.442695, %v2562_v39  ;;  %8493 = vpow2.f32 %v2867_v62  ;;  %v2839_v39 = vmul.f32 1.442695, %v2547_v28  ;;  %v10585_v28 = vrot.slane %v10253_v19, %v13958_v60 }
 0x5b2   : >> { %v10551_v38 = vpop.permute.xlu1 %3793  ;;  %8495 = vpow2.f32 %v2805_v46  ;;  %v2777_v62 = vmul.f32 1.442695, %v2516_v24  ;;  %v2564_v46 = vmul.f32 %v10499_v49, %v13961_v6  ;;  %v2533_v24 = vmul.f32 %v10476_v35, %v13963_v7 }
 0x5b3   : >> { %14012 = vst [vmem:[#allocation87_spill] sm:$0xff] %v10551_v38  ;;  %4190 = vperm.xlu1 %8411, %v10328_v14   ;;  %v10567_v27 = vpop.eup %8471  ;;  %8497 = vpow2.f32 %v2837_v61  ;;  %v14015_v38 = vmov 4   ;;  %v2575_v33 = vmul.f32 %v10585_v28, %v13964_v1 }
 0x5b4   : >> { %v10558_v12 = vpop.permute.xlu0 %4162  ;;  %v10574_v41 = vpop.eup %8473  ;;  %8499 = vpow2.f32 %v2869_v36  ;;  %v2873_v44 = vmul.f32 1.442695, %v2564_v46  ;;  %v2811_v26 = vmul.f32 1.442695, %v2533_v24  ;;  %v2534_v46 = vmul.f32 %v10476_v35, %v13960_v8 }
 0x5b5   : >> { %14013 = vst [vmem:[#allocation88_spill] sm:$0xff] %v10558_v12  ;;  %4894 = vperm.xlu0 %8418, %v10300_v54   ;;  %v10581_v61 = vpop.eup %8475  ;;  %8501 = vpow2.f32 %v2775_v37  ;;  %v2549_v37 = vmul.f32 %v10483_v25, %v13963_v7  ;;  %v2578_v24 = vmul.f32 %v10585_v28, %v13962_v4 }
 0x5b6   : >> { %v10590_v36 = vpop.eup %8477  ;;  %8503 = vpow2.f32 %v2807_v51 }
 0x5b7   : >> { %v10571_v12 = vpop.permute.xlu1 %3978  ;;  %8412 = vset.pattern.permute.xlu1 %v14015_v38  ;;  %v2517_v38 = vmul.f32 %v10471_v53, %v13963_v7  ;;  %v10594_v5 = vpop.eup %8479  ;;  %8505 = vpow2.f32 %v2839_v39 }
 0x5b8   : >> { %14014 = vst [vmem:[#allocation89_spill] sm:$0xff] %v10571_v12  ;;  %4317 = vperm.xlu1 %8412, %v10271_v11   ;;  %v10579_v20 = vpop.permute.xlu0 %4170  ;;  %v2809_v12 = vmul.f32 1.442695, %v2532_v3  ;;  %v10598_v3 = vpop.eup %8481  ;;  %8507 = vpow2.f32 %v2777_v62 }
 0x5b9   : >> { %14016 = vst [vmem:[#allocation90_spill] sm:$0xff] %v10579_v20  ;;  %4902 = vperm.xlu0 %8418, %v10308_v22   ;;  %v2871_v20 = vmul.f32 1.442695, %v2563_v30  ;;  %v10607_v30 = vpop.eup %8483  ;;  %v2779_v39 = vmul.f32 1.442695, %v2517_v38 }
 0x5ba   : >> { %14019 = vst [vmem:[#allocation93_spill] sm:$0xff] %v10607_v30  ;;  %8509 = vpow2.f32 %v2809_v12  ;;  %v10612_v62 = vpop.eup %8485  ;;  %v2565_v12 = vmul.f32 %v10499_v49, %v13963_v7  ;;  %v2781_v30 = vmul.f32 1.442695, %v2518_v15 }
 0x5bb   : >> { %8511 = vpow2.f32 %v2871_v20 }
 0x5bc   : >> { %v10602_v50 = vpop.permute.xlu1 %3609  ;;  %4325 = vperm.xlu1 %8412, %v10277_v42   ;;  %v10605_v51 = vpop.permute.xlu0 %4178  ;;  %8513 = vpow2.f32 %v2841_v16  ;;  %v2895_v16 = vmul.f32 1.442695, %v2575_v33  ;;  %v2875_v4 = vmul.f32 1.442695, %v2565_v12  ;;  %v2566_v33 = vmul.f32 %v10499_v49, %v13960_v8 }
 0x5bd   : >> { %14017 = vst [vmem:[#allocation91_spill] sm:$0xff] %v10602_v50  ;;  %14018 = vst [vmem:[#allocation92_spill] sm:$0xff] %v10605_v51  ;;  %4910 = vperm.xlu0 %8418, %v10317_v59   ;;  %v10616_v50 = vpop.eup %8487  ;;  %v2843_v51 = vmul.f32 1.442695, %v2549_v37  ;;  %8515 = vpow2.f32 %v2873_v44  ;;  %v2580_v37 = vmul.f32 %v10585_v28, %v13961_v6  ;;  %v2813_v44 = vmul.f32 1.442695, %v2534_v46 }
 0x5be   : >> { %14020 = vst [vmem:[#allocation94_spill] sm:$0xff] %v10616_v50  ;;  %v10620_v38 = vpop.eup %8489  ;;  %8517 = vpow2.f32 %v2779_v39  ;;  %v2519_v39 = vmul.f32 %v10471_v53, %v13959_v9  ;;  %v2901_v46 = vmul.f32 1.442695, %v2578_v24 }
 0x5bf   : >> { %14021 = vst [vmem:[#allocation95_spill] sm:$0xff] %v10620_v38  ;;  %v10627_v11 = vpop.eup %8491  ;;  %8519 = vpow2.f32 %v2811_v26  ;;  %v2905_v12 = vmul.f32 1.442695, %v2580_v37  ;;  %v2294_v37 = vld [vmem:[%s2292_s25 + $0x8] sm:$0xff] }
 0x5c0   : >> { %4329 = vperm.xlu1 %8412, %v10282_v47   ;;  %v10623_v1 = vpop.permute.xlu0 %4186  ;;  %v10634_v15 = vpop.eup %8493  ;;  %8521 = vpow2.f32 %v2843_v51  ;;  %v2520_v51 = vmul.f32 %v10471_v53, %v13956_v10  ;;  %v2877_v47 = vmul.f32 1.442695, %v2566_v33 }
 0x5c1   : >> { %14022 = vst [vmem:[#allocation96_spill] sm:$0xff] %v10623_v1  ;;  %v10629_v20 = vpop.permute.xlu1 %3797  ;;  %4918 = vperm.xlu0 %8418, %v10324_v40   ;;  %14024 = vst [vmem:[#allocation98_spill] sm:$0xff] %v10634_v15  ;;  %v2550_v1 = vmul.f32 %v10483_v25, %v13960_v8  ;;  %v10638_v7 = vpop.eup %8495  ;;  %8523 = vpow2.f32 %v2781_v30 }
 0x5c2   : >> { %14023 = vst [vmem:[#allocation97_spill] sm:$0xff] %v10629_v20  ;;  %v10642_v20 = vpop.eup %8497  ;;  %8525 = vpow2.f32 %v2895_v16  ;;  %v2293_v16 = vld [vmem:[%s2292_s25] sm:$0xff]  ;;  %s9239_s25 = smov (%p2281_p1), [#allocation19]  }
 0x5c3   : >> { %14025 = vst [vmem:[#allocation99_spill] sm:$0xff] %v10642_v20  ;;  %v10649_v6 = vpop.eup %8499  ;;  %8527 = vpow2.f32 %v2813_v44  ;;  %v2845_v30 = vmul.f32 1.442695, %v2550_v1  ;;  %v2535_v20 = vmul.f32 %v10476_v35, %v13959_v9  ;;  %v2582_v1 = vmul.f32 %v10585_v28, %v13960_v8 }
 0x5c4   : >> { %4337 = vperm.xlu1 %8412, %v10292_v18   ;;  %v10647_v26 = vpop.permute.xlu0 %4194  ;;  %14027 = vst [vmem:[#allocation101_spill] sm:$0xff] %v10649_v6  ;;  %v10654_v15 = vpop.eup %8501  ;;  %v14030_v6 = vld [vmem:[#allocation35_spill] sm:$0xff]  ;;  %8529 = vpow2.f32 %v2875_v4  ;;  %v13735_v4 = vmov 8   ;;  %v2551_v8 = vmul.f32 %v10483_v25, %v13959_v9 }
 0x5c5   : >> { %14026 = vst [vmem:[#allocation100_spill] sm:$0xff] %v10647_v26  ;;  %4926 = vperm.xlu0 %8418, %v10332_v32   ;;  %v10660_v24 = vpop.eup %8503  ;;  %v2783_v26 = vmul.f32 1.442695, %v2519_v39  ;;  %v2521_v38 = vmul.f32 %v10471_v53, %v14030_v6  ;;  %8531 = vpow2.f32 %v2901_v46  ;;  %v2379_v39 = vcombine.high %v10253_v19, %v10253_v19 }
 0x5c6   : >> { %v10658_v18 = vpop.permute.xlu1 %3614  ;;  %14029 = vst [vmem:[#allocation103_spill] sm:$0xff] %v10660_v24  ;;  %v10664_v50 = vpop.eup %8505  ;;  %v14033_v24 = vld [vmem:[#allocation36_spill] sm:$0xff]  ;;  %8533 = vpow2.f32 %v2905_v12 }
 0x5c7   : >> { %14028 = vst [vmem:[#allocation102_spill] sm:$0xff] %v10658_v18  ;;  %14031 = vst [vmem:[#allocation104_spill] sm:$0xff] %v10664_v50  ;;  %v10670_v44 = vpop.eup %8507  ;;  %v2785_v18 = vmul.f32 1.442695, %v2520_v51  ;;  %v2522_v33 = vmul.f32 %v10471_v53, %v14033_v24  ;;  %8535 = vpow2.f32 %v2845_v30  ;;  %v10690_v51 = vld [vmem:[%s10687_s27] sm:$0xff]  ;;  %v2536_v30 = vmul.f32 %v10476_v35, %v13956_v10 }
 0x5c8   : >> { %4345 = vperm.xlu1 %8412, %v10300_v54   ;;  %v10679_v46 = vpop.eup %8509  ;;  %v2815_v54 = vmul.f32 1.442695, %v2535_v20  ;;  %8537 = vpow2.f32 %v2783_v26  ;;  %v10702_v20 = vrot.slane %v10262_v63, %v13958_v60 }
 0x5c9   : >> { %8421 = vset.pattern.permute.xlu0 %v13735_v4  ;;  %v10675_v50 = vpop.permute.xlu0 %4321  ;;  %14034 = vst [vmem:[#allocation106_spill] sm:$0xff] %v10679_v46  ;;  %v10684_v19 = vpop.eup %8511  ;;  %v10692_v4 = vpack.c.bf16 %v2294_v37, %v2293_v16  ;;  %8539 = vpow2.f32 %v2877_v47  ;;  %v2567_v16 = vmul.f32 %v10499_v49, %v13959_v9  ;;  %v2909_v37 = vmul.f32 1.442695, %v2582_v1 }
 0x5ca   : >> { %14032 = vst [vmem:[#allocation105_spill] sm:$0xff] %v10675_v50  ;;  %5053 = vperm.xlu0 %8421, %v10274_v57   ;;  %14035 = vst [vmem:[#allocation107_spill] sm:$0xff] %v10684_v19  ;;  %v2787_v50 = vmul.f32 1.442695, %v2521_v38  ;;  %v10698_v46 = vpop.eup %8513  ;;  %8541 = vpow2.f32 %v2785_v18  ;;  %v10718_v47 = vrot.slane %v10690_v51, %v13958_v60  ;;  %v2847_v9 = vmul.f32 1.442695, %v2551_v8 }
 0x5cb   : >> { %14036 = vst [vmem:[#allocation108_spill] sm:$0xff] %v10692_v4  ;;  %v10694_v12 = vpop.permute.xlu1 %3801  ;;  %14038 = vst [vmem:[#allocation110_spill] sm:$0xff] %v10698_v46  ;;  %v10707_v26 = vpop.eup %8515  ;;  %v10710_v4 = vrot.slane %v2379_v39, %v13958_v60  ;;  %v2789_v46 = vmul.f32 1.442695, %v2522_v33  ;;  %8543 = vpow2.f32 %v2815_v54  ;;  %v2552_v1 = vmul.f32 %v10483_v25, %v13956_v10 }
 0x5cc   : >> { %14037 = vst [vmem:[#allocation109_spill] sm:$0xff] %v10694_v12  ;;  %14039 = vst [vmem:[#allocation111_spill] sm:$0xff] %v10702_v20  ;;  %4353 = vperm.xlu1 %8412, %v10308_v22   ;;  %v14043_v12 = vld [vmem:[#allocation37_spill] sm:$0xff]  ;;  %v8518_v19 = vpop.eup %8517  ;;  %v2817_v33 = vmul.f32 1.442695, %v2536_v30  ;;  %8545 = vpow2.f32 %v2787_v50  ;;  %v10731_v60 = vmul.f32 0.0, %v10563_v2  ;;  %v2553_v54 = vmul.f32 %v10483_v25, %v14030_v6 }
 0x5cd   : >> { %14040 = vst [vmem:[#allocation112_spill] sm:$0xff] %v10707_v26  ;;  %14041 = vst [vmem:[#allocation113_spill] sm:$0xff] %v10710_v4  ;;  %v10712_v38 = vpop.permute.xlu0 %4333  ;;  %v2523_v63 = vmul.f32 %v10471_v53, %v14043_v12  ;;  %v10723_v39 = vpop.eup %8519  ;;  %v2879_v26 = vmul.f32 1.442695, %v2567_v16  ;;  %8547 = vpow2.f32 %v2909_v37  ;;  %v3552_v50 = vmul.f32 0.0, %v10567_v27 }
 0x5ce   : >> { %14042 = vst [vmem:[#allocation114_spill] sm:$0xff] %v10712_v38  ;;  %5065 = vperm.xlu0 %8421, %v10287_v29   ;;  %14044 = vst [vmem:[#allocation115_spill] sm:$0xff] %v10723_v39  ;;  %v2537_v38 = vmul.f32 %v10476_v35, %v14030_v6  ;;  %v10728_v4 = vpop.eup %8521  ;;  %8549 = vpow2.f32 %v2789_v46  ;;  %v2538_v16 = vmul.f32 %v10476_v35, %v14033_v24  ;;  %v2849_v27 = vmul.f32 1.442695, %v2552_v1 }
 0x5cf   : >> { %14045 = vst [vmem:[#allocation116_spill] sm:$0xff] %v10728_v4  ;;  %v8524_v18 = vpop.eup %8523  ;;  %v2791_v39 = vmul.f32 1.442695, %v2523_v63  ;;  %v14048_v4 = vld [vmem:[#allocation38_spill] sm:$0xff]  ;;  %8551 = vpow2.f32 %v2847_v9  ;;  %v14052_v63 = vsub.s32 2, %v13957_v58  ;;  %v10764_v9 = vmul.f32 0.0, %v10598_v3 }
 0x5d0   : >> { %v10733_v8 = vpop.permute.xlu1 %3619  ;;  %4361 = vperm.xlu1 %8412, %v10317_v59   ;;  %v2524_v2 = vmul.f32 %v10471_v53, %v14048_v4  ;;  %v10743_v22 = vpop.eup %8525  ;;  %8553 = vpow2.f32 %v2817_v33  ;;  %v10767_v20 = vmul.f32 0.0, %v10627_v11  ;;  %v2851_v1 = vmul.f32 1.442695, %v2553_v54 }
 0x5d1   : >> { %14046 = vst [vmem:[#allocation117_spill] sm:$0xff] %v10733_v8  ;;  %v10739_v30 = vpop.permute.xlu0 %4341  ;;  %14049 = vst [vmem:[#allocation119_spill] sm:$0xff] %v10743_v22  ;;  %v14050_v8 = vld [vmem:[#allocation42_spill] sm:$0xff]  ;;  %v10752_v37 = vpop.eup %8527  ;;  %v10757_v46 = vrot.slane %v10690_v51, %v14052_v63  ;;  %8555 = vpow2.f32 %v2879_v26  ;;  %v2554_v3 = vmul.f32 %v10483_v25, %v14033_v24  ;;  %v3652_v11 = vmul.f32 %v10718_v47, %v10381_v31 }
 0x5d2   : >> { %14047 = vst [vmem:[#allocation118_spill] sm:$0xff] %v10739_v30  ;;  %v10747_v59 = vrot.slane %v10690_v51, %v14050_v8  ;;  %5073 = vperm.xlu0 %8421, %v10296_v56   ;;  %14051 = vst [vmem:[#allocation120_spill] sm:$0xff] %v10752_v37  ;;  %v2819_v30 = vmul.f32 1.442695, %v2537_v38  ;;  %v2569_v8 = vmul.f32 %v10499_v49, %v14030_v6  ;;  %v10761_v22 = vpop.eup %8529  ;;  %8557 = vpow2.f32 %v2791_v39 }
 0x5d3   : >> { %14053 = vst [vmem:[#allocation121_spill] sm:$0xff] %v10757_v46  ;;  %14054 = vst [vmem:[#allocation122_spill] sm:$0xff] %v10761_v22  ;;  %v10770_v37 = vpop.eup %8531  ;;  %v2793_v22 = vmul.f32 1.442695, %v2524_v2  ;;  %v10784_v26 = vmul.f32 0.0, %v10654_v15  ;;  %8559 = vpow2.f32 %v2849_v27  ;;  %v10790_v39 = vmul.f32 0.0, %v10670_v44 }
 0x5d4   : >> { %4369 = vperm.xlu1 %8412, %v10324_v40   ;;  %14055 = vst [vmem:[#allocation123_spill] sm:$0xff] %v10770_v37  ;;  %v10779_v6 = vpop.eup %8533  ;;  %v2821_v54 = vmul.f32 1.442695, %v2538_v16  ;;  %8561 = vpow2.f32 %v2819_v30  ;;  %v2539_v2 = vmul.f32 %v10476_v35, %v14043_v12  ;;  %v3651_v31 = vmul.f32 %v10718_v47, %v10377_v34  ;;  %v14061_v16 = vld [vmem:[#allocation39_spill] sm:$0xff] }
 0x5d5   : >> { %v10773_v38 = vpop.permute.xlu1 %3805  ;;  %v10775_v63 = vpop.permute.xlu0 %4349  ;;  %14058 = vst [vmem:[#allocation126_spill] sm:$0xff] %v10779_v6  ;;  %v2883_v6 = vmul.f32 1.442695, %v2569_v8  ;;  %v10796_v15 = vmul.f32 0.0, %v8518_v19  ;;  %8563 = vpow2.f32 %v2851_v1  ;;  %v2525_v27 = vmul.f32 %v10471_v53, %v14061_v16 }
 0x5d6   : >> { %14056 = vst [vmem:[#allocation124_spill] sm:$0xff] %v10773_v38  ;;  %14057 = vst [vmem:[#allocation125_spill] sm:$0xff] %v10775_v63  ;;  %5081 = vperm.xlu0 %8421, %v10303_v52   ;;  %v10787_v33 = vpop.eup %8535  ;;  %v14063_v44 = vsub.s32 3, %v13957_v58  ;;  %8565 = vpow2.f32 %v2793_v22  ;;  %v2540_v34 = vmul.f32 %v10476_v35, %v14048_v4  ;;  %v2853_v19 = vmul.f32 1.442695, %v2554_v3 }
 0x5d7   : >> { %14059 = vst [vmem:[#allocation127_spill] sm:$0xff] %v10787_v33  ;;  %v8538_v63 = vpop.eup %8537  ;;  %14060 = vst [vmem:[#allocation128_spill] sm:$0xff] %v10796_v15  ;;  %v10812_v37 = vadd.f32 %v3652_v11, %v3552_v50  ;;  %v10814_v38 = vmul.f32 0.0, %v8524_v18  ;;  %8567 = vpow2.f32 %v2821_v54  ;;  %v2823_v3 = vmul.f32 1.442695, %v2539_v2 }
 0x5d8   : >> { %4377 = vperm.xlu1 %8412, %v10332_v32   ;;  %v10801_v33 = vpop.eup %8539  ;;  %v10806_v30 = vrot.slane %v10690_v51, %v14063_v44  ;;  %v2555_v44 = vmul.f32 %v10483_v25, %v14043_v12  ;;  %v10823_v22 = vmul.f32 0.0, %v8538_v63  ;;  %8569 = vpow2.f32 %v2883_v6 }
 0x5d9   : >> { %14062 = vst [vmem:[#allocation129_spill] sm:$0xff] %v10801_v33  ;;  %v10808_v8 = vpop.permute.xlu0 %4357  ;;  %v8542_v1 = vpop.eup %8541  ;;  %14066 = vst [vmem:[#allocation132_spill] sm:$0xff] %v10812_v37  ;;  %v10827_v18 = vadd.f32 %v3651_v31, %v10731_v60  ;;  %v3833_v11 = vmul.f32 %v10747_v59, %v10392_v13  ;;  %v2795_v54 = vmul.f32 1.442695, %v2525_v27  ;;  %v3653_v63 = vmul.f32 %v10718_v47, %v10407_v21 }
 0x5da   : >> { %14064 = vst [vmem:[#allocation130_spill] sm:$0xff] %v10806_v30  ;;  %14065 = vst [vmem:[#allocation131_spill] sm:$0xff] %v10808_v8  ;;  %v10816_v15 = vpop.permute.xlu1 %3624  ;;  %5089 = vperm.xlu0 %8421, %v10313_v17   ;;  %v10821_v33 = vpop.eup %8543  ;;  %v14070_v30 = vmov 5   ;;  %v10838_v2 = vmul.f32 0.0, %v8542_v1  ;;  %v2825_v60 = vmul.f32 1.442695, %v2540_v34  ;;  %8571 = vpow2.f32 %v2853_v19 }
 0x5db   : >> { %14067 = vst [vmem:[#allocation133_spill] sm:$0xff] %v10814_v38  ;;  %14068 = vst [vmem:[#allocation134_spill] sm:$0xff] %v10821_v33  ;;  %v8546_v50 = vpop.eup %8545  ;;  %v2571_v38 = vmul.f32 %v10499_v49, %v14043_v12  ;;  %v3832_v31 = vmul.f32 %v10747_v59, %v10387_v0  ;;  %v3749_v27 = vmul.f32 %v10581_v61, %v10812_v37  ;;  %v2855_v1 = vmul.f32 1.442695, %v2555_v44 }
 0x5dc   : >> { %14069 = vst [vmem:[#allocation135_spill] sm:$0xff] %v10827_v18  ;;  %8415 = vset.pattern.permute.xlu1 %v14070_v30  ;;  %v10834_v33 = vpop.eup %8547  ;;  %v14073_v30 = vld [vmem:[#allocation40_spill] sm:$0xff]  ;;  %v10857_v19 = vmul.f32 0.0, %v8546_v50  ;;  %8573 = vpow2.f32 %v2823_v3  ;;  %v2556_v0 = vmul.f32 %v10483_v25, %v14048_v4 }
 0x5dd   : >> { %14071 = vst [vmem:[#allocation136_spill] sm:$0xff] %v10834_v33  ;;  %4504 = vperm.xlu1 %8415, %v10274_v57   ;;  %v10841_v6 = vpop.permute.xlu0 %4365  ;;  %v8550_v13 = vpop.eup %8549  ;;  %v2526_v21 = vmul.f32 %v10471_v53, %v14073_v30  ;;  %v14075_v33 = vsub.s32 4, %v13957_v58  ;;  %v3748_v53 = vmul.f32 %v10574_v41, %v10827_v18  ;;  %v10867_v44 = vadd.f32 %v3833_v11, %v3749_v27 }
 0x5de   : >> { %14072 = vst [vmem:[#allocation137_spill] sm:$0xff] %v10841_v6  ;;  %5097 = vperm.xlu0 %8421, %v10320_v48   ;;  %v10850_v8 = vpop.eup %8551  ;;  %8575 = vpow2.f32 %v2795_v54  ;;  %v10874_v50 = vmul.f32 0.0, %v8550_v13  ;;  %v2857_v13 = vmul.f32 1.442695, %v2556_v0  ;;  %v3834_v0 = vmul.f32 %v10747_v59, %v10402_v45 }
 0x5df   : >> { %14074 = vst [vmem:[#allocation138_spill] sm:$0xff] %v10850_v8  ;;  %v10855_v34 = vrot.slane %v10690_v51, %v14075_v33  ;;  %v10859_v6 = vpop.permute.xlu1 %3809  ;;  %v10863_v61 = vpop.eup %8553  ;;  %14077 = vst [vmem:[#allocation140_spill] sm:$0xff] %v10867_v44  ;;  %v2887_v8 = vmul.f32 1.442695, %v2571_v38  ;;  %v10872_v33 = vadd.f32 %v3653_v63, %v10764_v9  ;;  %8577 = vpow2.f32 %v2825_v60 }
 0x5e0   : >> { %v10869_v12 = vpop.eup %8555  ;;  %v10881_v11 = vadd.f32 %v3832_v31, %v3748_v53  ;;  %v2797_v54 = vmul.f32 1.442695, %v2526_v21  ;;  %8579 = vpow2.f32 %v2855_v1  ;;  %v3654_v63 = vmul.f32 %v10718_v47, %v10416_v43 }
 0x5e1   : >> { %14076 = vst [vmem:[#allocation139_spill] sm:$0xff] %v10855_v34  ;;  %14078 = vst [vmem:[#allocation141_spill] sm:$0xff] %v10869_v12  ;;  %4508 = vperm.xlu1 %8415, %v10277_v42   ;;  %v10877_v3 = vpop.permute.xlu0 %4373  ;;  %v2541_v34 = vmul.f32 %v10476_v35, %v14061_v16  ;;  %v8558_v41 = vpop.eup %8557  ;;  %v2557_v60 = vmul.f32 %v10483_v25, %v14061_v16  ;;  %v3934_v31 = vmul.f32 %v10594_v5, %v10867_v44  ;;  %v13755_v21 = vmov 9  }
 0x5e2   : >> { %14079 = vst [vmem:[#allocation142_spill] sm:$0xff] %v10877_v3  ;;  %14080 = vst [vmem:[#allocation143_spill] sm:$0xff] %v10881_v11  ;;  %5105 = vperm.xlu0 %8421, %v10328_v14   ;;  %v10885_v9 = vpop.eup %8559  ;;  %v4017_v53 = vmul.f32 %v10757_v46, %v10398_v55  ;;  %8581 = vpow2.f32 %v2887_v8  ;;  %v3750_v43 = vmul.f32 %v10612_v62, %v10872_v33  ;;  %v10907_v3 = vmul.f32 0.0, %v8558_v41 }
 0x5e3   : >> { %14081 = vst [vmem:[#allocation144_spill] sm:$0xff] %v10885_v9  ;;  %v10891_v27 = vpop.eup %8561  ;;  %v2827_v5 = vmul.f32 1.442695, %v2541_v34  ;;  %v4018_v9 = vmul.f32 %v10757_v46, %v10414_v23  ;;  %v3933_v8 = vmul.f32 %v10590_v36, %v10881_v11  ;;  %8583 = vpow2.f32 %v2797_v54  ;;  %v14086_v36 = vld [vmem:[#allocation49_spill] sm:$0xff] }
 0x5e4   : >> { %v10897_v38 = vpop.permute.xlu1 %3629  ;;  %v10901_v1 = vpop.eup %8563  ;;  %v2542_v45 = vmul.f32 %v10476_v35, %v14073_v30  ;;  %v10922_v34 = vadd.f32 %v3654_v63, %v10767_v20  ;;  %v14084_v41 = vsub.s32 5, %v13957_v58  ;;  %v2859_v37 = vmul.f32 1.442695, %v2557_v60  ;;  %v14095_v58 = vld [vmem:[#allocation52_spill] sm:$0xff]  ;;  %v14099_v11 = vld [vmem:[#allocation65_spill] sm:$0xff] }
 0x5e5   : >> { %14082 = vst [vmem:[#allocation145_spill] sm:$0xff] %v10901_v1  ;;  %4516 = vperm.xlu1 %8415, %v10287_v29   ;;  %v8566_v55 = vpop.eup %8565  ;;  %v10936_v35 = vadd.f32 %v4017_v53, %v3933_v8  ;;  %v2558_v20 = vmul.f32 %v10483_v25, %v14073_v30  ;;  %8585 = vpow2.f32 %v2857_v13  ;;  %v2568_v60 = vmul.f32 %v10499_v49, %v13956_v10  ;;  %v14092_v8 = vld [vmem:[#allocation70_spill] sm:$0xff] }
 0x5e6   : >> { %8422 = vset.pattern.permute.xlu0 %v13755_v21  ;;  %v10915_v18 = vpop.permute.xlu0 %4500  ;;  %v10919_v62 = vpop.eup %8567  ;;  %v10927_v23 = vrot.slane %v10690_v51, %v14084_v41  ;;  %v2573_v21 = vmul.f32 %v10499_v49, %v14061_v16  ;;  %v10942_v51 = vadd.f32 %v3834_v0, %v3750_v43  ;;  %v10944_v63 = vmul.f32 0.0, %v8566_v55  ;;  %v14094_v41 = vld [vmem:[#allocation67_spill] sm:$0xff]  ;;  %v14096_v0 = vld [vmem:[#allocation94_spill] sm:$0xff] }
 0x5e7   : >> { %14083 = vst [vmem:[#allocation146_spill] sm:$0xff] %v10915_v18  ;;  %5232 = vperm.xlu0 %8422, %v14086_v36   ;;  %v10932_v54 = vpop.eup %8569  ;;  %v10934_v18 = vadd.f32 %v4018_v9, %v3934_v31  ;;  %14089 = vst [vmem:[#allocation150_spill] sm:$0xff] %v10936_v35  ;;  %8587 = vpow2.f32 %v2827_v5  ;;  %v14091_v31 = vld [vmem:[#allocation66_spill] sm:$0xff]  ;;  %v3655_v25 = vmul.f32 %v10718_v47, %v14092_v8  ;;  %v2829_v43 = vmul.f32 1.442695, %v2542_v45  ;;  %v14120_v16 = vld [vmem:[#allocation111_spill] sm:$0xff] }
 0x5e8   : >> { %14085 = vst [vmem:[#allocation147_spill] sm:$0xff] %v10927_v23  ;;  %14087 = vst [vmem:[#allocation148_spill] sm:$0xff] %v10932_v54  ;;  %v10938_v1 = vpop.permute.xlu1 %3634  ;;  %v10949_v9 = vpop.eup %8571  ;;  %v10953_v53 = vmul.f32 %v10757_v46, %v14091_v31  ;;  %v3751_v55 = vmul.f32 %v10638_v7, %v10922_v34  ;;  %v3835_v5 = vmul.f32 %v10747_v59, %v14094_v41  ;;  %8589 = vpow2.f32 %v2859_v37  ;;  %v14098_v41 = vld [vmem:[#allocation95_spill] sm:$0xff] }
 0x5e9   : >> { %14088 = vst [vmem:[#allocation149_spill] sm:$0xff] %v10934_v18  ;;  %4524 = vperm.xlu1 %8415, %v10296_v56   ;;  %14090 = vst [vmem:[#allocation151_spill] sm:$0xff] %v10949_v9  ;;  %v2891_v31 = vmul.f32 1.442695, %v2573_v21  ;;  %v10966_v23 = vpop.eup %8573  ;;  %v2570_v45 = vmul.f32 %v10499_v49, %v14033_v24  ;;  %v10974_v56 = vmul.f32 %v14096_v0, %v10934_v18  ;;  %v2881_v8 = vmul.f32 1.442695, %v2568_v60 }
 0x5ea   : >> { %v10957_v13 = vpop.permute.xlu0 %4512  ;;  %v3935_v54 = vmul.f32 %v14098_v41, %v10942_v51  ;;  %v4019_v37 = vmul.f32 %v10757_v46, %v14099_v11  ;;  %v2584_v44 = vmul.f32 %v10585_v28, %v13956_v10  ;;  %v10988_v0 = vadd.f32 %v3655_v25, %v10784_v26  ;;  %v14101_v18 = vld [vmem:[#allocation93_spill] sm:$0xff]  ;;  %v14105_v10 = vld [vmem:[#allocation68_spill] sm:$0xff]  ;;  %v14107_v26 = vld [vmem:[#allocation54_spill] sm:$0xff] }
 0x5eb   : >> { %14093 = vst [vmem:[#allocation66_spill] sm:$0xff] %v10957_v13  ;;  %5244 = vperm.xlu0 %8422, %v14095_v58   ;;  %v2861_v13 = vmul.f32 1.442695, %v2558_v20  ;;  %14097 = vst [vmem:[#allocation70_spill] sm:$0xff] %v10974_v56  ;;  %v8576_v7 = vpop.eup %8575  ;;  %v10992_v9 = vmul.f32 %v14101_v18, %v10936_v35  ;;  %8591 = vpow2.f32 %v2829_v43  ;;  %v2572_v11 = vmul.f32 %v10499_v49, %v14048_v4  ;;  %v14118_v56 = vld [vmem:[#allocation71_spill] sm:$0xff] }
 0x5ec   : >> { %v10985_v20 = vpop.eup %8577  ;;  %14100 = vst [vmem:[#allocation67_spill] sm:$0xff] %v10988_v0  ;;  %v11000_v60 = vadd.f32 %v3835_v5, %v3751_v55  ;;  %8593 = vpow2.f32 %v2891_v31  ;;  %v2586_v18 = vmul.f32 %v10585_v28, %v14033_v24  ;;  %v3565_v25 = vmul.f32 0.0, %v8576_v7  ;;  %v14110_v31 = vld [vmem:[#allocation103_spill] sm:$0xff]  ;;  %v14111_v7 = vld [vmem:[#allocation72_spill] sm:$0xff] }
 0x5ed   : >> { %v10980_v21 = vpop.permute.xlu1 %3817  ;;  %4532 = vperm.xlu1 %8415, %v10303_v52   ;;  %14102 = vst [vmem:[#allocation94_spill] sm:$0xff] %v10992_v9  ;;  %v10998_v12 = vpop.eup %8579  ;;  %v11004_v52 = vmul.f32 %v10757_v46, %v14105_v10  ;;  %8595 = vpow2.f32 %v2861_v13  ;;  %v2574_v43 = vmul.f32 %v10499_v49, %v14073_v30  ;;  %v11013_v55 = vadd.f32 %v4019_v37, %v3935_v54 }
 0x5ee   : >> { %v10994_v41 = vpop.permute.xlu0 %4520  ;;  %14104 = vst [vmem:[#allocation65_spill] sm:$0xff] %v10998_v12  ;;  %8597 = vpow2.f32 %v2881_v8  ;;  %v2913_v10 = vmul.f32 1.442695, %v2584_v44  ;;  %v2588_v5 = vmul.f32 %v10585_v28, %v14048_v4  ;;  %v3752_v24 = vmul.f32 %v14110_v31, %v10988_v0  ;;  %v14114_v8 = vld [vmem:[#allocation99_spill] sm:$0xff] }
 0x5ef   : >> { %14103 = vst [vmem:[#allocation95_spill] sm:$0xff] %v10994_v41  ;;  %14106 = vst [vmem:[#allocation93_spill] sm:$0xff] %v11004_v52  ;;  %5252 = vperm.xlu0 %8422, %v14107_v26   ;;  %v2885_v41 = vmul.f32 1.442695, %v2570_v45  ;;  %v11011_v35 = vpop.eup %8581  ;;  %v3836_v13 = vmul.f32 %v10747_v59, %v14111_v7  ;;  %v2889_v49 = vmul.f32 1.442695, %v2572_v11  ;;  %v3936_v44 = vmul.f32 %v14114_v8, %v11000_v60 }
 0x5f0   : >> { %14108 = vst [vmem:[#allocation68_spill] sm:$0xff] %v11011_v35  ;;  %14109 = vst [vmem:[#allocation152_spill] sm:$0xff] %v11013_v55  ;;  %v14113_v35 = vld [vmem:[#allocation26_spill] sm:$0xff]  ;;  %v8584_v37 = vpop.eup %8583  ;;  %v14116_v52 = vld [vmem:[#allocation56_spill] sm:$0xff]  ;;  %v2917_v7 = vmul.f32 1.442695, %v2586_v18 }
 0x5f1   : >> { %4540 = vperm.xlu1 %8415, %v10313_v17   ;;  %v2576_v54 = vmul.f32 %v10585_v28, %v14113_v35  ;;  %v14115_v17 = vld [vmem:[#allocation69_spill] sm:$0xff]  ;;  %v14117_v31 = vld [vmem:[#allocation27_spill] sm:$0xff]  ;;  %8599 = vpow2.f32 %v2885_v41  ;;  %v2893_v11 = vmul.f32 1.442695, %v2574_v43  ;;  %v2592_v0 = vmul.f32 %v14120_v16, %v14113_v35 }
 0x5f2   : >> { %v3640_v45 = vpop.permute.xlu1 %3639  ;;  %v11022_v12 = vpop.permute.xlu0 %4528  ;;  %v4020_v4 = vmul.f32 %v10757_v46, %v14115_v17  ;;  %v2577_v9 = vmul.f32 %v10585_v28, %v14117_v31  ;;  %v14122_v17 = vld [vmem:[#allocation98_spill] sm:$0xff]  ;;  %8601 = vpow2.f32 %v2913_v10  ;;  %v2921_v31 = vmul.f32 1.442695, %v2588_v5 }
 0x5f3   : >> { %14112 = vst [vmem:[#allocation103_spill] sm:$0xff] %v11022_v12  ;;  %5260 = vperm.xlu0 %8422, %v14116_v52   ;;  %v11035_v12 = vmul.f32 %v10757_v46, %v14118_v56  ;;  %v11039_v29 = vpop.eup %8585  ;;  %v11044_v8 = vmul.f32 %v14122_v17, %v11013_v55  ;;  %v14124_v52 = vld [vmem:[#allocation29_spill] sm:$0xff]  ;;  %v3566_v43 = vmul.f32 0.0, %v8584_v37  ;;  %8603 = vpow2.f32 %v2889_v49  ;;  %v14127_v17 = vld [vmem:[#allocation58_spill] sm:$0xff]  ;;  %v14130_v49 = vld [vmem:[#allocation104_spill] sm:$0xff] }
 0x5f4   : >> { %14121 = vst [vmem:[#allocation99_spill] sm:$0xff] %v11039_v29  ;;  %v2579_v18 = vmul.f32 %v10585_v28, %v14124_v52  ;;  %v8588_v56 = vpop.eup %8587  ;;  %v2897_v35 = vmul.f32 1.442695, %v2576_v54  ;;  %v11052_v29 = vadd.f32 %v4020_v4, %v3936_v44  ;;  %8605 = vpow2.f32 %v2917_v7  ;;  %v14128_v10 = vld [vmem:[#allocation74_spill] sm:$0xff] }
 0x5f5   : >> { %14119 = vst [vmem:[#allocation72_spill] sm:$0xff] %v11035_v12  ;;  %4548 = vperm.xlu1 %8415, %v10320_v48   ;;  %14123 = vst [vmem:[#allocation69_spill] sm:$0xff] %v11044_v8  ;;  %v11048_v12 = vadd.f32 %v3836_v13, %v3752_v24  ;;  %v3665_v48 = vmul.f32 %v10718_v47, %v3640_v45  ;;  %v2899_v8 = vmul.f32 1.442695, %v2577_v9  ;;  %v11056_v26 = vpop.eup %8589  ;;  %8607 = vpow2.f32 %v2893_v11 }
 0x5f6   : >> { %v11050_v41 = vpop.permute.xlu0 %4536  ;;  %14126 = vst [vmem:[#allocation111_spill] sm:$0xff] %v11052_v29  ;;  %v3656_v24 = vmul.f32 %v10718_v47, %v14128_v10  ;;  %v2929_v13 = vmul.f32 1.442695, %v2592_v0  ;;  %v2903_v4 = vmul.f32 1.442695, %v2579_v18  ;;  %8609 = vpow2.f32 %v2921_v31  ;;  %v14132_v0 = vld [vmem:[#allocation31_spill] sm:$0xff] }
 0x5f7   : >> { %14125 = vst [vmem:[#allocation71_spill] sm:$0xff] %v11050_v41  ;;  %v3822_v46 = vpop.permute.xlu1 %3821  ;;  %5268 = vperm.xlu0 %8422, %v14127_v17   ;;  %v11067_v9 = vmul.f32 %v10585_v28, %v14073_v30  ;;  %v3937_v54 = vmul.f32 %v14130_v49, %v11048_v12  ;;  %v3664_v37 = vmul.f32 %v10718_v47, %v10938_v1  ;;  %8611 = vpow2.f32 %v2897_v35  ;;  %v14133_v18 = vld [vmem:[#allocation60_spill] sm:$0xff]  ;;  %v14135_v1 = vld [vmem:[#allocation101_spill] sm:$0xff] }
 0x5f8   : >> { %v2581_v7 = vmul.f32 %v10585_v28, %v14132_v0  ;;  %v8592_v11 = vpop.eup %8591  ;;  %v3681_v10 = vadd.f32 %v3665_v48, %v3565_v25  ;;  %8613 = vpow2.f32 %v2899_v8  ;;  %v11083_v49 = vadd.f32 %v3656_v24, %v10790_v39  ;;  %v14136_v31 = vld [vmem:[#allocation73_spill] sm:$0xff]  ;;  %v14145_v30 = vld [vmem:[#allocation76_spill] sm:$0xff] }
 0x5f9   : >> { %4556 = vperm.xlu1 %8415, %v10328_v14   ;;  %14129 = vst [vmem:[#allocation98_spill] sm:$0xff] %v11067_v9  ;;  %v11080_v45 = vpop.eup %8593  ;;  %v11087_v5 = vmul.f32 %v14135_v1, %v11052_v29  ;;  %v3663_v35 = vmul.f32 %v10718_v47, %v10897_v38  ;;  %8615 = vpow2.f32 %v2929_v13  ;;  %v11095_v48 = vmul.f32 %v10747_v59, %v14136_v31  ;;  %v14140_v14 = vld [vmem:[#allocation33_spill] sm:$0xff] }
 0x5fa   : >> { %v11073_v44 = vpop.permute.xlu0 %4544  ;;  %14134 = vst [vmem:[#allocation104_spill] sm:$0xff] %v11080_v45  ;;  %v11091_v41 = vpop.eup %8595  ;;  %v14137_v8 = vmov 6   ;;  %8617 = vpow2.f32 %v2903_v4  ;;  %v2595_v39 = vmul.f32 %v14120_v16, %v14124_v52  ;;  %v11104_v38 = vadd.f32 %v10953_v53, %v3937_v54  ;;  %v14141_v54 = vld [vmem:[#allocation75_spill] sm:$0xff] }
 0x5fb   : >> { %14131 = vst [vmem:[#allocation74_spill] sm:$0xff] %v11073_v44  ;;  %5276 = vperm.xlu0 %8422, %v14133_v18   ;;  %v11101_v24 = vpop.eup %8597  ;;  %v3662_v13 = vmul.f32 %v10718_v47, %v10816_v15  ;;  %v3680_v1 = vadd.f32 %v3664_v37, %v10944_v63  ;;  %v3846_v4 = vmul.f32 %v10747_v59, %v3822_v46  ;;  %v14142_v63 = vld [vmem:[#allocation106_spill] sm:$0xff] }
 0x5fc   : >> { %v3645_v44 = vpop.permute.xlu1 %3644  ;;  %14138 = vst [vmem:[#allocation101_spill] sm:$0xff] %v11101_v24  ;;  %v3762_v52 = vmul.f32 %v8588_v56, %v3681_v10  ;;  %v11116_v53 = vmul.f32 %v10585_v28, %v14140_v14  ;;  %v3847_v15 = vmul.f32 %v10747_v59, %v14141_v54  ;;  %v3753_v37 = vmul.f32 %v14142_v63, %v11083_v49  ;;  %v14149_v63 = vld [vmem:[#allocation102_spill] sm:$0xff] }
 0x5fd   : >> { %v3666_v25 = vmul.f32 %v10718_v47, %v3645_v44  ;;  %8416 = vset.pattern.permute.xlu1 %v14137_v8  ;;  %v2907_v44 = vmul.f32 1.442695, %v2581_v7  ;;  %v3679_v7 = vadd.f32 %v3663_v35, %v10907_v3  ;;  %v3837_v56 = vmul.f32 %v10747_v59, %v14145_v30 }
 0x5fe   : >> { %4683 = vperm.xlu1 %8416, %v14086_v36   ;;  %v11110_v31 = vpop.permute.xlu0 %4552  ;;  %v14143_v36 = vld [vmem:[#allocation117_spill] sm:$0xff]  ;;  %v11125_v46 = vpop.eup %8599  ;;  %v3660_v24 = vmul.f32 %v10718_v47, %v14149_v63  ;;  %v3761_v3 = vmul.f32 %v10985_v20, %v3680_v1  ;;  %v3845_v30 = vmul.f32 %v10747_v59, %v10980_v21  ;;  %v2935_v20 = vmul.f32 1.442695, %v2595_v39 }
 0x5ff   : >> { %14139 = vst [vmem:[#allocation73_spill] sm:$0xff] %v11110_v31  ;;  %5284 = vperm.xlu0 %8422, %v10324_v40   ;;  %v3682_v8 = vadd.f32 %v3666_v25, %v3566_v43  ;;  %v3661_v31 = vmul.f32 %v10718_v47, %v14143_v36  ;;  %14144 = vst [vmem:[#allocation75_spill] sm:$0xff] %v11125_v46  ;;  %v14146_v43 = vld [vmem:[#allocation80_spill] sm:$0xff]  ;;  %v11133_v29 = vpop.eup %8601  ;;  %v11138_v36 = vadd.f32 %v3662_v13, %v10874_v50 }
 0x600   : >> { %v3657_v25 = vmul.f32 %v10718_v47, %v14146_v43  ;;  %14148 = vst [vmem:[#allocation117_spill] sm:$0xff] %v11133_v29  ;;  %v11146_v43 = vpop.eup %8603  ;;  %v3760_v63 = vmul.f32 %v10966_v23, %v3679_v7  ;;  %v14155_v29 = vld [vmem:[#allocation107_spill] sm:$0xff]  ;;  %8619 = vpow2.f32 %v2907_v44 }
 0x601   : >> { %v11131_v9 = vpop.permute.xlu1 %3986  ;;  %v3690_v55 = vpack.c.bf16 %v3682_v8, %v3681_v10  ;;  %v3763_v54 = vmul.f32 %v8592_v11, %v3682_v8  ;;  %14151 = vst [vmem:[#allocation80_spill] sm:$0xff] %v11146_v43  ;;  %v14152_v11 = vld [vmem:[#allocation91_spill] sm:$0xff]  ;;  %v11151_v8 = vadd.f32 %v3846_v4, %v3762_v52  ;;  %v11155_v13 = vpop.eup %8605  ;;  %v3677_v21 = vadd.f32 %v3661_v31, %v10857_v19  ;;  %v14157_v4 = vld [vmem:[#allocation85_spill] sm:$0xff] }
 0x602   : >> { %14147 = vst [vmem:[#allocation106_spill] sm:$0xff] %v11131_v9  ;;  %4691 = vperm.xlu1 %8416, %v10277_v42   ;;  %v11144_v35 = vpop.permute.xlu0 %4560  ;;  %v3659_v10 = vmul.f32 %v10718_v47, %v14152_v11  ;;  %14153 = vst [vmem:[#allocation102_spill] sm:$0xff] %v11155_v13  ;;  %v11162_v46 = vmul.f32 %v14155_v29, %v11104_v38  ;;  %v11166_v52 = vpop.eup %8607  ;;  %v3658_v39 = vmul.f32 %v10718_v47, %v14157_v4  ;;  %v14158_v23 = vld [vmem:[#allocation35_spill] sm:$0xff]  ;;  %v14160_v4 = vld [vmem:[#allocation128_spill] sm:$0xff] }
 0x603   : >> { %14150 = vst [vmem:[#allocation76_spill] sm:$0xff] %v11144_v35  ;;  %5292 = vperm.xlu0 %8422, %v10332_v32   ;;  %7520 = vmatpush3.bf16.msra.mxu0 %v3690_v55  ;;  %v11153_v50 = vadd.f32 %v3847_v15, %v3763_v54  ;;  %v14154_v35 = vmov 0.0   ;;  %v2597_v55 = vmul.f32 %v14120_v16, %v14132_v0  ;;  %14156 = vst [vmem:[#allocation91_spill] sm:$0xff] %v11166_v52  ;;  %v11176_v11 = vpop.eup %8609  ;;  %8621 = vpow2.f32 %v2935_v20  ;;  %v14175_v52 = vld [vmem:[#allocation78_spill] sm:$0xff]  ;;  %v14176_v42 = vld [vmem:[#allocation121_spill] sm:$0xff] }
 0x604   : >> { %7521 = vmatprep.subr.bf16.mxu0 %v14154_v35  ;;  %v3689_v54 = vpack.c.bf16 %v3680_v1, %v3679_v7  ;;  %v2585_v31 = vmul.f32 %v10585_v28, %v14158_v23  ;;  %14159 = vst [vmem:[#allocation107_spill] sm:$0xff] %v11176_v11  ;;  %v3676_v29 = vadd.f32 %v3660_v24, %v10838_v2  ;;  %v11186_v1 = vpop.eup %8611  ;;  %v13791_v2 = vmov 10  }
 0x605   : >> { %v11170_v15 = vpop.permute.xlu1 %3994  ;;  %v3871_v19 = vpack.c.bf16 %v11153_v50, %v11151_v8  ;;  %v3759_v0 = vmul.f32 %v10919_v62, %v11138_v36  ;;  %v3843_v13 = vmul.f32 %v10747_v59, %v10859_v6  ;;  %v11183_v47 = vadd.f32 %v3845_v30, %v3761_v3  ;;  %v11197_v6 = vpop.eup %8613  ;;  %v14163_v3 = vld [vmem:[#allocation124_spill] sm:$0xff] }
 0x606   : >> { %4695 = vperm.xlu1 %8416, %v14095_v58   ;;  %v11188_v7 = vadd.f32 %v3837_v56, %v3753_v37  ;;  %v11191_v43 = vadd.f32 %v3657_v25, %v14160_v4  ;;  %v3675_v11 = vadd.f32 %v3659_v10, %v10823_v22  ;;  %14162 = vst [vmem:[#allocation128_spill] sm:$0xff] %v11197_v6  ;;  %v11206_v22 = vpop.eup %8615  ;;  %v14164_v25 = vld [vmem:[#allocation133_spill] sm:$0xff]  ;;  %v14166_v4 = vld [vmem:[#allocation54_spill] sm:$0xff] }
 0x607   : >> { %8425 = vset.pattern.permute.xlu0 %v13791_v2  ;;  %v11195_v62 = vpop.permute.xlu0 %4687  ;;  %7522 = vmatpush3.bf16.msra.mxu0 %v3689_v54  ;;  %v3758_v24 = vmul.f32 %v10891_v27, %v3677_v21  ;;  %v3842_v37 = vmul.f32 %v10747_v59, %v14163_v3  ;;  %v11203_v56 = vadd.f32 %v11095_v48, %v3760_v63  ;;  %v2911_v48 = vmul.f32 1.442695, %v11116_v53  ;;  %v11219_v63 = vpop.eup %8617  ;;  %v14165_v54 = vld [vmem:[#allocation109_spill] sm:$0xff]  ;;  %v14169_v2 = vld [vmem:[#allocation82_spill] sm:$0xff] }
 0x608   : >> { %14161 = vst [vmem:[#allocation85_spill] sm:$0xff] %v11195_v62  ;;  %7540 = vmatpush3.bf16.msra.mxu1 %v3871_v19  ;;  %5419 = vperm.xlu0 %8425, %v10274_v57   ;;  %v11209_v30 = vadd.f32 %v3658_v39, %v14164_v25  ;;  %v3688_v27 = vpack.c.bf16 %v11138_v36, %v3677_v21  ;;  %v14167_v36 = vld [vmem:[#allocation110_spill] sm:$0xff]  ;;  %v14168_v21 = vld [vmem:[#allocation115_spill] sm:$0xff]  ;;  %v14173_v6 = vld [vmem:[#allocation97_spill] sm:$0xff] }
 0x609   : >> { %v11211_v44 = vpop.permute.xlu1 %4002  ;;  %7523 = vmatprep.subr.bf16.mxu0 %v14154_v35  ;;  %7541 = vmatprep.subr.bf16.mxu1 %v14154_v35  ;;  %v2599_v10 = vmul.f32 %v14120_v16, %v14140_v14  ;;  %v3757_v20 = vmul.f32 %v10863_v61, %v3676_v29  ;;  %v3841_v39 = vmul.f32 %v10747_v59, %v14165_v54  ;;  %v14171_v54 = vld [vmem:[#allocation37_spill] sm:$0xff]  ;;  %8623 = vpow2.f32 %v2911_v48 }
 0x60a   : >> { %v11224_v19 = vadd.f32 %v3843_v13, %v3759_v0  ;;  %4703 = vperm.xlu1 %8416, %v14166_v4   ;;  %v3870_v3 = vpack.c.bf16 %v11183_v47, %v11203_v56  ;;  %v3938_v53 = vmul.f32 %v14167_v36, %v11188_v7  ;;  %v3754_v25 = vmul.f32 %v14168_v21, %v11191_v43  ;;  %v14172_v13 = vld [vmem:[#allocation134_spill] sm:$0xff]  ;;  %v14174_v36 = vld [vmem:[#allocation53_spill] sm:$0xff] }
 0x60b   : >> { %v3838_v62 = vmul.f32 %v10747_v59, %v14169_v2  ;;  %v11235_v61 = vpop.permute.xlu0 %4699  ;;  %7524 = vmatpush3.bf16.msra.mxu0 %v3688_v27  ;;  %v2587_v0 = vmul.f32 %v10585_v28, %v14171_v54  ;;  %v3756_v14 = vmul.f32 %v14172_v13, %v3675_v11  ;;  %v3840_v58 = vmul.f32 %v10747_v59, %v14173_v6  ;;  %v14180_v57 = vld [vmem:[#allocation77_spill] sm:$0xff] }
 0x60c   : >> { %14170 = vst [vmem:[#allocation124_spill] sm:$0xff] %v11235_v61  ;;  %v11242_v45 = vadd.f32 %v3842_v37, %v3758_v24  ;;  %7542 = vmatpush3.bf16.msra.mxu1 %v3870_v3  ;;  %5431 = vperm.xlu0 %8425, %v14174_v36   ;;  %v2939_v21 = vmul.f32 1.442695, %v2597_v55  ;;  %v4022_v2 = vmul.f32 %v14176_v42, %v14175_v52  ;;  %v2915_v13 = vmul.f32 1.442695, %v2585_v31  ;;  %v14177_v24 = vld [vmem:[#allocation120_spill] sm:$0xff] }
 0x60d   : >> { %v11247_v9 = vpop.permute.xlu1 %4010  ;;  %7525 = vmatprep.subr.bf16.mxu0 %v14154_v35  ;;  %7543 = vmatprep.subr.bf16.mxu1 %v14154_v35  ;;  %v3687_v27 = vpack.c.bf16 %v3676_v29, %v3675_v11  ;;  %v2601_v6 = vmul.f32 %v14120_v16, %v14158_v23  ;;  %v3755_v37 = vmul.f32 %v14177_v24, %v11209_v30  ;;  %v14178_v3 = vld [vmem:[#allocation87_spill] sm:$0xff]  ;;  %v14179_v52 = vld [vmem:[#allocation56_spill] sm:$0xff]  ;;  %v2943_v23 = vmul.f32 1.442695, %v2599_v10 }
 0x60e   : >> { %v3839_v55 = vmul.f32 %v10747_v59, %v14178_v3  ;;  %v11257_v61 = vadd.f32 %v3841_v39, %v3757_v20  ;;  %4711 = vperm.xlu1 %8416, %v14179_v52   ;;  %v3869_v36 = vpack.c.bf16 %v11224_v19, %v11242_v45  ;;  %v11264_v11 = vmul.f32 %v14176_v42, %v14180_v57  ;;  %v14182_v29 = vld [vmem:[#allocation67_spill] sm:$0xff] }
 0x60f   : >> { %v11266_v31 = vpop.permute.xlu0 %4707  ;;  %7526 = vmatpush3.bf16.msra.mxu0 %v3687_v27  ;;  %v3685_v24 = vpack.c.bf16 %v11083_v49, %v14182_v29  ;;  %v3854_v59 = vadd.f32 %v3838_v62, %v3754_v25  ;;  %v3856_v20 = vadd.f32 %v3840_v58, %v3756_v14  ;;  %v2919_v3 = vmul.f32 1.442695, %v2587_v0  ;;  %v14183_v49 = vld [vmem:[#allocation39_spill] sm:$0xff] }
 0x610   : >> { %14181 = vst [vmem:[#allocation133_spill] sm:$0xff] %v11266_v31  ;;  %7544 = vmatpush3.bf16.msra.mxu1 %v3869_v36  ;;  %5475 = vperm.xlu0 %8425, %v10332_v32   ;;  %v11273_v52 = vadd.f32 %v4022_v2, %v3938_v53  ;;  %v3686_v57 = vpack.c.bf16 %v11209_v30, %v11191_v43  ;;  %8625 = vpow2.f32 %v2939_v21  ;;  %v2947_v10 = vmul.f32 1.442695, %v2601_v6  ;;  %v14184_v53 = vld [vmem:[#allocation79_spill] sm:$0xff]  ;;  %v14186_v36 = vld [vmem:[#allocation130_spill] sm:$0xff]  ;;  %v11294_v21 = vpop.eup %8619  ;;  %v14188_v2 = vld [vmem:[#allocation116_spill] sm:$0xff] }
 0x611   : >> { %7527 = vmatprep.subr.bf16.mxu0 %v14154_v35  ;;  %7545 = vmatprep.subr.bf16.mxu1 %v14154_v35  ;;  %v2589_v62 = vmul.f32 %v10585_v28, %v14183_v49  ;;  %v11281_v58 = vadd.f32 %v3839_v55, %v3755_v37  ;;  %v3868_v48 = vpack.c.bf16 %v11257_v61, %v3856_v20  ;;  %8627 = vpow2.f32 %v2915_v13  ;;  %v14185_v0 = vld [vmem:[#allocation83_spill] sm:$0xff]  ;;  %v11300_v6 = vpop.eup %8621  ;;  %v14189_v55 = vld [vmem:[#allocation84_spill] sm:$0xff] }
 0x612   : >> { %4719 = vperm.xlu1 %8416, %v14127_v17   ;;  %v4139_v14 = vpop.permute.xlu1 %4138  ;;  %v11287_v25 = vmul.f32 %v14176_v42, %v14184_v53  ;;  %v4201_v43 = vmul.f32 %v14186_v36, %v14185_v0  ;;  %8629 = vpow2.f32 %v2943_v23  ;;  %v3939_v27 = vmul.f32 %v14188_v2, %v3854_v59  ;;  %v14190_v23 = vld [vmem:[#allocation70_spill] sm:$0xff] }
 0x613   : >> { %v4202_v30 = vmul.f32 %v14186_v36, %v4139_v14  ;;  %v11292_v28 = vpop.permute.xlu0 %4715  ;;  %7528 = vmatpush3.bf16.msra.mxu0 %v3686_v57  ;;  %8631 = vpow2.f32 %v2919_v3  ;;  %v2603_v13 = vmul.f32 %v14120_v16, %v14171_v54  ;;  %v4204_v29 = vmul.f32 %v14186_v36, %v14189_v55  ;;  %v14192_v3 = vld [vmem:[#allocation112_spill] sm:$0xff]  ;;  %v14193_v53 = vld [vmem:[#allocation138_spill] sm:$0xff]  ;;  %v14194_v55 = vld [vmem:[#allocation81_spill] sm:$0xff] }
 0x614   : >> { %14187 = vst [vmem:[#allocation109_spill] sm:$0xff] %v11292_v28  ;;  %7546 = vmatpush3.bf16.msra.mxu1 %v3868_v48  ;;  %5467 = vperm.xlu0 %8425, %v10324_v40   ;;  %v2923_v14 = vmul.f32 1.442695, %v2589_v62  ;;  %v4122_v48 = vmul.f32 %v14192_v3, %v11273_v52  ;;  %v3941_v0 = vmul.f32 %v14193_v53, %v3856_v20  ;;  %8633 = vpow2.f32 %v2947_v10  ;;  %v14197_v28 = vld [vmem:[#allocation105_spill] sm:$0xff]  ;;  %v14198_v62 = vld [vmem:[#allocation139_spill] sm:$0xff] }
 0x615   : >> { %v11307_v57 = vadd.f32 %v4202_v30, %v14190_v23  ;;  %7529 = vmatprep.subr.bf16.mxu0 %v14154_v35  ;;  %7547 = vmatprep.subr.bf16.mxu1 %v14154_v35  ;;  %v3867_v37 = vpack.c.bf16 %v11281_v58, %v3854_v59  ;;  %v4031_v30 = vmul.f32 %v14176_v42, %v14194_v55  ;;  %v14195_v23 = vld [vmem:[#allocation94_spill] sm:$0xff]  ;;  %v14200_v53 = vld [vmem:[#allocation93_spill] sm:$0xff] }
 0x616   : >> { %4727 = vperm.xlu1 %8416, %v14133_v18   ;;  %v11315_v2 = vpop.permute.xlu1 %4142  ;;  %v11321_v39 = vadd.f32 %v4201_v43, %v14195_v23  ;;  %v4385_v31 = vmul.f32 %v14198_v62, %v14197_v28  ;;  %v11330_v54 = vadd.f32 %v14200_v53, %v3939_v27  ;;  %v14201_v59 = vld [vmem:[#allocation57_spill] sm:$0xff]  ;;  %v2951_v43 = vmul.f32 1.442695, %v2603_v13  ;;  %v14206_v27 = vld [vmem:[#allocation72_spill] sm:$0xff] }
 0x617   : >> { %14191 = vst [vmem:[#allocation110_spill] sm:$0xff] %v11307_v57  ;;  %v4301_v3 = vmul.f32 %v11186_v1, %v11307_v57  ;;  %v11327_v20 = vpop.permute.xlu0 %4723  ;;  %7530 = vmatpush3.bf16.msra.mxu0 %v3685_v24  ;;  %v14202_v10 = vld [vmem:[#allocation25_spill] sm:$0xff]  ;;  %v2605_v23 = vmul.f32 %v14120_v16, %v14183_v49  ;;  %v11338_v28 = vadd.f32 %v4204_v29, %v11087_v5  ;;  %v14204_v1 = vld [vmem:[#allocation86_spill] sm:$0xff]  ;;  %8635 = vpow2.f32 %v2923_v14  ;;  %v14207_v29 = vld [vmem:[#allocation27_spill] sm:$0xff] }
 0x618   : >> { %14196 = vst [vmem:[#allocation115_spill] sm:$0xff] %v11321_v39  ;;  %14199 = vst [vmem:[#allocation82_spill] sm:$0xff] %v11327_v20  ;;  %7548 = vmatpush3.bf16.msra.mxu1 %v3867_v37  ;;  %5447 = vperm.xlu0 %8425, %v14201_v59   ;;  %v2591_v55 = vmul.f32 %v14120_v16, %v14202_v10  ;;  %v4206_v20 = vmul.f32 %v14186_v36, %v14204_v1  ;;  %v14208_v1 = vld [vmem:[#allocation113_spill] sm:$0xff]  ;;  %v14210_v14 = vld [vmem:[#allocation119_spill] sm:$0xff]  ;;  %8637 = vpow2.f32 %v2951_v43 }
 0x619   : >> { %14203 = vst [vmem:[#allocation134_spill] sm:$0xff] %v11338_v28  ;;  %7531 = vmatprep.subr.bf16.mxu0 %v14154_v35  ;;  %7549 = vmatprep.subr.bf16.mxu1 %v14154_v35  ;;  %v11344_v24 = vadd.f32 %v4385_v31, %v4301_v3  ;;  %v11347_v37 = vadd.f32 %v14206_v27, %v3941_v0 }
 0x61a   : >> { %v4032_v13 = vmul.f32 %v14176_v42, %v11247_v9  ;;  %4735 = vperm.xlu1 %8416, %v10324_v40   ;;  %v4151_v5 = vpop.permute.xlu1 %4150  ;;  %v2593_v53 = vmul.f32 %v14120_v16, %v14207_v29  ;;  %v2607_v49 = vmul.f32 %v14208_v1, %v14202_v10  ;;  %v14209_v31 = vpack.c.bf16 %v10922_v34, %v10872_v33  ;;  %v14211_v9 = vld [vmem:[#allocation28_spill] sm:$0xff]  ;;  %v11372_v40 = vpop.eup %8623 }
 0x61b   : >> { %14205 = vst [vmem:[#allocation97_spill] sm:$0xff] %v11344_v24  ;;  %v4205_v17 = vmul.f32 %v14186_v36, %v4151_v5  ;;  %v11362_v0 = vmul.f32 %v14210_v14, %v11321_v39  ;;  %v11366_v3 = vmul.f32 %v14120_v16, %v14211_v9  ;;  %v11370_v27 = vmul.f32 %v11206_v22, %v11344_v24  ;;  %v11378_v34 = vpop.permute.xlu0 %4731  ;;  %v14215_v14 = vld [vmem:[#allocation122_spill] sm:$0xff]  ;;  %v14224_v39 = vld [vmem:[#allocation65_spill] sm:$0xff] }
 0x61c   : >> { %7532 = vmatpush3.bf16.msra.mxu0 %v14209_v31  ;;  %v3947_v5 = vmul.f32 %v11056_v26, %v11151_v8  ;;  %v3948_v33 = vmul.f32 %v11091_v41, %v11153_v50  ;;  %14213 = vst [vmem:[#allocation121_spill] sm:$0xff] %v11378_v34  ;;  %v14214_v31 = vpack.c.bf16 %v11188_v7, %v11048_v12  ;;  %v14216_v26 = vld [vmem:[#allocation123_spill] sm:$0xff]  ;;  %v2955_v12 = vmul.f32 1.442695, %v2605_v23  ;;  %v14219_v23 = vld [vmem:[#allocation114_spill] sm:$0xff]  ;;  %v14221_v34 = vld [vmem:[#allocation132_spill] sm:$0xff] }
 0x61d   : >> { %14212 = vst [vmem:[#allocation78_spill] sm:$0xff] %v11370_v27  ;;  %5435 = vperm.xlu0 %8425, %v14166_v4   ;;  %v4123_v22 = vmul.f32 %v14215_v14, %v11330_v54  ;;  %v11386_v24 = vadd.f32 %v4206_v20, %v4122_v48  ;;  %v11389_v10 = vadd.f32 %v4205_v17, %v11162_v46  ;;  %v11397_v8 = vpop.eup %8625  ;;  %v14217_v46 = vld [vmem:[#allocation141_spill] sm:$0xff]  ;;  %v14218_v20 = vld [vmem:[#allocation30_spill] sm:$0xff]  ;;  %v14222_v27 = vld [vmem:[#allocation135_spill] sm:$0xff] }
 0x61e   : >> { %7550 = vmatpush3.bf16.msra.mxu1 %v14214_v31  ;;  %7533 = vmatprep.subr.bf16.mxu0 %v14154_v35  ;;  %v11395_v41 = vmul.f32 %v14216_v26, %v11338_v28  ;;  %v4030_v50 = vmul.f32 %v14176_v42, %v11211_v44  ;;  %v11401_v7 = vadd.f32 %v4032_v13, %v3948_v33  ;;  %v4159_v17 = vpop.permute.xlu1 %4158  ;;  %v11410_v31 = vpop.eup %8627  ;;  %v14220_v26 = vld [vmem:[#allocation145_spill] sm:$0xff]  ;;  %8639 = vpow2.f32 %v2955_v12 }
 0x61f   : >> { %7551 = vmatprep.subr.bf16.mxu1 %v14154_v35  ;;  %4743 = vperm.xlu1 %8416, %v10332_v32   ;;  %v4125_v48 = vmul.f32 %v14217_v46, %v11347_v37  ;;  %v11408_v43 = vmul.f32 %v14120_v16, %v14218_v20  ;;  %v4388_v14 = vmul.f32 %v14198_v62, %v14219_v23  ;;  %v11422_v4 = vpop.eup %8629  ;;  %v14225_v23 = vld [vmem:[#allocation99_spill] sm:$0xff] }
 0x620   : >> { %v3943_v44 = vmul.f32 %v14220_v26, %v11242_v45  ;;  %v4304_v13 = vmul.f32 %v11219_v63, %v11389_v10  ;;  %v4207_v33 = vmul.f32 %v14186_v36, %v4159_v17  ;;  %v14223_v46 = vpack.c.bf16 %v14221_v34, %v14222_v27  ;;  %v11434_v27 = vpop.eup %8631  ;;  %v14227_v34 = vld [vmem:[#allocation118_spill] sm:$0xff] }
 0x621   : >> { %v11424_v57 = vadd.f32 %v4031_v30, %v3947_v5  ;;  %v3945_v28 = vmul.f32 %v14224_v39, %v11203_v56  ;;  %v3946_v29 = vmul.f32 %v14225_v23, %v11183_v47  ;;  %v14226_v45 = vpack.c.bf16 %v11000_v60, %v10942_v51  ;;  %v14234_v23 = vld [vmem:[#allocation151_spill] sm:$0xff] }
 0x622   : >> { %7534 = vmatpush3.bf16.msra.mxu0 %v14223_v46  ;;  %v13811_v63 = vmov 11   ;;  %v2927_v17 = vmul.f32 1.442695, %v2591_v55  ;;  %v4390_v30 = vmul.f32 %v14198_v62, %v14227_v34  ;;  %v11438_v5 = vadd.f32 %v4207_v33, %v4123_v22  ;;  %v11450_v55 = vpop.permute.xlu0 %4739  ;;  %v4167_v22 = vpop.permute.xlu1 %4166  ;;  %v14235_v34 = vld [vmem:[#allocation140_spill] sm:$0xff] }
 0x623   : >> { %7552 = vmatpush3.bf16.msra.mxu1 %v14226_v45  ;;  %8433 = vset.pattern.permute.xlu0 %v13811_v63  ;;  %v11442_v47 = vadd.f32 %v4388_v14, %v4304_v13  ;;  %v2931_v56 = vmul.f32 1.442695, %v2593_v53  ;;  %v4028_v51 = vmul.f32 %v14176_v42, %v11170_v15  ;;  %v11446_v60 = vadd.f32 %v4030_v50, %v3946_v29  ;;  %v11454_v46 = vpop.eup %8633  ;;  %v14231_v50 = vld [vmem:[#allocation50_spill] sm:$0xff]  ;;  %v14232_v14 = vld [vmem:[#allocation108_spill] sm:$0xff] }
 0x624   : >> { %5658 = vperm.xlu0 %8433, %v10332_v32   ;;  %7553 = vmatprep.subr.bf16.mxu1 %v14154_v35  ;;  %v4056_v39 = vpack.c.bf16 %v11401_v7, %v11424_v57  ;;  %14229 = vst [vmem:[#allocation87_spill] sm:$0xff] %v11450_v55  ;;  %v14230_v26 = vmov 7   ;;  %v2959_v33 = vmul.f32 1.442695, %v2607_v49  ;;  %v4043_v53 = vadd.f32 %v11264_v11, %v3943_v44  ;;  %v14238_v44 = vld [vmem:[#allocation125_spill] sm:$0xff] }
 0x625   : >> { %14228 = vst [vmem:[#allocation120_spill] sm:$0xff] %v11442_v47  ;;  %8419 = vset.pattern.permute.xlu1 %v14230_v26  ;;  %7559 = vmatprep.subr.bf16.mxu0 %v14154_v35  ;;  %v4306_v15 = vmul.f32 %v11294_v21, %v11438_v5  ;;  %v4209_v29 = vmul.f32 %v14186_v36, %v4167_v22  ;;  %v11463_v13 = vshrl.u32 %v14232_v14, 16  ;;  %v14236_v26 = vld [vmem:[#allocation143_spill] sm:$0xff]  ;;  %v14239_v55 = vld [vmem:[#allocation61_spill] sm:$0xff]  ;;  %8641 = vpow2.f32 %v2927_v17  ;;  %v14242_v17 = vld [vmem:[#allocation148_spill] sm:$0xff] }
 0x626   : >> { %4870 = vperm.xlu1 %8419, %v14231_v50   ;;  %7536 = vmatmul.mubr.bf16.vlgmr.msra.gmra.mxu0 %v14232_v14  ;;  %v3944_v45 = vmul.f32 %v14234_v23, %v11224_v19  ;;  %v4045_v49 = vadd.f32 %v11287_v25, %v3945_v28  ;;  %v14237_v11 = vpack.c.bf16 %v14235_v34, %v14236_v26  ;;  %v11483_v25 = vpop.eup %8635  ;;  %v14241_v28 = vld [vmem:[#allocation106_spill] sm:$0xff]  ;;  %v4175_v23 = vpop.permute.xlu1 %4174  ;;  %8643 = vpow2.f32 %v2931_v56 }
 0x627   : >> { %14233 = vst [vmem:[#allocation77_spill] sm:$0xff] %v11463_v13  ;;  %7560 = vmatpush3.bf16.msra.mxu0 %v4056_v39  ;;  %v11473_v21 = vmul.f32 %v11300_v6, %v11442_v47  ;;  %v4392_v22 = vmul.f32 %v14198_v62, %v14238_v44  ;;  %v11477_v63 = vadd.f32 %v4209_v29, %v4125_v48  ;;  %v14243_v29 = vld [vmem:[#allocation51_spill] sm:$0xff]  ;;  %8645 = vpow2.f32 %v2959_v33  ;;  %v11501_v34 = vpop.permute.xlu0 %4866 }
 0x628   : >> { %7554 = vmatpush3.bf16.msra.mxu1 %v14237_v11  ;;  %5646 = vperm.xlu0 %8433, %v14239_v55   ;;  %v11481_v19 = vadd.f32 %v4390_v30, %v4306_v15  ;;  %v4026_v39 = vmul.f32 %v14176_v42, %v14241_v28  ;;  %v11487_v6 = vadd.f32 %v4028_v51, %v3944_v45  ;;  %v14244_v51 = vld [vmem:[#allocation144_spill] sm:$0xff]  ;;  %v2933_v56 = vmul.f32 1.442695, %v11366_v3  ;;  %v8638_v11 = vpop.eup %8637  ;;  %v14246_v33 = vld [vmem:[#allocation127_spill] sm:$0xff]  ;;  %v14247_v28 = vld [vmem:[#allocation89_spill] sm:$0xff] }
 0x629   : >> { %7561 = vmatprep.subr.bf16.mxu0 %v14154_v35  ;;  %v4055_v12 = vpack.c.bf16 %v11446_v60, %v4045_v49  ;;  %7579 = vmatprep.subr.bf16.mxu1 %v14154_v35  ;;  %v4308_v48 = vmul.f32 %v11372_v40, %v11477_v63  ;;  %v4127_v30 = vmul.f32 %v14242_v17, %v4043_v53  ;;  %v2937_v3 = vmul.f32 1.442695, %v11408_v43 }
 0x62a   : >> { %14240 = vst [vmem:[#allocation67_spill] sm:$0xff] %v11481_v19  ;;  %7575 = vmatprep.mubr.msk.bf16.mxu0 %vm9229_vm4, %v14154_v35  ;;  %v4211_v15 = vmul.f32 %v14186_v36, %v4175_v23  ;;  %4874 = vperm.xlu1 %8419, %v14243_v29   ;;  %v3942_v45 = vmul.f32 %v14244_v51, %v11257_v61  ;;  %14245 = vst [vmem:[#allocation79_spill] sm:$0xff] %v11501_v34  ;;  %v14248_v23 = vld [vmem:[#allocation131_spill] sm:$0xff]  ;;  %8647 = vpow2.f32 %v2933_v56 }
 0x62b   : >> { %7556 = vmatmul.mubr.bf16.vlgmr.msra.gmra.mxu1 %v11463_v13  ;;  %7562 = vmatpush3.bf16.msra.mxu0 %v4055_v12  ;;  %v11506_v40 = vmul.f32 %v11397_v8, %v11481_v19  ;;  %v2610_v26 = vmul.f32 %v14208_v1, %v14211_v9  ;;  %v3940_v44 = vmul.f32 %v14246_v33, %v11281_v58  ;;  %v14249_v33 = vld [vmem:[#allocation68_spill] sm:$0xff]  ;;  %8649 = vpow2.f32 %v2937_v3 }
 0x62c   : >> { %7595 = vmatprep.mubr.msk.bf16.mxu1 %vm9229_vm4, %v14154_v35  ;;  %v11514_v61 = vadd.f32 %v4211_v15, %v4127_v30  ;;  %5642 = vperm.xlu0 %8433, %v14133_v18   ;;  %v11519_v8 = vadd.f32 %v4392_v22, %v4308_v48  ;;  %v4024_v12 = vmul.f32 %v14176_v42, %v14247_v28  ;;  %v4183_v30 = vpop.permute.xlu1 %4182  ;;  %v14250_v22 = vld [vmem:[#allocation53_spill] sm:$0xff]  ;;  %v14257_v3 = vld [vmem:[#allocation104_spill] sm:$0xff] }
 0x62d   : >> { %7563 = vmatprep.subr.bf16.mxu0 %v14154_v35  ;;  %v4394_v17 = vmul.f32 %v14198_v62, %v14248_v23  ;;  %v11525_v51 = vadd.f32 %v4026_v39, %v3942_v45  ;;  %v4054_v58 = vpack.c.bf16 %v11487_v6, %v4043_v53  ;;  %v4129_v34 = vmul.f32 %v14249_v33, %v4045_v49  ;;  %v14252_v39 = vld [vmem:[#allocation32_spill] sm:$0xff] }
 0x62e   : >> { %v4310_v15 = vmul.f32 %v11410_v31, %v11514_v61  ;;  %v4213_v43 = vmul.f32 %v14186_v36, %v4183_v30  ;;  %4882 = vperm.xlu1 %8419, %v14250_v22   ;;  %v11535_v42 = vmul.f32 %v11422_v4, %v11519_v8  ;;  %v2598_v48 = vmul.f32 %v14120_v16, %v14252_v39  ;;  %v14253_v31 = vld [vmem:[#allocation91_spill] sm:$0xff]  ;;  %v14254_v23 = vld [vmem:[#allocation100_spill] sm:$0xff] }
 0x62f   : >> { %7564 = vmatpush3.bf16.msra.mxu0 %v4054_v58  ;;  %v2965_v53 = vmul.f32 1.442695, %v2610_v26  ;;  %v2612_v45 = vmul.f32 %v14208_v1, %v14218_v20  ;;  %v4132_v49 = vmul.f32 %v14253_v31, %v11401_v7  ;;  %v11549_v56 = vadd.f32 %v4024_v12, %v3940_v44  ;;  %v14255_v58 = vld [vmem:[#allocation137_spill] sm:$0xff]  ;;  %v14258_v12 = vld [vmem:[#allocation55_spill] sm:$0xff]  ;;  %v14260_v31 = vld [vmem:[#allocation80_spill] sm:$0xff] }
 0x630   : >> { %14251 = vst [vmem:[#allocation83_spill] sm:$0xff] %v11535_v42  ;;  %v11543_v28 = vadd.f32 %v4213_v43, %v4129_v34  ;;  %5630 = vperm.xlu0 %8433, %v14201_v59   ;;  %7565 = vmatprep.subr.bf16.mxu0 %v14154_v35  ;;  %v11547_v4 = vadd.f32 %v4394_v17, %v4310_v15  ;;  %v11557_v34 = vpop.permute.xlu0 %4878  ;;  %v4191_v33 = vpop.permute.xlu1 %4190 }
 0x631   : >> { %v4216_v26 = vmul.f32 %v14186_v36, %v14254_v23  ;;  %v4396_v30 = vmul.f32 %v14198_v62, %v14255_v58  ;;  %v4053_v7 = vpack.c.bf16 %v11525_v51, %v11347_v37  ;;  %14256 = vst [vmem:[#allocation130_spill] sm:$0xff] %v11557_v34  ;;  %v4131_v17 = vmul.f32 %v14257_v3, %v11424_v57 }
 0x632   : >> { %v4312_v43 = vmul.f32 %v11434_v27, %v11543_v28  ;;  %v4215_v44 = vmul.f32 %v14186_v36, %v4191_v33  ;;  %4890 = vperm.xlu1 %8419, %v14258_v12   ;;  %v11567_v15 = vmul.f32 %v11454_v46, %v11547_v4  ;;  %v4130_v37 = vmul.f32 %v14260_v31, %v11446_v60  ;;  %v8640_v27 = vpop.eup %8639  ;;  %v14261_v31 = vld [vmem:[#allocation96_spill] sm:$0xff] }
 0x633   : >> { %v4203_v23 = vmul.f32 %v14186_v36, %v11315_v2  ;;  %7566 = vmatpush3.bf16.msra.mxu0 %v4053_v7  ;;  %v2941_v58 = vmul.f32 1.442695, %v2598_v48  ;;  %8651 = vpow2.f32 %v2965_v53  ;;  %v11573_v57 = vadd.f32 %v4216_v26, %v4132_v49  ;;  %v8642_v3 = vpop.eup %8641  ;;  %v14262_v48 = vld [vmem:[#allocation34_spill] sm:$0xff] }
 0x634   : >> { %14259 = vst [vmem:[#allocation116_spill] sm:$0xff] %v11567_v15  ;;  %v4231_v34 = vadd.f32 %v4215_v44, %v4131_v17  ;;  %5614 = vperm.xlu0 %8433, %v14250_v22   ;;  %7567 = vmatprep.subr.bf16.mxu0 %v14154_v35  ;;  %v11577_v33 = vadd.f32 %v4396_v30, %v4312_v43  ;;  %v2969_v46 = vmul.f32 1.442695, %v2612_v45  ;;  %v8644_v26 = vpop.eup %8643  ;;  %v14263_v7 = vld [vmem:[#allocation142_spill] sm:$0xff]  ;;  %v14266_v15 = vld [vmem:[#allocation69_spill] sm:$0xff]  ;;  %v11600_v9 = vpop.permute.xlu0 %4886 }
 0x635   : >> { %v4052_v60 = vpack.c.bf16 %v11549_v56, %v11330_v54  ;;  %v4214_v2 = vmul.f32 %v14186_v36, %v14261_v31  ;;  %v2600_v53 = vmul.f32 %v14120_v16, %v14262_v48  ;;  %v2614_v49 = vmul.f32 %v14208_v1, %v14252_v39  ;;  %v4318_v54 = vpop.permute.xlu1 %4317  ;;  %v8646_v44 = vpop.eup %8645  ;;  %v14265_v31 = vld [vmem:[#allocation88_spill] sm:$0xff]  ;;  %14267 = vst [vmem:[#allocation70_spill] sm:$0xff] %v11600_v9 }
 0x636   : >> { %v4398_v17 = vmul.f32 %v14198_v62, %v14263_v7  ;;  %v4240_v30 = vpack.c.bf16 %v11573_v57, %v4231_v34  ;;  %v4314_v45 = vmul.f32 %v11483_v25, %v4231_v34  ;;  %4898 = vperm.xlu1 %8419, %v14201_v59   ;;  %v11593_v43 = vmul.f32 %v8638_v11, %v11577_v33  ;;  %v14268_v25 = vld [vmem:[#allocation75_spill] sm:$0xff]  ;;  %v14269_v11 = vld [vmem:[#allocation52_spill] sm:$0xff] }
 0x637   : >> { %v4208_v20 = vmul.f32 %v14186_v36, %v14265_v31  ;;  %v11598_v39 = vadd.f32 %v4203_v23, %v14266_v15  ;;  %v4384_v7 = vmul.f32 %v14198_v62, %v4318_v54  ;;  %7568 = vmatpush3.bf16.msra.mxu0 %v4052_v60  ;;  %8653 = vpow2.f32 %v2941_v58  ;;  %v14270_v31 = vld [vmem:[#allocation92_spill] sm:$0xff]  ;;  %v14275_v54 = vld [vmem:[#allocation147_spill] sm:$0xff] }
 0x638   : >> { %14264 = vst [vmem:[#allocation84_spill] sm:$0xff] %v11593_v43  ;;  %v4128_v34 = vmul.f32 %v14268_v25, %v11487_v6  ;;  %v11605_v47 = vadd.f32 %v4214_v2, %v4130_v37  ;;  %5610 = vperm.xlu0 %8433, %v14269_v11   ;;  %7580 = vmatpush3.bf16.msra.mxu1 %v4240_v30  ;;  %8655 = vpow2.f32 %v2969_v46  ;;  %v2945_v58 = vmul.f32 1.442695, %v2600_v53  ;;  %v14271_v6 = vld [vmem:[#allocation36_spill] sm:$0xff]  ;;  %v14272_v2 = vld [vmem:[#allocation59_spill] sm:$0xff] }
 0x639   : >> { %v11608_v43 = vadd.f32 %v4398_v17, %v4314_v45  ;;  %v4212_v15 = vmul.f32 %v14186_v36, %v14270_v31  ;;  %v11613_v23 = vadd.f32 %v4384_v7, %v11362_v0  ;;  %7569 = vmatprep.subr.bf16.mxu0 %v14154_v35  ;;  %7581 = vmatprep.subr.bf16.mxu1 %v14154_v35  ;;  %v4326_v46 = vpop.permute.xlu1 %4325  ;;  %v2973_v30 = vmul.f32 1.442695, %v2614_v49  ;;  %v14274_v45 = vld [vmem:[#allocation146_spill] sm:$0xff]  ;;  %v14276_v25 = vld [vmem:[#allocation128_spill] sm:$0xff]  ;;  %v14278_v49 = vld [vmem:[#allocation129_spill] sm:$0xff] }
 0x63a   : >> { %v2602_v37 = vmul.f32 %v14120_v16, %v14271_v6  ;;  %v4239_v60 = vpack.c.bf16 %v11605_v47, %v11543_v28  ;;  %4906 = vperm.xlu1 %8419, %v14272_v2   ;;  %v2616_v0 = vmul.f32 %v14208_v1, %v14262_v48  ;;  %v4567_v7 = vmul.f32 %v14275_v54, %v14274_v45  ;;  %v14279_v48 = vld [vmem:[#allocation101_spill] sm:$0xff]  ;;  %v11645_v45 = vpop.permute.xlu0 %4894 }
 0x63b   : >> { %v11623_v17 = vmul.f32 %v8640_v27, %v11608_v43  ;;  %v4483_v53 = vmul.f32 %v8642_v3, %v11613_v23  ;;  %v4302_v31 = vmul.f32 %v14276_v25, %v11598_v39  ;;  %v4386_v28 = vmul.f32 %v14198_v62, %v4326_v46  ;;  %v8648_v27 = vpop.eup %8647  ;;  %14280 = vst [vmem:[#allocation138_spill] sm:$0xff] %v11645_v45  ;;  %v14284_v25 = vld [vmem:[#allocation111_spill] sm:$0xff]  ;;  %v14297_v45 = vld [vmem:[#allocation46_spill] sm:$0xff] }
 0x63c   : >> { %v14277_v9 = vpack.c.bf16 %v11273_v52, %v11104_v38  ;;  %v4126_v42 = vmul.f32 %v14279_v48, %v11525_v51  ;;  %v11640_v19 = vadd.f32 %v4212_v15, %v4128_v34  ;;  %5602 = vperm.xlu0 %8433, %v14231_v50   ;;  %7582 = vmatpush3.bf16.msra.mxu1 %v4239_v60  ;;  %v11643_v3 = vpop.eup %8649  ;;  %8657 = vpow2.f32 %v2945_v58  ;;  %v14283_v34 = vld [vmem:[#allocation38_spill] sm:$0xff]  ;;  %v14285_v58 = vld [vmem:[#allocation152_spill] sm:$0xff] }
 0x63d   : >> { %14273 = vst [vmem:[#allocation112_spill] sm:$0xff] %v11623_v17  ;;  %v4124_v17 = vmul.f32 %v14278_v49, %v11549_v56  ;;  %v11647_v46 = vadd.f32 %v4386_v28, %v4302_v31  ;;  %7583 = vmatprep.subr.bf16.mxu1 %v14154_v35  ;;  %v2949_v38 = vmul.f32 1.442695, %v2602_v37  ;;  %v11651_v52 = vadd.f32 %v4567_v7, %v4483_v53  ;;  %v4330_v48 = vpop.permute.xlu1 %4329 }
 0x63e   : >> { %7570 = vmatpush3.bf16.msra.mxu0 %v14277_v9  ;;  %v14282_v9 = vld [vmem:[#allocation90_spill] sm:$0xff]  ;;  %v4238_v56 = vpack.c.bf16 %v11640_v19, %v11514_v61  ;;  %4914 = vperm.xlu1 %8419, %v14239_v55   ;;  %v2604_v15 = vmul.f32 %v14120_v16, %v14283_v34  ;;  %8659 = vpow2.f32 %v2973_v30  ;;  %v4387_v60 = vmul.f32 %v14198_v62, %v4330_v48 }
 0x63f   : >> { %7571 = vmatprep.subr.bf16.mxu0 %v14154_v35  ;;  %14281 = vst [vmem:[#allocation81_spill] sm:$0xff] %v11651_v52  ;;  %v4210_v51 = vmul.f32 %v14186_v36, %v14282_v9  ;;  %v14286_v37 = vpack.c.bf16 %v14284_v25, %v14285_v58  ;;  %v11665_v7 = vmul.f32 %v8644_v26, %v11647_v46  ;;  %v2977_v61 = vmul.f32 1.442695, %v2616_v0  ;;  %v14288_v30 = vld [vmem:[#allocation126_spill] sm:$0xff] }
 0x640   : >> { %v11668_v36 = vmul.f32 %v8646_v44, %v11651_v52  ;;  %v8652_v53 = vpop.eup %8651  ;;  %v13819_v28 = vmov 12   ;;  %7584 = vmatpush3.bf16.msra.mxu1 %v4238_v56  ;;  %v4305_v49 = vmul.f32 %v14288_v30, %v11386_v24  ;;  %v14289_v9 = vld [vmem:[#allocation98_spill] sm:$0xff]  ;;  %v2618_v26 = vmul.f32 %v14208_v1, %v14271_v6  ;;  %v14291_v56 = vld [vmem:[#allocation63_spill] sm:$0xff]  ;;  %v14294_v30 = vld [vmem:[#allocation149_spill] sm:$0xff] }
 0x641   : >> { %v11670_v31 = vadd.f32 %v4210_v51, %v4126_v42  ;;  %8435 = vset.pattern.permute.xlu0 %v13819_v28  ;;  %v2925_v48 = vmul.f32 1.442695, %v14289_v9  ;;  %v4224_v25 = vadd.f32 %v4208_v20, %v4124_v17  ;;  %v11679_v44 = vadd.f32 %v4387_v60, %v11395_v41  ;;  %v14290_v42 = vld [vmem:[#allocation40_spill] sm:$0xff]  ;;  %v4338_v58 = vpop.permute.xlu1 %4337  ;;  %7585 = vmatprep.subr.bf16.mxu1 %v14154_v35  ;;  %v14292_v60 = vld [vmem:[#allocation66_spill] sm:$0xff]  ;;  %v14321_v6 = vld [vmem:[#allocation107_spill] sm:$0xff] }
 0x642   : >> { %7572 = vmatpush3.bf16.msra.mxu0 %v14286_v37  ;;  %14287 = vst [vmem:[#allocation94_spill] sm:$0xff] %v11668_v36  ;;  %5841 = vperm.xlu0 %8435, %v10332_v32   ;;  %8661 = vpow2.f32 %v2949_v38  ;;  %v2606_v0 = vmul.f32 %v14120_v16, %v14290_v42  ;;  %v2953_v20 = vmul.f32 1.442695, %v2604_v15  ;;  %v4058_v41 = vrot.slane %v14232_v14, 1  ;;  %v11694_v37 = vpop.permute.xlu0 %4902  ;;  %v14295_v9 = vld [vmem:[#allocation150_spill] sm:$0xff] }
 0x643   : >> { %7573 = vmatprep.subr.bf16.mxu0 %v14154_v35  ;;  %v4237_v51 = vpack.c.bf16 %v11670_v31, %v11477_v63  ;;  %4922 = vperm.xlu1 %8419, %v14291_v56   ;;  %v2620_v17 = vmul.f32 %v14208_v1, %v14283_v34  ;;  %v4570_v38 = vmul.f32 %v14275_v54, %v14292_v60  ;;  %8663 = vpow2.f32 %v2977_v61 }
 0x644   : >> { %14293 = vst [vmem:[#allocation105_spill] sm:$0xff] %v11694_v37  ;;  %v4486_v16 = vmul.f32 %v8648_v27, %v11679_v44  ;;  %v4389_v63 = vmul.f32 %v14198_v62, %v4338_v58  ;;  %v14296_v28 = vpack.c.bf16 %v14294_v30, %v14295_v9  ;;  %v8654_v15 = vpop.eup %8653  ;;  %v2381_v55 = vcombine.high %v14297_v45, %v14297_v45  ;;  %v14298_v27 = vld [vmem:[#allocation136_spill] sm:$0xff] }
 0x645   : >> { %7586 = vmatpush3.bf16.msra.mxu1 %v4237_v51  ;;  %8665 = vpow2.f32 %v2925_v48  ;;  %v2981_v60 = vmul.f32 1.442695, %v2618_v26  ;;  %v8656_v34 = vpop.eup %8655  ;;  %v4307_v58 = vmul.f32 %v14298_v27, %v4224_v25  ;;  %v4236_v30 = vpack.c.bf16 %v4224_v25, %v11438_v5  ;;  %v4346_v48 = vpop.permute.xlu1 %4345  ;;  %v14300_v51 = vld [vmem:[#allocation95_spill] sm:$0xff] }
 0x646   : >> { %7574 = vmatpush3.bf16.msra.mxu0 %v14296_v28  ;;  %v11704_v37 = vadd.f32 %v4389_v63, %v4305_v49  ;;  %5825 = vperm.xlu0 %8435, %v14133_v18   ;;  %v2957_v28 = vmul.f32 1.442695, %v2606_v0  ;;  %v11709_v61 = vadd.f32 %v4570_v38, %v4486_v16  ;;  %v14299_v45 = vmov 8   ;;  %v14301_v38 = vld [vmem:[#allocation49_spill] sm:$0xff]  ;;  %v14303_v25 = vld [vmem:[#allocation43_spill] sm:$0xff]  ;;  %v11731_v16 = vpop.permute.xlu0 %4910 }
 0x647   : >> { %7599 = vmatprep.subr.bf16.mxu0 %v14154_v35  ;;  %7587 = vmatprep.subr.bf16.mxu1 %v14154_v35  ;;  %8667 = vpow2.f32 %v2953_v20  ;;  %v2985_v26 = vmul.f32 1.442695, %v2620_v17  ;;  %v2622_v49 = vmul.f32 %v14208_v1, %v14290_v42  ;;  %v4572_v63 = vmul.f32 %v14275_v54, %v14300_v51  ;;  %14305 = vst [vmem:[#allocation93_spill] sm:$0xff] %v11731_v16 }
 0x648   : >> { %8420 = vset.pattern.permute.xlu1 %v14299_v45  ;;  %v4488_v9 = vmul.f32 %v11643_v3, %v11704_v37  ;;  %v4391_v0 = vmul.f32 %v14198_v62, %v4346_v48  ;;  %v11722_v5 = vmul.f32 %v8652_v53, %v11709_v61  ;;  %v11725_v20 = vrot.slane %v2381_v55, %v14303_v25  ;;  %v14306_v55 = vld [vmem:[#allocation27_spill] sm:$0xff] }
 0x649   : >> { %7576 = vmatmul.mubr.bf16.vlgmr.msra.gmra.mxu0 %v4058_v41  ;;  %5049 = vperm.xlu1 %8420, %v14301_v38   ;;  %v14304_v41 = vld [vmem:[#allocation26_spill] sm:$0xff]  ;;  %8669 = vpow2.f32 %v2981_v60  ;;  %v2609_v27 = vmul.f32 %v14208_v1, %v14306_v55  ;;  %v14307_v45 = vld [vmem:[#allocation103_spill] sm:$0xff]  ;;  %v4235_v48 = vpack.c.bf16 %v11386_v24, %v11389_v10  ;;  %v4354_v51 = vpop.permute.xlu1 %4353 }
 0x64a   : >> { %14302 = vst [vmem:[#allocation139_spill] sm:$0xff] %v11722_v5  ;;  %7588 = vmatpush3.bf16.msra.mxu1 %v4236_v30  ;;  %v2608_v17 = vmul.f32 %v14208_v1, %v14304_v41  ;;  %7615 = vmatprep.mubr.msk.bf16.mxu0 %vm9229_vm4, %v14154_v35  ;;  %v11733_v3 = vadd.f32 %v4391_v0, %v4307_v58  ;;  %8671 = vpow2.f32 %v2957_v28  ;;  %v8658_v30 = vpop.eup %8657  ;;  %v2989_v58 = vmul.f32 1.442695, %v2622_v49  ;;  %v14308_v28 = vld [vmem:[#allocation117_spill] sm:$0xff] }
 0x64b   : >> { %5813 = vperm.xlu0 %8435, %v14201_v59   ;;  %7589 = vmatprep.subr.bf16.mxu1 %v14154_v35  ;;  %v11737_v53 = vadd.f32 %v4572_v63, %v4488_v9  ;;  %v4574_v60 = vmul.f32 %v14275_v54, %v14307_v45  ;;  %8673 = vpow2.f32 %v2985_v26  ;;  %v8660_v0 = vpop.eup %8659  ;;  %v4309_v63 = vmul.f32 %v14308_v28, %v11670_v31  ;;  %v14310_v26 = vld [vmem:[#allocation56_spill] sm:$0xff] }
 0x64c   : >> { %v4490_v16 = vmul.f32 %v8654_v15, %v11733_v3  ;;  %v4393_v9 = vmul.f32 %v14198_v62, %v4354_v51  ;;  %v2961_v45 = vmul.f32 1.442695, %v2608_v17  ;;  %v2624_v10 = vmul.f32 %v11725_v20, %v14304_v41  ;;  %v14311_v51 = vld [vmem:[#allocation71_spill] sm:$0xff] }
 0x64d   : >> { %5057 = vperm.xlu1 %8420, %v14243_v29   ;;  %v11751_v42 = vmul.f32 %v8656_v34, %v11737_v53  ;;  %v2963_v31 = vmul.f32 1.442695, %v2609_v27  ;;  %v4576_v28 = vmul.f32 %v14275_v54, %v14311_v51  ;;  %v14312_v34 = vld [vmem:[#allocation134_spill] sm:$0xff]  ;;  %v4362_v17 = vpop.permute.xlu1 %4361  ;;  %8675 = vpow2.f32 %v2989_v58 }
 0x64e   : >> { %7590 = vmatpush3.bf16.msra.mxu1 %v4235_v48  ;;  %v11755_v24 = vadd.f32 %v4393_v9, %v4309_v63  ;;  %v11759_v15 = vadd.f32 %v4574_v60, %v4490_v16  ;;  %v4234_v48 = vpack.c.bf16 %v14312_v34, %v11598_v39  ;;  %v14314_v9 = vld [vmem:[#allocation102_spill] sm:$0xff]  ;;  %v4395_v16 = vmul.f32 %v14198_v62, %v4362_v17  ;;  %v14316_v39 = vld [vmem:[#allocation29_spill] sm:$0xff]  ;;  %v14318_v17 = vld [vmem:[#allocation115_spill] sm:$0xff] }
 0x64f   : >> { %14309 = vst [vmem:[#allocation86_spill] sm:$0xff] %v11751_v42  ;;  %5809 = vperm.xlu0 %8435, %v14310_v26   ;;  %7591 = vmatprep.subr.bf16.mxu1 %v14154_v35  ;;  %v8662_v49 = vpop.eup %8661  ;;  %v11765_v42 = vpop.permute.xlu0 %4918  ;;  %v4311_v41 = vmul.f32 %v14314_v9, %v11640_v19  ;;  %8677 = vpow2.f32 %v2961_v45  ;;  %v2611_v58 = vmul.f32 %v14208_v1, %v14316_v39  ;;  %v2993_v51 = vmul.f32 1.442695, %v2624_v10 }
 0x650   : >> { %14313 = vst [vmem:[#allocation72_spill] sm:$0xff] %v11765_v42  ;;  %v4492_v63 = vmul.f32 %v8658_v30, %v11755_v24  ;;  %v11773_v27 = vmul.f32 %v8660_v0, %v11759_v15  ;;  %v8664_v60 = vpop.eup %8663  ;;  %8679 = vpow2.f32 %v2963_v31  ;;  %v14317_v30 = vld [vmem:[#allocation74_spill] sm:$0xff] }
 0x651   : >> { %5061 = vperm.xlu1 %8420, %v14269_v11   ;;  %v11777_v42 = vadd.f32 %v4395_v16, %v4311_v41  ;;  %v4578_v0 = vmul.f32 %v14275_v54, %v14317_v30  ;;  %v4370_v9 = vpop.permute.xlu1 %4369  ;;  %v4241_v41 = vrot.slane %v11463_v13, 1  ;;  %8681 = vpow2.f32 %v2993_v51 }
 0x652   : >> { %14315 = vst [vmem:[#allocation113_spill] sm:$0xff] %v11773_v27  ;;  %7592 = vmatpush3.bf16.msra.mxu1 %v4234_v48  ;;  %v8666_v34 = vpop.eup %8665  ;;  %v11781_v19 = vadd.f32 %v4576_v28, %v4492_v63  ;;  %v14319_v48 = vld [vmem:[#allocation110_spill] sm:$0xff]  ;;  %v14320_v27 = vld [vmem:[#allocation31_spill] sm:$0xff]  ;;  %v4313_v28 = vmul.f32 %v14321_v6, %v11605_v47  ;;  %v4397_v31 = vmul.f32 %v14198_v62, %v4370_v9  ;;  %v14324_v47 = vld [vmem:[#allocation33_spill] sm:$0xff] }
 0x653   : >> { %5797 = vperm.xlu0 %8435, %v14250_v22   ;;  %7593 = vmatprep.subr.bf16.mxu1 %v14154_v35  ;;  %v4233_v45 = vpack.c.bf16 %v14319_v48, %v14318_v17  ;;  %v2613_v10 = vmul.f32 %v14208_v1, %v14320_v27  ;;  %v4494_v5 = vmul.f32 %v8662_v49, %v11777_v42  ;;  %v14322_v63 = vld [vmem:[#allocation54_spill] sm:$0xff]  ;;  %v2967_v17 = vmul.f32 1.442695, %v2611_v58  ;;  %v11800_v36 = vpop.permute.xlu0 %4926  ;;  %v14325_v58 = vld [vmem:[#allocation73_spill] sm:$0xff] }
 0x654   : >> { %v8668_v16 = vpop.eup %8667  ;;  %v11796_v30 = vmul.f32 %v8664_v60, %v11781_v19  ;;  %v2627_v48 = vmul.f32 %v11725_v20, %v14316_v39  ;;  %14323 = vst [vmem:[#allocation119_spill] sm:$0xff] %v11800_v36  ;;  %v11802_v49 = vadd.f32 %v4397_v31, %v4313_v28  ;;  %v2615_v6 = vmul.f32 %v14208_v1, %v14324_v47 }
 0x655   : >> { %5069 = vperm.xlu1 %8420, %v14322_v63   ;;  %v11807_v9 = vadd.f32 %v4578_v0, %v4494_v5  ;;  %v4580_v51 = vmul.f32 %v14275_v54, %v14325_v58  ;;  %v2971_v63 = vmul.f32 1.442695, %v2613_v10  ;;  %v2629_v36 = vmul.f32 %v11725_v20, %v14320_v27  ;;  %v14326_v5 = vld [vmem:[#allocation41_spill] sm:$0xff] }
 0x656   : >> { %7594 = vmatpush3.bf16.msra.mxu1 %v4233_v45  ;;  %v8670_v13 = vpop.eup %8669  ;;  %v4378_v45 = vpop.permute.xlu1 %4377  ;;  %v4496_v31 = vmul.f32 %v8668_v16, %v11802_v49  ;;  %v4315_v39 = vmul.f32 %v8666_v34, %v11573_v57  ;;  %8683 = vpow2.f32 %v2967_v17  ;;  %v2999_v10 = vmul.f32 1.442695, %v2627_v48  ;;  %v14328_v34 = vld [vmem:[#allocation35_spill] sm:$0xff]  ;;  %v14329_v48 = vld [vmem:[#allocation76_spill] sm:$0xff] }
 0x657   : >> { %5793 = vperm.xlu0 %8435, %v14269_v11   ;;  %7619 = vmatprep.subr.bf16.mxu1 %v14154_v35  ;;  %v8672_v60 = vpop.eup %8671  ;;  %v4399_v11 = vmul.f32 %v14198_v62, %v4378_v45  ;;  %v11820_v58 = vmul.f32 %v8670_v13, %v11807_v9  ;;  %v2975_v57 = vmul.f32 1.442695, %v2615_v6  ;;  %v2617_v62 = vmul.f32 %v14208_v1, %v14328_v34  ;;  %v11833_v0 = vpop.permute.xlu0 %5053  ;;  %v14331_v6 = vld [vmem:[#allocation58_spill] sm:$0xff] }
 0x658   : >> { %v8674_v28 = vpop.eup %8673  ;;  %v11827_v16 = vadd.f32 %v4580_v51, %v4496_v31  ;;  %8685 = vpow2.f32 %v2971_v63  ;;  %v2631_v13 = vmul.f32 %v11725_v20, %v14324_v47  ;;  %v4582_v45 = vmul.f32 %v14275_v54, %v14329_v48  ;;  %14330 = vst [vmem:[#allocation123_spill] sm:$0xff] %v11833_v0  ;;  %v11841_v63 = vld [vmem:[%s10687_s27] sm:$0xff] }
 0x659   : >> { %5077 = vperm.xlu1 %8420, %v14310_v26   ;;  %7596 = vmatmul.mubr.bf16.vlgmr.msra.gmra.mxu1 %v4241_v41  ;;  %14327 = vst [vmem:[#allocation122_spill] sm:$0xff] %v11820_v58  ;;  %v4415_v27 = vadd.f32 %v4399_v11, %v4315_v39  ;;  %v3003_v41 = vmul.f32 1.442695, %v2629_v36  ;;  %v14333_v36 = vsub.s32 6, %v14326_v5  ;;  %8687 = vpow2.f32 %v2999_v10 }
 0x65a   : >> { %7635 = vmatprep.mubr.msk.bf16.mxu1 %vm9229_vm4, %v14154_v35  ;;  %v8676_v17 = vpop.eup %8675  ;;  %v4505_v58 = vpop.permute.xlu1 %4504  ;;  %v11838_v51 = vmul.f32 %v8674_v28, %v11827_v16  ;;  %v13832_v47 = vmov 13   ;;  %8689 = vpow2.f32 %v2975_v57  ;;  %v14334_v28 = vld [vmem:[#allocation78_spill] sm:$0xff]  ;;  %v4422_v10 = vpack.c.bf16 %v11802_v49, %v11577_v33 }
 0x65b   : >> { %5781 = vperm.xlu0 %8435, %v14301_v38   ;;  %v4423_v11 = vpack.c.bf16 %v4415_v27, %v11608_v43  ;;  %v4498_v39 = vmul.f32 %v8672_v60, %v4415_v27  ;;  %v11846_v31 = vrot.slane %v11841_v63, %v14333_v36  ;;  %v4568_v48 = vmul.f32 %v14275_v54, %v4505_v58  ;;  %v14335_v36 = vld [vmem:[#allocation37_spill] sm:$0xff] }
 0x65c   : >> { %14332 = vst [vmem:[#allocation141_spill] sm:$0xff] %v11838_v51  ;;  %v8678_v0 = vpop.eup %8677  ;;  %v2979_v43 = vmul.f32 1.442695, %v2617_v62  ;;  %v2619_v58 = vmul.f32 %v14208_v1, %v14335_v36  ;;  %8691 = vpow2.f32 %v3003_v41 }
 0x65d   : >> { %5085 = vperm.xlu1 %8420, %v14331_v6   ;;  %7600 = vmatpush3.bf16.msra.mxu0 %v4423_v11  ;;  %v11850_v27 = vadd.f32 %v4582_v45, %v4498_v39  ;;  %v8680_v60 = vpop.eup %8679  ;;  %v11853_v6 = vadd.f32 %v4568_v48, %v14334_v28  ;;  %v3007_v45 = vmul.f32 1.442695, %v2631_v13  ;;  %v2633_v11 = vmul.f32 %v11725_v20, %v14328_v34  ;;  %v14337_v39 = vld [vmem:[#allocation85_spill] sm:$0xff] }
 0x65e   : >> { %7601 = vmatprep.subr.bf16.mxu0 %v14154_v35  ;;  %v4509_v57 = vpop.permute.xlu1 %4508  ;;  %v4751_v48 = vmul.f32 %v11846_v31, %v14337_v39  ;;  %v8682_v49 = vpop.eup %8681  ;;  %8693 = vpow2.f32 %v2979_v43  ;;  %v2983_v39 = vmul.f32 1.442695, %v2619_v58  ;;  %v14340_v43 = vld [vmem:[#allocation62_spill] sm:$0xff] }
 0x65f   : >> { %8447 = vset.pattern.permute.xlu0 %v13832_v47  ;;  %v11863_v62 = vmul.f32 %v8676_v17, %v11850_v27  ;;  %v4667_v41 = vmul.f32 %v8678_v0, %v11853_v6  ;;  %v4569_v33 = vmul.f32 %v14275_v54, %v4509_v57  ;;  %v11873_v47 = vpop.permute.xlu0 %5065  ;;  %v14339_v17 = vld [vmem:[#allocation39_spill] sm:$0xff]  ;;  %v2635_v0 = vmul.f32 %v11725_v20, %v14335_v36  ;;  %v14353_v36 = vld [vmem:[#allocation120_spill] sm:$0xff] }
 0x660   : >> { %6020 = vperm.xlu0 %8447, %v14291_v56   ;;  %14338 = vst [vmem:[#allocation145_spill] sm:$0xff] %v11873_v47  ;;  %v2621_v13 = vmul.f32 %v14208_v1, %v14339_v17  ;;  %8695 = vpow2.f32 %v3007_v45  ;;  %v3011_v1 = vmul.f32 1.442695, %v2633_v11 }
 0x661   : >> { %5093 = vperm.xlu1 %8420, %v14133_v18   ;;  %14336 = vst [vmem:[#allocation114_spill] sm:$0xff] %v11863_v62  ;;  %7602 = vmatpush3.bf16.msra.mxu0 %v4422_v10  ;;  %v11878_v34 = vadd.f32 %v4569_v33, %v11665_v7  ;;  %v11882_v28 = vadd.f32 %v4751_v48, %v4667_v41  ;;  %8697 = vpow2.f32 %v2983_v39  ;;  %v14346_v39 = vld [vmem:[#allocation133_spill] sm:$0xff] }
 0x662   : >> { %7603 = vmatprep.subr.bf16.mxu0 %v14154_v35  ;;  %v4421_v10 = vpack.c.bf16 %v11777_v42, %v11547_v4  ;;  %v4517_v57 = vpop.permute.xlu1 %4516  ;;  %v2987_v47 = vmul.f32 1.442695, %v2621_v13  ;;  %v3015_v42 = vmul.f32 1.442695, %v2635_v0  ;;  %8699 = vpow2.f32 %v3011_v1  ;;  %v14343_v13 = vld [vmem:[#allocation124_spill] sm:$0xff]  ;;  %v14345_v1 = vld [vmem:[#allocation25_spill] sm:$0xff] }
 0x663   : >> { %v4571_v33 = vmul.f32 %v14275_v54, %v4517_v57  ;;  %v11893_v58 = vmul.f32 %v8680_v60, %v11878_v34  ;;  %v11896_v48 = vmul.f32 %v8682_v49, %v11882_v28  ;;  %v8684_v41 = vpop.eup %8683  ;;  %v4420_v60 = vpack.c.bf16 %v11755_v24, %v11519_v8  ;;  %v11905_v11 = vpop.permute.xlu0 %5073  ;;  %v14344_v24 = vld [vmem:[#allocation44_spill] sm:$0xff] }
 0x664   : >> { %6004 = vperm.xlu0 %8447, %v14272_v2   ;;  %14342 = vst [vmem:[#allocation135_spill] sm:$0xff] %v11905_v11  ;;  %8701 = vpow2.f32 %v2987_v47  ;;  %v2623_v7 = vmul.f32 %v11725_v20, %v14345_v1 }
 0x665   : >> { %5101 = vperm.xlu1 %8420, %v14340_v43   ;;  %14341 = vst [vmem:[#allocation132_spill] sm:$0xff] %v11896_v48  ;;  %7604 = vmatpush3.bf16.msra.mxu0 %v4421_v10  ;;  %v11899_v4 = vadd.f32 %v4571_v33, %v11473_v21  ;;  %v8686_v45 = vpop.eup %8685  ;;  %v2637_v21 = vmul.f32 %v11725_v20, %v14339_v17  ;;  %8703 = vpow2.f32 %v3015_v42 }
 0x666   : >> { %7605 = vmatprep.subr.bf16.mxu0 %v14154_v35  ;;  %v4525_v49 = vpop.permute.xlu1 %4524  ;;  %v4754_v10 = vmul.f32 %v11846_v31, %v14343_v13  ;;  %v8688_v8 = vpop.eup %8687  ;;  %v11918_v33 = vrot.slane %v14344_v24, %v14303_v25  ;;  %v4756_v43 = vmul.f32 %v11846_v31, %v14346_v39  ;;  %v14348_v24 = vmov 9  }
 0x667   : >> { %v4670_v0 = vmul.f32 %v8684_v41, %v11899_v4  ;;  %v4573_v57 = vmul.f32 %v14275_v54, %v4525_v49  ;;  %v8690_v11 = vpop.eup %8689 }
 0x668   : >> { %5988 = vperm.xlu0 %8447, %v14258_v12  }
 0x669   : >> { %5109 = vperm.xlu1 %8420, %v10332_v32   ;;  %7606 = vmatpush3.bf16.msra.mxu0 %v4420_v60  ;;  %v11923_v13 = vadd.f32 %v4573_v57, %v11506_v40  ;;  %v11927_v41 = vadd.f32 %v4754_v10, %v4670_v0  ;;  %v8692_v49 = vpop.eup %8691  ;;  %v14347_v60 = vld [vmem:[#allocation67_spill] sm:$0xff]  ;;  %v2625_v40 = vmul.f32 %v11725_v20, %v14306_v55  ;;  %v3019_v57 = vmul.f32 1.442695, %v2637_v21 }
 0x66a   : >> { %7607 = vmatprep.subr.bf16.mxu0 %v14154_v35  ;;  %v4419_v47 = vpack.c.bf16 %v11733_v3, %v14347_v60  ;;  %v4533_v17 = vpop.permute.xlu1 %4532  ;;  %v11944_v3 = vpop.permute.xlu0 %5081  ;;  %v2991_v0 = vmul.f32 1.442695, %v2623_v7  ;;  %v14351_v60 = vld [vmem:[#allocation83_spill] sm:$0xff] }
 0x66b   : >> { %v4672_v10 = vmul.f32 %v8686_v45, %v11923_v13  ;;  %v4575_v42 = vmul.f32 %v14275_v54, %v4533_v17  ;;  %v11942_v39 = vmul.f32 %v8688_v8, %v11927_v41  ;;  %14350 = vst [vmem:[#allocation99_spill] sm:$0xff] %v11944_v3  ;;  %v8694_v21 = vpop.eup %8693  ;;  %v14352_v45 = vld [vmem:[#allocation109_spill] sm:$0xff]  ;;  %v2995_v3 = vmul.f32 1.442695, %v2625_v40  ;;  %v14356_v40 = vld [vmem:[#allocation116_spill] sm:$0xff] }
 0x66c   : >> { %5972 = vperm.xlu0 %8447, %v14243_v29   ;;  %v4758_v8 = vmul.f32 %v11846_v31, %v14352_v45  ;;  %8705 = vpow2.f32 %v3019_v57  ;;  %v13838_v45 = vmov 15  }
 0x66d   : >> { %8423 = vset.pattern.permute.xlu1 %v14348_v24  ;;  %14349 = vst [vmem:[#allocation65_spill] sm:$0xff] %v11942_v39  ;;  %7608 = vmatpush3.bf16.msra.mxu0 %v4419_v47  ;;  %v2639_v24 = vmul.f32 %v11918_v33, %v14345_v1  ;;  %v11949_v48 = vadd.f32 %v4575_v42, %v14351_v60  ;;  %v8696_v1 = vpop.eup %8695  ;;  %8707 = vpow2.f32 %v2991_v0 }
 0x66e   : >> { %5236 = vperm.xlu1 %8423, %v14231_v50   ;;  %7609 = vmatprep.subr.bf16.mxu0 %v14154_v35  ;;  %v11953_v17 = vadd.f32 %v4756_v43, %v4672_v10  ;;  %v4418_v47 = vpack.c.bf16 %v11704_v37, %v14353_v36  ;;  %v4541_v7 = vpop.permute.xlu1 %4540  ;;  %v14355_v10 = vld [vmem:[#allocation28_spill] sm:$0xff]  ;;  %8709 = vpow2.f32 %v2995_v3 }
 0x66f   : >> { %v4674_v60 = vmul.f32 %v8690_v11, %v11949_v48  ;;  %v4577_v39 = vmul.f32 %v14275_v54, %v4541_v7  ;;  %v2626_v37 = vmul.f32 %v11725_v20, %v14355_v10  ;;  %v3023_v36 = vmul.f32 1.442695, %v2639_v24  ;;  %v14357_v11 = vld [vmem:[#allocation30_spill] sm:$0xff] }
 0x670   : >> { %5968 = vperm.xlu0 %8447, %v14231_v50   ;;  %v11965_v43 = vmul.f32 %v8692_v49, %v11953_v17  ;;  %v2628_v7 = vmul.f32 %v11725_v20, %v14357_v11  ;;  %v8698_v49 = vpop.eup %8697  ;;  %v4417_v24 = vpack.c.bf16 %v11679_v44, %v11647_v46  ;;  %v2642_v44 = vmul.f32 %v11918_v33, %v14355_v10 }
 0x671   : >> { %7610 = vmatpush3.bf16.msra.mxu0 %v4418_v47  ;;  %v11970_v57 = vadd.f32 %v4577_v39, %v14356_v40  ;;  %v11976_v42 = vadd.f32 %v4758_v8, %v4674_v60  ;;  %v14358_v47 = vld [vmem:[#allocation82_spill] sm:$0xff]  ;;  %v8700_v40 = vpop.eup %8699  ;;  %v2997_v46 = vmul.f32 1.442695, %v2626_v37  ;;  %8711 = vpow2.f32 %v3023_v36  ;;  %v14364_v36 = vld [vmem:[#allocation97_spill] sm:$0xff] }
 0x672   : >> { %5240 = vperm.xlu1 %8423, %v14243_v29   ;;  %14354 = vst [vmem:[#allocation118_spill] sm:$0xff] %v11965_v43  ;;  %7611 = vmatprep.subr.bf16.mxu0 %v14154_v35  ;;  %v4760_v0 = vmul.f32 %v11846_v31, %v14358_v47  ;;  %v11982_v43 = vpop.permute.xlu0 %5089  ;;  %v4549_v39 = vpop.permute.xlu1 %4548 }
 0x673   : >> { %14359 = vst [vmem:[#allocation151_spill] sm:$0xff] %v11982_v43  ;;  %v4676_v8 = vmul.f32 %v8694_v21, %v11970_v57  ;;  %v4579_v60 = vmul.f32 %v14275_v54, %v4549_v39  ;;  %v11991_v47 = vmul.f32 %v8696_v1, %v11976_v42  ;;  %v8702_v3 = vpop.eup %8701  ;;  %v14361_v43 = vld [vmem:[#allocation84_spill] sm:$0xff]  ;;  %v3001_v21 = vmul.f32 1.442695, %v2628_v7 }
 0x674   : >> { %8451 = vset.pattern.permute.xlu0 %v13838_v45  ;;  %v14362_v45 = vld [vmem:[#allocation32_spill] sm:$0xff]  ;;  %v8704_v1 = vpop.eup %8703  ;;  %v2644_v7 = vmul.f32 %v11918_v33, %v14357_v11  ;;  %8713 = vpow2.f32 %v2997_v46 }
 0x675   : >> { %6386 = vperm.xlu0 %8451, %v14291_v56   ;;  %14360 = vst [vmem:[#allocation140_spill] sm:$0xff] %v11991_v47  ;;  %7612 = vmatpush3.bf16.msra.mxu0 %v4417_v24  ;;  %v11996_v50 = vadd.f32 %v4579_v60, %v14361_v43  ;;  %v2630_v39 = vmul.f32 %v11725_v20, %v14362_v45  ;;  %v14363_v47 = vld [vmem:[#allocation121_spill] sm:$0xff]  ;;  %v4424_v43 = vrot.slane %v14232_v14, 2  ;;  %v3029_v14 = vmul.f32 1.442695, %v2642_v44  ;;  %v14365_v11 = vld [vmem:[#allocation112_spill] sm:$0xff] }
 0x676   : >> { %5248 = vperm.xlu1 %8423, %v14250_v22   ;;  %7613 = vmatprep.subr.bf16.mxu0 %v14154_v35  ;;  %v12001_v62 = vadd.f32 %v4760_v0, %v4676_v8  ;;  %v4762_v37 = vmul.f32 %v11846_v31, %v14363_v47  ;;  %v4416_v24 = vpack.c.bf16 %v14364_v36, %v11613_v23  ;;  %v4557_v10 = vpop.permute.xlu1 %4556  ;;  %v13845_v23 = vsub.s32 7, %v14326_v5  ;;  %v12020_v36 = vpop.permute.xlu0 %5097 }
 0x677   : >> { %v4605_v60 = vpack.c.bf16 %v11827_v16, %v11996_v50  ;;  %v4678_v0 = vmul.f32 %v8698_v49, %v11996_v50  ;;  %v4581_v8 = vmul.f32 %v14275_v54, %v4557_v10  ;;  %v3005_v52 = vmul.f32 1.442695, %v2630_v39  ;;  %v14366_v50 = vld [vmem:[#allocation87_spill] sm:$0xff]  ;;  %v14367_v10 = vld [vmem:[#allocation34_spill] sm:$0xff] }
 0x678   : >> { %v12017_v47 = vmul.f32 %v8700_v40, %v12001_v62  ;;  %v4764_v54 = vmul.f32 %v11846_v31, %v14366_v50  ;;  %v2632_v49 = vmul.f32 %v11725_v20, %v14367_v10  ;;  %v3033_v40 = vmul.f32 1.442695, %v2644_v7 }
 0x679   : >> { %6370 = vperm.xlu0 %8451, %v14272_v2   ;;  %7614 = vmatpush3.bf16.msra.mxu0 %v4416_v24  ;;  %v4597_v51 = vadd.f32 %v4581_v8, %v14365_v11  ;;  %v12023_v16 = vadd.f32 %v4762_v37, %v4678_v0  ;;  %v2646_v46 = vmul.f32 %v11918_v33, %v14362_v45  ;;  %v8706_v44 = vpop.eup %8705  ;;  %8715 = vpow2.f32 %v3001_v21  ;;  %v14369_v21 = vld [vmem:[#allocation94_spill] sm:$0xff] }
 0x67a   : >> { %5256 = vperm.xlu1 %8423, %v14258_v12   ;;  %7639 = vmatprep.subr.bf16.mxu0 %v14154_v35  ;;  %v4684_v37 = vpop.permute.xlu1 %4683  ;;  %v12041_v0 = vrot.slane %v11841_v63, %v13845_v23  ;;  %8717 = vpow2.f32 %v3029_v14  ;;  %v14370_v63 = vld [vmem:[#allocation36_spill] sm:$0xff]  ;;  %v3009_v50 = vmul.f32 1.442695, %v2632_v49 }
 0x67b   : >> { %v4606_v11 = vpack.c.bf16 %v11850_v27, %v4597_v51  ;;  %v4680_v39 = vmul.f32 %v8702_v3, %v4597_v51  ;;  %v12036_v24 = vmul.f32 %v8704_v1, %v12023_v16  ;;  %v4750_v7 = vmul.f32 %v11846_v31, %v4684_v37  ;;  %v8708_v51 = vpop.eup %8707  ;;  %v12048_v3 = vpop.permute.xlu0 %5105  ;;  %v14371_v37 = vld [vmem:[#allocation79_spill] sm:$0xff] }
 0x67c   : >> { %7616 = vmatmul.mubr.bf16.vlgmr.msra.gmra.mxu0 %v4424_v43  ;;  %8719 = vpow2.f32 %v3005_v52  ;;  %14368 = vst [vmem:[#allocation143_spill] sm:$0xff] %v12048_v3  ;;  %v13846_v43 = vmov 14   ;;  %v2634_v14 = vmul.f32 %v11725_v20, %v14370_v63  ;;  %v8710_v8 = vpop.eup %8709  ;;  %v14383_v3 = vld [vmem:[#allocation70_spill] sm:$0xff] }
 0x67d   : >> { %6354 = vperm.xlu0 %8451, %v14258_v12   ;;  %7655 = vmatprep.mubr.msk.bf16.mxu0 %vm9229_vm4, %v14154_v35  ;;  %v12046_v27 = vadd.f32 %v4764_v54, %v4680_v39  ;;  %v12051_v1 = vadd.f32 %v4750_v7, %v14369_v21  ;;  %8721 = vpow2.f32 %v3033_v40  ;;  %v2648_v39 = vmul.f32 %v11918_v33, %v14367_v10  ;;  %v14373_v40 = vld [vmem:[#allocation38_spill] sm:$0xff] }
 0x67e   : >> { %5264 = vperm.xlu1 %8423, %v14201_v59   ;;  %7620 = vmatpush3.bf16.msra.mxu1 %v4606_v11  ;;  %v4692_v52 = vpop.permute.xlu1 %4691  ;;  %v3037_v11 = vmul.f32 1.442695, %v2646_v46  ;;  %v4933_v7 = vmul.f32 %v12041_v0, %v14371_v37  ;;  %v3013_v46 = vmul.f32 1.442695, %v2634_v14  ;;  %8723 = vpow2.f32 %v3009_v50 }
 0x67f   : >> { %7621 = vmatprep.subr.bf16.mxu1 %v14154_v35  ;;  %v12060_v54 = vmul.f32 %v8706_v44, %v12046_v27  ;;  %v4849_v21 = vmul.f32 %v8708_v51, %v12051_v1  ;;  %v4752_v23 = vmul.f32 %v11846_v31, %v4692_v52  ;;  %v2636_v51 = vmul.f32 %v11725_v20, %v14373_v40  ;;  %v12080_v5 = vpop.permute.xlu0 %5232 }
 0x680   : >> { %v3041_v52 = vmul.f32 1.442695, %v2648_v39  ;;  %14374 = vst [vmem:[#allocation125_spill] sm:$0xff] %v12080_v5  ;;  %8725 = vpow2.f32 %v3037_v11  ;;  %v2650_v50 = vmul.f32 %v11918_v33, %v14370_v63  ;;  %v14377_v39 = vld [vmem:[#allocation139_spill] sm:$0xff]  ;;  %v14384_v10 = vmov 10  }
 0x681   : >> { %8460 = vset.pattern.permute.xlu0 %v13846_v43  ;;  %v8712_v43 = vpop.eup %8711  ;;  %v12071_v49 = vadd.f32 %v4752_v23, %v11893_v58  ;;  %v12074_v44 = vadd.f32 %v4933_v7, %v4849_v21  ;;  %v14376_v7 = vpack.c.bf16 %v11807_v9, %v11970_v57  ;;  %8727 = vpow2.f32 %v3013_v46 }
 0x682   : >> { %5272 = vperm.xlu1 %8423, %v14272_v2   ;;  %6207 = vperm.xlu0 %8460, %v10332_v32   ;;  %v14372_v32 = vld [vmem:[#allocation61_spill] sm:$0xff]  ;;  %v4696_v37 = vpop.permute.xlu1 %4695  ;;  %v8714_v14 = vpop.eup %8713  ;;  %v3017_v11 = vmul.f32 1.442695, %v2636_v51  ;;  %8729 = vpow2.f32 %v3041_v52  ;;  %v2652_v9 = vmul.f32 %v11918_v33, %v14373_v40  ;;  %v3045_v51 = vmul.f32 1.442695, %v2650_v50  ;;  %v14382_v40 = vld [vmem:[#allocation86_spill] sm:$0xff] }
 0x683   : >> { %7622 = vmatpush3.bf16.msra.mxu1 %v4605_v60  ;;  %v4753_v58 = vmul.f32 %v11846_v31, %v4696_v37  ;;  %v12084_v60 = vmul.f32 %v8710_v8, %v12071_v49  ;;  %v12087_v23 = vmul.f32 %v8712_v43, %v12074_v44  ;;  %v14378_v8 = vld [vmem:[#allocation40_spill] sm:$0xff]  ;;  %v12113_v63 = vpop.permute.xlu0 %5244 }
 0x684   : >> { %7623 = vmatprep.subr.bf16.mxu1 %v14154_v35  ;;  %v2638_v37 = vmul.f32 %v11725_v20, %v14378_v8  ;;  %14381 = vst [vmem:[#allocation148_spill] sm:$0xff] %v12113_v63  ;;  %8731 = vpow2.f32 %v3017_v11  ;;  %v14387_v11 = vpack.c.bf16 %v11759_v15, %v11923_v13  ;;  %v2641_v15 = vmul.f32 %v11918_v33, %v14306_v55 }
 0x685   : >> { %14375 = vst [vmem:[#allocation106_spill] sm:$0xff] %v12087_v23  ;;  %v12095_v21 = vadd.f32 %v4753_v58, %v14377_v39  ;;  %8733 = vpow2.f32 %v3045_v51 }
 0x686   : >> { %5280 = vperm.xlu1 %8423, %v14372_v32   ;;  %6191 = vperm.xlu0 %8460, %v14133_v18   ;;  %v4704_v43 = vpop.permute.xlu1 %4703  ;;  %v8716_v57 = vpop.eup %8715 }
 0x687   : >> { %7624 = vmatpush3.bf16.msra.mxu1 %v14376_v7  ;;  %v14379_v7 = vld [vmem:[#allocation130_spill] sm:$0xff]  ;;  %v4852_v39 = vmul.f32 %v8714_v14, %v12095_v21  ;;  %v4755_v20 = vmul.f32 %v11846_v31, %v4704_v43  ;;  %v8718_v5 = vpop.eup %8717  ;;  %v4938_v43 = vmul.f32 %v12041_v0, %v14383_v3 }
 0x688   : >> { %7625 = vmatprep.subr.bf16.mxu1 %v14154_v35  ;;  %v4936_v58 = vmul.f32 %v12041_v0, %v14379_v7  ;;  %v3021_v7 = vmul.f32 1.442695, %v2638_v37 }
 0x689   : >> { %v8720_v52 = vpop.eup %8719  ;;  %v12116_v23 = vadd.f32 %v4755_v20, %v14382_v40 }
 0x68a   : >> { %5288 = vperm.xlu1 %8423, %v14291_v56   ;;  %6179 = vperm.xlu0 %8460, %v14201_v59   ;;  %v14380_v59 = vpack.c.bf16 %v11781_v19, %v11949_v48  ;;  %v12119_v46 = vadd.f32 %v4936_v58, %v4852_v39  ;;  %v8722_v14 = vpop.eup %8721  ;;  %v4712_v19 = vpop.permute.xlu1 %4711  ;;  %v2654_v48 = vmul.f32 %v11918_v33, %v14378_v8  ;;  %v14386_v58 = vld [vmem:[#allocation47_spill] sm:$0xff]  ;;  %8735 = vpow2.f32 %v3021_v7 }
 0x68b   : >> { %v4854_v50 = vmul.f32 %v8716_v57, %v12116_v23  ;;  %v4757_v37 = vmul.f32 %v11846_v31, %v4712_v19  ;;  %v12137_v39 = vrot.slane %v14386_v58, %v14303_v25  ;;  %v14389_v57 = vld [vmem:[#allocation113_spill] sm:$0xff]  ;;  %v14390_v19 = vld [vmem:[#allocation138_spill] sm:$0xff]  ;;  %v8724_v51 = vpop.eup %8723 }
 0x68c   : >> { %7626 = vmatpush3.bf16.msra.mxu1 %v14380_v59  ;;  %v3049_v59 = vmul.f32 1.442695, %v2652_v9  ;;  %v12133_v3 = vmul.f32 %v8718_v5, %v12119_v46  ;;  %v14388_v9 = vld [vmem:[#allocation26_spill] sm:$0xff]  ;;  %v4940_v63 = vmul.f32 %v12041_v0, %v14390_v19  ;;  %v3053_v13 = vmul.f32 1.442695, %v2654_v48 }
 0x68d   : >> { %7627 = vmatprep.subr.bf16.mxu1 %v14154_v35  ;;  %v2640_v20 = vmul.f32 %v11918_v33, %v14388_v9  ;;  %v12145_v40 = vadd.f32 %v4757_v37, %v14389_v57  ;;  %v12148_v5 = vadd.f32 %v4938_v43, %v4854_v50  ;;  %v8726_v57 = vpop.eup %8725  ;;  %v2656_v19 = vmul.f32 %v12137_v39, %v14388_v9 }
 0x68e   : >> { %8424 = vset.pattern.permute.xlu1 %v14384_v10  ;;  %6175 = vperm.xlu0 %8460, %v14310_v26   ;;  %14385 = vst [vmem:[#allocation144_spill] sm:$0xff] %v12133_v3  ;;  %v4720_v3 = vpop.permute.xlu1 %4719  ;;  %8737 = vpow2.f32 %v3049_v59  ;;  %v14393_v59 = vpack.c.bf16 %v11737_v53, %v11899_v4  ;;  %v3027_v53 = vmul.f32 1.442695, %v2641_v15  ;;  %v14398_v15 = vld [vmem:[#allocation29_spill] sm:$0xff]  ;;  %v14413_v26 = vld [vmem:[#allocation35_spill] sm:$0xff] }
 0x68f   : >> { %5415 = vperm.xlu1 %8424, %v14301_v38   ;;  %v4856_v7 = vmul.f32 %v8720_v52, %v12145_v40  ;;  %v4759_v43 = vmul.f32 %v11846_v31, %v4720_v3  ;;  %v12163_v50 = vmul.f32 %v8722_v14, %v12148_v5  ;;  %v3025_v48 = vmul.f32 1.442695, %v2640_v20  ;;  %v8728_v3 = vpop.eup %8727  ;;  %v14400_v20 = vld [vmem:[#allocation122_spill] sm:$0xff] }
 0x690   : >> { %7628 = vmatpush3.bf16.msra.mxu1 %v14387_v11  ;;  %v12155_v11 = vpop.permute.xlu0 %5252  ;;  %8739 = vpow2.f32 %v3053_v13  ;;  %v8730_v4 = vpop.eup %8729  ;;  %v2643_v13 = vmul.f32 %v11918_v33, %v14398_v15 }
 0x691   : >> { %7629 = vmatprep.subr.bf16.mxu1 %v14154_v35  ;;  %14391 = vst [vmem:[#allocation127_spill] sm:$0xff] %v12155_v11  ;;  %14392 = vst [vmem:[#allocation89_spill] sm:$0xff] %v12163_v50  ;;  %v12171_v37 = vadd.f32 %v4759_v43, %v11796_v30  ;;  %v12174_v52 = vadd.f32 %v4940_v63, %v4856_v7  ;;  %v14395_v50 = vld [vmem:[#allocation52_spill] sm:$0xff]  ;;  %8741 = vpow2.f32 %v3025_v48  ;;  %v3057_v7 = vmul.f32 1.442695, %v2656_v19  ;;  %v8732_v48 = vpop.eup %8731 }
 0x692   : >> { %6163 = vperm.xlu0 %8460, %v14250_v22   ;;  %v14394_v22 = vld [vmem:[#allocation105_spill] sm:$0xff]  ;;  %v4728_v11 = vpop.permute.xlu1 %4727  ;;  %8743 = vpow2.f32 %v3027_v53  ;;  %v2659_v19 = vmul.f32 %v12137_v39, %v14398_v15 }
 0x693   : >> { %5423 = vperm.xlu1 %8424, %v14243_v29   ;;  %v4942_v14 = vmul.f32 %v12041_v0, %v14394_v22  ;;  %v4858_v30 = vmul.f32 %v8724_v51, %v12171_v37  ;;  %v4761_v43 = vmul.f32 %v11846_v31, %v4728_v11  ;;  %v12185_v63 = vmul.f32 %v8726_v57, %v12174_v52  ;;  %v14401_v57 = vld [vmem:[#allocation93_spill] sm:$0xff] }
 0x694   : >> { %7630 = vmatpush3.bf16.msra.mxu1 %v14393_v59  ;;  %v14397_v22 = vpack.c.bf16 %v11709_v61, %v11878_v34  ;;  %v12192_v59 = vpop.permute.xlu0 %5260  ;;  %v14402_v61 = vld [vmem:[#allocation31_spill] sm:$0xff]  ;;  %8745 = vpow2.f32 %v3057_v7 }
 0x695   : >> { %7631 = vmatprep.subr.bf16.mxu1 %v14154_v35  ;;  %14396 = vst [vmem:[#allocation131_spill] sm:$0xff] %v12185_v63  ;;  %14399 = vst [vmem:[#allocation68_spill] sm:$0xff] %v12192_v59  ;;  %v12195_v51 = vadd.f32 %v4761_v43, %v14400_v20  ;;  %v12198_v11 = vadd.f32 %v4942_v14, %v4858_v30  ;;  %v2645_v34 = vmul.f32 %v11918_v33, %v14402_v61  ;;  %v14404_v30 = vld [vmem:[#allocation81_spill] sm:$0xff]  ;;  %v8734_v59 = vpop.eup %8733 }
 0x696   : >> { %6159 = vperm.xlu0 %8460, %v14395_v50   ;;  %v4736_v63 = vpop.permute.xlu1 %4735 }
 0x697   : >> { %5427 = vperm.xlu1 %8424, %v14395_v50   ;;  %v4944_v50 = vmul.f32 %v12041_v0, %v14401_v57  ;;  %v4860_v20 = vmul.f32 %v8728_v3, %v12195_v51  ;;  %v4763_v43 = vmul.f32 %v11846_v31, %v4736_v63  ;;  %v12211_v14 = vmul.f32 %v8730_v4, %v12198_v11  ;;  %v14407_v3 = vld [vmem:[#allocation141_spill] sm:$0xff]  ;;  %v8736_v4 = vpop.eup %8735 }
 0x698   : >> { %7632 = vmatpush3.bf16.msra.mxu1 %v14397_v22  ;;  %v14405_v22 = vpack.c.bf16 %v11853_v6, %v14404_v30  ;;  %v3031_v57 = vmul.f32 1.442695, %v2643_v13  ;;  %v14409_v13 = vmov 15   ;;  %v3035_v7 = vmul.f32 1.442695, %v2645_v34 }
 0x699   : >> { %7633 = vmatprep.subr.bf16.mxu1 %v14154_v35  ;;  %14403 = vst [vmem:[#allocation91_spill] sm:$0xff] %v12211_v14  ;;  %v12220_v9 = vadd.f32 %v4763_v43, %v14407_v3  ;;  %v12222_v63 = vadd.f32 %v4944_v50, %v4860_v20  ;;  %v14408_v14 = vld [vmem:[#allocation72_spill] sm:$0xff]  ;;  %v2661_v43 = vmul.f32 %v12137_v39, %v14402_v61  ;;  %v12232_v50 = vpop.permute.xlu0 %5268  ;;  %v12244_v61 = vld [vmem:[%s10687_s27 + $0x8] sm:$0xff] }
 0x69a   : >> { %6147 = vperm.xlu0 %8460, %v14301_v38   ;;  %v14406_v38 = vld [vmem:[#allocation77_spill] sm:$0xff]  ;;  %v4946_v6 = vmul.f32 %v12041_v0, %v14408_v14  ;;  %v4744_v30 = vpop.permute.xlu1 %4743  ;;  %14411 = vst [vmem:[#allocation100_spill] sm:$0xff] %v12232_v50  ;;  %8747 = vpow2.f32 %v3031_v57  ;;  %v14412_v50 = vld [vmem:[#allocation114_spill] sm:$0xff] }
 0x69b   : >> { %5471 = vperm.xlu1 %8424, %v14291_v56   ;;  %v4607_v53 = vrot.slane %v14406_v38, 2  ;;  %v8738_v3 = vpop.eup %8737  ;;  %v4788_v20 = vpack.c.bf16 %v12220_v9, %v12023_v16  ;;  %v4862_v15 = vmul.f32 %v8732_v48, %v12220_v9  ;;  %v4765_v14 = vmul.f32 %v11846_v31, %v4744_v30  ;;  %v14414_v31 = vld [vmem:[#allocation119_spill] sm:$0xff] }
 0x69c   : >> { %7634 = vmatpush3.bf16.msra.mxu1 %v14405_v22  ;;  %v14410_v22 = vld [vmem:[#allocation33_spill] sm:$0xff]  ;;  %v12241_v34 = vmul.f32 %v8734_v59, %v12222_v63  ;;  %v2649_v16 = vmul.f32 %v11918_v33, %v14413_v26  ;;  %v4948_v48 = vmul.f32 %v12041_v0, %v14414_v31  ;;  %8749 = vpow2.f32 %v3035_v7 }
 0x69d   : >> { %7659 = vmatprep.subr.bf16.mxu1 %v14154_v35  ;;  %v2647_v38 = vmul.f32 %v11918_v33, %v14410_v22  ;;  %v4781_v8 = vadd.f32 %v4765_v14, %v14412_v50  ;;  %v12249_v9 = vadd.f32 %v4946_v6, %v4862_v15  ;;  %v2663_v59 = vmul.f32 %v12137_v39, %v14410_v22  ;;  %v14416_v15 = vld [vmem:[#allocation50_spill] sm:$0xff] }
 0x69e   : >> { %8465 = vset.pattern.permute.xlu0 %v14409_v13  ;;  %v3063_v13 = vmul.f32 1.442695, %v2659_v19  ;;  %v8740_v19 = vpop.eup %8739  ;;  %v14415_v50 = vmov 11   ;;  %v12265_v7 = vrot.slane %v12244_v61, %v14303_v25 }
 0x69f   : >> { %5463 = vperm.xlu1 %8424, %v14372_v32   ;;  %6338 = vperm.xlu0 %8465, %v14243_v29   ;;  %v3039_v57 = vmul.f32 1.442695, %v2647_v38  ;;  %v4864_v30 = vmul.f32 %v8736_v4, %v4781_v8  ;;  %v12261_v6 = vmul.f32 %v8738_v3, %v12249_v9  ;;  %v3067_v32 = vmul.f32 1.442695, %v2661_v43  ;;  %v14419_v43 = vld [vmem:[#allocation37_spill] sm:$0xff] }
 0x6a0   : >> { %7636 = vmatmul.mubr.bf16.vlgmr.msra.gmra.mxu1 %v4607_v53  ;;  %v4789_v53 = vpack.c.bf16 %v4781_v8, %v12046_v27  ;;  %8751 = vpow2.f32 %v3063_v13  ;;  %v8742_v27 = vpop.eup %8741  ;;  %v12269_v8 = vpop.permute.xlu0 %5276  ;;  %v3043_v4 = vmul.f32 1.442695, %v2649_v16  ;;  %v2651_v22 = vmul.f32 %v11918_v33, %v14419_v43 }
 0x6a1   : >> { %7675 = vmatprep.mubr.msk.bf16.mxu1 %vm9229_vm4, %v14154_v35  ;;  %v4871_v14 = vpop.permute.xlu1 %4870  ;;  %14417 = vst [vmem:[#allocation137_spill] sm:$0xff] %v12261_v6  ;;  %v12271_v31 = vadd.f32 %v4948_v48, %v4864_v30  ;;  %8753 = vpow2.f32 %v3039_v57  ;;  %v2665_v16 = vmul.f32 %v12137_v39, %v14413_v26  ;;  %v14421_v48 = vld [vmem:[#allocation123_spill] sm:$0xff] }
 0x6a2   : >> { %v4934_v38 = vmul.f32 %v12041_v0, %v4871_v14  ;;  %7640 = vmatpush3.bf16.msra.mxu0 %v4789_v53  ;;  %v8744_v14 = vpop.eup %8743  ;;  %8755 = vpow2.f32 %v3067_v32  ;;  %v5117_v53 = vmul.f32 %v12265_v7, %v14421_v48 }
 0x6a3   : >> { %8426 = vset.pattern.permute.xlu1 %v14415_v50  ;;  %6334 = vperm.xlu0 %8465, %v14416_v15   ;;  %v14418_v15 = vld [vmem:[#allocation132_spill] sm:$0xff]  ;;  %v12280_v13 = vmul.f32 %v8740_v19, %v12271_v31  ;;  %8757 = vpow2.f32 %v3043_v4  ;;  %v14422_v19 = vld [vmem:[#allocation39_spill] sm:$0xff]  ;;  %v3075_v26 = vmul.f32 1.442695, %v2665_v16  ;;  %v14427_v16 = vld [vmem:[#allocation65_spill] sm:$0xff] }
 0x6a4   : >> { %5654 = vperm.xlu1 %8426, %v14291_v56   ;;  %v12274_v3 = vadd.f32 %v4934_v38, %v14418_v15  ;;  %7641 = vmatprep.subr.bf16.mxu0 %v14154_v35  ;;  %v3071_v56 = vmul.f32 1.442695, %v2663_v59  ;;  %v8746_v38 = vpop.eup %8745  ;;  %v3047_v59 = vmul.f32 1.442695, %v2651_v22  ;;  %v2653_v48 = vmul.f32 %v11918_v33, %v14422_v19 }
 0x6a5   : >> { %v4875_v6 = vpop.permute.xlu1 %4874  ;;  %14420 = vst [vmem:[#allocation104_spill] sm:$0xff] %v12280_v13 }
 0x6a6   : >> { %v5033_v57 = vmul.f32 %v8742_v27, %v12274_v3  ;;  %v4935_v15 = vmul.f32 %v12041_v0, %v4875_v6  ;;  %7642 = vmatpush3.bf16.msra.mxu0 %v4788_v20  ;;  %v12300_v27 = vpop.permute.xlu0 %5284  ;;  %8759 = vpow2.f32 %v3071_v56  ;;  %v2667_v20 = vmul.f32 %v12137_v39, %v14419_v43 }
 0x6a7   : >> { %7643 = vmatprep.subr.bf16.mxu0 %v14154_v35  ;;  %14423 = vst [vmem:[#allocation80_spill] sm:$0xff] %v12300_v27  ;;  %v14426_v56 = vpack.c.bf16 %v12195_v51, %v12001_v62  ;;  %8761 = vpow2.f32 %v3047_v59 }
 0x6a8   : >> { %8427 = vset.pattern.permute.xlu1 %v14384_v10  ;;  %v12293_v32 = vadd.f32 %v4935_v15, %v12084_v60  ;;  %v12298_v30 = vadd.f32 %v5117_v53, %v5033_v57  ;;  %v8748_v53 = vpop.eup %8747  ;;  %v14425_v57 = vld [vmem:[#allocation44_spill] sm:$0xff]  ;;  %8763 = vpow2.f32 %v3075_v26  ;;  %v3079_v43 = vmul.f32 1.442695, %v2667_v20  ;;  %v14431_v20 = vld [vmem:[#allocation25_spill] sm:$0xff] }
 0x6a9   : >> { %5455 = vperm.xlu1 %8427, %v14272_v2   ;;  %v4883_v6 = vpop.permute.xlu1 %4882  ;;  %v2427_v15 = vcombine.high %v14425_v57, %v14425_v57  ;;  %v2669_v57 = vmul.f32 %v12137_v39, %v14422_v19  ;;  %v14430_v26 = vpack.c.bf16 %v12171_v37, %v11976_v42  ;;  %v14434_v19 = vld [vmem:[#allocation135_spill] sm:$0xff]  ;;  %v2657_v42 = vmul.f32 %v12137_v39, %v14306_v55 }
 0x6aa   : >> { %v4937_v4 = vmul.f32 %v12041_v0, %v4883_v6  ;;  %v12308_v22 = vmul.f32 %v8744_v14, %v12293_v32  ;;  %v12311_v33 = vmul.f32 %v8746_v38, %v12298_v30  ;;  %7644 = vmatpush3.bf16.msra.mxu0 %v14426_v56  ;;  %v3051_v14 = vmul.f32 1.442695, %v2653_v48  ;;  %v8750_v6 = vpop.eup %8749  ;;  %v12334_v48 = vpop.permute.xlu0 %5292 }
 0x6ab   : >> { %7645 = vmatprep.subr.bf16.mxu0 %v14154_v35  ;;  %v12332_v59 = vrot.slane %v2427_v15, %v14303_v25  ;;  %14429 = vst [vmem:[#allocation142_spill] sm:$0xff] %v12334_v48  ;;  %v5122_v48 = vmul.f32 %v12265_v7, %v14434_v19  ;;  %v3083_v37 = vmul.f32 1.442695, %v2669_v57  ;;  %v14436_v19 = vpack.c.bf16 %v12145_v40, %v11953_v17  ;;  %v14439_v17 = vld [vmem:[#allocation58_spill] sm:$0xff] }
 0x6ac   : >> { %14424 = vst [vmem:[#allocation96_spill] sm:$0xff] %v12311_v33  ;;  %v12320_v60 = vadd.f32 %v4937_v4, %v14427_v16  ;;  %v14428_v33 = vld [vmem:[#allocation145_spill] sm:$0xff]  ;;  %v14432_v16 = vld [vmem:[#allocation118_spill] sm:$0xff]  ;;  %8765 = vpow2.f32 %v3051_v14 }
 0x6ad   : >> { %5459 = vperm.xlu1 %8427, %v14133_v18   ;;  %v4891_v38 = vpop.permute.xlu1 %4890  ;;  %v5120_v18 = vmul.f32 %v12265_v7, %v14428_v33  ;;  %v8752_v56 = vpop.eup %8751  ;;  %v2655_v33 = vmul.f32 %v12137_v39, %v14431_v20  ;;  %8767 = vpow2.f32 %v3079_v43  ;;  %v2671_v43 = vmul.f32 %v12332_v59, %v14431_v20 }
 0x6ae   : >> { %v5036_v51 = vmul.f32 %v8748_v53, %v12320_v60  ;;  %v4939_v4 = vmul.f32 %v12041_v0, %v4891_v38  ;;  %7646 = vmatpush3.bf16.msra.mxu0 %v14430_v26  ;;  %v14433_v53 = vld [vmem:[#allocation62_spill] sm:$0xff]  ;;  %v8754_v38 = vpop.eup %8753  ;;  %8769 = vpow2.f32 %v3083_v37 }
 0x6af   : >> { %7647 = vmatprep.subr.bf16.mxu0 %v14154_v35  ;;  %v8756_v26 = vpop.eup %8755  ;;  %v3087_v37 = vmul.f32 1.442695, %v2671_v43 }
 0x6b0   : >> { %v12343_v62 = vadd.f32 %v4939_v4, %v14432_v16  ;;  %v12347_v15 = vadd.f32 %v5120_v18, %v5036_v51  ;;  %v3055_v51 = vmul.f32 1.442695, %v2655_v33  ;;  %v8758_v57 = vpop.eup %8757  ;;  %v12374_v4 = vpop.permute.xlu0 %5419  ;;  %v3059_v33 = vmul.f32 1.442695, %v2657_v42 }
 0x6b1   : >> { %8428 = vset.pattern.permute.xlu1 %v14415_v50  ;;  %v4899_v13 = vpop.permute.xlu1 %4898 }
 0x6b2   : >> { %5650 = vperm.xlu1 %8428, %v14433_v53   ;;  %v5038_v16 = vmul.f32 %v8750_v6, %v12343_v62  ;;  %v4941_v14 = vmul.f32 %v12041_v0, %v4899_v13  ;;  %v12358_v18 = vmul.f32 %v8752_v56, %v12347_v15  ;;  %7648 = vmatpush3.bf16.msra.mxu0 %v14436_v19  ;;  %v14437_v53 = vld [vmem:[#allocation140_spill] sm:$0xff]  ;;  %v14438_v6 = vld [vmem:[#allocation99_spill] sm:$0xff]  ;;  %8771 = vpow2.f32 %v3055_v51 }
 0x6b3   : >> { %7649 = vmatprep.subr.bf16.mxu0 %v14154_v35  ;;  %v5124_v56 = vmul.f32 %v12265_v7, %v14438_v6  ;;  %v8760_v19 = vpop.eup %8759  ;;  %v14442_v6 = vld [vmem:[#allocation28_spill] sm:$0xff]  ;;  %8773 = vpow2.f32 %v3059_v33 }
 0x6b4   : >> { %14435 = vst [vmem:[#allocation88_spill] sm:$0xff] %v12358_v18  ;;  %v12366_v27 = vadd.f32 %v4941_v14, %v14437_v53  ;;  %v12370_v13 = vadd.f32 %v5122_v48, %v5038_v16  ;;  %v14441_v16 = vpack.c.bf16 %v12116_v23, %v11927_v41  ;;  %v2658_v42 = vmul.f32 %v12137_v39, %v14442_v6 }
 0x6b5   : >> { %v4907_v40 = vpop.permute.xlu1 %4906  ;;  %8775 = vpow2.f32 %v3087_v37  ;;  %v14447_v37 = vld [vmem:[#allocation108_spill] sm:$0xff] }
 0x6b6   : >> { %8429 = vset.pattern.permute.xlu1 %v14384_v10  ;;  %v5040_v14 = vmul.f32 %v8754_v38, %v12366_v27  ;;  %v4943_v20 = vmul.f32 %v12041_v0, %v4907_v40  ;;  %v12382_v48 = vmul.f32 %v8756_v26, %v12370_v13  ;;  %7650 = vmatpush3.bf16.msra.mxu0 %v14441_v16  ;;  %v14443_v38 = vld [vmem:[#allocation30_spill] sm:$0xff]  ;;  %v8762_v26 = vpop.eup %8761  ;;  %v3061_v33 = vmul.f32 1.442695, %v2658_v42 }
 0x6b7   : >> { %5451 = vperm.xlu1 %8429, %v14439_v17   ;;  %7651 = vmatprep.subr.bf16.mxu0 %v14154_v35  ;;  %v2660_v40 = vmul.f32 %v12137_v39, %v14443_v38  ;;  %v8764_v51 = vpop.eup %8763  ;;  %v2674_v16 = vmul.f32 %v12332_v59, %v14442_v6  ;;  %v2662_v42 = vmul.f32 %v12137_v39, %v14362_v45 }
 0x6b8   : >> { %14440 = vst [vmem:[#allocation69_spill] sm:$0xff] %v12382_v48  ;;  %v12390_v18 = vadd.f32 %v4943_v20, %v12017_v47  ;;  %v12395_v53 = vadd.f32 %v5124_v56, %v5040_v14  ;;  %v14444_v48 = vld [vmem:[#allocation151_spill] sm:$0xff]  ;;  %v12408_v14 = vpop.permute.xlu0 %5431  ;;  %8777 = vpow2.f32 %v3061_v33 }
 0x6b9   : >> { %v5126_v41 = vmul.f32 %v12265_v7, %v14444_v48  ;;  %v4915_v23 = vpop.permute.xlu1 %4914  ;;  %v14446_v48 = vpack.c.bf16 %v12095_v21, %v12071_v49  ;;  %v5128_v49 = vmul.f32 %v12265_v7, %v12020_v36 }
 0x6ba   : >> { %v5042_v20 = vmul.f32 %v8758_v57, %v12390_v18  ;;  %v4945_v43 = vmul.f32 %v12041_v0, %v4915_v23  ;;  %v12406_v56 = vmul.f32 %v8760_v19, %v12395_v53  ;;  %v2429_v57 = vcombine.high %v14386_v58, %v14386_v58 }
 0x6bb   : >> { %8430 = vset.pattern.permute.xlu1 %v14415_v50  ;;  %7652 = vmatpush3.bf16.msra.mxu0 %v14446_v48  ;;  %v3065_v19 = vmul.f32 1.442695, %v2660_v40  ;;  %v4790_v48 = vrot.slane %v14447_v37, 3  ;;  %v2676_v58 = vmul.f32 %v12332_v59, %v14443_v38  ;;  %v3093_v37 = vmul.f32 1.442695, %v2674_v16  ;;  %v14450_v16 = vld [vmem:[#allocation143_spill] sm:$0xff] }
 0x6bc   : >> { %5638 = vperm.xlu1 %8430, %v14272_v2   ;;  %14445 = vst [vmem:[#allocation75_spill] sm:$0xff] %v12406_v56  ;;  %v12418_v23 = vadd.f32 %v4945_v43, %v12036_v24  ;;  %7653 = vmatprep.subr.bf16.mxu0 %v14154_v35  ;;  %v12421_v47 = vadd.f32 %v5126_v41, %v5042_v20  ;;  %v8766_v56 = vpop.eup %8765 }
 0x6bd   : >> { %v8768_v24 = vpop.eup %8767  ;;  %v14448_v20 = vpack.c.bf16 %v11882_v28, %v12051_v1  ;;  %v12443_v6 = vrot.slane %v2429_v57, %v14303_v25  ;;  %8779 = vpow2.f32 %v3065_v19  ;;  %v3097_v28 = vmul.f32 1.442695, %v2676_v58 }
 0x6be   : >> { %v4923_v21 = vpop.permute.xlu1 %4922  ;;  %v4971_v43 = vpack.c.bf16 %v12249_v9, %v12418_v23  ;;  %v5044_v40 = vmul.f32 %v8762_v26, %v12418_v23  ;;  %v12436_v36 = vmul.f32 %v8764_v51, %v12421_v47  ;;  %v3069_v26 = vmul.f32 1.442695, %v2662_v42  ;;  %v14449_v51 = vld [vmem:[#allocation34_spill] sm:$0xff]  ;;  %v8770_v33 = vpop.eup %8769 }
 0x6bf   : >> { %v4947_v41 = vmul.f32 %v12041_v0, %v4923_v21  ;;  %7654 = vmatpush3.bf16.msra.mxu0 %v14448_v20  ;;  %v2664_v23 = vmul.f32 %v12137_v39, %v14449_v51  ;;  %v2678_v1 = vmul.f32 %v12332_v59, %v14362_v45  ;;  %v5130_v57 = vmul.f32 %v12265_v7, %v14450_v16  ;;  %v14451_v42 = vld [vmem:[#allocation42_spill] sm:$0xff]  ;;  %v8772_v20 = vpop.eup %8771  ;;  %v14454_v16 = vld [vmem:[#allocation36_spill] sm:$0xff] }
 0x6c0   : >> { %8431 = vset.pattern.permute.xlu1 %v14384_v10  ;;  %v12446_v0 = vadd.f32 %v5128_v49, %v5044_v40  ;;  %7679 = vmatprep.subr.bf16.mxu0 %v14154_v35  ;;  %v12449_v10 = vpop.permute.xlu0 %5475  ;;  %v12463_v40 = vrot.slane %v12244_v61, %v14451_v42  ;;  %8781 = vpow2.f32 %v3093_v37  ;;  %v2666_v37 = vmul.f32 %v12137_v39, %v14454_v16  ;;  %v14457_v45 = vld [vmem:[#allocation38_spill] sm:$0xff] }
 0x6c1   : >> { %5439 = vperm.xlu1 %8431, %v14258_v12   ;;  %v4963_v9 = vadd.f32 %v4947_v41, %v12060_v54  ;;  %v14452_v41 = vld [vmem:[#allocation56_spill] sm:$0xff]  ;;  %8783 = vpow2.f32 %v3069_v26  ;;  %v2668_v26 = vmul.f32 %v12137_v39, %v14457_v45 }
 0x6c2   : >> { %7656 = vmatmul.mubr.bf16.vlgmr.msra.gmra.mxu0 %v4790_v48  ;;  %v12459_v21 = vmul.f32 %v8768_v24, %v12446_v0  ;;  %v14453_v48 = vld [vmem:[#allocation106_spill] sm:$0xff]  ;;  %8785 = vpow2.f32 %v3097_v28 }
 0x6c3   : >> { %v4972_v54 = vpack.c.bf16 %v12271_v31, %v4963_v9  ;;  %v5046_v19 = vmul.f32 %v8766_v56, %v4963_v9  ;;  %7695 = vmatprep.mubr.msk.bf16.mxu0 %vm9229_vm4, %v14154_v35  ;;  %v2692_v56 = vmul.f32 %v12443_v6, %v14443_v38  ;;  %v3073_v9 = vmul.f32 1.442695, %v2664_v23  ;;  %v14456_v38 = vld [vmem:[#allocation125_spill] sm:$0xff] }
 0x6c4   : >> { %v5050_v49 = vpop.permute.xlu1 %5049 }
 0x6c5   : >> { %v5116_v58 = vmul.f32 %v12265_v7, %v5050_v49  ;;  %5443 = vperm.xlu1 %8431, %v14452_v41   ;;  %7660 = vmatpush3.bf16.msra.mxu1 %v4972_v54  ;;  %v12469_v31 = vadd.f32 %v5130_v57, %v5046_v19  ;;  %v8774_v49 = vpop.eup %8773  ;;  %v2680_v57 = vmul.f32 %v12332_v59, %v14449_v51  ;;  %v3101_v19 = vmul.f32 1.442695, %v2678_v1 }
 0x6c6   : >> { %7661 = vmatprep.subr.bf16.mxu1 %v14154_v35  ;;  %v8776_v28 = vpop.eup %8775  ;;  %8787 = vpow2.f32 %v3073_v9  ;;  %v14461_v9 = vld [vmem:[#allocation40_spill] sm:$0xff] }
 0x6c7   : >> { %v12474_v24 = vadd.f32 %v5116_v58, %v14453_v48  ;;  %v12480_v54 = vmul.f32 %v8770_v33, %v12469_v31  ;;  %v5299_v58 = vmul.f32 %v12463_v40, %v14456_v38  ;;  %v12486_v48 = vpop.permute.xlu0 %5467  ;;  %v3129_v33 = vmul.f32 1.442695, %v2692_v56 }
 0x6c8   : >> { %v5058_v42 = vpop.permute.xlu1 %5057  ;;  %v3077_v38 = vmul.f32 1.442695, %v2666_v37  ;;  %8789 = vpow2.f32 %v3101_v19  ;;  %v14460_v37 = vpack.c.bf16 %v12222_v63, %v12390_v18  ;;  %v3081_v19 = vmul.f32 1.442695, %v2668_v26  ;;  %v14463_v18 = vld [vmem:[#allocation148_spill] sm:$0xff] }
 0x6c9   : >> { %14455 = vst [vmem:[#allocation92_spill] sm:$0xff] %v12480_v54  ;;  %v5215_v23 = vmul.f32 %v8772_v20, %v12474_v24  ;;  %v5118_v25 = vmul.f32 %v12265_v7, %v5058_v42  ;;  %8432 = vset.pattern.permute.xlu1 %v14415_v50  ;;  %7662 = vmatpush3.bf16.msra.mxu1 %v4971_v43  ;;  %v3105_v42 = vmul.f32 1.442695, %v2680_v57  ;;  %8791 = vpow2.f32 %v3129_v33 }
 0x6ca   : >> { %5634 = vperm.xlu1 %8432, %v14439_v17   ;;  %7663 = vmatprep.subr.bf16.mxu1 %v14154_v35  ;;  %v2682_v50 = vmul.f32 %v12332_v59, %v14454_v16  ;;  %8793 = vpow2.f32 %v3077_v38  ;;  %v14464_v26 = vpack.c.bf16 %v12198_v11, %v12366_v27  ;;  %v2700_v11 = vmul.f32 %v12443_v6, %v14457_v45 }
 0x6cb   : >> { %v12495_v1 = vadd.f32 %v5118_v25, %v12308_v22  ;;  %v12500_v51 = vadd.f32 %v5299_v58, %v5215_v23  ;;  %v8778_v22 = vpop.eup %8777  ;;  %v2670_v58 = vmul.f32 %v12137_v39, %v14461_v9  ;;  %v12517_v23 = vpop.permute.xlu0 %5447  ;;  %8795 = vpow2.f32 %v3105_v42  ;;  %v14465_v42 = vld [vmem:[#allocation89_spill] sm:$0xff] }
 0x6cc   : >> { %v5062_v20 = vpop.permute.xlu1 %5061  ;;  %v8780_v57 = vpop.eup %8779  ;;  %v3109_v63 = vmul.f32 1.442695, %v2682_v50  ;;  %v5302_v39 = vmul.f32 %v12463_v40, %v14463_v18  ;;  %v2686_v50 = vmul.f32 %v12332_v59, %v14461_v9  ;;  %8797 = vpow2.f32 %v3081_v19 }
 0x6cd   : >> { %14458 = vst [vmem:[#allocation59_spill] sm:$0xff] %v12500_v51  ;;  %v5119_v43 = vmul.f32 %v12265_v7, %v5062_v20  ;;  %v12506_v56 = vmul.f32 %v8774_v49, %v12495_v1  ;;  %v12509_v25 = vmul.f32 %v8776_v28, %v12500_v51  ;;  %7664 = vmatpush3.bf16.msra.mxu1 %v14460_v37  ;;  %v14462_v49 = vld [vmem:[#allocation144_spill] sm:$0xff]  ;;  %v3085_v38 = vmul.f32 1.442695, %v2670_v58 }
 0x6ce   : >> { %5622 = vperm.xlu1 %8432, %v14258_v12   ;;  %7665 = vmatprep.subr.bf16.mxu1 %v14154_v35  ;;  %v2684_v28 = vmul.f32 %v12332_v59, %v14457_v45  ;;  %v14466_v12 = vld [vmem:[#allocation127_spill] sm:$0xff]  ;;  %8799 = vpow2.f32 %v3109_v63  ;;  %v14470_v63 = vld [vmem:[#allocation54_spill] sm:$0xff]  ;;  %v3117_v45 = vmul.f32 1.442695, %v2686_v50  ;;  %v2673_v50 = vmul.f32 %v12332_v59, %v14306_v55 }
 0x6cf   : >> { %14459 = vst [vmem:[#allocation146_spill] sm:$0xff] %v12509_v25  ;;  %v12520_v20 = vadd.f32 %v5119_v43, %v14462_v49  ;;  %v8782_v49 = vpop.eup %8781  ;;  %v5436_v58 = vpop.permute.xlu0 %5435  ;;  %8801 = vpow2.f32 %v3085_v38 }
 0x6d0   : >> { %v5070_v16 = vpop.permute.xlu1 %5069  ;;  %v8784_v33 = vpop.eup %8783 }
 0x6d1   : >> { %v5218_v37 = vmul.f32 %v8778_v22, %v12520_v20  ;;  %v5121_v43 = vmul.f32 %v12265_v7, %v5070_v16  ;;  %7666 = vmatpush3.bf16.msra.mxu1 %v14464_v26  ;;  %v3113_v16 = vmul.f32 1.442695, %v2684_v28  ;;  %v8786_v27 = vpop.eup %8785 }
 0x6d2   : >> { %5626 = vperm.xlu1 %8432, %v14452_v41   ;;  %7667 = vmatprep.subr.bf16.mxu1 %v14154_v35  ;;  %v5304_v41 = vmul.f32 %v12463_v40, %v14466_v12 }
 0x6d3   : >> { %v12538_v18 = vadd.f32 %v5121_v43, %v14465_v42  ;;  %v12541_v22 = vadd.f32 %v5302_v39, %v5218_v37  ;;  %v14468_v39 = vld [vmem:[#allocation41_spill] sm:$0xff]  ;;  %v14471_v42 = vpack.c.bf16 %v12174_v52, %v12343_v62  ;;  %v14472_v43 = vld [vmem:[#allocation26_spill] sm:$0xff]  ;;  %8803 = vpow2.f32 %v3113_v16 }
 0x6d4   : >> { %v5078_v25 = vpop.permute.xlu1 %5077  ;;  %v14469_v37 = vsub.s32 2, %v14468_v39  ;;  %8805 = vpow2.f32 %v3117_v45  ;;  %v3091_v45 = vmul.f32 1.442695, %v2673_v50 }
 0x6d5   : >> { %v5220_v26 = vmul.f32 %v8780_v57, %v12538_v18  ;;  %v5123_v19 = vmul.f32 %v12265_v7, %v5078_v25  ;;  %v12552_v28 = vmul.f32 %v8782_v49, %v12541_v22  ;;  %7668 = vmatpush3.bf16.msra.mxu1 %v14471_v42  ;;  %v2672_v57 = vmul.f32 %v12332_v59, %v14472_v43  ;;  %v14473_v25 = vld [vmem:[#allocation131_spill] sm:$0xff] }
 0x6d6   : >> { %v12557_v12 = vrot.slane %v12244_v61, %v14469_v37  ;;  %5618 = vperm.xlu1 %8432, %v14470_v63   ;;  %7669 = vmatprep.subr.bf16.mxu1 %v14154_v35  ;;  %v2702_v61 = vmul.f32 %v12443_v6, %v14461_v9  ;;  %v14474_v37 = vld [vmem:[#allocation68_spill] sm:$0xff]  ;;  %v3145_v42 = vmul.f32 1.442695, %v2700_v11  ;;  %v2688_v11 = vmul.f32 %v12443_v6, %v14472_v43 }
 0x6d7   : >> { %14467 = vst [vmem:[#allocation147_spill] sm:$0xff] %v12552_v28  ;;  %v12566_v54 = vadd.f32 %v5123_v19, %v14473_v25  ;;  %v12569_v49 = vadd.f32 %v5304_v41, %v5220_v26  ;;  %v5306_v52 = vmul.f32 %v12463_v40, %v14474_v37  ;;  %v8788_v19 = vpop.eup %8787  ;;  %v3089_v37 = vmul.f32 1.442695, %v2672_v57  ;;  %v14476_v25 = vld [vmem:[#allocation91_spill] sm:$0xff]  ;;  %v14477_v28 = vld [vmem:[#allocation100_spill] sm:$0xff] }
 0x6d8   : >> { %v5487_v62 = vmul.f32 %v12557_v12, %v5436_v58  ;;  %v5086_v38 = vpop.permute.xlu1 %5085  ;;  %v8790_v9 = vpop.eup %8789  ;;  %v14475_v58 = vpack.c.bf16 %v12148_v5, %v12320_v60  ;;  %v5308_v5 = vmul.f32 %v12463_v40, %v14477_v28  ;;  %8807 = vpow2.f32 %v3145_v42  ;;  %v14481_v28 = vld [vmem:[#allocation29_spill] sm:$0xff] }
 0x6d9   : >> { %v5222_v41 = vmul.f32 %v8784_v33, %v12566_v54  ;;  %v5125_v16 = vmul.f32 %v12265_v7, %v5086_v38  ;;  %v5403_v26 = vmul.f32 %v8786_v27, %v12569_v49  ;;  %v8792_v39 = vpop.eup %8791  ;;  %v3149_v27 = vmul.f32 1.442695, %v2702_v61  ;;  %v14479_v61 = vld [vmem:[#allocation49_spill] sm:$0xff] }
 0x6da   : >> { %5606 = vperm.xlu1 %8432, %v14243_v29   ;;  %7670 = vmatpush3.bf16.msra.mxu1 %v14475_v58  ;;  %v8794_v29 = vpop.eup %8793  ;;  %8809 = vpow2.f32 %v3089_v37  ;;  %v2675_v50 = vmul.f32 %v12332_v59, %v14481_v28  ;;  %v14483_v37 = vld [vmem:[#allocation77_spill] sm:$0xff] }
 0x6db   : >> { %v12590_v63 = vadd.f32 %v5125_v16, %v14476_v25  ;;  %7671 = vmatprep.subr.bf16.mxu1 %v14154_v35  ;;  %v12593_v33 = vadd.f32 %v5306_v52, %v5222_v41  ;;  %v12595_v38 = vadd.f32 %v5487_v62, %v5403_v26  ;;  %v8796_v57 = vpop.eup %8795  ;;  %v14480_v62 = vpack.c.bf16 %v12119_v46, %v12293_v32 }
 0x6dc   : >> { %v5094_v60 = vpop.permute.xlu1 %5093  ;;  %v3121_v41 = vmul.f32 1.442695, %v2688_v11  ;;  %8811 = vpow2.f32 %v3149_v27  ;;  %v8798_v26 = vpop.eup %8797  ;;  %v5310_v46 = vmul.f32 %v12463_v40, %v12269_v8  ;;  %v14485_v27 = vmov 12  }
 0x6dd   : >> { %v5224_v25 = vmul.f32 %v8788_v19, %v12590_v63  ;;  %v5127_v16 = vmul.f32 %v12265_v7, %v5094_v60  ;;  %v12604_v52 = vmul.f32 %v8790_v9, %v12593_v33  ;;  %v12613_v42 = vmul.f32 %v8792_v39, %v12595_v38  ;;  %v14488_v39 = vld [vmem:[#allocation137_spill] sm:$0xff] }
 0x6de   : >> { %5598 = vperm.xlu1 %8432, %v14479_v61   ;;  %7672 = vmatpush3.bf16.msra.mxu1 %v14480_v62  ;;  %v4973_v60 = vrot.slane %v14483_v37, 3  ;;  %8813 = vpow2.f32 %v3091_v45  ;;  %v8800_v62 = vpop.eup %8799  ;;  %v14486_v8 = vpack.c.bf16 %v12274_v3, %v12074_v44  ;;  %v14490_v44 = vld [vmem:[#allocation80_spill] sm:$0xff]  ;;  %v14494_v61 = vld [vmem:[#allocation61_spill] sm:$0xff] }
 0x6df   : >> { %14478 = vst [vmem:[#allocation128_spill] sm:$0xff] %v12604_v52  ;;  %14482 = vst [vmem:[#allocation129_spill] sm:$0xff] %v12613_v42  ;;  %v12616_v19 = vadd.f32 %v5127_v16, %v12241_v34  ;;  %7673 = vmatprep.subr.bf16.mxu1 %v14154_v35  ;;  %v12619_v9 = vadd.f32 %v5308_v5, %v5224_v25  ;;  %v3095_v25 = vmul.f32 1.442695, %v2675_v50  ;;  %v14487_v16 = vld [vmem:[#allocation31_spill] sm:$0xff]  ;;  %8815 = vpow2.f32 %v3121_v41  ;;  %v8802_v58 = vpop.eup %8801 }
 0x6e0   : >> { %v5102_v32 = vpop.permute.xlu1 %5101  ;;  %v2677_v45 = vmul.f32 %v12332_v59, %v14487_v16  ;;  %v8804_v42 = vpop.eup %8803  ;;  %v5312_v3 = vmul.f32 %v12463_v40, %v14490_v44  ;;  %v14493_v44 = vld [vmem:[#allocation104_spill] sm:$0xff] }
 0x6e1   : >> { %v5226_v34 = vmul.f32 %v8794_v29, %v12616_v19  ;;  %v5129_v11 = vmul.f32 %v12265_v7, %v5102_v32  ;;  %v12629_v5 = vmul.f32 %v8796_v57, %v12619_v9  ;;  %v14489_v29 = vld [vmem:[#allocation63_spill] sm:$0xff]  ;;  %v2691_v57 = vmul.f32 %v12443_v6, %v14481_v28  ;;  %v8806_v28 = vpop.eup %8805 }
 0x6e2   : >> { %8434 = vset.pattern.permute.xlu1 %v14485_v27  ;;  %7674 = vmatpush3.bf16.msra.mxu1 %v14486_v8  ;;  %v14491_v8 = vld [vmem:[#allocation33_spill] sm:$0xff]  ;;  %8817 = vpow2.f32 %v3095_v25 }
 0x6e3   : >> { %14484 = vst [vmem:[#allocation101_spill] sm:$0xff] %v12629_v5  ;;  %v5145_v43 = vadd.f32 %v5129_v11, %v14488_v39  ;;  %5837 = vperm.xlu1 %8434, %v14489_v29   ;;  %v12639_v32 = vadd.f32 %v5310_v46, %v5226_v34  ;;  %7699 = vmatprep.subr.bf16.mxu1 %v14154_v35  ;;  %v3099_v34 = vmul.f32 1.442695, %v2677_v45 }
 0x6e4   : >> { %v5110_v50 = vpop.permute.xlu1 %5109  ;;  %v2679_v41 = vmul.f32 %v12332_v59, %v14491_v8 }
 0x6e5   : >> { %v5154_v52 = vpack.c.bf16 %v5145_v43, %v12446_v0  ;;  %v5228_v39 = vmul.f32 %v8798_v26, %v5145_v43  ;;  %v5131_v11 = vmul.f32 %v12265_v7, %v5110_v50  ;;  %7676 = vmatmul.mubr.bf16.vlgmr.msra.gmra.mxu1 %v4973_v60  ;;  %v12651_v46 = vmul.f32 %v8800_v62, %v12639_v32  ;;  %v14495_v43 = vld [vmem:[#allocation142_spill] sm:$0xff]  ;;  %v14496_v60 = vld [vmem:[#allocation35_spill] sm:$0xff]  ;;  %v8808_v25 = vpop.eup %8807 }
 0x6e6   : >> { %7715 = vmatprep.mubr.msk.bf16.mxu1 %vm9229_vm4, %v14154_v35  ;;  %v3127_v0 = vmul.f32 1.442695, %v2691_v57  ;;  %v5314_v7 = vmul.f32 %v12463_v40, %v14495_v43  ;;  %v3103_v26 = vmul.f32 1.442695, %v2679_v41  ;;  %v2681_v62 = vmul.f32 %v12332_v59, %v14496_v60 }
 0x6e7   : >> { %14492 = vst [vmem:[#allocation90_spill] sm:$0xff] %v12651_v46  ;;  %v5147_v29 = vadd.f32 %v5131_v11, %v14493_v44  ;;  %5829 = vperm.xlu1 %8434, %v14494_v61   ;;  %v12657_v5 = vadd.f32 %v5312_v3, %v5228_v39  ;;  %v5495_v50 = vmul.f32 %v12557_v12, %v12486_v48  ;;  %8819 = vpow2.f32 %v3099_v34  ;;  %v8810_v57 = vpop.eup %8809  ;;  %v14497_v39 = vld [vmem:[#allocation62_spill] sm:$0xff] }
 0x6e8   : >> { %v2695_v48 = vmul.f32 %v12443_v6, %v14491_v8  ;;  %8821 = vpow2.f32 %v3127_v0 }
 0x6e9   : >> { %v5155_v45 = vpack.c.bf16 %v5147_v29, %v12469_v31  ;;  %v5230_v46 = vmul.f32 %v8802_v58, %v5147_v29  ;;  %v5237_v11 = vpop.permute.xlu1 %5236  ;;  %v5411_v44 = vmul.f32 %v8804_v42, %v12657_v5  ;;  %v8812_v31 = vpop.eup %8811  ;;  %v14498_v58 = vld [vmem:[#allocation96_spill] sm:$0xff]  ;;  %8823 = vpow2.f32 %v3103_v26 }
 0x6ea   : >> { %v5300_v3 = vmul.f32 %v12463_v40, %v5237_v11  ;;  %v3107_v42 = vmul.f32 1.442695, %v2681_v62  ;;  %v3135_v8 = vmul.f32 1.442695, %v2695_v48 }
 0x6eb   : >> { %5833 = vperm.xlu1 %8434, %v14497_v39   ;;  %7680 = vmatpush3.bf16.msra.mxu0 %v5155_v45  ;;  %v12669_v41 = vadd.f32 %v5314_v7, %v5230_v46  ;;  %v12671_v43 = vadd.f32 %v5495_v50, %v5411_v44  ;;  %v8814_v34 = vpop.eup %8813  ;;  %v5497_v45 = vmul.f32 %v12557_v12, %v12449_v10  ;;  %v14499_v50 = vld [vmem:[#allocation37_spill] sm:$0xff] }
 0x6ec   : >> { %v12676_v29 = vadd.f32 %v5300_v3, %v14498_v58  ;;  %7681 = vmatprep.subr.bf16.mxu0 %v14154_v35  ;;  %v2683_v11 = vmul.f32 %v12332_v59, %v14499_v50  ;;  %v5483_v44 = vmul.f32 %v12557_v12, %v12374_v4  ;;  %v8816_v10 = vpop.eup %8815  ;;  %v14501_v58 = vmov 13  }
 0x6ed   : >> { %v5241_v46 = vpop.permute.xlu1 %5240  ;;  %v5413_v7 = vmul.f32 %v8806_v28, %v12669_v41  ;;  %v12685_v0 = vmul.f32 %v8808_v25, %v12671_v43  ;;  %8825 = vpow2.f32 %v3107_v42 }
 0x6ee   : >> { %v5399_v62 = vmul.f32 %v8810_v57, %v12676_v29  ;;  %v5301_v3 = vmul.f32 %v12463_v40, %v5241_v46  ;;  %v14503_v57 = vld [vmem:[#allocation39_spill] sm:$0xff]  ;;  %v3111_v16 = vmul.f32 1.442695, %v2683_v11  ;;  %8827 = vpow2.f32 %v3135_v8 }
 0x6ef   : >> { %14500 = vst [vmem:[#allocation111_spill] sm:$0xff] %v12685_v0  ;;  %8436 = vset.pattern.permute.xlu1 %v14501_v58  ;;  %7682 = vmatpush3.bf16.msra.mxu0 %v5154_v52  ;;  %v12694_v28 = vadd.f32 %v5497_v45, %v5413_v7  ;;  %v14502_v0 = vld [vmem:[#allocation64_spill] sm:$0xff]  ;;  %v2685_v46 = vmul.f32 %v12332_v59, %v14503_v57  ;;  %v8818_v7 = vpop.eup %8817 }
 0x6f0   : >> { %v12697_v25 = vadd.f32 %v5301_v3, %v12506_v56  ;;  %6024 = vperm.xlu1 %8436, %v14502_v0   ;;  %7683 = vmatprep.subr.bf16.mxu0 %v14154_v35  ;;  %v12701_v4 = vadd.f32 %v5483_v44, %v5399_v62  ;;  %v14504_v59 = vpack.c.bf16 %v12616_v19, %v12421_v47  ;;  %8829 = vpow2.f32 %v3111_v16  ;;  %v14507_v3 = vld [vmem:[#allocation25_spill] sm:$0xff] }
 0x6f1   : >> { %v5249_v26 = vpop.permute.xlu1 %5248  ;;  %v12706_v51 = vmul.f32 %v8812_v31, %v12694_v28  ;;  %v14505_v31 = vld [vmem:[#allocation88_spill] sm:$0xff]  ;;  %v5486_v44 = vmul.f32 %v12557_v12, %v12408_v14  ;;  %v14506_v62 = vpack.c.bf16 %v12590_v63, %v12395_v53 }
 0x6f2   : >> { %v5303_v56 = vmul.f32 %v12463_v40, %v5249_v26  ;;  %v12712_v48 = vmul.f32 %v8814_v34, %v12697_v25  ;;  %v12715_v45 = vmul.f32 %v8816_v10, %v12701_v4  ;;  %v3115_v34 = vmul.f32 1.442695, %v2685_v46 }
 0x6f3   : >> { %7684 = vmatpush3.bf16.msra.mxu0 %v14504_v59  ;;  %v2687_v10 = vmul.f32 %v12443_v6, %v14507_v3 }
 0x6f4   : >> { %v12721_v11 = vadd.f32 %v5303_v56, %v14505_v31  ;;  %8437 = vset.pattern.permute.xlu1 %v14485_v27  ;;  %7685 = vmatprep.subr.bf16.mxu0 %v14154_v35  ;;  %v8820_v26 = vpop.eup %8819  ;;  %v14508_v56 = vld [vmem:[#allocation69_spill] sm:$0xff]  ;;  %8831 = vpow2.f32 %v3115_v34  ;;  %v2689_v34 = vmul.f32 %v12443_v6, %v14306_v55 }
 0x6f5   : >> { %5821 = vperm.xlu1 %8437, %v14272_v2   ;;  %v5257_v42 = vpop.permute.xlu1 %5256  ;;  %v8822_v46 = vpop.eup %8821 }
 0x6f6   : >> { %v5402_v19 = vmul.f32 %v8818_v7, %v12721_v11  ;;  %v5305_v8 = vmul.f32 %v12463_v40, %v5257_v42  ;;  %v8824_v59 = vpop.eup %8823  ;;  %v5490_v42 = vmul.f32 %v12557_v12, %v12517_v23 }
 0x6f7   : >> { %7686 = vmatpush3.bf16.msra.mxu0 %v14506_v62  ;;  %v14510_v62 = vld [vmem:[#allocation75_spill] sm:$0xff] }
 0x6f8   : >> { %v12737_v16 = vadd.f32 %v5486_v44, %v5402_v19  ;;  %v12740_v14 = vadd.f32 %v5305_v8, %v14508_v56  ;;  %7687 = vmatprep.subr.bf16.mxu0 %v14154_v35  ;;  %v14509_v44 = vpack.c.bf16 %v12566_v54, %v12370_v13  ;;  %v3119_v8 = vmul.f32 1.442695, %v2687_v10 }
 0x6f9   : >> { %8438 = vset.pattern.permute.xlu1 %v14501_v58  ;;  %v5265_v7 = vpop.permute.xlu1 %5264  ;;  %v14511_v10 = vpack.c.bf16 %v12538_v18, %v12347_v15 }
 0x6fa   : >> { %v5307_v63 = vmul.f32 %v12463_v40, %v5265_v7  ;;  %6012 = vperm.xlu1 %8438, %v14494_v61   ;;  %v12749_v31 = vmul.f32 %v8820_v26, %v12740_v14  ;;  %v12757_v19 = vmul.f32 %v8822_v46, %v12737_v16  ;;  %v8826_v7 = vpop.eup %8825  ;;  %8833 = vpow2.f32 %v3119_v8 }
 0x6fb   : >> { %7688 = vmatpush3.bf16.msra.mxu0 %v14509_v44  ;;  %v8828_v52 = vpop.eup %8827 }
 0x6fc   : >> { %v12762_v56 = vadd.f32 %v5307_v63, %v14510_v62  ;;  %7689 = vmatprep.subr.bf16.mxu0 %v14154_v35  ;;  %v14512_v63 = vld [vmem:[#allocation28_spill] sm:$0xff]  ;;  %v3123_v62 = vmul.f32 1.442695, %v2689_v34  ;;  %v2701_v34 = vmul.f32 %v12443_v6, %v14503_v57 }
 0x6fd   : >> { %v5273_v26 = vpop.permute.xlu1 %5272  ;;  %v2690_v44 = vmul.f32 %v12443_v6, %v14512_v63  ;;  %v8830_v47 = vpop.eup %8829 }
 0x6fe   : >> { %v5335_v13 = vpack.c.bf16 %v12619_v9, %v12762_v56  ;;  %v5406_v54 = vmul.f32 %v8824_v59, %v12762_v56  ;;  %v5309_v46 = vmul.f32 %v12463_v40, %v5273_v26  ;;  %6016 = vperm.xlu1 %8438, %v14497_v39   ;;  %8835 = vpow2.f32 %v3123_v62  ;;  %v12869_v9 = vld [vmem:[%s10687_s27 + $0x8] sm:$0xff]  ;;  %v14524_v56 = vld [vmem:[#allocation41_spill] sm:$0xff] }
 0x6ff   : >> { %7690 = vmatpush3.bf16.msra.mxu0 %v14511_v10  ;;  %v3147_v62 = vmul.f32 1.442695, %v2701_v34  ;;  %v14518_v34 = vld [vmem:[#allocation146_spill] sm:$0xff] }
 0x700   : >> { %v12778_v23 = vadd.f32 %v5309_v46, %v12436_v36  ;;  %7691 = vmatprep.subr.bf16.mxu0 %v14154_v35  ;;  %v12781_v59 = vadd.f32 %v5490_v42, %v5406_v54  ;;  %v14513_v36 = vpack.c.bf16 %v12520_v20, %v12495_v1  ;;  %v3125_v42 = vmul.f32 1.442695, %v2690_v44  ;;  %v14514_v20 = vld [vmem:[#allocation108_spill] sm:$0xff] }
 0x701   : >> { %v5281_v26 = vpop.permute.xlu1 %5280  ;;  %v8832_v54 = vpop.eup %8831  ;;  %v5156_v44 = vrot.slane %v14514_v20, 4 }
 0x702   : >> { %v5336_v53 = vpack.c.bf16 %v12639_v32, %v12778_v23  ;;  %v5311_v15 = vmul.f32 %v12463_v40, %v5281_v26  ;;  %8439 = vset.pattern.permute.xlu1 %v14485_v27  ;;  %v12788_v18 = vmul.f32 %v8826_v7, %v12778_v23  ;;  %v12797_v8 = vmul.f32 %v8828_v52, %v12781_v59  ;;  %v14516_v23 = vld [vmem:[#allocation92_spill] sm:$0xff] }
 0x703   : >> { %5817 = vperm.xlu1 %8439, %v14439_v17   ;;  %7692 = vmatpush3.bf16.msra.mxu0 %v14513_v36  ;;  %v14515_v52 = vpack.c.bf16 %v12298_v30, %v12474_v24  ;;  %8837 = vpow2.f32 %v3125_v42  ;;  %v5659_v42 = vpop.permute.xlu0 %5658 }
 0x704   : >> { %v5327_v32 = vadd.f32 %v5311_v15, %v12459_v21  ;;  %7693 = vmatprep.subr.bf16.mxu0 %v14154_v35  ;;  %v2699_v21 = vmul.f32 %v12443_v6, %v14499_v50  ;;  %8839 = vpow2.f32 %v3147_v62  ;;  %v2697_v62 = vmul.f32 %v12443_v6, %v14496_v60 }
 0x705   : >> { %v5289_v7 = vpop.permute.xlu1 %5288 }
 0x706   : >> { %v5337_v46 = vpack.c.bf16 %v12657_v5, %v5327_v32  ;;  %v5313_v10 = vmul.f32 %v12463_v40, %v5289_v7  ;;  %v12803_v1 = vmul.f32 %v8830_v47, %v5327_v32  ;;  %v14517_v5 = vld [vmem:[#allocation60_spill] sm:$0xff]  ;;  %v3143_v30 = vmul.f32 1.442695, %v2699_v21  ;;  %v14519_v7 = vld [vmem:[#allocation55_spill] sm:$0xff] }
 0x707   : >> { %8440 = vset.pattern.permute.xlu1 %v14501_v58  ;;  %7694 = vmatpush3.bf16.msra.mxu0 %v14515_v52  ;;  %v8834_v24 = vpop.eup %8833 }
 0x708   : >> { %v5329_v26 = vadd.f32 %v5313_v10, %v14516_v23  ;;  %6008 = vperm.xlu1 %8440, %v14517_v5   ;;  %7719 = vmatprep.subr.bf16.mxu0 %v14154_v35  ;;  %8841 = vpow2.f32 %v3143_v30  ;;  %v14520_v23 = vld [vmem:[#allocation57_spill] sm:$0xff] }
 0x70a   : >> { %v5338_v40 = vpack.c.bf16 %v12669_v41, %v5329_v26  ;;  %v5416_v47 = vpop.permute.xlu1 %5415  ;;  %v5412_v15 = vmul.f32 %v8832_v54, %v5329_v26  ;;  %7696 = vmatmul.mubr.bf16.vlgmr.msra.gmra.mxu0 %v5156_v44 }
 0x70b   : >> { %v5482_v36 = vmul.f32 %v12557_v12, %v5416_v47  ;;  %7735 = vmatprep.mubr.msk.bf16.mxu0 %vm9229_vm4, %v14154_v35  ;;  %v8836_v52 = vpop.eup %8835 }
 0x70c   : >> { %8441 = vset.pattern.permute.xlu1 %v14485_v27  ;;  %7700 = vmatpush3.bf16.msra.mxu1 %v5338_v40  ;;  %v12839_v40 = vpop.permute.xlu0 %5646 }
 0x70d   : >> { %v12821_v32 = vadd.f32 %v5482_v36, %v14518_v34  ;;  %5805 = vperm.xlu1 %8441, %v14519_v7   ;;  %7701 = vmatprep.subr.bf16.mxu1 %v14154_v35 }
 0x70e   : >> { %v5424_v41 = vpop.permute.xlu1 %5423 }
 0x70f   : >> { %v5484_v10 = vmul.f32 %v12557_v12, %v5424_v41  ;;  %v12829_v44 = vmul.f32 %v8834_v24, %v12821_v32  ;;  %v14522_v24 = vld [vmem:[#allocation36_spill] sm:$0xff]  ;;  %v3139_v41 = vmul.f32 1.442695, %v2697_v62 }
 0x710   : >> { %7702 = vmatpush3.bf16.msra.mxu1 %v5337_v46  ;;  %v8838_v46 = vpop.eup %8837  ;;  %v2698_v34 = vmul.f32 %v12443_v6, %v14522_v24 }
 0x711   : >> { %v12832_v21 = vadd.f32 %v5484_v10, %v12712_v48  ;;  %8442 = vset.pattern.permute.xlu1 %v14501_v58  ;;  %7703 = vmatprep.subr.bf16.mxu1 %v14154_v35  ;;  %v14521_v48 = vld [vmem:[#allocation147_spill] sm:$0xff]  ;;  %8843 = vpow2.f32 %v3139_v41 }
 0x712   : >> { %5996 = vperm.xlu1 %8442, %v14520_v23   ;;  %v5428_v26 = vpop.permute.xlu1 %5427  ;;  %v3141_v54 = vmul.f32 1.442695, %v2698_v34  ;;  %v14526_v34 = vpack.c.bf16 %v12593_v33, %v12740_v14 }
 0x713   : >> { %v5485_v47 = vmul.f32 %v12557_v12, %v5428_v26  ;;  %v12843_v36 = vmul.f32 %v8836_v52, %v12832_v21 }
 0x714   : >> { %7704 = vmatpush3.bf16.msra.mxu1 %v5336_v53  ;;  %8845 = vpow2.f32 %v3141_v54  ;;  %v14529_v54 = vpack.c.bf16 %v12569_v49, %v12721_v11  ;;  %v14530_v49 = vpack.c.bf16 %v12541_v22, %v12697_v25 }
 0x715   : >> { %v12846_v30 = vadd.f32 %v5485_v47, %v14521_v48  ;;  %7705 = vmatprep.subr.bf16.mxu1 %v14154_v35  ;;  %v8840_v47 = vpop.eup %8839  ;;  %v12861_v48 = vpop.permute.xlu0 %5642 }
 0x716   : >> { %6000 = vperm.xlu1 %8442, %v14439_v17   ;;  %v5472_v10 = vpop.permute.xlu1 %5471  ;;  %v8842_v23 = vpop.eup %8841 }
 0x717   : >> { %v12855_v52 = vmul.f32 %v8838_v46, %v12846_v30  ;;  %v5496_v53 = vmul.f32 %v12557_v12, %v5472_v10  ;;  %v14523_v10 = vld [vmem:[#allocation54_spill] sm:$0xff] }
 0x718   : >> { %7706 = vmatpush3.bf16.msra.mxu1 %v5335_v13  ;;  %v14525_v13 = vsub.s32 3, %v14524_v56 }
 0x719   : >> { %v5512_v62 = vadd.f32 %v5496_v53, %v5412_v15  ;;  %7707 = vmatprep.subr.bf16.mxu1 %v14154_v35 }
 0x71a   : >> { %8443 = vset.pattern.permute.xlu1 %v14485_v27  ;;  %v5464_v26 = vpop.permute.xlu1 %5463  ;;  %v12874_v15 = vrot.slane %v12869_v9, %v14525_v13 }
 0x71b   : >> { %v5521_v46 = vpack.c.bf16 %v12694_v28, %v5512_v62  ;;  %v5494_v55 = vmul.f32 %v12557_v12, %v5464_v26  ;;  %5801 = vperm.xlu1 %8443, %v14523_v10   ;;  %v5595_v63 = vmul.f32 %v8840_v47, %v5512_v62  ;;  %v12882_v28 = vpop.permute.xlu0 %5630  ;;  %v14527_v62 = vld [vmem:[#allocation34_spill] sm:$0xff] }
 0x71c   : >> { %7708 = vmatpush3.bf16.msra.mxu1 %v14526_v34  ;;  %v2696_v33 = vmul.f32 %v12443_v6, %v14527_v62  ;;  %v5680_v14 = vmul.f32 %v12874_v15, %v5659_v42  ;;  %v14531_v34 = vld [vmem:[#allocation51_spill] sm:$0xff] }
 0x71d   : >> { %v5510_v41 = vadd.f32 %v5494_v55, %v12803_v1  ;;  %7720 = vmatpush3.bf16.msra.mxu0 %v5521_v46  ;;  %7709 = vmatprep.subr.bf16.mxu1 %v14154_v35  ;;  %v14528_v1 = vld [vmem:[#allocation56_spill] sm:$0xff] }
 0x71e   : >> { %7721 = vmatprep.subr.bf16.mxu0 %v14154_v35  ;;  %v3137_v46 = vmul.f32 1.442695, %v2696_v33  ;;  %v14532_v33 = vld [vmem:[#allocation59_spill] sm:$0xff] }
 0x71f   : >> { %v5520_v26 = vpack.c.bf16 %v12671_v43, %v5510_v41  ;;  %v5593_v53 = vmul.f32 %v8842_v23, %v5510_v41  ;;  %8444 = vset.pattern.permute.xlu1 %v14501_v58  ;;  %v5655_v47 = vpop.permute.xlu1 %5654  ;;  %v12898_v23 = vadd.f32 %v5680_v14, %v12706_v51  ;;  %v12907_v11 = vpop.permute.xlu0 %5614  ;;  %v14533_v14 = vpack.c.bf16 %v12676_v29, %v14532_v33 }
 0x720   : >> { %v5679_v55 = vmul.f32 %v12874_v15, %v5655_v47  ;;  %5992 = vperm.xlu1 %8444, %v14528_v1   ;;  %7710 = vmatpush3.bf16.msra.mxu1 %v14529_v54  ;;  %v8844_v51 = vpop.eup %8843  ;;  %8847 = vpow2.f32 %v3137_v46  ;;  %v14536_v46 = vld [vmem:[#allocation90_spill] sm:$0xff] }
 0x721   : >> { %7722 = vmatpush3.bf16.msra.mxu0 %v5520_v26  ;;  %7711 = vmatprep.subr.bf16.mxu1 %v14154_v35  ;;  %v5339_v26 = vrot.slane %v14483_v37, 4 }
 0x722   : >> { %v12895_v43 = vadd.f32 %v5679_v55, %v5595_v63  ;;  %7723 = vmatprep.subr.bf16.mxu0 %v14154_v35  ;;  %v14534_v55 = vld [vmem:[#allocation31_spill] sm:$0xff] }
 0x723   : >> { %v2693_v54 = vmul.f32 %v12443_v6, %v14534_v55  ;;  %v14549_v55 = vld [vmem:[#allocation40_spill] sm:$0xff] }
 0x724   : >> { %v5704_v42 = vpack.c.bf16 %v12898_v23, %v12895_v43  ;;  %8445 = vset.pattern.permute.xlu1 %v14485_v27  ;;  %v5456_v13 = vpop.permute.xlu1 %5455  ;;  %7712 = vmatpush3.bf16.msra.mxu1 %v14530_v49  ;;  %v12923_v49 = vpop.permute.xlu0 %5610 }
 0x725   : >> { %v5492_v63 = vmul.f32 %v12557_v12, %v5456_v13  ;;  %5789 = vperm.xlu1 %8445, %v14531_v34   ;;  %7713 = vmatprep.subr.bf16.mxu1 %v14154_v35  ;;  %v8846_v13 = vpop.eup %8845 }
 0x727   : >> { %v5508_v41 = vadd.f32 %v5492_v63, %v12788_v18  ;;  %v14535_v18 = vld [vmem:[#allocation53_spill] sm:$0xff] }
 0x728   : >> { %v5460_v47 = vpop.permute.xlu1 %5459  ;;  %7714 = vmatpush3.bf16.msra.mxu1 %v14533_v14  ;;  %v14537_v14 = vld [vmem:[#allocation32_spill] sm:$0xff] }
 0x729   : >> { %v5493_v22 = vmul.f32 %v12557_v12, %v5460_v47  ;;  %8446 = vset.pattern.permute.xlu1 %v14501_v58  ;;  %7739 = vmatprep.subr.bf16.mxu1 %v14154_v35  ;;  %v5591_v25 = vmul.f32 %v8844_v51, %v5508_v41  ;;  %v3131_v51 = vmul.f32 1.442695, %v2693_v54  ;;  %v2694_v34 = vmul.f32 %v12443_v6, %v14537_v14 }
 0x72a   : >> { %5980 = vperm.xlu1 %8446, %v14535_v18   ;;  %v5677_v18 = vmul.f32 %v12874_v15, %v12839_v40 }
 0x72b   : >> { %v5509_v63 = vadd.f32 %v5493_v22, %v14536_v46  ;;  %7716 = vmatmul.mubr.bf16.vlgmr.msra.gmra.mxu1 %v5339_v26  ;;  %v14538_v26 = vld [vmem:[#allocation111_spill] sm:$0xff]  ;;  %v12941_v22 = vpop.permute.xlu0 %5602  ;;  %8849 = vpow2.f32 %v3131_v51  ;;  %v3133_v54 = vmul.f32 1.442695, %v2694_v34  ;;  %v14539_v46 = vld [vmem:[#allocation50_spill] sm:$0xff] }
 0x72c   : >> { %7740 = vmatpush3.bf16.msra.mxu1 %v5704_v42  ;;  %7755 = vmatprep.mubr.msk.bf16.mxu1 %vm9229_vm4, %v14154_v35  ;;  %v12935_v42 = vadd.f32 %v5677_v18, %v5593_v53 }
 0x72d   : >> { %v5519_v29 = vpack.c.bf16 %v5509_v63, %v5508_v41  ;;  %v5592_v47 = vmul.f32 %v8846_v13, %v5509_v63  ;;  %v5651_v33 = vpop.permute.xlu1 %5650  ;;  %7741 = vmatprep.subr.bf16.mxu1 %v14154_v35  ;;  %v8848_v53 = vpop.eup %8847  ;;  %8851 = vpow2.f32 %v3133_v54 }
 0x72e   : >> { %v5678_v1 = vmul.f32 %v12874_v15, %v5651_v33  ;;  %5984 = vperm.xlu1 %8446, %v14523_v10   ;;  %v5676_v33 = vmul.f32 %v12874_v15, %v12861_v48 }
 0x72f   : >> { %7724 = vmatpush3.bf16.msra.mxu0 %v5519_v29  ;;  %v12950_v63 = vpop.permute.xlu0 %5841 }
 0x730   : >> { %v12938_v41 = vadd.f32 %v5678_v1, %v14538_v26  ;;  %7725 = vmatprep.subr.bf16.mxu0 %v14154_v35  ;;  %v14540_v1 = vld [vmem:[#allocation101_spill] sm:$0xff]  ;;  %v14541_v26 = vld [vmem:[#allocation52_spill] sm:$0xff] }
 0x732   : >> { %v5703_v6 = vpack.c.bf16 %v12938_v41, %v12935_v42  ;;  %8448 = vset.pattern.permute.xlu1 %v14485_v27  ;;  %v5452_v40 = vpop.permute.xlu1 %5451 }
 0x733   : >> { %v5491_v13 = vmul.f32 %v12557_v12, %v5452_v40  ;;  %5785 = vperm.xlu1 %8448, %v14539_v46   ;;  %v12960_v40 = vadd.f32 %v5676_v33, %v5592_v47 }
 0x734   : >> { %7742 = vmatpush3.bf16.msra.mxu1 %v5703_v6 }
 0x735   : >> { %v5507_v18 = vadd.f32 %v5491_v13, %v14540_v1  ;;  %7743 = vmatprep.subr.bf16.mxu1 %v14154_v35  ;;  %v12966_v13 = vpop.permute.xlu0 %5825 }
 0x737   : >> { %v5518_v34 = vpack.c.bf16 %v5507_v18, %v12781_v59  ;;  %8449 = vset.pattern.permute.xlu1 %v14501_v58  ;;  %v5639_v29 = vpop.permute.xlu1 %5638  ;;  %v5590_v27 = vmul.f32 %v8848_v53, %v5507_v18  ;;  %v14543_v58 = vld [vmem:[#allocation49_spill] sm:$0xff]  ;;  %v14545_v18 = vld [vmem:[#allocation43_spill] sm:$0xff] }
 0x738   : >> { %v5675_v51 = vmul.f32 %v12874_v15, %v5639_v29  ;;  %5976 = vperm.xlu1 %8449, %v14541_v26   ;;  %v8850_v53 = vpop.eup %8849 }
 0x739   : >> { %7726 = vmatpush3.bf16.msra.mxu0 %v5518_v34  ;;  %v14546_v34 = vld [vmem:[#allocation45_spill] sm:$0xff] }
 0x73a   : >> { %v12958_v6 = vadd.f32 %v5675_v51, %v5591_v25  ;;  %7727 = vmatprep.subr.bf16.mxu0 %v14154_v35  ;;  %v14544_v25 = vmov 14   ;;  %v12974_v29 = vrot.slane %v14546_v34, %v14545_v18  ;;  %v14547_v51 = vld [vmem:[#allocation63_spill] sm:$0xff]  ;;  %v8852_v26 = vpop.eup %8851  ;;  %v5673_v34 = vmul.f32 %v12874_v15, %v12882_v28 }
 0x73c   : >> { %14542 = vst [vmem:[#allocation152_spill] sm:$0xff] %v12958_v6  ;;  %v5702_v59 = vpack.c.bf16 %v12960_v40, %v12958_v6  ;;  %5964 = vperm.xlu1 %8449, %v14543_v58   ;;  %v5440_v54 = vpop.permute.xlu1 %5439  ;;  %v2718_v6 = vmul.f32 %v12974_v29, %v14549_v55 }
 0x73d   : >> { %v5488_v48 = vmul.f32 %v12557_v12, %v5440_v54  ;;  %v12978_v54 = vpop.permute.xlu0 %5813 }
 0x73e   : >> { %7744 = vmatpush3.bf16.msra.mxu1 %v5702_v59  ;;  %v14548_v59 = vld [vmem:[#allocation128_spill] sm:$0xff] }
 0x73f   : >> { %v5504_v1 = vadd.f32 %v5488_v48, %v12749_v31  ;;  %7745 = vmatprep.subr.bf16.mxu1 %v14154_v35 }
 0x740   : >> { %8450 = vset.pattern.permute.xlu1 %v14544_v25  ;;  %v5444_v47 = vpop.permute.xlu1 %5443 }
 0x741   : >> { %v5489_v33 = vmul.f32 %v12557_v12, %v5444_v47  ;;  %6203 = vperm.xlu1 %8450, %v14547_v51   ;;  %v5587_v58 = vmul.f32 %v8850_v53, %v5504_v1  ;;  %v2703_v53 = vmul.f32 %v12974_v29, %v14507_v3  ;;  %v2717_v47 = vmul.f32 %v12974_v29, %v14503_v57 }
 0x743   : >> { %v5505_v46 = vadd.f32 %v5489_v33, %v14548_v59  ;;  %v3151_v59 = vmul.f32 1.442695, %v2703_v53  ;;  %v14553_v53 = vld [vmem:[#allocation38_spill] sm:$0xff] }
 0x745   : >> { %v5517_v31 = vpack.c.bf16 %v5505_v46, %v5504_v1  ;;  %6195 = vperm.xlu1 %8450, %v14494_v61   ;;  %v5635_v48 = vpop.permute.xlu1 %5634  ;;  %v5588_v10 = vmul.f32 %v8852_v26, %v5505_v46  ;;  %v12992_v1 = vadd.f32 %v5673_v34, %v12797_v8  ;;  %v12997_v46 = vpop.permute.xlu0 %5809  ;;  %v3181_v26 = vmul.f32 1.442695, %v2718_v6 }
 0x746   : >> { %v5674_v12 = vmul.f32 %v12874_v15, %v5635_v48  ;;  %v3179_v8 = vmul.f32 1.442695, %v2717_v47  ;;  %v14551_v34 = vmov 15   ;;  %v2715_v6 = vmul.f32 %v12974_v29, %v14499_v50 }
 0x747   : >> { %7728 = vmatpush3.bf16.msra.mxu0 %v5517_v31  ;;  %v14550_v31 = vpack.c.bf16 %v12595_v38, %v12737_v16  ;;  %8853 = vpow2.f32 %v3181_v26  ;;  %v14552_v16 = vpack.c.bf16 %v12846_v30, %v12832_v21  ;;  %v2716_v47 = vmul.f32 %v12974_v29, %v14553_v53 }
 0x748   : >> { %v12994_v33 = vadd.f32 %v5674_v12, %v5590_v27  ;;  %7729 = vmatprep.subr.bf16.mxu0 %v14154_v35  ;;  %8855 = vpow2.f32 %v3151_v59  ;;  %v3175_v21 = vmul.f32 1.442695, %v2715_v6  ;;  %v14556_v6 = vld [vmem:[#allocation129_spill] sm:$0xff] }
 0x749   : >> { %6199 = vperm.xlu1 %8450, %v14497_v39   ;;  %v5623_v28 = vpop.permute.xlu1 %5622  ;;  %v13013_v38 = vpop.permute.xlu0 %5797  ;;  %8857 = vpow2.f32 %v3179_v8 }
 0x74a   : >> { %v5701_v51 = vpack.c.bf16 %v12994_v33, %v12992_v1  ;;  %v5671_v27 = vmul.f32 %v12874_v15, %v5623_v28  ;;  %v14554_v28 = vld [vmem:[#allocation48_spill] sm:$0xff]  ;;  %8859 = vpow2.f32 %v3175_v21 }
 0x74b   : >> { %7730 = vmatpush3.bf16.msra.mxu0 %v14550_v31  ;;  %v13022_v26 = vrot.slane %v14554_v28, %v14545_v18 }
 0x74c   : >> { %7746 = vmatpush3.bf16.msra.mxu1 %v5701_v51  ;;  %7731 = vmatprep.subr.bf16.mxu0 %v14154_v35  ;;  %v13024_v51 = vadd.f32 %v5671_v27, %v5587_v58  ;;  %v14555_v27 = vpack.c.bf16 %v12701_v4, %v12821_v32  ;;  %v2714_v4 = vmul.f32 %v12974_v29, %v14522_v24 }
 0x74d   : >> { %8452 = vset.pattern.permute.xlu1 %v14551_v34  ;;  %v5627_v48 = vpop.permute.xlu1 %5626  ;;  %7747 = vmatprep.subr.bf16.mxu1 %v14154_v35  ;;  %v2733_v58 = vmul.f32 %v13022_v26, %v14503_v57 }
 0x74e   : >> { %v5672_v12 = vmul.f32 %v12874_v15, %v5627_v48  ;;  %6390 = vperm.xlu1 %8452, %v14502_v0   ;;  %v5669_v0 = vmul.f32 %v12874_v15, %v12907_v11  ;;  %v3177_v11 = vmul.f32 1.442695, %v2716_v47 }
 0x74f   : >> { %7732 = vmatpush3.bf16.msra.mxu0 %v14552_v16  ;;  %v2734_v16 = vmul.f32 %v13022_v26, %v14549_v55 }
 0x750   : >> { %v13026_v31 = vadd.f32 %v5672_v12, %v5588_v10  ;;  %7733 = vmatprep.subr.bf16.mxu0 %v14154_v35  ;;  %v5522_v10 = vrot.slane %v14514_v20, 5  ;;  %v13043_v48 = vadd.f32 %v5669_v0, %v12757_v19  ;;  %v5668_v19 = vmul.f32 %v12874_v15, %v12923_v49 }
 0x751   : >> { %v5619_v59 = vpop.permute.xlu1 %5618  ;;  %v3211_v0 = vmul.f32 1.442695, %v2733_v58  ;;  %8861 = vpow2.f32 %v3177_v11  ;;  %v3213_v49 = vmul.f32 1.442695, %v2734_v16  ;;  %v2713_v58 = vmul.f32 %v12974_v29, %v14496_v60 }
 0x752   : >> { %v5700_v30 = vpack.c.bf16 %v13026_v31, %v13024_v51  ;;  %v5670_v8 = vmul.f32 %v12874_v15, %v5619_v59  ;;  %8453 = vset.pattern.permute.xlu1 %v14544_v25  ;;  %v13051_v59 = vpop.permute.xlu0 %5793  ;;  %v5666_v11 = vmul.f32 %v12874_v15, %v12941_v22 }
 0x753   : >> { %6187 = vperm.xlu1 %8453, %v14272_v2   ;;  %7734 = vmatpush3.bf16.msra.mxu0 %v14555_v27  ;;  %8863 = vpow2.f32 %v3211_v0  ;;  %v3171_v22 = vmul.f32 1.442695, %v2713_v58 }
 0x754   : >> { %v13046_v12 = vadd.f32 %v5670_v8, %v14556_v6  ;;  %7748 = vmatpush3.bf16.msra.mxu1 %v5700_v30  ;;  %7759 = vmatprep.subr.bf16.mxu0 %v14154_v35  ;;  %v13068_v30 = vadd.f32 %v5668_v19, %v12855_v52  ;;  %v8854_v27 = vpop.eup %8853  ;;  %v14557_v6 = vsub.s32 4, %v14524_v56  ;;  %8865 = vpow2.f32 %v3213_v49 }
 0x755   : >> { %v5607_v2 = vpop.permute.xlu1 %5606  ;;  %7749 = vmatprep.subr.bf16.mxu1 %v14154_v35  ;;  %v5705_v49 = vrot.slane %v14483_v37, 5 }
 0x756   : >> { %v5699_v32 = vpack.c.bf16 %v13046_v12, %v13043_v48  ;;  %v5667_v47 = vmul.f32 %v12874_v15, %v5607_v2  ;;  %7736 = vmatmul.mubr.bf16.vlgmr.msra.gmra.mxu0 %v5522_v10  ;;  %v3173_v10 = vmul.f32 1.442695, %v2714_v4  ;;  %v13082_v16 = vrot.slane %v12869_v9, %v14557_v6  ;;  %v5782_v2 = vpop.permute.xlu0 %5781 }
 0x757   : >> { %8454 = vset.pattern.permute.xlu1 %v14551_v34  ;;  %7775 = vmatprep.mubr.msk.bf16.mxu0 %vm9229_vm4, %v14154_v35 }
 0x758   : >> { %v13065_v21 = vadd.f32 %v5667_v47, %v12843_v36  ;;  %6378 = vperm.xlu1 %8454, %v14494_v61   ;;  %7750 = vmatpush3.bf16.msra.mxu1 %v5699_v32  ;;  %v8856_v61 = vpop.eup %8855  ;;  %v13086_v32 = vadd.f32 %v5666_v11, %v12715_v45  ;;  %v5848_v47 = vmul.f32 %v13082_v16, %v5782_v2  ;;  %8867 = vpow2.f32 %v3173_v10 }
 0x759   : >> { %v5599_v8 = vpop.permute.xlu1 %5598  ;;  %7751 = vmatprep.subr.bf16.mxu1 %v14154_v35  ;;  %v8858_v19 = vpop.eup %8857  ;;  %v5863_v45 = vmul.f32 %v13082_v16, %v12950_v63  ;;  %8869 = vpow2.f32 %v3171_v22  ;;  %v2731_v63 = vmul.f32 %v13022_v26, %v14499_v50  ;;  %v2732_v11 = vmul.f32 %v13022_v26, %v14553_v53 }
 0x75a   : >> { %v5698_v36 = vpack.c.bf16 %v13068_v30, %v13065_v21  ;;  %v5665_v52 = vmul.f32 %v12874_v15, %v5599_v8  ;;  %v5779_v15 = vmul.f32 %v8854_v27, %v12898_v23 }
 0x75b   : >> { %v3207_v2 = vmul.f32 1.442695, %v2731_v63  ;;  %v3209_v22 = vmul.f32 1.442695, %v2732_v11 }
 0x75c   : >> { %v5681_v4 = vadd.f32 %v5665_v52, %v12829_v44  ;;  %6382 = vperm.xlu1 %8454, %v14497_v39   ;;  %7752 = vmatpush3.bf16.msra.mxu1 %v5698_v36  ;;  %v5778_v44 = vmul.f32 %v8858_v19, %v12895_v43  ;;  %v5879_v27 = vadd.f32 %v5863_v45, %v5779_v15  ;;  %v8860_v43 = vpop.eup %8859  ;;  %v14558_v19 = vld [vmem:[#allocation33_spill] sm:$0xff] }
 0x75d   : >> { %7753 = vmatprep.subr.bf16.mxu1 %v14154_v35  ;;  %v2712_v45 = vmul.f32 %v12974_v29, %v14527_v62  ;;  %8871 = vpow2.f32 %v3207_v2 }
 0x75e   : >> { %v5697_v0 = vpack.c.bf16 %v13086_v32, %v5681_v4  ;;  %v5764_v8 = vmul.f32 %v8856_v61, %v5681_v4  ;;  %v5838_v6 = vpop.permute.xlu1 %5837  ;;  %v8862_v52 = vpop.eup %8861  ;;  %v2711_v4 = vmul.f32 %v12974_v29, %v14558_v19  ;;  %8873 = vpow2.f32 %v3209_v22 }
 0x75f   : >> { %v5862_v39 = vmul.f32 %v13082_v16, %v5838_v6  ;;  %v13141_v22 = vpop.f32.mrf.mxu1 }
 0x760   : >> { %8455 = vset.pattern.permute.xlu1 %v14544_v25  ;;  %7754 = vmatpush3.bf16.msra.mxu1 %v5697_v0  ;;  %v13099_v23 = vadd.f32 %v5848_v47, %v5764_v8  ;;  %v8864_v47 = vpop.eup %8863  ;;  %v5776_v0 = vmul.f32 %v8860_v43, %v12935_v42  ;;  %v5777_v8 = vmul.f32 %v8862_v52, %v12938_v41  ;;  %v3167_v42 = vmul.f32 1.442695, %v2711_v4  ;;  %v13139_v4 = vpop.f32.mrf.mxu0 }
 0x761   : >> { %v5878_v58 = vadd.f32 %v5862_v39, %v5778_v44  ;;  %6183 = vperm.xlu1 %8455, %v14439_v17   ;;  %7779 = vmatprep.subr.bf16.mxu1 %v14154_v35  ;;  %v14559_v44 = vsub.s32 5, %v14524_v56  ;;  %v2729_v41 = vmul.f32 %v13022_v26, %v14496_v60  ;;  %v3169_v52 = vmul.f32 1.442695, %v2712_v45 }
 0x762   : >> { %v5830_v10 = vpop.permute.xlu1 %5829  ;;  %8875 = vpow2.f32 %v3167_v42 }
 0x763   : >> { %v5887_v36 = vpack.c.bf16 %v5879_v27, %v5878_v58  ;;  %7756 = vmatmul.mubr.bf16.vlgmr.msra.gmra.mxu1 %v5705_v49  ;;  %v5860_v61 = vmul.f32 %v13082_v16, %v5830_v10  ;;  %v13123_v39 = vrot.slane %v12869_v9, %v14559_v44  ;;  %v6021_v49 = vpop.permute.xlu0 %6020  ;;  %v5961_v43 = vmul.f32 %v8864_v47, %v5878_v58  ;;  %v7557_v44 = vpop.f32.mrf.mxu1 }
 0x764   : >> { %7795 = vmatprep.mubr.msk.bf16.mxu1 %vm9229_vm4, %v14154_v35  ;;  %v2730_v58 = vmul.f32 %v13022_v26, %v14522_v24  ;;  %8877 = vpow2.f32 %v3169_v52 }
 0x765   : >> { %8456 = vset.pattern.permute.xlu1 %v14551_v34  ;;  %7760 = vmatpush3.bf16.msra.mxu0 %v5887_v36  ;;  %v13125_v63 = vadd.f32 %v5860_v61, %v5776_v0  ;;  %v6045_v61 = vmul.f32 %v13123_v39, %v6021_v49  ;;  %v14562_v49 = vld [vmem:[#allocation57_spill] sm:$0xff] }
 0x766   : >> { %6374 = vperm.xlu1 %8456, %v14517_v5   ;;  %v5834_v15 = vpop.permute.xlu1 %5833  ;;  %7761 = vmatprep.subr.bf16.mxu0 %v14154_v35  ;;  %v8866_v5 = vpop.eup %8865 }
 0x767   : >> { %v5861_v6 = vmul.f32 %v13082_v16, %v5834_v15  ;;  %v8868_v11 = vpop.eup %8867  ;;  %v5962_v15 = vmul.f32 %v8866_v5, %v5879_v27  ;;  %v13143_v0 = vadd.f32 %v6045_v61, %v5961_v43  ;;  %v7537_v27 = vpop.f32.mrf.mxu0  ;;  %v3205_v43 = vmul.f32 1.442695, %v2730_v58 }
 0x768   : >> { %v8870_v47 = vpop.eup %8869  ;;  %v5775_v45 = vmul.f32 %v8868_v11, %v12960_v40  ;;  %v3913_v11 = vpop.f32.mrf.mxu1 }
 0x769   : >> { %v13127_v10 = vadd.f32 %v5861_v6, %v5777_v8  ;;  %14560 = vst [vmem:[#allocation126_spill] sm:$0xff] %v13143_v0  ;;  %v3203_v8 = vmul.f32 1.442695, %v2729_v41  ;;  %v2710_v6 = vmul.f32 %v12974_v29, %v14537_v14  ;;  %v3728_v41 = vpop.f32.mrf.mxu0 }
 0x76a   : >> { %8457 = vset.pattern.permute.xlu1 %v14544_v25  ;;  %v7558_v58 = vpop.f32.mrf.mxu1 }
 0x76b   : >> { %v5886_v9 = vpack.c.bf16 %v13127_v10, %v13125_v63  ;;  %6171 = vperm.xlu1 %8457, %v14519_v7   ;;  %v6025_v36 = vpop.permute.xlu1 %6024  ;;  %8879 = vpow2.f32 %v3203_v8  ;;  %v7538_v52 = vpop.f32.mrf.mxu0  ;;  %v3165_v27 = vmul.f32 1.442695, %v2710_v6 }
 0x76c   : >> { %v6046_v2 = vmul.f32 %v13123_v39, %v6025_v36  ;;  %v14563_v36 = vld [vmem:[#allocation152_spill] sm:$0xff]  ;;  %8881 = vpow2.f32 %v3205_v43  ;;  %v8872_v6 = vpop.eup %8871  ;;  %v14565_v43 = vld [vmem:[#allocation54_spill] sm:$0xff] }
 0x76d   : >> { %7762 = vmatpush3.bf16.msra.mxu0 %v5886_v9  ;;  %v5859_v9 = vmul.f32 %v13082_v16, %v12966_v13  ;;  %v5774_v61 = vmul.f32 %v8870_v47, %v14563_v36  ;;  %v13167_v13 = vpop.f32.mrf.mxu0  ;;  %v8874_v36 = vpop.eup %8873  ;;  %8883 = vpow2.f32 %v3165_v27  ;;  %v5959_v58 = vmul.f32 %v8872_v6, %v13125_v63 }
 0x76e   : >> { %v13145_v7 = vadd.f32 %v6046_v2, %v5962_v15  ;;  %7763 = vmatprep.subr.bf16.mxu0 %v14154_v35  ;;  %v14564_v2 = vld [vmem:[#allocation31_spill] sm:$0xff] }
 0x76f   : >> { %8458 = vset.pattern.permute.xlu1 %v14551_v34  ;;  %v2709_v40 = vmul.f32 %v12974_v29, %v14564_v2  ;;  %v7577_v41 = vpop.f32.mrf.mxu0  ;;  %v8876_v27 = vpop.eup %8875 }
 0x770   : >> { %14561 = vst [vmem:[#allocation98_spill] sm:$0xff] %v13145_v7  ;;  %v6070_v5 = vpack.c.bf16 %v13145_v7, %v13143_v0  ;;  %6362 = vperm.xlu1 %8458, %v14562_v49   ;;  %v5822_v42 = vpop.permute.xlu1 %5821  ;;  %v13163_v49 = vadd.f32 %v5859_v9, %v5775_v45  ;;  %v2728_v41 = vmul.f32 %v13022_v26, %v14527_v62 }
 0x771   : >> { %v5858_v15 = vmul.f32 %v13082_v16, %v5822_v42  ;;  %v3163_v8 = vmul.f32 1.442695, %v2709_v40  ;;  %v14566_v40 = vld [vmem:[#allocation29_spill] sm:$0xff]  ;;  %v5772_v63 = vmul.f32 %v8876_v27, %v12992_v1 }
 0x772   : >> { %7780 = vmatpush3.bf16.msra.mxu1 %v6070_v5  ;;  %v13171_v5 = vpop.f32.mrf.mxu1  ;;  %v2707_v11 = vmul.f32 %v12974_v29, %v14566_v40 }
 0x773   : >> { %v13161_v44 = vadd.f32 %v5858_v15, %v5774_v61  ;;  %7781 = vmatprep.subr.bf16.mxu1 %v14154_v35  ;;  %8885 = vpow2.f32 %v3163_v8  ;;  %v2727_v15 = vmul.f32 %v13022_v26, %v14558_v19  ;;  %v8878_v8 = vpop.eup %8877 }
 0x774   : >> { %6366 = vperm.xlu1 %8458, %v14439_v17   ;;  %v7597_v45 = vpop.f32.mrf.mxu1  ;;  %v4097_v17 = vpop.f32.mrf.mxu0 }
 0x775   : >> { %v5885_v47 = vpack.c.bf16 %v13163_v49, %v13161_v44  ;;  %v6013_v42 = vpop.permute.xlu1 %6012  ;;  %v3199_v6 = vmul.f32 1.442695, %v2727_v15  ;;  %v14570_v15 = vld [vmem:[#allocation30_spill] sm:$0xff] }
 0x776   : >> { %v6043_v9 = vmul.f32 %v13123_v39, %v6013_v42  ;;  %v4280_v52 = vpop.f32.mrf.mxu1  ;;  %v7578_v45 = vpop.f32.mrf.mxu0  ;;  %v2708_v27 = vmul.f32 %v12974_v29, %v14570_v15 }
 0x777   : >> { %7764 = vmatpush3.bf16.msra.mxu0 %v5885_v47  ;;  %v5960_v47 = vmul.f32 %v8874_v36, %v13127_v10  ;;  %v3201_v45 = vmul.f32 1.442695, %v2728_v41  ;;  %8887 = vpow2.f32 %v3199_v6  ;;  %v2725_v41 = vmul.f32 %v13022_v26, %v14564_v2 }
 0x778   : >> { %8459 = vset.pattern.permute.xlu1 %v14544_v25  ;;  %7765 = vmatprep.subr.bf16.mxu0 %v14154_v35  ;;  %v7598_v17 = vpop.f32.mrf.mxu1  ;;  %v13186_v37 = vadd.f32 %v6043_v9, %v5959_v58  ;;  %v13190_v0 = vpop.f32.mrf.mxu0  ;;  %v3159_v9 = vmul.f32 1.442695, %v2707_v11 }
 0x779   : >> { %6167 = vperm.xlu1 %8459, %v14565_v43   ;;  %v6017_v61 = vpop.permute.xlu1 %6016  ;;  %v5773_v17 = vmul.f32 %v8878_v8, %v12994_v33  ;;  %8889 = vpow2.f32 %v3201_v45  ;;  %v14571_v8 = vld [vmem:[#allocation51_spill] sm:$0xff]  ;;  %v2726_v45 = vmul.f32 %v13022_v26, %v14537_v14 }
 0x77a   : >> { %v6044_v42 = vmul.f32 %v13123_v39, %v6017_v61  ;;  %14567 = vst [vmem:[#allocation66_spill] sm:$0xff] %v13186_v37  ;;  %v13194_v10 = vpop.f32.mrf.mxu1  ;;  %v14569_v61 = vld [vmem:[#allocation56_spill] sm:$0xff]  ;;  %v7617_v58 = vpop.f32.mrf.mxu0  ;;  %8891 = vpow2.f32 %v3159_v9  ;;  %v3195_v9 = vmul.f32 1.442695, %v2725_v41  ;;  %v5855_v41 = vmul.f32 %v13082_v16, %v12997_v46 }
 0x77c   : >> { %v13188_v19 = vadd.f32 %v6044_v42, %v5960_v47  ;;  %v8880_v47 = vpop.eup %8879  ;;  %v5856_v42 = vmul.f32 %v13082_v16, %v12978_v54  ;;  %v7637_v62 = vpop.f32.mrf.mxu1 }
 0x77d   : >> { %8461 = vset.pattern.permute.xlu1 %v14551_v34  ;;  %v5957_v33 = vmul.f32 %v8880_v47, %v13161_v44 }
 0x77e   : >> { %14568 = vst [vmem:[#allocation149_spill] sm:$0xff] %v13188_v19  ;;  %v6069_v36 = vpack.c.bf16 %v13188_v19, %v13186_v37  ;;  %6358 = vperm.xlu1 %8461, %v14569_v61   ;;  %v5818_v52 = vpop.permute.xlu1 %5817  ;;  %v4463_v19 = vpop.f32.mrf.mxu0  ;;  %v13205_v7 = vadd.f32 %v5856_v42, %v5772_v63 }
 0x77f   : >> { %v5857_v1 = vmul.f32 %v13082_v16, %v5818_v52  ;;  %v8882_v37 = vpop.eup %8881  ;;  %v6005_v61 = vpop.permute.xlu0 %6004 }
 0x780   : >> { %7782 = vmatpush3.bf16.msra.mxu1 %v6069_v36  ;;  %v4646_v54 = vpop.f32.mrf.mxu1  ;;  %v7618_v62 = vpop.f32.mrf.mxu0  ;;  %v3161_v36 = vmul.f32 1.442695, %v2708_v27  ;;  %v6041_v58 = vmul.f32 %v13123_v39, %v6005_v61  ;;  %v5958_v44 = vmul.f32 %v8882_v37, %v13163_v49  ;;  %v14572_v37 = vld [vmem:[#allocation28_spill] sm:$0xff] }
 0x781   : >> { %v13207_v11 = vadd.f32 %v5857_v1, %v5773_v17  ;;  %7783 = vmatprep.subr.bf16.mxu1 %v14154_v35  ;;  %v8884_v6 = vpop.eup %8883  ;;  %v2706_v49 = vmul.f32 %v12974_v29, %v14572_v37 }
 0x782   : >> { %8462 = vset.pattern.permute.xlu1 %v14544_v25  ;;  %v7638_v52 = vpop.f32.mrf.mxu1  ;;  %v13222_v42 = vpop.f32.mrf.mxu0  ;;  %v13224_v1 = vadd.f32 %v6041_v58, %v5957_v33  ;;  %v5771_v61 = vmul.f32 %v8884_v6, %v13026_v31  ;;  %8893 = vpow2.f32 %v3161_v36  ;;  %v14574_v6 = vld [vmem:[#allocation27_spill] sm:$0xff] }
 0x783   : >> { %v5884_v19 = vpack.c.bf16 %v13207_v11, %v13205_v7  ;;  %6155 = vperm.xlu1 %8462, %v14571_v8   ;;  %v6009_v63 = vpop.permute.xlu1 %6008  ;;  %v8886_v17 = vpop.eup %8885  ;;  %v3197_v8 = vmul.f32 1.442695, %v2726_v45  ;;  %v2705_v36 = vmul.f32 %v12974_v29, %v14574_v6  ;;  %8895 = vpow2.f32 %v3195_v9 }
 0x784   : >> { %v6042_v47 = vmul.f32 %v13123_v39, %v6009_v63  ;;  %v7657_v27 = vpop.f32.mrf.mxu0  ;;  %v5770_v52 = vmul.f32 %v8886_v17, %v13024_v51  ;;  %v3157_v45 = vmul.f32 1.442695, %v2706_v49 }
 0x785   : >> { %7766 = vmatpush3.bf16.msra.mxu0 %v5884_v19  ;;  %v14573_v19 = vld [vmem:[#allocation53_spill] sm:$0xff]  ;;  %8897 = vpow2.f32 %v3197_v8  ;;  %v3155_v17 = vmul.f32 1.442695, %v2705_v36  ;;  %v8888_v27 = vpop.eup %8887 }
 0x786   : >> { %v13226_v54 = vadd.f32 %v6042_v47, %v5958_v44  ;;  %7767 = vmatprep.subr.bf16.mxu0 %v14154_v35  ;;  %v4829_v63 = vpop.f32.mrf.mxu0  ;;  %v13242_v47 = vadd.f32 %v5855_v41, %v5771_v61  ;;  %8899 = vpow2.f32 %v3157_v45  ;;  %v2723_v61 = vmul.f32 %v13022_v26, %v14566_v40 }
 0x787   : >> { %8463 = vset.pattern.permute.xlu1 %v14551_v34  ;;  %8901 = vpow2.f32 %v3155_v17  ;;  %v5955_v8 = vmul.f32 %v8888_v27, %v13205_v7  ;;  %v14576_v7 = vld [vmem:[#allocation26_spill] sm:$0xff]  ;;  %v14577_v27 = vld [vmem:[#allocation52_spill] sm:$0xff] }
 0x788   : >> { %v6068_v62 = vpack.c.bf16 %v13226_v54, %v13224_v1  ;;  %6346 = vperm.xlu1 %8463, %v14573_v19   ;;  %v5806_v33 = vpop.permute.xlu1 %5805  ;;  %v7658_v58 = vpop.f32.mrf.mxu0  ;;  %v3191_v45 = vmul.f32 1.442695, %v2723_v61 }
 0x789   : >> { %v5854_v31 = vmul.f32 %v13082_v16, %v5806_v33  ;;  %v8890_v19 = vpop.eup %8889  ;;  %v2724_v33 = vmul.f32 %v13022_v26, %v14570_v15 }
 0x78a   : >> { %7784 = vmatpush3.bf16.msra.mxu1 %v6068_v62  ;;  %v8892_v9 = vpop.eup %8891  ;;  %v5956_v63 = vmul.f32 %v8890_v19, %v13207_v11  ;;  %v2704_v11 = vmul.f32 %v12974_v29, %v14576_v7  ;;  %8903 = vpow2.f32 %v3191_v45  ;;  %v6489_v45 = vrot.slane %v13190_v0, 4 }
 0x78b   : >> { %v5870_v44 = vadd.f32 %v5854_v31, %v5770_v52  ;;  %7785 = vmatprep.subr.bf16.mxu1 %v14154_v35  ;;  %v5768_v58 = vmul.f32 %v8892_v9, %v13043_v48  ;;  %v2720_v0 = vmul.f32 %v13022_v26, %v14576_v7 }
 0x78c   : >> { %6350 = vperm.xlu1 %8463, %v14565_v43   ;;  %v14575_v43 = vld [vmem:[#allocation50_spill] sm:$0xff] }
 0x78d   : >> { %v5883_v46 = vpack.c.bf16 %v13242_v47, %v5870_v44  ;;  %v5997_v51 = vpop.permute.xlu1 %5996 }
 0x78e   : >> { %v6039_v62 = vmul.f32 %v13123_v39, %v5997_v51  ;;  %v6483_v51 = vrot.slane %v13167_v13, 6  ;;  %v6486_v13 = vrot.slane %v13171_v5, 5 }
 0x78f   : >> { %7768 = vmatpush3.bf16.msra.mxu0 %v5883_v46  ;;  %v8894_v52 = vpop.eup %8893  ;;  %v5852_v46 = vmul.f32 %v13082_v16, %v13013_v38 }
 0x790   : >> { %8464 = vset.pattern.permute.xlu1 %v14544_v25  ;;  %7769 = vmatprep.subr.bf16.mxu0 %v14154_v35  ;;  %v6480_v25 = vrot.slane %v13141_v22, 7  ;;  %v13259_v31 = vadd.f32 %v6039_v62, %v5955_v8  ;;  %v5989_v22 = vpop.permute.xlu0 %5988  ;;  %v3193_v62 = vmul.f32 1.442695, %v2724_v33  ;;  %v8896_v38 = vpop.eup %8895 }
 0x791   : >> { %6151 = vperm.xlu1 %8464, %v14575_v43   ;;  %v6001_v49 = vpop.permute.xlu1 %6000  ;;  %v13277_v29 = vadd.f32 %v5852_v46, %v5768_v58  ;;  %v5953_v8 = vmul.f32 %v8896_v38, %v5870_v44  ;;  %v6037_v5 = vmul.f32 %v13123_v39, %v5989_v22  ;;  %v2722_v58 = vmul.f32 %v13022_v26, %v14572_v37 }
 0x792   : >> { %v6040_v41 = vmul.f32 %v13123_v39, %v6001_v49  ;;  %v6522_v48 = vsel %vm6521_vm5, %v13139_v4, %v6480_v25  ;;  %v8898_v61 = vpop.eup %8897  ;;  %v2721_v49 = vmul.f32 %v13022_v26, %v14574_v6  ;;  %8905 = vpow2.f32 %v3193_v62 }
 0x793   : >> { %v6524_v4 = vsel %vm6523_vm6, %v6522_v48, %v6483_v51  ;;  %v8900_v46 = vpop.eup %8899  ;;  %v5954_v44 = vmul.f32 %v8898_v61, %v13242_v47  ;;  %v6492_v48 = vrot.slane %v13194_v10, 3  ;;  %v3189_v61 = vmul.f32 1.442695, %v2722_v58 }
 0x794   : >> { %v13261_v36 = vadd.f32 %v6040_v41, %v5956_v63  ;;  %v14579_v63 = vld [vmem:[#allocation49_spill] sm:$0xff]  ;;  %v3153_v41 = vmul.f32 1.442695, %v2704_v11  ;;  %v13295_v51 = vpop.permute.xlu0 %5972  ;;  %v6526_v11 = vsel %vm6525_vm7, %v6524_v4, %v6486_v13  ;;  %v3187_v22 = vmul.f32 1.442695, %v2721_v49 }
 0x795   : >> { %8466 = vset.pattern.permute.xlu1 %v14551_v34  ;;  %v5769_v34 = vmul.f32 %v8894_v52, %v13046_v12  ;;  %v14578_v12 = vld [vmem:[#allocation45_spill] sm:$0xff]  ;;  %v5767_v47 = vmul.f32 %v8900_v46, %v13068_v30  ;;  %v6528_v38 = vsel %vm6527_vm8, %v6526_v11, %v6489_v45  ;;  %v2719_v49 = vmul.f32 %v13022_v26, %v14507_v3 }
 0x796   : >> { %v6067_v17 = vpack.c.bf16 %v13261_v36, %v13259_v31  ;;  %6342 = vperm.xlu1 %8466, %v14577_v27   ;;  %v5802_v19 = vpop.permute.xlu1 %5801  ;;  %v2428_v33 = vcombine.high %v14578_v12, %v14578_v12  ;;  %v8902_v27 = vpop.eup %8901  ;;  %8907 = vpow2.f32 %v3153_v41  ;;  %v5851_v10 = vmul.f32 %v13082_v16, %v13051_v59 }
 0x797   : >> { %v5853_v9 = vmul.f32 %v13082_v16, %v5802_v19  ;;  %v13300_v19 = vadd.f32 %v6037_v5, %v5953_v8  ;;  %v5766_v30 = vmul.f32 %v8902_v27, %v13065_v21  ;;  %v6495_v12 = vrot.slane %v13222_v42, 2  ;;  %v8904_v21 = vpop.eup %8903 }
 0x798   : >> { %7786 = vmatpush3.bf16.msra.mxu1 %v6067_v17  ;;  %v13322_v8 = vpop.permute.xlu0 %5968  ;;  %8909 = vpow2.f32 %v3187_v22  ;;  %v5867_v5 = vadd.f32 %v5851_v10, %v5767_v47  ;;  %v3183_v59 = vmul.f32 1.442695, %v2719_v49 }
 0x799   : >> { %v13280_v43 = vadd.f32 %v5853_v9, %v5769_v34  ;;  %7787 = vmatprep.subr.bf16.mxu1 %v14154_v35  ;;  %v13311_v34 = vrot.slane %v2428_v33, %v14545_v18  ;;  %v3185_v33 = vmul.f32 1.442695, %v2720_v0  ;;  %8911 = vpow2.f32 %v3189_v61 }
 0x79a   : >> { %6330 = vperm.xlu1 %8466, %v14579_v63   ;;  %v6530_v63 = vsel %vm6529_vm9, %v6528_v38, %v6492_v48 }
 0x79b   : >> { %v5882_v25 = vpack.c.bf16 %v13280_v43, %v13277_v29  ;;  %v5993_v52 = vpop.permute.xlu1 %5992  ;;  %v2750_v26 = vmul.f32 %v13311_v34, %v14549_v55  ;;  %v6532_v58 = vsel %vm6531_vm10, %v6530_v63, %v6495_v12  ;;  %8913 = vpow2.f32 %v3185_v33 }
 0x79c   : >> { %v6038_v17 = vmul.f32 %v13123_v39, %v5993_v52  ;;  %v2749_v52 = vmul.f32 %v13311_v34, %v14503_v57  ;;  %v13331_v22 = vpop.permute.xlu0 %6386  ;;  %8915 = vpow2.f32 %v3183_v59  ;;  %v2747_v10 = vmul.f32 %v13311_v34, %v14499_v50 }
 0x79d   : >> { %7770 = vmatpush3.bf16.msra.mxu0 %v5882_v25 }
 0x79e   : >> { %v13302_v62 = vadd.f32 %v6038_v17, %v5954_v44  ;;  %7771 = vmatprep.subr.bf16.mxu0 %v14154_v35  ;;  %v3245_v17 = vmul.f32 1.442695, %v2750_v26  ;;  %v3243_v47 = vmul.f32 1.442695, %v2749_v52 }
 0x79f   : >> { %v8906_v44 = vpop.eup %8905 }
 0x7a0   : >> { %v6066_v9 = vpack.c.bf16 %v13302_v62, %v13300_v19  ;;  %v5790_v13 = vpop.permute.xlu1 %5789  ;;  %v5952_v61 = vmul.f32 %v8906_v44, %v13280_v43  ;;  %8917 = vpow2.f32 %v3245_v17  ;;  %v13355_v43 = vpop.permute.xlu0 %6370 }
 0x7a1   : >> { %v5850_v4 = vmul.f32 %v13082_v16, %v5790_v13  ;;  %v5951_v13 = vmul.f32 %v8904_v21, %v13277_v29  ;;  %8919 = vpow2.f32 %v3243_v47 }
 0x7a2   : >> { %7788 = vmatpush3.bf16.msra.mxu1 %v6066_v9  ;;  %v2430_v9 = vcombine.high %v14554_v28, %v14554_v28  ;;  %v2748_v28 = vmul.f32 %v13311_v34, %v14553_v53 }
 0x7a3   : >> { %v5866_v41 = vadd.f32 %v5850_v4, %v5766_v30  ;;  %7789 = vmatprep.subr.bf16.mxu1 %v14154_v35  ;;  %v8908_v4 = vpop.eup %8907 }
 0x7a4   : >> { %v13353_v29 = vrot.slane %v2430_v9, %v14545_v18  ;;  %v5765_v21 = vmul.f32 %v8908_v4, %v13086_v32  ;;  %v3241_v18 = vmul.f32 1.442695, %v2748_v28  ;;  %v6033_v32 = vmul.f32 %v13123_v39, %v13295_v51 }
 0x7a5   : >> { %v5881_v25 = vpack.c.bf16 %v5867_v5, %v5866_v41  ;;  %v5981_v42 = vpop.permute.xlu1 %5980  ;;  %v5009_v45 = vpop.f32.mrf.mxu1  ;;  %v2745_v4 = vmul.f32 %v13311_v34, %v14496_v60 }
 0x7a6   : >> { %v6498_v46 = vrot.slane %v5009_v45, 1  ;;  %v6035_v27 = vmul.f32 %v13123_v39, %v5981_v42  ;;  %v8910_v59 = vpop.eup %8909  ;;  %v3239_v42 = vmul.f32 1.442695, %v2747_v10  ;;  %v2765_v52 = vmul.f32 %v13353_v29, %v14503_v57 }
 0x7a7   : >> { %7772 = vmatpush3.bf16.msra.mxu0 %v5881_v25  ;;  %v7677_v11 = vpop.f32.mrf.mxu1  ;;  %v2766_v44 = vmul.f32 %v13353_v29, %v14549_v55  ;;  %v6632_v55 = vld [vmem:[#allocation5 + $0x28] sm:$0xff] (%p2281_p1) }
 0x7a8   : >> { %7773 = vmatprep.subr.bf16.mxu0 %v14154_v35  ;;  %v6534_v0 = vsel %vm6533_vm11, %v6532_v58, %v6498_v46  ;;  %v13346_v12 = vadd.f32 %v6035_v27, %v5951_v13  ;;  %v8912_v58 = vpop.eup %8911  ;;  %v5949_v46 = vmul.f32 %v8910_v59, %v5866_v41  ;;  %8921 = vpow2.f32 %v3239_v42 }
 0x7a9   : >> { %v5985_v48 = vpop.permute.xlu1 %5984  ;;  %6543 = vst [vmem:[%s6542_s15] sm:$0xff] %v6534_v0  ;;  %v5012_v38 = vpop.f32.mrf.mxu1  ;;  %v3275_v41 = vmul.f32 1.442695, %v2765_v52  ;;  %8923 = vpow2.f32 %v3241_v18  ;;  %v3235_v18 = vmul.f32 1.442695, %v2745_v4 }
 0x7aa   : >> { %v6036_v49 = vmul.f32 %v13123_v39, %v5985_v48  ;;  %v8914_v17 = vpop.eup %8913  ;;  %v13371_v0 = vpop.permute.xlu0 %6354  ;;  %v5950_v48 = vmul.f32 %v8912_v58, %v5867_v5  ;;  %v5888_v38 = vrot.slane %v14514_v20, 6  ;;  %v13375_v13 = vadd.f32 %v6033_v32, %v5949_v46  ;;  %v14582_v32 = vld [vmem:[#allocation126_spill] sm:$0xff] }
 0x7ab   : >> { %v7678_v30 = vpop.f32.mrf.mxu1  ;;  %v8916_v9 = vpop.eup %8915  ;;  %v6032_v5 = vmul.f32 %v13123_v39, %v13322_v8  ;;  %8925 = vpow2.f32 %v3275_v41 }
 0x7ac   : >> { %v13348_v33 = vadd.f32 %v6036_v49, %v5952_v61  ;;  %v3277_v49 = vmul.f32 1.442695, %v2766_v44 }
 0x7ad   : >> { %v8918_v28 = vpop.eup %8917 }
 0x7ae   : >> { %v6065_v63 = vpack.c.bf16 %v13348_v33, %v13346_v12  ;;  %v5786_v26 = vpop.permute.xlu1 %5785  ;;  %v8920_v8 = vpop.eup %8919  ;;  %8927 = vpow2.f32 %v3277_v49  ;;  %v2764_v49 = vmul.f32 %v13353_v29, %v14553_v53  ;;  %v6633_v53 = vld [vmem:[#allocation5 + $0x68] sm:$0xff] (%p2281_p1) }
 0x7af   : >> { %v5849_v25 = vmul.f32 %v13082_v16, %v5786_v26  ;;  %v2746_v16 = vmul.f32 %v13311_v34, %v14522_v24  ;;  %v5947_v26 = vmul.f32 %v8916_v9, %v13099_v23  ;;  %v6208_v52 = vpop.permute.xlu0 %6207 }
 0x7b0   : >> { %7790 = vmatpush3.bf16.msra.mxu1 %v6065_v63 }
 0x7b1   : >> { %v5865_v45 = vadd.f32 %v5849_v25, %v5765_v21  ;;  %7791 = vmatprep.subr.bf16.mxu1 %v14154_v35  ;;  %v3237_v10 = vmul.f32 1.442695, %v2746_v16  ;;  %v8983_v21 = vld [vmem:[%s10687_s27 + $0x8] sm:$0xff]  ;;  %v14580_v25 = vsub.s32 6, %v14524_v56  ;;  %v6144_v16 = vmul.f32 %v8920_v8, %v14582_v32  ;;  %s9128_s27 = sshll.u32 (%p2281_p1), %s9239_s25, 4  ;;  %s9129_s27 = int_to_ptr.vmem [resolvable:$false] %s9128_s27 }
 0x7b2   : >> { %v14585_v8 = vld [vmem:[#allocation66_spill] sm:$0xff]  ;;  %p9131_p0 = scmp.lt.s32.totalorder (%p2281_p1), %s13623_s7, %s9129_s27 }
 0x7b3   : >> { %v5880_v11 = vpack.c.bf16 %v5865_v45, %v13099_v23  ;;  %v5977_v27 = vpop.permute.xlu1 %5976  ;;  %v5948_v51 = vmul.f32 %v8914_v17, %v5865_v45  ;;  %v13391_v42 = vrot.slane %v8983_v21, %v14580_v25  ;;  %v14581_v23 = vld [vmem:[#allocation98_spill] sm:$0xff]  ;;  %8929 = vpow2.f32 %v3237_v10 }
 0x7b4   : >> { %v6034_v47 = vmul.f32 %v13123_v39, %v5977_v27  ;;  %v14583_v27 = vld [vmem:[#allocation77_spill] sm:$0xff]  ;;  %8931 = vpow2.f32 %v3235_v18 }
 0x7b5   : >> { %7774 = vmatpush3.bf16.msra.mxu0 %v5880_v11  ;;  %v13397_v45 = vadd.f32 %v6032_v5, %v5948_v51  ;;  %v6229_v17 = vmul.f32 %v13391_v42, %v6208_v52  ;;  %v8922_v9 = vpop.eup %8921 }
 0x7b6   : >> { %v13377_v61 = vadd.f32 %v6034_v47, %v5950_v48  ;;  %7799 = vmatprep.subr.bf16.mxu0 %v14154_v35  ;;  %v6071_v48 = vrot.slane %v14583_v27, 6  ;;  %v8924_v10 = vpop.eup %8923  ;;  %v6142_v52 = vmul.f32 %v8922_v9, %v14585_v8  ;;  %v2761_v9 = vmul.f32 %v13353_v29, %v14496_v60  ;;  %v13549_v60 = vld [vmem:[%s13678_s8] ss:$0 sm:$0xff] (%p2281_p1) }
 0x7b7   : >> { %v5965_v30 = vpop.permute.xlu1 %5964 }
 0x7b8   : >> { %v6064_v63 = vpack.c.bf16 %v13377_v61, %v13375_v13  ;;  %v6031_v59 = vmul.f32 %v13123_v39, %v5965_v30  ;;  %7776 = vmatmul.mubr.bf16.vlgmr.msra.gmra.mxu0 %v5888_v38  ;;  %v6145_v39 = vmul.f32 %v8918_v28, %v14581_v23  ;;  %v2763_v38 = vmul.f32 %v13353_v29, %v14499_v50  ;;  %v14584_v30 = vld [vmem:[#allocation33_spill] sm:$0xff]  ;;  %v8926_v25 = vpop.eup %8925  ;;  %v8988_v50 = vld [vmem:[#allocation18 + $0x18] sm:$0xff] (%p2281_p1)  }
 0x7b9   : >> { %7815 = vmatprep.mubr.msk.bf16.mxu0 %vm9229_vm4, %v14154_v35  ;;  %v2743_v4 = vmul.f32 %v13311_v34, %v14584_v30  ;;  %v14586_v23 = vld [vmem:[#allocation149_spill] sm:$0xff] }
 0x7ba   : >> { %v13395_v58 = vadd.f32 %v6031_v59, %v5947_v26  ;;  %7792 = vmatpush3.bf16.msra.mxu1 %v6064_v63  ;;  %v6245_v41 = vadd.f32 %v6229_v17, %v6145_v39  ;;  %v3271_v63 = vmul.f32 1.442695, %v2763_v38  ;;  %v3273_v59 = vmul.f32 1.442695, %v2764_v49 }
 0x7bb   : >> { %7793 = vmatprep.subr.bf16.mxu1 %v14154_v35  ;;  %v6143_v39 = vmul.f32 %v8924_v10, %v14586_v23  ;;  %v14588_v17 = vsub.s32 7, %v14524_v56 }
 0x7bc   : >> { %v6063_v46 = vpack.c.bf16 %v13397_v45, %v13395_v58  ;;  %v6204_v44 = vpop.permute.xlu1 %6203  ;;  %8933 = vpow2.f32 %v3271_v63  ;;  %v6192_v63 = vpop.permute.xlu0 %6191 }
 0x7bd   : >> { %v6228_v11 = vmul.f32 %v13391_v42, %v6204_v44  ;;  %v13425_v32 = vrot.slane %v8983_v21, %v14588_v17  ;;  %8935 = vpow2.f32 %v3273_v59 }
 0x7be   : >> { %7794 = vmatpush3.bf16.msra.mxu1 %v6063_v46  ;;  %v14587_v46 = vld [vmem:[#allocation34_spill] sm:$0xff] }
 0x7bf   : >> { %v6244_v47 = vadd.f32 %v6228_v11, %v6144_v16  ;;  %7819 = vmatprep.subr.bf16.mxu1 %v14154_v35  ;;  %v2744_v44 = vmul.f32 %v13311_v34, %v14587_v46  ;;  %v8928_v16 = vpop.eup %8927  ;;  %v3231_v11 = vmul.f32 1.442695, %v2743_v4  ;;  %v6411_v8 = vmul.f32 %v13425_v32, %v13331_v22 }
 0x7c0   : >> { %v6196_v51 = vpop.permute.xlu1 %6195  ;;  %v8930_v49 = vpop.eup %8929  ;;  %v6328_v56 = vmul.f32 %v8928_v16, %v6245_v41  ;;  %v2762_v4 = vmul.f32 %v13353_v29, %v14522_v24  ;;  %v6225_v16 = vmul.f32 %v13391_v42, %v6192_v63 }
 0x7c1   : >> { %v6253_v5 = vpack.c.bf16 %v6245_v41, %v6244_v47  ;;  %7796 = vmatmul.mubr.bf16.vlgmr.msra.gmra.mxu1 %v6071_v48  ;;  %v6226_v28 = vmul.f32 %v13391_v42, %v6196_v51  ;;  %v6327_v51 = vmul.f32 %v8926_v25, %v6244_v47  ;;  %8937 = vpow2.f32 %v3231_v11  ;;  %v8932_v47 = vpop.eup %8931 }
 0x7c2   : >> { %7835 = vmatprep.mubr.msk.bf16.mxu1 %vm9229_vm4, %v14154_v35  ;;  %v6141_v22 = vmul.f32 %v8930_v49, %v13226_v54  ;;  %v2742_v41 = vmul.f32 %v13311_v34, %v14537_v14  ;;  %v6140_v11 = vmul.f32 %v8932_v47, %v13224_v1 }
 0x7c3   : >> { %7800 = vmatpush3.bf16.msra.mxu0 %v6253_v5  ;;  %v6242_v48 = vadd.f32 %v6226_v28, %v6142_v52  ;;  %v6427_v59 = vadd.f32 %v6411_v8, %v6327_v51  ;;  %v3267_v52 = vmul.f32 1.442695, %v2761_v9  ;;  %v2741_v9 = vmul.f32 %v13311_v34, %v14564_v2 }
 0x7c4   : >> { %v6200_v26 = vpop.permute.xlu1 %6199  ;;  %7801 = vmatprep.subr.bf16.mxu0 %v14154_v35  ;;  %v3229_v49 = vmul.f32 1.442695, %v2742_v41  ;;  %v2760_v41 = vmul.f32 %v13353_v29, %v14587_v46 }
 0x7c5   : >> { %v6227_v18 = vmul.f32 %v13391_v42, %v6200_v26  ;;  %v3233_v26 = vmul.f32 1.442695, %v2744_v44  ;;  %v3269_v44 = vmul.f32 1.442695, %v2762_v4  ;;  %v3227_v1 = vmul.f32 1.442695, %v2741_v9 }
 0x7c7   : >> { %v6243_v38 = vadd.f32 %v6227_v18, %v6143_v39  ;;  %8939 = vpow2.f32 %v3233_v26 }
 0x7c8   : >> { %8941 = vpow2.f32 %v3267_v52 }
 0x7c9   : >> { %v6252_v5 = vpack.c.bf16 %v6243_v38, %v6242_v48  ;;  %v6391_v10 = vpop.permute.xlu1 %6390  ;;  %8943 = vpow2.f32 %v3269_v44 }
 0x7ca   : >> { %v6412_v21 = vmul.f32 %v13425_v32, %v6391_v10  ;;  %v13434_v28 = vpop.f32.mrf.mxu0  ;;  %v6241_v10 = vadd.f32 %v6225_v16, %v6141_v22  ;;  %8945 = vpow2.f32 %v3229_v49 }
 0x7cb   : >> { %7802 = vmatpush3.bf16.msra.mxu0 %v6252_v5  ;;  %8947 = vpow2.f32 %v3227_v1 }
 0x7cc   : >> { %v6428_v25 = vadd.f32 %v6412_v21, %v6328_v56  ;;  %7803 = vmatprep.subr.bf16.mxu0 %v14154_v35  ;;  %v7697_v23 = vpop.f32.mrf.mxu0  ;;  %v2757_v56 = vmul.f32 %v13353_v29, %v14564_v2  ;;  %v8934_v21 = vpop.eup %8933 }
 0x7cd   : >> { %v8936_v4 = vpop.eup %8935  ;;  %v6325_v23 = vmul.f32 %v8934_v21, %v6242_v48  ;;  %v3265_v48 = vmul.f32 1.442695, %v2760_v41 }
 0x7ce   : >> { %v6436_v39 = vpack.c.bf16 %v6428_v25, %v6427_v59  ;;  %v6188_v18 = vpop.permute.xlu1 %6187  ;;  %v5195_v17 = vpop.f32.mrf.mxu0  ;;  %v3259_v59 = vmul.f32 1.442695, %v2757_v56  ;;  %v2759_v25 = vmul.f32 %v13353_v29, %v14584_v30  ;;  %v6326_v22 = vmul.f32 %v8936_v4, %v6243_v38 }
 0x7cf   : >> { %v6224_v51 = vmul.f32 %v13391_v42, %v6188_v18  ;;  %v8938_v52 = vpop.eup %8937  ;;  %v6180_v18 = vpop.permute.xlu0 %6179 }
 0x7d0   : >> { %7820 = vmatpush3.bf16.msra.mxu1 %v6436_v39  ;;  %v7698_v54 = vpop.f32.mrf.mxu0  ;;  %v6138_v16 = vmul.f32 %v8938_v52, %v13259_v31  ;;  %8949 = vpow2.f32 %v3259_v59 }
 0x7d1   : >> { %v6240_v5 = vadd.f32 %v6224_v51, %v6140_v11  ;;  %7821 = vmatprep.subr.bf16.mxu1 %v14154_v35  ;;  %v2739_v11 = vmul.f32 %v13311_v34, %v14566_v40  ;;  %v3263_v51 = vmul.f32 1.442695, %v2759_v25  ;;  %v6222_v54 = vmul.f32 %v13391_v42, %v6180_v18 }
 0x7d2   : >> { %v2738_v18 = vmul.f32 %v13311_v34, %v14572_v37 }
 0x7d3   : >> { %v6251_v26 = vpack.c.bf16 %v6241_v10, %v6240_v5  ;;  %v6379_v8 = vpop.permute.xlu1 %6378  ;;  %v6238_v56 = vadd.f32 %v6222_v54, %v6138_v16  ;;  %8951 = vpow2.f32 %v3263_v51 }
 0x7d4   : >> { %v6409_v47 = vmul.f32 %v13425_v32, %v6379_v8  ;;  %v8940_v39 = vpop.eup %8939  ;;  %v3223_v8 = vmul.f32 1.442695, %v2739_v11  ;;  %8953 = vpow2.f32 %v3265_v48  ;;  %v2737_v11 = vmul.f32 %v13311_v34, %v14574_v6 }
 0x7d5   : >> { %7804 = vmatpush3.bf16.msra.mxu0 %v6251_v26  ;;  %v8942_v38 = vpop.eup %8941  ;;  %v6139_v49 = vmul.f32 %v8940_v39, %v13261_v36  ;;  %v2740_v26 = vmul.f32 %v13311_v34, %v14570_v15  ;;  %v6407_v36 = vmul.f32 %v13425_v32, %v13355_v43  ;;  %v6403_v48 = vmul.f32 %v13425_v32, %v13371_v0 }
 0x7d6   : >> { %7805 = vmatprep.subr.bf16.mxu0 %v14154_v35  ;;  %v6425_v44 = vadd.f32 %v6409_v47, %v6325_v23  ;;  %v8944_v31 = vpop.eup %8943  ;;  %v6323_v21 = vmul.f32 %v8942_v38, %v6240_v5  ;;  %v2758_v23 = vmul.f32 %v13353_v29, %v14537_v14  ;;  %8955 = vpow2.f32 %v3223_v8 }
 0x7d7   : >> { %v6383_v63 = vpop.permute.xlu1 %6382  ;;  %v8946_v59 = vpop.eup %8945  ;;  %v6324_v25 = vmul.f32 %v8944_v31, %v6241_v10 }
 0x7d8   : >> { %v6410_v2 = vmul.f32 %v13425_v32, %v6383_v63  ;;  %v3225_v63 = vmul.f32 1.442695, %v2740_v26  ;;  %v6423_v41 = vadd.f32 %v6407_v36, %v6323_v21  ;;  %v6137_v39 = vmul.f32 %v8946_v59, %v13302_v62 }
 0x7d9   : >> { %v2755_v59 = vmul.f32 %v13353_v29, %v14566_v40 }
 0x7da   : >> { %v6426_v17 = vadd.f32 %v6410_v2, %v6326_v22  ;;  %v8948_v22 = vpop.eup %8947  ;;  %v6176_v2 = vpop.permute.xlu0 %6175  ;;  %8957 = vpow2.f32 %v3225_v63 }
 0x7db   : >> { %v6136_v14 = vmul.f32 %v8948_v22, %v13300_v19  ;;  %v3219_v19 = vmul.f32 1.442695, %v2737_v11  ;;  %v3255_v40 = vmul.f32 1.442695, %v2755_v59 }
 0x7dc   : >> { %v6435_v30 = vpack.c.bf16 %v6426_v17, %v6425_v44  ;;  %v6184_v9 = vpop.permute.xlu1 %6183  ;;  %v3261_v44 = vmul.f32 1.442695, %v2758_v23  ;;  %v6221_v17 = vmul.f32 %v13391_v42, %v6176_v2  ;;  %v2756_v2 = vmul.f32 %v13353_v29, %v14570_v15 }
 0x7dd   : >> { %v6223_v46 = vmul.f32 %v13391_v42, %v6184_v9  ;;  %v8950_v51 = vpop.eup %8949 }
 0x7de   : >> { %7822 = vmatpush3.bf16.msra.mxu1 %v6435_v30  ;;  %v3221_v30 = vmul.f32 1.442695, %v2738_v18  ;;  %v6237_v9 = vadd.f32 %v6221_v17, %v6137_v39  ;;  %8959 = vpow2.f32 %v3261_v44  ;;  %v6164_v39 = vpop.permute.xlu0 %6163 }
 0x7df   : >> { %v6239_v1 = vadd.f32 %v6223_v46, %v6139_v49  ;;  %7823 = vmatprep.subr.bf16.mxu1 %v14154_v35 }
 0x7e0   : >> { %v8952_v26 = vpop.eup %8951  ;;  %8961 = vpow2.f32 %v3221_v30 }
 0x7e1   : >> { %v6250_v4 = vpack.c.bf16 %v6239_v1, %v6238_v56  ;;  %v6375_v47 = vpop.permute.xlu1 %6374  ;;  %v8954_v8 = vpop.eup %8953  ;;  %8963 = vpow2.f32 %v3219_v19 }
 0x7e2   : >> { %v6408_v52 = vmul.f32 %v13425_v32, %v6375_v47  ;;  %v6322_v23 = vmul.f32 %v8954_v8, %v6239_v1  ;;  %v6218_v1 = vmul.f32 %v13391_v42, %v6164_v39  ;;  %8965 = vpow2.f32 %v3255_v40 }
 0x7e3   : >> { %7806 = vmatpush3.bf16.msra.mxu0 %v6250_v4 }
 0x7e4   : >> { %v6424_v5 = vadd.f32 %v6408_v52, %v6324_v25  ;;  %7807 = vmatprep.subr.bf16.mxu0 %v14154_v35  ;;  %v8956_v25 = vpop.eup %8955  ;;  %v6321_v52 = vmul.f32 %v8952_v26, %v6238_v56  ;;  %v3257_v56 = vmul.f32 1.442695, %v2756_v2  ;;  %v6160_v26 = vpop.permute.xlu0 %6159 }
 0x7e5   : >> { %v6217_v59 = vmul.f32 %v13391_v42, %v6160_v26 }
 0x7e6   : >> { %v6434_v43 = vpack.c.bf16 %v6424_v5, %v6423_v41  ;;  %v6172_v10 = vpop.permute.xlu1 %6171  ;;  %8967 = vpow2.f32 %v3257_v56 }
 0x7e7   : >> { %v6220_v16 = vmul.f32 %v13391_v42, %v6172_v10  ;;  %v8958_v5 = vpop.eup %8957  ;;  %v2735_v10 = vmul.f32 %v13311_v34, %v14507_v3 }
 0x7e8   : >> { %7824 = vmatpush3.bf16.msra.mxu1 %v6434_v43  ;;  %v6134_v43 = vmul.f32 %v8956_v25, %v13346_v12 }
 0x7e9   : >> { %v6236_v62 = vadd.f32 %v6220_v16, %v6136_v14  ;;  %7825 = vmatprep.subr.bf16.mxu1 %v14154_v35  ;;  %v6135_v14 = vmul.f32 %v8958_v5, %v13348_v33  ;;  %v2736_v16 = vmul.f32 %v13311_v34, %v14576_v7  ;;  %v2754_v34 = vmul.f32 %v13353_v29, %v14572_v37 }
 0x7ea   : >> { %v6234_v12 = vadd.f32 %v6218_v1, %v6134_v43  ;;  %v2751_v37 = vmul.f32 %v13353_v29, %v14507_v3 }
 0x7eb   : >> { %v6249_v38 = vpack.c.bf16 %v6237_v9, %v6236_v62  ;;  %v6319_v54 = vmul.f32 %v8950_v51, %v6236_v62  ;;  %v6363_v49 = vpop.permute.xlu1 %6362  ;;  %v5375_v46 = vpop.f32.mrf.mxu1  ;;  %v3215_v51 = vmul.f32 1.442695, %v2735_v10  ;;  %v2753_v62 = vmul.f32 %v13353_v29, %v14574_v6 }
 0x7ec   : >> { %v6501_v31 = vrot.slane %v5375_v46, 7  ;;  %v6405_v47 = vmul.f32 %v13425_v32, %v6363_v49  ;;  %v8960_v11 = vpop.eup %8959  ;;  %v3217_v33 = vmul.f32 1.442695, %v2736_v16  ;;  %v2752_v6 = vmul.f32 %v13353_v29, %v14576_v7 }
 0x7ed   : >> { %7808 = vmatpush3.bf16.msra.mxu0 %v6249_v38  ;;  %v13481_v21 = vadd.f32 %v6403_v48, %v6319_v54  ;;  %v7717_v4 = vpop.f32.mrf.mxu1  ;;  %v8962_v54 = vpop.eup %8961  ;;  %v6320_v49 = vmul.f32 %v8960_v11, %v6237_v9  ;;  %8969 = vpow2.f32 %v3215_v51  ;;  %v3251_v8 = vmul.f32 1.442695, %v2753_v62 }
 0x7ee   : >> { %7809 = vmatprep.subr.bf16.mxu0 %v14154_v35  ;;  %v13487_v0 = vsel %vm6521_vm5, %v13434_v28, %v6501_v31  ;;  %v6421_v18 = vadd.f32 %v6405_v47, %v6321_v52  ;;  %v8964_v46 = vpop.eup %8963  ;;  %v6133_v4 = vmul.f32 %v8962_v54, %v13377_v61  ;;  %8971 = vpow2.f32 %v3217_v33 }
 0x7ef   : >> { %v6367_v63 = vpop.permute.xlu1 %6366  ;;  %v5378_v36 = vpop.f32.mrf.mxu1  ;;  %8973 = vpow2.f32 %v3251_v8  ;;  %v3249_v52 = vmul.f32 1.442695, %v2752_v6  ;;  %v3247_v61 = vmul.f32 1.442695, %v2751_v37 }
 0x7f0   : >> { %v6406_v22 = vmul.f32 %v13425_v32, %v6367_v63  ;;  %v3253_v63 = vmul.f32 1.442695, %v2754_v34  ;;  %v6132_v36 = vmul.f32 %v8964_v46, %v13375_v13  ;;  %v8966_v2 = vpop.eup %8965  ;;  %v6148_v13 = vpop.permute.xlu0 %6147 }
 0x7f1   : >> { %v7718_v41 = vpop.f32.mrf.mxu1  ;;  %v6317_v39 = vmul.f32 %v8966_v2, %v6234_v12 }
 0x7f2   : >> { %v6422_v28 = vadd.f32 %v6406_v22, %v6322_v23  ;;  %v6233_v23 = vadd.f32 %v6217_v59, %v6133_v4  ;;  %8975 = vpow2.f32 %v3253_v63 }
 0x7f3   : >> { %8977 = vpow2.f32 %v3249_v52  ;;  %v8968_v3 = vpop.eup %8967 }
 0x7f4   : >> { %v6433_v44 = vpack.c.bf16 %v6422_v28, %v6421_v18  ;;  %v6168_v17 = vpop.permute.xlu1 %6167  ;;  %8979 = vpow2.f32 %v3247_v61 }
 0x7f5   : >> { %v6219_v15 = vmul.f32 %v13391_v42, %v6168_v17 }
 0x7f6   : >> { %7826 = vmatpush3.bf16.msra.mxu1 %v6433_v44 }
 0x7f7   : >> { %v6235_v30 = vadd.f32 %v6219_v15, %v6135_v14  ;;  %7827 = vmatprep.subr.bf16.mxu1 %v14154_v35  ;;  %v6214_v14 = vmul.f32 %v13391_v42, %v6148_v13  ;;  %v6339_v15 = vpop.permute.xlu0 %6338 }
 0x7f8   : >> { %v6399_v33 = vmul.f32 %v13425_v32, %v6339_v15 }
 0x7f9   : >> { %v6248_v48 = vpack.c.bf16 %v6235_v30, %v6234_v12  ;;  %v6359_v38 = vpop.permute.xlu1 %6358  ;;  %v6318_v18 = vmul.f32 %v8968_v3, %v6235_v30 }
 0x7fa   : >> { %v6404_v19 = vmul.f32 %v13425_v32, %v6359_v38  ;;  %v8970_v5 = vpop.eup %8969 }
 0x7fb   : >> { %7810 = vmatpush3.bf16.msra.mxu0 %v6248_v48  ;;  %v8972_v43 = vpop.eup %8971  ;;  %v6130_v44 = vmul.f32 %v8970_v5, %v13395_v58  ;;  %v6335_v34 = vpop.permute.xlu0 %6334 }
 0x7fc   : >> { %v6420_v31 = vadd.f32 %v6404_v19, %v6320_v49  ;;  %7811 = vmatprep.subr.bf16.mxu0 %v14154_v35  ;;  %v8974_v1 = vpop.eup %8973  ;;  %v6131_v16 = vmul.f32 %v8972_v43, %v13397_v45  ;;  %v6254_v19 = vrot.slane %v14514_v20, 7  ;;  %v6398_v8 = vmul.f32 %v13425_v32, %v6335_v34  ;;  %v6585_v34 = vld [vmem:[#allocation4 + $0x40] sm:$0xff] (%p2281_p1) }
 0x7fd   : >> { %v6230_v12 = vadd.f32 %v6214_v14, %v6130_v44 }
 0x7fe   : >> { %v6432_v9 = vpack.c.bf16 %v6420_v31, %v13481_v21  ;;  %v6156_v47 = vpop.permute.xlu1 %6155 }
 0x7ff   : >> { %v6216_v25 = vmul.f32 %v13391_v42, %v6156_v47  ;;  %v8976_v51 = vpop.eup %8975 }
 0x800   : >> { %7828 = vmatpush3.bf16.msra.mxu1 %v6432_v9  ;;  %v8978_v48 = vpop.eup %8977  ;;  %v6316_v54 = vmul.f32 %v8976_v51, %v6233_v23 }
 0x801   : >> { %v6232_v7 = vadd.f32 %v6216_v25, %v6132_v36  ;;  %7829 = vmatprep.subr.bf16.mxu1 %v14154_v35  ;;  %v8980_v45 = vpop.eup %8979 }
 0x802   : >> { %v6313_v4 = vmul.f32 %v8980_v45, %v6230_v12 }
 0x803   : >> { %v6247_v21 = vpack.c.bf16 %v6233_v23, %v6232_v7  ;;  %v6347_v22 = vpop.permute.xlu1 %6346  ;;  %v6315_v62 = vmul.f32 %v8974_v1, %v6232_v7  ;;  %v6437_v7 = vrot.slane %v14583_v27, 7 }
 0x804   : >> { %v6401_v29 = vmul.f32 %v13425_v32, %v6347_v22 }
 0x805   : >> { %7812 = vmatpush3.bf16.msra.mxu0 %v6247_v21  ;;  %v6415_v46 = vadd.f32 %v6399_v33, %v6315_v62  ;;  %v8984_v62 = vld [vmem:[#allocation18 + $0x38] sm:$0xff] (%p2281_p1)   ;;  %v6577_v33 = vld [vmem:[#allocation4 + $0x30] sm:$0xff] (%p2281_p1) }
 0x806   : >> { %7813 = vmatprep.subr.bf16.mxu0 %v14154_v35  ;;  %v6417_v10 = vadd.f32 %v6401_v29, %v6317_v39  ;;  %v6600_v57 = vmul.f32 (%p2281_p1), %v13549_v60, %v6577_v33 }
 0x807   : >> { %v6351_v41 = vpop.permute.xlu1 %6350 }
 0x808   : >> { %v6402_v28 = vmul.f32 %v13425_v32, %v6351_v41 }
 0x80a   : >> { %v6418_v40 = vadd.f32 %v6402_v28, %v6318_v18 }
 0x80c   : >> { %v6431_v17 = vpack.c.bf16 %v6418_v40, %v6417_v10  ;;  %v6152_v56 = vpop.permute.xlu1 %6151 }
 0x80d   : >> { %v6215_v11 = vmul.f32 %v13391_v42, %v6152_v56 }
 0x80e   : >> { %7830 = vmatpush3.bf16.msra.mxu1 %v6431_v17 }
 0x80f   : >> { %v6231_v30 = vadd.f32 %v6215_v11, %v6131_v16  ;;  %7831 = vmatprep.subr.bf16.mxu1 %v14154_v35 }
 0x811   : >> { %v6246_v38 = vpack.c.bf16 %v6231_v30, %v6230_v12  ;;  %v6343_v58 = vpop.permute.xlu1 %6342  ;;  %v6314_v42 = vmul.f32 %v8978_v48, %v6231_v30  ;;  %v8985_v48 = vld [vmem:[#allocation18 + $0x30] sm:$0xff] (%p2281_p1)  }
 0x812   : >> { %v6400_v49 = vmul.f32 %v13425_v32, %v6343_v58  ;;  %v8987_v58 = vld [vmem:[#allocation18 + $0x20] sm:$0xff] (%p2281_p1)  }
 0x813   : >> { %7814 = vmatpush3.bf16.msra.mxu0 %v6246_v38  ;;  %v6414_v59 = vadd.f32 %v6398_v8, %v6314_v42  ;;  %v8986_v38 = vld [vmem:[#allocation18 + $0x28] sm:$0xff] (%p2281_p1)   ;;  %v6586_v42 = vld [vmem:[#allocation4 + $0x20] sm:$0xff] (%p2281_p1) }
 0x814   : >> { %v6416_v26 = vadd.f32 %v6400_v49, %v6316_v54  ;;  %7839 = vmatprep.subr.bf16.mxu0 (%p2281_p1), %v8984_v62  ;;  %v6578_v54 = vld [vmem:[#allocation4] sm:$0xff] (%p2281_p1) }
 0x815   : >> { %v6331_v31 = vpop.permute.xlu1 %6330  ;;  %v6601_v24 = vmul.f32 (%p2281_p1), %v13549_v60, %v6578_v54 }
 0x816   : >> { %v6430_v6 = vpack.c.bf16 %v6416_v26, %v6415_v46  ;;  %v6397_v9 = vmul.f32 %v13425_v32, %v6331_v31  ;;  %7816 = vmatmul.mubr.bf16.vlgmr.msra.gmra.mxu0 %v6254_v19  ;;  %v5558_v47 = vpop.f32.mrf.mxu0  ;;  %v6545_v46 = vld [vmem:[%s9463_s3] sm:$0xff] (%p2281_p1)  ;;  %v6546_v26 = vld [vmem:[%s9463_s3 + $0x8] sm:$0xff] (%p2281_p1) }
 0x817   : >> { %v6504_v63 = vrot.slane %v5558_v47, 6  ;;  %7840 = vmatpush3.bf16.msra.mxu0 (%p2281_p1), %v8984_v62  ;;  %v6640_v47 = vld [vmem:[#allocation5 + $0x20] sm:$0xff] (%p2281_p1) }
 0x818   : >> { %v6413_v37 = vadd.f32 %v6397_v9, %v6313_v4  ;;  %7832 = vmatpush3.bf16.msra.mxu1 %v6430_v6  ;;  %v7737_v20 = vpop.f32.mrf.mxu0  ;;  %7841 = vmatprep.subr.bf16.mxu0 (%p2281_p1), %v8985_v48  ;;  %v6608_v4 = vmul.f32 (%p2281_p1), %v13549_v60, %v6585_v34  ;;  %v6609_v9 = vmul.f32 (%p2281_p1), %v13549_v60, %v6586_v42  ;;  %v6637_v34 = vld [vmem:[#allocation5 + $0x30] sm:$0xff] (%p2281_p1) }
 0x819   : >> { %7833 = vmatprep.subr.bf16.mxu1 %v14154_v35  ;;  %v6536_v36 = vsel %vm6523_vm6, %v13487_v0, %v6504_v63  ;;  %v6641_v63 = vld [vmem:[#allocation5 + $0x78] sm:$0xff] (%p2281_p1) }
 0x81a   : >> { %v6429_v25 = vpack.c.bf16 %v6414_v59, %v6413_v37  ;;  %v5561_v52 = vpop.f32.mrf.mxu0 }
 0x81b   : > { %7842 = vmatpush3.bf16.msra.mxu0 (%p2281_p1), %v8985_v48  ;;  %v6579_v52 = vld [vmem:[#allocation4 + $0x58] sm:$0xff] (%p2281_p1) }
 0x81c   : >> { %7834 = vmatpush3.bf16.msra.mxu1 %v6429_v25  ;;  %v7738_v23 = vpop.f32.mrf.mxu0  ;;  %7843 = vmatprep.subr.bf16.mxu0 (%p2281_p1), %v8986_v38 }
 0x81d   : > { %7871 = vmatprep.subr.bf16.mxu1 (%p2281_p1), %v8984_v62  ;;  %v8989_v23 = vld [vmem:[#allocation18 + $0x10] sm:$0xff] (%p2281_p1)  }
 0x81f   : >> { %7836 = vmatmul.mubr.bf16.vlgmr.msra.gmra.mxu1 %v6437_v7  ;;  %7844 = vmatpush3.bf16.msra.mxu0 (%p2281_p1), %v8986_v38  ;;  %v6580_v7 = vld [vmem:[#allocation4 + $0x18] sm:$0xff] (%p2281_p1) }
 0x820   : > { %7879 = vmatpush3.bf16.msra.mxu1 (%p2281_p1), %v8984_v62  ;;  %7845 = vmatprep.subr.bf16.mxu0 (%p2281_p1), %v8987_v58  ;;  %v6581_v62 = vld [vmem:[#allocation4 + $0x50] sm:$0xff] (%p2281_p1) }
 0x821   : > { %7872 = vmatprep.subr.bf16.mxu1 (%p2281_p1), %v8985_v48 }
 0x823   : >> { %v5741_v32 = vpop.f32.mrf.mxu1  ;;  %7846 = vmatpush3.bf16.msra.mxu0 (%p2281_p1), %v8987_v58 }
 0x824   : >> { %v6507_v61 = vrot.slane %v5741_v32, 5  ;;  %7880 = vmatpush3.bf16.msra.mxu1 (%p2281_p1), %v8985_v48  ;;  %7847 = vmatprep.subr.bf16.mxu0 (%p2281_p1), %v8988_v50  ;;  %v6553_v32 = vld [vmem:[%s9463_s3 + $0x40] sm:$0xff] (%p2281_p1)  ;;  %v6582_v48 = vld [vmem:[#allocation4 + $0x68] sm:$0xff] (%p2281_p1) }
 0x825   : >> { %v7757_v21 = vpop.f32.mrf.mxu1  ;;  %7873 = vmatprep.subr.bf16.mxu1 (%p2281_p1), %v8986_v38 }
 0x826   : >> { %v6537_v22 = vsel %vm6525_vm7, %v6536_v36, %v6507_v61  ;;  %v6554_v61 = vld [vmem:[%s9463_s3 + $0x48] sm:$0xff] (%p2281_p1) }
 0x827   : >> { %v5744_v2 = vpop.f32.mrf.mxu1  ;;  %7848 = vmatpush3.bf16.msra.mxu0 (%p2281_p1), %v8988_v50 }
 0x828   : > { %7881 = vmatpush3.bf16.msra.mxu1 (%p2281_p1), %v8986_v38  ;;  %v6603_v2 = vmul.f32 (%p2281_p1), %v13549_v60, %v6580_v7  ;;  %7849 = vmatprep.subr.bf16.mxu0 (%p2281_p1), %v8989_v23  ;;  %v6555_v38 = vld [vmem:[%s9463_s3 + $0x50] sm:$0xff] (%p2281_p1)  ;;  %v6583_v7 = vld [vmem:[#allocation4 + $0x8] sm:$0xff] (%p2281_p1) }
 0x829   : >> { %v7758_v3 = vpop.f32.mrf.mxu1  ;;  %7874 = vmatprep.subr.bf16.mxu1 (%p2281_p1), %v8987_v58 }
 0x82b   : > { %7850 = vmatpush3.bf16.msra.mxu0 (%p2281_p1), %v8989_v23 }
 0x82c   : > { %7882 = vmatpush3.bf16.msra.mxu1 (%p2281_p1), %v8987_v58 }
 0x82d   : > { %7875 = vmatprep.subr.bf16.mxu1 (%p2281_p1), %v8988_v50 }
 0x830   : > { %7883 = vmatpush3.bf16.msra.mxu1 (%p2281_p1), %v8988_v50  ;;  %v13570_v50 = vld [vmem:[#allocation18] sm:$0xff] (%p2281_p1)  }
 0x831   : > { %7876 = vmatprep.subr.bf16.mxu1 (%p2281_p1), %v8989_v23 }
 0x834   : > { %7884 = vmatpush3.bf16.msra.mxu1 (%p2281_p1), %v8989_v23 }
 0x878   : >> { %v5924_v29 = vpop.f32.mrf.mxu0 }
 0x879   : >> { %v6510_v13 = vrot.slane %v5924_v29, 4 }
 0x87a   : >> { %v7777_v35 = vpop.f32.mrf.mxu0 }
 0x87b   : >> { %v6538_v41 = vsel %vm6527_vm8, %v6537_v22, %v6510_v13  ;;  %v6602_v22 = vmul.f32 (%p2281_p1), %v13549_v60, %v6579_v52  ;;  %v6547_v35 = vld [vmem:[%s9463_s3 + $0x10] sm:$0xff] (%p2281_p1)  ;;  %v6644_v52 = vld [vmem:[#allocation5] sm:$0xff] (%p2281_p1) }
 0x87c   : >> { %v5927_v0 = vpop.f32.mrf.mxu0 }
 0x87d   : > { %v6635_v0 = vld [vmem:[#allocation5 + $0x40] sm:$0xff] (%p2281_p1) }
 0x87e   : >> { %v7778_v5 = vpop.f32.mrf.mxu0 }
 0x87f   : > { %v6587_v5 = vld [vmem:[#allocation4 + $0x10] sm:$0xff] (%p2281_p1) }
 0x881   : >> { %v6107_v39 = vpop.f32.mrf.mxu1 }
 0x882   : >> { %v6513_v27 = vrot.slane %v6107_v39, 3  ;;  %v13562_v39 = vld [vmem:[#allocation18 + $0x8] sm:$0xff] (%p2281_p1)  }
 0x883   : >> { %v7797_v18 = vpop.f32.mrf.mxu1  ;;  %7851 = vmatprep.subr.bf16.mxu0 (%p2281_p1), %v13562_v39  ;;  %7877 = vmatprep.subr.bf16.mxu1 (%p2281_p1), %v13562_v39 }
 0x884   : >> { %v6539_v28 = vsel %vm6529_vm9, %v6538_v41, %v6513_v27  ;;  %v6634_v41 = vld [vmem:[#allocation5 + $0x10] sm:$0xff] (%p2281_p1)  ;;  %7852 = vmatpush3.bf16.msra.mxu0 (%p2281_p1), %v13562_v39  ;;  %7885 = vmatpush3.bf16.msra.mxu1 (%p2281_p1), %v13562_v39  ;;  %v6592_v39 = vld [vmem:[#allocation4 + $0x28] sm:$0xff] (%p2281_p1) }
 0x885   : >> { %v6110_v43 = vpop.f32.mrf.mxu1  ;;  %7853 = vmatprep.subr.bf16.mxu0 (%p2281_p1), %v13570_v50  ;;  %7878 = vmatprep.subr.bf16.mxu1 (%p2281_p1), %v13570_v50 }
 0x887   : >> { %v7798_v10 = vpop.f32.mrf.mxu1 }
 0x888   : > { %7854 = vmatpush3.bf16.msra.mxu0 (%p2281_p1), %v13570_v50  ;;  %7886 = vmatpush3.bf16.msra.mxu1 (%p2281_p1), %v13570_v50 }
 0x8d6   : >> { %v6290_v40 = vpop.f32.mrf.mxu0 }
 0x8d7   : >> { %v6516_v1 = vrot.slane %v6290_v40, 2  ;;  %v6588_v40 = vld [vmem:[#allocation4 + $0x38] sm:$0xff] (%p2281_p1) }
 0x8d8   : >> { %v7817_v44 = vpop.f32.mrf.mxu0 }
 0x8d9   : >> { %v6540_v16 = vsel %vm6531_vm10, %v6539_v28, %v6516_v1  ;;  %v6610_v44 = vmul.f32 (%p2281_p1), %v13549_v60, %v6587_v5  ;;  %v6548_v1 = vld [vmem:[%s9463_s3 + $0x18] sm:$0xff] (%p2281_p1)  ;;  %v6638_v5 = vld [vmem:[#allocation5 + $0x70] sm:$0xff] (%p2281_p1) }
 0x8da   : >> { %v6293_v17 = vpop.f32.mrf.mxu0 }
 0x8dc   : >> { %v7818_v56 = vpop.f32.mrf.mxu0 }
 0x8df   : >> { %v6473_v14 = vpop.f32.mrf.mxu1 }
 0x8e0   : >> { %v6519_v15 = vrot.slane %v6473_v14, 1  ;;  %v6611_v14 = vmul.f32 (%p2281_p1), %v13549_v60, %v6588_v40 }
 0x8e1   : >> { %v7837_v11 = vpop.f32.mrf.mxu1  ;;  %2283 = sbr.rel (!%p2281_p1) target bundleno = 1117 (0x45d), region = 152 }
 0x8e2   : >> { %v6541_v51 = vsel %vm6533_vm11, %v6540_v16, %v6519_v15  ;;  %v6642_v15 = vld [vmem:[#allocation5 + $0x18] sm:$0xff] (%p2281_p1) }
 0x8e3   : >> { %6544 = vst [vmem:[%s6542_s15 + $0x8] sm:$0xff] %v6541_v51  ;;  %v6476_v12 = vpop.f32.mrf.mxu1  ;;  %v6643_v16 = vld [vmem:[#allocation5 + $0x58] sm:$0xff] (%p2281_p1)  ;;  %s9130_s15 = scalar_lea.vmem (%p2281_p1), %s9129_s27, 4096 }
 0x8e4   : > { %p9132_p10 = scmp.lt.s32.totalorder (%p2281_p1), %s9130_s15, %s9124_s23 }
 0x8e5   : >> { %v7838_v30 = vpop.f32.mrf.mxu1 }
 0x8e6   : > { %p9133_p3 = por %p9132_p10, %p9131_p0 }
 0x8e8   : > { %p9134_p6 = pnand %p9133_p3, %p9127_p9 }
 0x8ea   : > { %v6561_v49 = vld [vmem:[#allocation6] sm:$0xff]  ;;  %v6562_v19 = vld [vmem:[#allocation6 + $0x8] sm:$0xff]  ;;  %v6563_v37 = vld [vmem:[#allocation6 + $0x10] sm:$0xff] }
 0x8eb   : > { %v6569_v45 = vld [vmem:[#allocation6 + $0x40] sm:$0xff]  ;;  %v6616_v31 = vadd.f32 %v6600_v57, %v6561_v49  ;;  %v6617_v8 = vadd.f32 %v6601_v24, %v6562_v19  ;;  %v6570_v6 = vld [vmem:[#allocation6 + $0x48] sm:$0xff]  ;;  %v6564_v25 = vld [vmem:[#allocation6 + $0x18] sm:$0xff]  ;;  %v6618_v18 = vadd.f32 %v6602_v22, %v6563_v37  ;;  %v6604_v49 = vmul.f32 %v13549_v60, %v6581_v62 }
 0x8ec   : > { %v6624_v36 = vadd.f32 %v6608_v4, %v6569_v45  ;;  %v6625_v21 = vadd.f32 %v6609_v9, %v6570_v6  ;;  %v6619_v28 = vadd.f32 %v6603_v2, %v6564_v25  ;;  %v6571_v43 = vld [vmem:[#allocation6 + $0x50] sm:$0xff]  ;;  %v6572_v10 = vld [vmem:[#allocation6 + $0x58] sm:$0xff]  ;;  %v6565_v30 = vld [vmem:[#allocation6 + $0x20] sm:$0xff]  ;;  %v6605_v19 = vmul.f32 %v13549_v60, %v6582_v48 }
 0x8ed   : > { %v6648_v59 = vmul.f32 %v6632_v55, %v6616_v31  ;;  %v6649_v20 = vmul.f32 %v6633_v53, %v6617_v8  ;;  %v6650_v51 = vmul.f32 %v6634_v41, %v6618_v18  ;;  %v6626_v58 = vadd.f32 %v6610_v44, %v6571_v43  ;;  %v6566_v54 = vld [vmem:[#allocation6 + $0x28] sm:$0xff]  ;;  %v6556_v53 = vld [vmem:[%s9463_s3 + $0x58] sm:$0xff]  ;;  %v6573_v31 = vld [vmem:[#allocation6 + $0x60] sm:$0xff] }
 0x8ee   : > { %v6656_v13 = vmul.f32 %v6640_v47, %v6624_v36  ;;  %v6657_v27 = vmul.f32 %v6641_v63, %v6625_v21  ;;  %v6651_v12 = vmul.f32 %v6635_v0, %v6619_v28  ;;  %v6627_v33 = vadd.f32 %v6611_v14, %v6572_v10  ;;  %v6636_v45 = vld [vmem:[#allocation5 + $0x48] sm:$0xff]  ;;  %v6589_v8 = vld [vmem:[#allocation4 + $0x60] sm:$0xff]  ;;  %v6590_v6 = vld [vmem:[#allocation4 + $0x70] sm:$0xff] }
 0x8ef   : > { %v6664_v3 = vadd.f32 %v6648_v59, %v6545_v46  ;;  %v6665_v29 = vadd.f32 %v6649_v20, %v6546_v26  ;;  %v13572_v24 = vadd.f32 %v6650_v51, %v6547_v35  ;;  %v6658_v42 = vmul.f32 %v6642_v15, %v6626_v58  ;;  %v6549_v4 = vld [vmem:[%s9463_s3 + $0x20] sm:$0xff]  ;;  %v6550_v9 = vld [vmem:[%s9463_s3 + $0x28] sm:$0xff]  ;;  %v6567_v22 = vld [vmem:[#allocation6 + $0x30] sm:$0xff] }
 0x8f0   : > { %v6672_v56 = vadd.f32 %v6656_v13, %v6553_v32  ;;  %v6673_v11 = vadd.f32 %v6657_v27, %v6554_v61  ;;  %v13574_v55 = vadd.f32 %v6651_v12, %v6548_v1  ;;  %v6659_v46 = vmul.f32 %v6643_v16, %v6627_v33  ;;  %v6574_v63 = vld [vmem:[#allocation6 + $0x68] sm:$0xff]  ;;  %v6557_v36 = vld [vmem:[%s9463_s3 + $0x60] sm:$0xff]  ;;  %v6568_v0 = vld [vmem:[#allocation6 + $0x38] sm:$0xff] }
 0x8f1   : > { %v6680_v17 = vpack.c.bf16 %v6665_v29, %v6664_v3  ;;  %v6620_v26 = vadd.f32 %v6604_v49, %v6565_v30  ;;  %v6621_v47 = vadd.f32 %v6605_v19, %v6566_v54  ;;  %v6612_v37 = vmul.f32 %v13549_v60, %v6589_v8  ;;  %v6645_v21 = vld [vmem:[#allocation5 + $0x8] sm:$0xff]  ;;  %v6575_v43 = vld [vmem:[#allocation6 + $0x70] sm:$0xff]  ;;  %v6591_v10 = vld [vmem:[#allocation4 + $0x78] sm:$0xff] }
 0x8f2   : > { %v6684_v57 = vpack.c.bf16 %v6673_v11, %v6672_v56  ;;  %v6674_v59 = vadd.f32 %v6658_v42, %v6555_v38  ;;  %v6613_v25 = vmul.f32 %v13549_v60, %v6590_v6  ;;  %v6675_v23 = vadd.f32 %v6659_v46, %v6556_v53  ;;  %v6584_v2 = vld [vmem:[#allocation4 + $0x48] sm:$0xff]  ;;  %v6576_v56 = vld [vmem:[#allocation6 + $0x78] sm:$0xff]  ;;  %v6646_v12 = vld [vmem:[#allocation5 + $0x60] sm:$0xff] }
 0x8f3   : > { %7855 = vmatprep.mubr.bf16.mxu0 %v6680_v17  ;;  %v6652_v20 = vmul.f32 %v6636_v45, %v6620_v26  ;;  %v6653_v32 = vmul.f32 %v6637_v34, %v6621_v47  ;;  %v6628_v61 = vadd.f32 %v6612_v37, %v6573_v31  ;;  %v6606_v3 = vmul.f32 %v13549_v60, %v6583_v7  ;;  %v6558_v35 = vld [vmem:[%s9463_s3 + $0x68] sm:$0xff]  ;;  %v6639_v17 = vld [vmem:[#allocation5 + $0x38] sm:$0xff]  ;;  %v6551_v62 = vld [vmem:[%s9463_s3 + $0x30] sm:$0xff] }
 0x8f4   : > { %7863 = vmatprep.mubr.bf16.mxu1 %v6684_v57  ;;  %v6681_v29 = vpack.c.bf16 %v13574_v55, %v13572_v24  ;;  %v6629_v41 = vadd.f32 %v6613_v25, %v6574_v63  ;;  %v6607_v28 = vmul.f32 %v13549_v60, %v6584_v2  ;;  %v6614_v1 = vmul.f32 %v13549_v60, %v6591_v10  ;;  %v6552_v48 = vld [vmem:[%s9463_s3 + $0x38] sm:$0xff]  ;;  %v6647_v33 = vld [vmem:[#allocation5 + $0x50] sm:$0xff]  ;;  %v7178_v26 = vld [vmem:[%s13680_s10] ss:$0 sm:$0xff] }
 0x8f5   : > { %v6668_v13 = vadd.f32 %v6652_v20, %v6549_v4  ;;  %v6669_v27 = vadd.f32 %v6653_v32, %v6550_v9  ;;  %v6660_v18 = vmul.f32 %v6644_v52, %v6628_v61  ;;  %v6622_v44 = vadd.f32 %v6606_v3, %v6567_v22  ;;  %v6559_v49 = vld [vmem:[%s9463_s3 + $0x70] sm:$0xff]  ;;  %v6560_v57 = vld [vmem:[%s9463_s3 + $0x78] sm:$0xff] }
 0x8f6   : > { %v6661_v40 = vmul.f32 %v6645_v21, %v6629_v41  ;;  %v6615_v14 = vmul.f32 %v13549_v60, %v6592_v39  ;;  %v6685_v15 = vpack.c.bf16 %v6675_v23, %v6674_v59  ;;  %v6623_v51 = vadd.f32 %v6607_v28, %v6568_v0  ;;  %7856 = vmatmul.mubr.bf16.vlgmr.msra.gmra.mxu0 %v6681_v29 }
 0x8f7   : > { %v6682_v16 = vpack.c.bf16 %v6669_v27, %v6668_v13  ;;  %v6676_v11 = vadd.f32 %v6660_v18, %v6557_v36  ;;  %v6654_v38 = vmul.f32 %v6638_v5, %v6622_v44  ;;  %v6630_v58 = vadd.f32 %v6614_v1, %v6575_v43 }
 0x8f8   : > { %v6677_v30 = vadd.f32 %v6661_v40, %v6558_v35  ;;  %v6655_v54 = vmul.f32 %v6639_v17, %v6623_v51  ;;  %v6631_v19 = vadd.f32 %v6615_v14, %v6576_v56  ;;  %7864 = vmatmul.mubr.bf16.vlgmr.msra.gmra.mxu1 %v6685_v15 }
 0x8f9   : > { %v6662_v24 = vmul.f32 %v6646_v12, %v6630_v58  ;;  %v6670_v55 = vadd.f32 %v6654_v38, %v6551_v62  ;;  %7859 = vmatprep.mubr.bf16.mxu0 %v6682_v16 }
 0x8fa   : > { %v6686_v60 = vpack.c.bf16 %v6677_v30, %v6676_v11  ;;  %v6671_v53 = vadd.f32 %v6655_v54, %v6552_v48  ;;  %v6663_v45 = vmul.f32 %v6647_v33, %v6631_v19 }
 0x8fb   : > { %v6678_v50 = vadd.f32 %v6662_v24, %v6559_v49 }
 0x8fc   : > { %7867 = vmatprep.mubr.bf16.mxu1 %v6686_v60  ;;  %v6679_v34 = vadd.f32 %v6663_v45, %v6560_v57  ;;  %v6683_v42 = vpack.c.bf16 %v6671_v53, %v6670_v55 }
 0x8fe   : > { %v6687_v46 = vpack.c.bf16 %v6679_v34, %v6678_v50  ;;  %7860 = vmatmul.mubr.bf16.gmra.mxu0 %v6683_v42 }
 0x900   : > { %7868 = vmatmul.mubr.bf16.gmra.mxu1 %v6687_v46 }
 0x9b6   : > { %v7857_v31 = vpop.f32.mrf.mxu0 }
 0x9b7   : > { %v6802_v6 = vadd.f32 %v7857_v31, %v7178_v26 }
 0x9b8   : > { %v7865_v8 = vpop.f32.mrf.mxu1  ;;  %v6793_v9 = vpop.f32.mrf.mxu0 }
 0x9b9   : > { %v6834_v4 = vadd.f32 %v7865_v8, %v7178_v26  ;;  %6858 = vst [vmem:[%s10229_s22 + $0x10] sm:$0xff] %v6802_v6  ;;  %v6794_v63 = vadd.f32 %v7178_v26, %v6793_v9 }
 0x9ba   : > { %v6825_v47 = vpop.f32.mrf.mxu1  ;;  %v7858_v59 = vpop.f32.mrf.mxu0 }
 0x9bb   : > { %6866 = vst [vmem:[%s10229_s22 + $0x50] sm:$0xff] %v6834_v4  ;;  %v6826_v37 = vadd.f32 %v7178_v26, %v6825_v47  ;;  %6856 = vst [vmem:[%s10229_s22] sm:$0xff] %v6794_v63  ;;  %v6805_v36 = vadd.f32 %v7858_v59, %v7178_v26 }
 0x9bc   : > { %v7866_v20 = vpop.f32.mrf.mxu1  ;;  %v6796_v52 = vpop.f32.mrf.mxu0 }
 0x9bd   : > { %6864 = vst [vmem:[%s10229_s22 + $0x40] sm:$0xff] %v6826_v37  ;;  %v6837_v25 = vadd.f32 %v7866_v20, %v7178_v26  ;;  %6859 = vst [vmem:[%s10229_s22 + $0x18] sm:$0xff] %v6805_v36  ;;  %v6797_v23 = vadd.f32 %v7178_v26, %v6796_v52 }
 0x9be   : > { %v6828_v7 = vpop.f32.mrf.mxu1  ;;  %v7861_v61 = vpop.f32.mrf.mxu0 }
 0x9bf   : > { %6867 = vst [vmem:[%s10229_s22 + $0x58] sm:$0xff] %v6837_v25  ;;  %v6829_v32 = vadd.f32 %v7178_v26, %v6828_v7  ;;  %6857 = vst [vmem:[%s10229_s22 + $0x8] sm:$0xff] %v6797_v23  ;;  %v6818_v22 = vadd.f32 %v7861_v61, %v7178_v26 }
 0x9c0   : > { %v7869_v21 = vpop.f32.mrf.mxu1  ;;  %v6809_v3 = vpop.f32.mrf.mxu0 }
 0x9c1   : > { %6865 = vst [vmem:[%s10229_s22 + $0x48] sm:$0xff] %v6829_v32  ;;  %v6850_v2 = vadd.f32 %v7869_v21, %v7178_v26  ;;  %6862 = vst [vmem:[%s10229_s22 + $0x30] sm:$0xff] %v6818_v22  ;;  %v6810_v13 = vadd.f32 %v7178_v26, %v6809_v3 }
 0x9c2   : > { %v6841_v29 = vpop.f32.mrf.mxu1  ;;  %v7862_v41 = vpop.f32.mrf.mxu0 }
 0x9c3   : > { %6870 = vst [vmem:[%s10229_s22 + $0x70] sm:$0xff] %v6850_v2  ;;  %v6842_v35 = vadd.f32 %v7178_v26, %v6841_v29  ;;  %6860 = vst [vmem:[%s10229_s22 + $0x20] sm:$0xff] %v6810_v13  ;;  %v6821_v5 = vadd.f32 %v7862_v41, %v7178_v26 }
 0x9c4   : > { %v7870_v0 = vpop.f32.mrf.mxu1  ;;  %v6812_v18 = vpop.f32.mrf.mxu0 }
 0x9c5   : > { %6868 = vst [vmem:[%s10229_s22 + $0x60] sm:$0xff] %v6842_v35  ;;  %v6853_v27 = vadd.f32 %v7870_v0, %v7178_v26  ;;  %6863 = vst [vmem:[%s10229_s22 + $0x38] sm:$0xff] %v6821_v5  ;;  %v6813_v43 = vadd.f32 %v7178_v26, %v6812_v18 }
 0x9c6   : > { %v6844_v28 = vpop.f32.mrf.mxu1 }
 0x9c7   : > { %6871 = vst [vmem:[%s10229_s22 + $0x78] sm:$0xff] %v6853_v27  ;;  %v6845_v10 = vadd.f32 %v7178_v26, %v6844_v28  ;;  %6861 = vst [vmem:[%s10229_s22 + $0x28] sm:$0xff] %v6813_v43 }
 0x9c9   : > { %6869 = vst [vmem:[%s10229_s22 + $0x68] sm:$0xff] %v6845_v10 }
 0x9ca   : > { %9137 = shalt.err (!%p9134_p6)
}
 0x9cb   : > { %s9138_s22 = scalar_lea.hbm %s13621_s26, 2048  ;;  %s9142_s28 = scalar_lea.hbm %s13681_s11, 4096 }
 0x9cc   : > { %p9139_p4 = scmp.ne.s32.totalorder %s13621_s26, %s9138_s22  ;;  %p9143_p11 = scmp.lt.s32.totalorder %s13621_s26, %s13681_s11 }
 0x9cd   : > { %p9144_p5 = scmp.lt.s32.totalorder %s9142_s28, %s9138_s22 }
 0x9ce   : > { %p9140_p8 = pnand %p9139_p4, %p14589_p12 }
 0x9cf   : > { %p9145_p1 = por %p9144_p5, %p9143_p11 }
 0x9d0   : > { %p9141_p13 = pneg %p9140_p8 }
 0x9d2   : > { %p9146_p2 = pnand %p9145_p1, %p9141_p13 }
 0x9d4   : > { %9149 = shalt.err (!%p9146_p2)
}
 0x9d5   : > { %s9240_s30 = smov 128   ;;  %s9241_s5 = smov 8  }
 0x9d6   : > { %7905 = dma.vmem_to_hbm [thread:$0]  (%p14589_p12), %s13623_s7, 2048, %s13621_s26, %s6873_s21, %s9240_s30, %s9240_s30, %s9241_s5  }
 0x9d7 PF: > { %s6902_s23 = sand.u32 1, %s9188_s17   ;;  %p14590_p7 = scmp.ne.s32.totalorder %s13901_s24, 0 }
 0x9d8   : > { %p14591_p9 = scmp.ge.s32.totalorder %s9200_s20, 2  ;;  %s6903_s25 = scalar_lea.sflag [#allocation12], %s6902_s23 }
 0x9da   : > { %p7925_p0 = pnand %p14591_p9, %p14590_p7 }
 0x9dc   : > { %p7926_p10 = pneg %p7925_p0 }
 0x9de   : > { %9183 = dma.done.wait (%p7926_p10), %s6903_s25, 2048  }
 0x9df   : > { %9185 = vsyncadd (%p7926_p10), %s6903_s25, 4294965248  ;;  %s14592_s27 = sld [smem:[#allocation24_spill]]  ;;  %p26_p3 = scmp.ge.s32.totalorder %s9399_s12, 4  }
 0x9e0   : > { %s14593_s17 = smov %s9192_s18  ;;  %s14594_s18 = smov %s9196_s19 }
 0x9e1   : > { %s14596_s20 = smov %s9399_s12  ;;  %28 = sbr.rel (!%p26_p3) target bundleno = 12 (0xc), region = 163 }
 0x9e5   : > { %s14595_s19 = smov %s14592_s27 }
 0x9e6   :  { %6908 = vsyncpa [#allocation11], 1 }
 0x9e7   :  { %6910 = vsyncpa [#allocation11 + $0x1], 1 }
 0x9e8   :  { %6911 = vsyncpa [#allocation14], 1 }
 0x9e9   :  { %6912 = vsyncpa [#allocation17], 1 }
 0x9ea   :  { %6913 = vsyncpa [#allocation12], 1 }
 0x9eb   :  { %6915 = vsyncpa [#allocation12 + $0x1], 1 }

</bundles_post_ra>
